<compile_context>
chip_gen: v7x
topology: tpu7x:2x2x1
jax: 0.10.0
libtpu: 0.0.40
codegen_flags: <defaults>
</compile_context>

<pallas_src>
import functools

import jax
import jax.numpy as jnp
from jax.experimental import pallas as pl
from jax.experimental.pallas import tpu as pltpu

EMBED_DIM = 32          # small synthetic config (torch default is 768)
NUM_HEADS = 4           # (torch default is 12)
NUM_LAYERS = 2          # (torch default is 12)
MLP_RATIO = 4
INIT_VALUES = 1e-5      # LayerScale gamma init
LN_EPS = 1e-5           # nn.LayerNorm default eps

_PARAM_ORDER = ("ln1w", "ln1b", "qw", "qb", "kw", "kb", "vw", "vb",
                "projw", "projb", "g1",
                "ln2w", "ln2b", "fc1w", "fc1b", "fc2w", "fc2b", "g2")


def _layernorm(x, w, b):
    mu = jnp.mean(x, axis=-1, keepdims=True)
    var = jnp.mean(jnp.square(x - mu), axis=-1, keepdims=True)
    return (x - mu) * jax.lax.rsqrt(var + LN_EPS) * w + b


# exact GELU (torch nn.GELU default) via Abramowitz & Stegun 7.1.26 erf polynomial
# (|err| < 1.5e-7); uses only ops with guaranteed Mosaic lowerings (exp goes to the EUP).
_ERF_P = 0.3275911
_ERF_A = (0.254829592, -0.284496736, 1.421413741, -1.453152027, 1.061405429)


def _erf(x):
    sgn = jnp.where(x >= 0, 1.0, -1.0).astype(x.dtype)
    ax = jnp.abs(x)
    t = 1.0 / (1.0 + _ERF_P * ax)
    a1, a2, a3, a4, a5 = _ERF_A
    poly = ((((a5 * t + a4) * t + a3) * t + a2) * t + a1) * t
    return sgn * (1.0 - poly * jnp.exp(-ax * ax))


def _gelu_exact(x):
    return 0.5 * x * (1.0 + _erf(x * 0.7071067811865476))


def fused_blocks_kernel(x_ref, bias_ref,
                        ln1w_ref, ln1b_ref,
                        qw_ref, qb_ref, kw_ref, kb_ref, vw_ref, vb_ref,
                        pw_ref, pb_ref, g1_ref,
                        ln2w_ref, ln2b_ref, fc1w_ref, fc1b_ref,
                        fc2w_ref, fc2b_ref, g2_ref,
                        o_ref, *, num_layers, num_heads):
    Bb, Np, C = x_ref.shape            # block of batch elements (1 on 2-TC chips, B otherwise)
    H = num_heads
    R = Bb * Np                        # rows processed together (Np is a multiple of 8)

    x = x_ref[...].reshape(R, C)       # (R, C) f32, padded rows are zeros
    bias = bias_ref[...]               # (R, R) additive attention bias (0 / -1e30), hoisted

    for l in range(num_layers):        # static unroll over layers; weights stay VMEM-resident
        # --- attention branch: x = x + gamma1 * (proj(MHSA(LN1(x))) + proj_bias) ---
        hn = _layernorm(x, ln1w_ref[l], ln1b_ref[l])
        hb = hn.astype(jnp.bfloat16)

        attn = jnp.zeros((R, C), jnp.float32)
        for h in range(H):             # static unroll over heads; per-head weights are 2-D
            # 1/sqrt(D) pre-folded into the Q weights/bias.
            q = jnp.dot(hb, qw_ref[l, h], preferred_element_type=jnp.float32) + qb_ref[l, h]
            k = jnp.dot(hb, kw_ref[l, h], preferred_element_type=jnp.float32) + kb_ref[l, h]
            v = jnp.dot(hb, vw_ref[l, h], preferred_element_type=jnp.float32) + vb_ref[l, h]

            # s[n, m] = sum_d q[n, d] * k[m, d]  (f32 feed, no cast overhead at these shapes)
            s = jax.lax.dot_general(q, k, (((1,), (1,)), ((), ())),
                                    preferred_element_type=jnp.float32) + bias
            s = s - jnp.max(s, axis=-1, keepdims=True)
            p = jnp.exp(s)
            p = p * pl.reciprocal(jnp.sum(p, axis=-1, keepdims=True), approx=True)
            o = jnp.dot(p, v, preferred_element_type=jnp.float32)          # (R, D)

            attn = attn + jnp.dot(o.astype(jnp.bfloat16), pw_ref[l, h],
                                  preferred_element_type=jnp.float32)      # (R, C)

        x = x + g1_ref[l] * (attn + pb_ref[l])

        # --- MLP branch: x = x + gamma2 * fc2(GELU(fc1(LN2(x)))) ---
        hn2 = _layernorm(x, ln2w_ref[l], ln2b_ref[l])
        hn2 = jnp.dot(hn2.astype(jnp.bfloat16), fc1w_ref[l],
                      preferred_element_type=jnp.float32) + fc1b_ref[l]
        hn2 = _gelu_exact(hn2)
        hn2 = jnp.dot(hn2.astype(jnp.bfloat16), fc2w_ref[l],
                      preferred_element_type=jnp.float32) + fc2b_ref[l]
        x = x + g2_ref[l] * hn2

    o_ref[...] = x.reshape(Bb, Np, C)


def _full_spec(shape):
    nd = len(shape)
    return pl.BlockSpec(shape, lambda b, _nd=nd: (0,) * _nd)


def _single_tensorcore_chip():
    """True for 1-TC chips (v5e/v6e): fold the batch.  2-TC chips (v4/v5p/v7x): keep grid=(B,)."""
    try:
        kind = jax.devices()[0].device_kind.lower()
    except Exception:
        return True
    return not any(tag in kind for tag in ("v4", "v5p", "v7"))


def run_fused(x, attn_bias, weights, *, batch_block):
    """All transformer layers over padded x of shape (B, Np, C) in one pallas_call."""
    B, Np, C = x.shape
    assert B % batch_block == 0
    kernel = functools.partial(fused_blocks_kernel,
                               num_layers=NUM_LAYERS, num_heads=NUM_HEADS)

    x_spec = pl.BlockSpec((batch_block, Np, C), lambda b: (b, 0, 0))
    in_specs = [x_spec, _full_spec(attn_bias.shape)]
    in_specs += [_full_spec(w.shape) for w in weights]

    # TODO(synk): at the production config (C=768, 12 layers) the stacked weights no longer fit
    # VMEM-resident (esp. v7x's 64 MiB) -- move qkv/proj/fc1/fc2 to memory_space=pl.ANY, stream
    # one layer's slabs via pltpu.emit_pipeline / manual double-buffering keyed on the layer
    # index, and raise vmem_limit_bytes with explicit headroom.
    return pl.pallas_call(
        kernel,
        out_shape=jax.ShapeDtypeStruct((B, Np, C), jnp.float32),
        grid_spec=pltpu.PrefetchScalarGridSpec(
            num_scalar_prefetch=0,
            grid=(B // batch_block,),
            in_specs=in_specs,
            out_specs=x_spec,
        ),
        compiler_params=pltpu.CompilerParams(
            dimension_semantics=("parallel",)),
    )(x, attn_bias, *weights)


def make_attn_bias(batch_block, n_pad, n_valid):
    """(R, R) additive bias: block-diagonal across folded batch elements, padded keys masked."""
    R = batch_block * n_pad
    idx = jnp.arange(R)
    same_batch = (idx[:, None] // n_pad) == (idx[None, :] // n_pad)
    key_valid = (idx[None, :] % n_pad) < n_valid
    return jnp.where(same_batch & key_valid, 0.0, -1e30).astype(jnp.float32)


def init_params(key):
    """Deterministic synthetic init mirroring TransformerBlock.init_weights() (f32)."""
    C = EMBED_DIM
    hid = MLP_RATIO * C

    def tn(k, shape):  # trunc_normal_(std=0.02)
        return 0.02 * jax.random.truncated_normal(k, -2.0, 2.0, shape, jnp.float32)

    layers = []
    for j in range(NUM_LAYERS):
        ks = jax.random.split(jax.random.fold_in(key, j), 4)
        layers.append(dict(
            ln1w=jnp.ones((1, C), jnp.float32), ln1b=jnp.zeros((1, C), jnp.float32),
            qkvw=tn(ks[0], (C, 3 * C)), qkvb=jnp.zeros((1, 3 * C), jnp.float32),
            projw=tn(ks[1], (C, C)), projb=jnp.zeros((1, C), jnp.float32),
            g1=jnp.full((1, C), INIT_VALUES, jnp.float32),
            ln2w=jnp.ones((1, C), jnp.float32), ln2b=jnp.zeros((1, C), jnp.float32),
            fc1w=tn(ks[2], (C, hid)), fc1b=jnp.zeros((1, hid), jnp.float32),
            fc2w=tn(ks[3], (hid, C)), fc2b=jnp.zeros((1, C), jnp.float32),
            g2=jnp.full((1, C), INIT_VALUES, jnp.float32),
        ))
    return layers


def prepare_kernel_params(layers):
    """One-time transform: stack per-layer weights, split qkv/proj per head (so the kernel does
    zero activation relayouts), fold 1/sqrt(D) into Q, cast matmul weights to bf16."""
    C = EMBED_DIM
    H = NUM_HEADS
    D = C // H
    scale = D ** -0.5

    def stack(fn):
        return jnp.stack([fn(l) for l in layers], axis=0)

    def head_w(sec, do_scale=False):
        def f(l):
            w = l['qkvw'][:, sec * C:(sec + 1) * C]            # (C, C)
            w = w.reshape(C, H, D).transpose(1, 0, 2)          # (H, C, D)
            return w * scale if do_scale else w
        return stack(f)                                        # (L, H, C, D)

    def head_b(sec, do_scale=False):
        def f(l):
            b = l['qkvb'][0, sec * C:(sec + 1) * C].reshape(H, 1, D)
            return b * scale if do_scale else b
        return stack(f)                                        # (L, H, 1, D)

    w = dict(
        ln1w=stack(lambda l: l['ln1w']), ln1b=stack(lambda l: l['ln1b']),
        qw=head_w(0, True).astype(jnp.bfloat16), qb=head_b(0, True),
        kw=head_w(1).astype(jnp.bfloat16), kb=head_b(1),
        vw=head_w(2).astype(jnp.bfloat16), vb=head_b(2),
        projw=stack(lambda l: l['projw'].reshape(H, D, C)).astype(jnp.bfloat16),  # (L,H,D,C)
        projb=stack(lambda l: l['projb']),
        g1=stack(lambda l: l['g1']),
        ln2w=stack(lambda l: l['ln2w']), ln2b=stack(lambda l: l['ln2b']),
        fc1w=stack(lambda l: l['fc1w']).astype(jnp.bfloat16), fc1b=stack(lambda l: l['fc1b']),
        fc2w=stack(lambda l: l['fc2w']).astype(jnp.bfloat16), fc2b=stack(lambda l: l['fc2b']),
        g2=stack(lambda l: l['g2']),
    )
    return [w[k] for k in _PARAM_ORDER]


def transformer_block_forward(x, kernel_weights, cls_token, *, batch_block=None):
    """Equivalent of TransformerBlock.forward (with_cls_token=True, with_dw_conv=False)."""
    B, N, C = x.shape
    # cls-token concat + pos_drop(p=0) are glue (plain JAX)
    cls = jnp.broadcast_to(cls_token, (B, 1, C)).astype(x.dtype)
    x = jnp.concatenate([cls, x], axis=1)                   # (B, N+1, C)
    n_tok = N + 1
    n_pad = ((n_tok + 15) // 16) * 16                       # pad to 16 for bf16 sublane packing
    x = jnp.pad(x, ((0, 0), (0, n_pad - n_tok), (0, 0)))

    if batch_block is None:
        batch_block = B if _single_tensorcore_chip() else 1
    attn_bias = make_attn_bias(batch_block, n_pad, n_tok)   # hoisted out of the kernel entirely

    out = run_fused(x, attn_bias, kernel_weights, batch_block=batch_block)
    return out[:, :n_tok, :]
    # TODO(synk): with_dw_conv=True path (depthwise 3x3 pos_embed / MixMlp) not exercised by the
    # default config and is not implemented here.


def reference_forward(x, layers, cls_token):
    """Pure-JAX f32 reference (matches the torch module semantics) for validation."""
    B, N, C = x.shape
    H = NUM_HEADS
    D = C // H
    scale = D ** -0.5
    cls = jnp.broadcast_to(cls_token, (B, 1, C))
    x = jnp.concatenate([cls, x], axis=1)
    for p in layers:
        h = _layernorm(x, p['ln1w'][0], p['ln1b'][0])
        qkv = h @ p['qkvw'] + p['qkvb'][0]
        q = qkv[..., :C].reshape(B, -1, H, D) * scale
        k = qkv[..., C:2 * C].reshape(B, -1, H, D)
        v = qkv[..., 2 * C:].reshape(B, -1, H, D)
        s = jnp.einsum('bnhd,bmhd->bhnm', q, k)
        a = jax.nn.softmax(s, axis=-1)
        o = jnp.einsum('bhnm,bmhd->bnhd', a, v).reshape(B, -1, C)
        o = o @ p['projw'] + p['projb'][0]
        x = x + p['g1'][0] * o
        h2 = _layernorm(x, p['ln2w'][0], p['ln2b'][0])
        h2 = h2 @ p['fc1w'] + p['fc1b'][0]
        h2 = jax.nn.gelu(h2, approximate=False)
        h2 = h2 @ p['fc2w'] + p['fc2b'][0]
        x = x + p['g2'][0] * h2
    return x


if __name__ == "__main__":
    key = jax.random.PRNGKey(0)
    kx, kc, kp = jax.random.split(key, 3)

    B, N, C = 2, 16, EMBED_DIM
    x = jax.random.normal(kx, (B, N, C), jnp.float32)
    cls_token = 1e-6 * jax.random.normal(kc, (1, 1, C), jnp.float32)  # normal_(std=1e-6)

    layers = init_params(kp)
    kernel_weights = prepare_kernel_params(layers)

    out = transformer_block_forward(x, kernel_weights, cls_token)
    out = jax.block_until_ready(out)
    assert out.shape == (B, N + 1, C), out.shape
    assert bool(jnp.all(jnp.isfinite(out)))

    ref = reference_forward(x, layers, cls_token)
    max_err = float(jnp.max(jnp.abs(out - ref)))
    assert max_err < 1e-3, f"max abs error vs f32 reference: {max_err}"

    print("KERNEL_OK")
</pallas_src>

<mosaic_0001>
module attributes {stable_mosaic.version = 11 : i64} {
  func.func @fused_blocks_kernel(%arg0: i32, %arg1: memref<2x32x32xf32, #tpu.memory_space<vmem>>, %arg2: memref<64x64xf32, #tpu.memory_space<vmem>>, %arg3: memref<2x1x32xf32, #tpu.memory_space<vmem>>, %arg4: memref<2x1x32xf32, #tpu.memory_space<vmem>>, %arg5: memref<2x4x32x8xbf16, #tpu.memory_space<vmem>>, %arg6: memref<2x4x1x8xf32, #tpu.memory_space<vmem>>, %arg7: memref<2x4x32x8xbf16, #tpu.memory_space<vmem>>, %arg8: memref<2x4x1x8xf32, #tpu.memory_space<vmem>>, %arg9: memref<2x4x32x8xbf16, #tpu.memory_space<vmem>>, %arg10: memref<2x4x1x8xf32, #tpu.memory_space<vmem>>, %arg11: memref<2x4x8x32xbf16, #tpu.memory_space<vmem>>, %arg12: memref<2x1x32xf32, #tpu.memory_space<vmem>>, %arg13: memref<2x1x32xf32, #tpu.memory_space<vmem>>, %arg14: memref<2x1x32xf32, #tpu.memory_space<vmem>>, %arg15: memref<2x1x32xf32, #tpu.memory_space<vmem>>, %arg16: memref<2x32x128xbf16, #tpu.memory_space<vmem>>, %arg17: memref<2x1x128xf32, #tpu.memory_space<vmem>>, %arg18: memref<2x128x32xbf16, #tpu.memory_space<vmem>>, %arg19: memref<2x1x32xf32, #tpu.memory_space<vmem>>, %arg20: memref<2x1x32xf32, #tpu.memory_space<vmem>>, %arg21: memref<2x32x32xf32, #tpu.memory_space<vmem>>) attributes {dimension_semantics = [#tpu.dimension_semantics<parallel>], iteration_bounds = array<i64: 1>, scalar_prefetch = 0 : i64, scratch_operands = 0 : i64, tpu.core_type = #tpu.core_type<tc>, window_params = [{transform_indices = @transform_0, window_bounds = array<i64: 2, 32, 32>}, {pipeline_mode = #tpu.pipeline_mode<synchronous>, transform_indices = @transform_1, window_bounds = array<i64: 64, 64>}, {pipeline_mode = #tpu.pipeline_mode<synchronous>, transform_indices = @transform_2, window_bounds = array<i64: 2, 1, 32>}, {pipeline_mode = #tpu.pipeline_mode<synchronous>, transform_indices = @transform_3, window_bounds = array<i64: 2, 1, 32>}, {pipeline_mode = #tpu.pipeline_mode<synchronous>, transform_indices = @transform_4, window_bounds = array<i64: 2, 4, 32, 8>}, {pipeline_mode = #tpu.pipeline_mode<synchronous>, transform_indices = @transform_5, window_bounds = array<i64: 2, 4, 1, 8>}, {pipeline_mode = #tpu.pipeline_mode<synchronous>, transform_indices = @transform_6, window_bounds = array<i64: 2, 4, 32, 8>}, {pipeline_mode = #tpu.pipeline_mode<synchronous>, transform_indices = @transform_7, window_bounds = array<i64: 2, 4, 1, 8>}, {pipeline_mode = #tpu.pipeline_mode<synchronous>, transform_indices = @transform_8, window_bounds = array<i64: 2, 4, 32, 8>}, {pipeline_mode = #tpu.pipeline_mode<synchronous>, transform_indices = @transform_9, window_bounds = array<i64: 2, 4, 1, 8>}, {pipeline_mode = #tpu.pipeline_mode<synchronous>, transform_indices = @transform_10, window_bounds = array<i64: 2, 4, 8, 32>}, {pipeline_mode = #tpu.pipeline_mode<synchronous>, transform_indices = @transform_11, window_bounds = array<i64: 2, 1, 32>}, {pipeline_mode = #tpu.pipeline_mode<synchronous>, transform_indices = @transform_12, window_bounds = array<i64: 2, 1, 32>}, {pipeline_mode = #tpu.pipeline_mode<synchronous>, transform_indices = @transform_13, window_bounds = array<i64: 2, 1, 32>}, {pipeline_mode = #tpu.pipeline_mode<synchronous>, transform_indices = @transform_14, window_bounds = array<i64: 2, 1, 32>}, {pipeline_mode = #tpu.pipeline_mode<synchronous>, transform_indices = @transform_15, window_bounds = array<i64: 2, 32, 128>}, {pipeline_mode = #tpu.pipeline_mode<synchronous>, transform_indices = @transform_16, window_bounds = array<i64: 2, 1, 128>}, {pipeline_mode = #tpu.pipeline_mode<synchronous>, transform_indices = @transform_17, window_bounds = array<i64: 2, 128, 32>}, {pipeline_mode = #tpu.pipeline_mode<synchronous>, transform_indices = @transform_18, window_bounds = array<i64: 2, 1, 32>}, {pipeline_mode = #tpu.pipeline_mode<synchronous>, transform_indices = @transform_19, window_bounds = array<i64: 2, 1, 32>}, {transform_indices = @transform_20, window_bounds = array<i64: 2, 32, 32>}]} {
    %c0 = arith.constant 0 : index
    %c0_0 = arith.constant 0 : index
    %c0_1 = arith.constant 0 : index
    %0 = vector.load %arg1[%c0, %c0_0, %c0_1] : memref<2x32x32xf32, #tpu.memory_space<vmem>>, vector<2x32x32xf32>
    %1 = vector.shape_cast %0 : vector<2x32x32xf32> to vector<64x32xf32>
    %c0_2 = arith.constant 0 : index
    %c0_3 = arith.constant 0 : index
    %2 = vector.load %arg2[%c0_2, %c0_3] : memref<64x64xf32, #tpu.memory_space<vmem>>, vector<64x64xf32>
    %c0_4 = arith.constant 0 : index
    %c0_5 = arith.constant 0 : index
    %c0_6 = arith.constant 0 : index
    %3 = vector.load %arg3[%c0_4, %c0_5, %c0_6] : memref<2x1x32xf32, #tpu.memory_space<vmem>>, vector<1x1x32xf32>
    %4 = vector.shape_cast %3 : vector<1x1x32xf32> to vector<1x32xf32>
    %c0_7 = arith.constant 0 : index
    %c0_8 = arith.constant 0 : index
    %c0_9 = arith.constant 0 : index
    %5 = vector.load %arg4[%c0_7, %c0_8, %c0_9] : memref<2x1x32xf32, #tpu.memory_space<vmem>>, vector<1x1x32xf32>
    %6 = vector.shape_cast %5 : vector<1x1x32xf32> to vector<1x32xf32>
    %cst = arith.constant dense<0.000000e+00> : vector<64xf32>
    %7 = vector.multi_reduction <add>, %1, %cst [1] : vector<64x32xf32> to vector<64xf32>
    %8 = vector.shape_cast %7 : vector<64xf32> to vector<64x1xf32>
    %cst_10 = arith.constant 3.200000e+01 : f32
    %9 = vector.broadcast %cst_10 : f32 to vector<64x1xf32>
    %10 = arith.divf %8, %9 : vector<64x1xf32>
    %11 = vector.broadcast %10 : vector<64x1xf32> to vector<64x32xf32>
    %12 = arith.subf %1, %11 : vector<64x32xf32>
    %13 = arith.mulf %12, %12 : vector<64x32xf32>
    %cst_11 = arith.constant dense<0.000000e+00> : vector<64xf32>
    %14 = vector.multi_reduction <add>, %13, %cst_11 [1] : vector<64x32xf32> to vector<64xf32>
    %15 = vector.shape_cast %14 : vector<64xf32> to vector<64x1xf32>
    %cst_12 = arith.constant 3.200000e+01 : f32
    %16 = vector.broadcast %cst_12 : f32 to vector<64x1xf32>
    %17 = arith.divf %15, %16 : vector<64x1xf32>
    %18 = vector.broadcast %10 : vector<64x1xf32> to vector<64x32xf32>
    %19 = arith.subf %1, %18 : vector<64x32xf32>
    %cst_13 = arith.constant 9.99999974E-6 : f32
    %20 = vector.broadcast %cst_13 : f32 to vector<64x1xf32>
    %21 = arith.addf %17, %20 : vector<64x1xf32>
    %22 = math.rsqrt %21 : vector<64x1xf32>
    %23 = vector.broadcast %22 : vector<64x1xf32> to vector<64x32xf32>
    %24 = arith.mulf %19, %23 : vector<64x32xf32>
    %25 = vector.broadcast %4 : vector<1x32xf32> to vector<64x32xf32>
    %26 = arith.mulf %24, %25 : vector<64x32xf32>
    %27 = vector.broadcast %6 : vector<1x32xf32> to vector<64x32xf32>
    %28 = arith.addf %26, %27 : vector<64x32xf32>
    %29 = arith.truncf %28 : vector<64x32xf32> to vector<64x32xbf16>
    %cst_14 = arith.constant 0.000000e+00 : f32
    %30 = vector.broadcast %cst_14 : f32 to vector<64x32xf32>
    %c0_15 = arith.constant 0 : index
    %c0_16 = arith.constant 0 : index
    %c0_17 = arith.constant 0 : index
    %c0_18 = arith.constant 0 : index
    %31 = vector.load %arg5[%c0_15, %c0_16, %c0_17, %c0_18] : memref<2x4x32x8xbf16, #tpu.memory_space<vmem>>, vector<1x1x32x8xbf16>
    %32 = vector.shape_cast %31 : vector<1x1x32x8xbf16> to vector<32x8xbf16>
    %cst_19 = arith.constant dense<0.000000e+00> : vector<64x8xf32>
    %33 = tpu.matmul %29, %32, %cst_19 {dimension_numbers = #tpu.dot_dimension_numbers<[1], [0], [0], [1], [0, 0, 1, 1], [], []>} : vector<64x32xbf16>, vector<32x8xbf16>, vector<64x8xf32> -> vector<64x8xf32>
    %c0_20 = arith.constant 0 : index
    %c0_21 = arith.constant 0 : index
    %c0_22 = arith.constant 0 : index
    %c0_23 = arith.constant 0 : index
    %34 = vector.load %arg6[%c0_20, %c0_21, %c0_22, %c0_23] : memref<2x4x1x8xf32, #tpu.memory_space<vmem>>, vector<1x1x1x8xf32>
    %35 = vector.shape_cast %34 : vector<1x1x1x8xf32> to vector<1x8xf32>
    %36 = vector.broadcast %35 : vector<1x8xf32> to vector<64x8xf32>
    %37 = arith.addf %33, %36 : vector<64x8xf32>
    %c0_24 = arith.constant 0 : index
    %c0_25 = arith.constant 0 : index
    %c0_26 = arith.constant 0 : index
    %c0_27 = arith.constant 0 : index
    %38 = vector.load %arg7[%c0_24, %c0_25, %c0_26, %c0_27] : memref<2x4x32x8xbf16, #tpu.memory_space<vmem>>, vector<1x1x32x8xbf16>
    %39 = vector.shape_cast %38 : vector<1x1x32x8xbf16> to vector<32x8xbf16>
    %cst_28 = arith.constant dense<0.000000e+00> : vector<64x8xf32>
    %40 = tpu.matmul %29, %39, %cst_28 {dimension_numbers = #tpu.dot_dimension_numbers<[1], [0], [0], [1], [0, 0, 1, 1], [], []>} : vector<64x32xbf16>, vector<32x8xbf16>, vector<64x8xf32> -> vector<64x8xf32>
    %c0_29 = arith.constant 0 : index
    %c0_30 = arith.constant 0 : index
    %c0_31 = arith.constant 0 : index
    %c0_32 = arith.constant 0 : index
    %41 = vector.load %arg8[%c0_29, %c0_30, %c0_31, %c0_32] : memref<2x4x1x8xf32, #tpu.memory_space<vmem>>, vector<1x1x1x8xf32>
    %42 = vector.shape_cast %41 : vector<1x1x1x8xf32> to vector<1x8xf32>
    %43 = vector.broadcast %42 : vector<1x8xf32> to vector<64x8xf32>
    %44 = arith.addf %40, %43 : vector<64x8xf32>
    %c0_33 = arith.constant 0 : index
    %c0_34 = arith.constant 0 : index
    %c0_35 = arith.constant 0 : index
    %c0_36 = arith.constant 0 : index
    %45 = vector.load %arg9[%c0_33, %c0_34, %c0_35, %c0_36] : memref<2x4x32x8xbf16, #tpu.memory_space<vmem>>, vector<1x1x32x8xbf16>
    %46 = vector.shape_cast %45 : vector<1x1x32x8xbf16> to vector<32x8xbf16>
    %cst_37 = arith.constant dense<0.000000e+00> : vector<64x8xf32>
    %47 = tpu.matmul %29, %46, %cst_37 {dimension_numbers = #tpu.dot_dimension_numbers<[1], [0], [0], [1], [0, 0, 1, 1], [], []>} : vector<64x32xbf16>, vector<32x8xbf16>, vector<64x8xf32> -> vector<64x8xf32>
    %c0_38 = arith.constant 0 : index
    %c0_39 = arith.constant 0 : index
    %c0_40 = arith.constant 0 : index
    %c0_41 = arith.constant 0 : index
    %48 = vector.load %arg10[%c0_38, %c0_39, %c0_40, %c0_41] : memref<2x4x1x8xf32, #tpu.memory_space<vmem>>, vector<1x1x1x8xf32>
    %49 = vector.shape_cast %48 : vector<1x1x1x8xf32> to vector<1x8xf32>
    %50 = vector.broadcast %49 : vector<1x8xf32> to vector<64x8xf32>
    %51 = arith.addf %47, %50 : vector<64x8xf32>
    %cst_42 = arith.constant dense<0.000000e+00> : vector<64x64xf32>
    %52 = tpu.matmul %37, %44, %cst_42 {dimension_numbers = #tpu.dot_dimension_numbers<[1], [1], [0], [0], [0, 0, 1, 0], [], []>} : vector<64x8xf32>, vector<64x8xf32>, vector<64x64xf32> -> vector<64x64xf32>
    %53 = arith.addf %52, %2 : vector<64x64xf32>
    %cst_43 = arith.constant dense<0xFF800000> : vector<64xf32>
    %54 = vector.multi_reduction <maximumf>, %53, %cst_43 [1] : vector<64x64xf32> to vector<64xf32>
    %55 = vector.shape_cast %54 : vector<64xf32> to vector<64x1xf32>
    %56 = vector.broadcast %55 : vector<64x1xf32> to vector<64x64xf32>
    %57 = arith.subf %53, %56 : vector<64x64xf32>
    %58 = math.exp %57 : vector<64x64xf32>
    %cst_44 = arith.constant dense<0.000000e+00> : vector<64xf32>
    %59 = vector.multi_reduction <add>, %58, %cst_44 [1] : vector<64x64xf32> to vector<64xf32>
    %60 = vector.shape_cast %59 : vector<64xf32> to vector<64x1xf32>
    %61 = tpu.reciprocal %60 {approx = true} : vector<64x1xf32> -> vector<64x1xf32>
    %62 = vector.broadcast %61 : vector<64x1xf32> to vector<64x64xf32>
    %63 = arith.mulf %58, %62 : vector<64x64xf32>
    %cst_45 = arith.constant dense<0.000000e+00> : vector<64x8xf32>
    %64 = tpu.matmul %63, %51, %cst_45 {dimension_numbers = #tpu.dot_dimension_numbers<[1], [0], [0], [1], [0, 0, 1, 1], [], []>} : vector<64x64xf32>, vector<64x8xf32>, vector<64x8xf32> -> vector<64x8xf32>
    %65 = arith.truncf %64 : vector<64x8xf32> to vector<64x8xbf16>
    %c0_46 = arith.constant 0 : index
    %c0_47 = arith.constant 0 : index
    %c0_48 = arith.constant 0 : index
    %c0_49 = arith.constant 0 : index
    %66 = vector.load %arg11[%c0_46, %c0_47, %c0_48, %c0_49] : memref<2x4x8x32xbf16, #tpu.memory_space<vmem>>, vector<1x1x8x32xbf16>
    %67 = vector.shape_cast %66 : vector<1x1x8x32xbf16> to vector<8x32xbf16>
    %cst_50 = arith.constant dense<0.000000e+00> : vector<64x32xf32>
    %68 = tpu.matmul %65, %67, %cst_50 {dimension_numbers = #tpu.dot_dimension_numbers<[1], [0], [0], [1], [0, 0, 1, 1], [], []>} : vector<64x8xbf16>, vector<8x32xbf16>, vector<64x32xf32> -> vector<64x32xf32>
    %69 = arith.addf %30, %68 : vector<64x32xf32>
    %c0_51 = arith.constant 0 : index
    %c1 = arith.constant 1 : index
    %c0_52 = arith.constant 0 : index
    %c0_53 = arith.constant 0 : index
    %70 = vector.load %arg5[%c0_51, %c1, %c0_52, %c0_53] : memref<2x4x32x8xbf16, #tpu.memory_space<vmem>>, vector<1x1x32x8xbf16>
    %71 = vector.shape_cast %70 : vector<1x1x32x8xbf16> to vector<32x8xbf16>
    %cst_54 = arith.constant dense<0.000000e+00> : vector<64x8xf32>
    %72 = tpu.matmul %29, %71, %cst_54 {dimension_numbers = #tpu.dot_dimension_numbers<[1], [0], [0], [1], [0, 0, 1, 1], [], []>} : vector<64x32xbf16>, vector<32x8xbf16>, vector<64x8xf32> -> vector<64x8xf32>
    %c0_55 = arith.constant 0 : index
    %c1_56 = arith.constant 1 : index
    %c0_57 = arith.constant 0 : index
    %c0_58 = arith.constant 0 : index
    %73 = vector.load %arg6[%c0_55, %c1_56, %c0_57, %c0_58] : memref<2x4x1x8xf32, #tpu.memory_space<vmem>>, vector<1x1x1x8xf32>
    %74 = vector.shape_cast %73 : vector<1x1x1x8xf32> to vector<1x8xf32>
    %75 = vector.broadcast %74 : vector<1x8xf32> to vector<64x8xf32>
    %76 = arith.addf %72, %75 : vector<64x8xf32>
    %c0_59 = arith.constant 0 : index
    %c1_60 = arith.constant 1 : index
    %c0_61 = arith.constant 0 : index
    %c0_62 = arith.constant 0 : index
    %77 = vector.load %arg7[%c0_59, %c1_60, %c0_61, %c0_62] : memref<2x4x32x8xbf16, #tpu.memory_space<vmem>>, vector<1x1x32x8xbf16>
    %78 = vector.shape_cast %77 : vector<1x1x32x8xbf16> to vector<32x8xbf16>
    %cst_63 = arith.constant dense<0.000000e+00> : vector<64x8xf32>
    %79 = tpu.matmul %29, %78, %cst_63 {dimension_numbers = #tpu.dot_dimension_numbers<[1], [0], [0], [1], [0, 0, 1, 1], [], []>} : vector<64x32xbf16>, vector<32x8xbf16>, vector<64x8xf32> -> vector<64x8xf32>
    %c0_64 = arith.constant 0 : index
    %c1_65 = arith.constant 1 : index
    %c0_66 = arith.constant 0 : index
    %c0_67 = arith.constant 0 : index
    %80 = vector.load %arg8[%c0_64, %c1_65, %c0_66, %c0_67] : memref<2x4x1x8xf32, #tpu.memory_space<vmem>>, vector<1x1x1x8xf32>
    %81 = vector.shape_cast %80 : vector<1x1x1x8xf32> to vector<1x8xf32>
    %82 = vector.broadcast %81 : vector<1x8xf32> to vector<64x8xf32>
    %83 = arith.addf %79, %82 : vector<64x8xf32>
    %c0_68 = arith.constant 0 : index
    %c1_69 = arith.constant 1 : index
    %c0_70 = arith.constant 0 : index
    %c0_71 = arith.constant 0 : index
    %84 = vector.load %arg9[%c0_68, %c1_69, %c0_70, %c0_71] : memref<2x4x32x8xbf16, #tpu.memory_space<vmem>>, vector<1x1x32x8xbf16>
    %85 = vector.shape_cast %84 : vector<1x1x32x8xbf16> to vector<32x8xbf16>
    %cst_72 = arith.constant dense<0.000000e+00> : vector<64x8xf32>
    %86 = tpu.matmul %29, %85, %cst_72 {dimension_numbers = #tpu.dot_dimension_numbers<[1], [0], [0], [1], [0, 0, 1, 1], [], []>} : vector<64x32xbf16>, vector<32x8xbf16>, vector<64x8xf32> -> vector<64x8xf32>
    %c0_73 = arith.constant 0 : index
    %c1_74 = arith.constant 1 : index
    %c0_75 = arith.constant 0 : index
    %c0_76 = arith.constant 0 : index
    %87 = vector.load %arg10[%c0_73, %c1_74, %c0_75, %c0_76] : memref<2x4x1x8xf32, #tpu.memory_space<vmem>>, vector<1x1x1x8xf32>
    %88 = vector.shape_cast %87 : vector<1x1x1x8xf32> to vector<1x8xf32>
    %89 = vector.broadcast %88 : vector<1x8xf32> to vector<64x8xf32>
    %90 = arith.addf %86, %89 : vector<64x8xf32>
    %cst_77 = arith.constant dense<0.000000e+00> : vector<64x64xf32>
    %91 = tpu.matmul %76, %83, %cst_77 {dimension_numbers = #tpu.dot_dimension_numbers<[1], [1], [0], [0], [0, 0, 1, 0], [], []>} : vector<64x8xf32>, vector<64x8xf32>, vector<64x64xf32> -> vector<64x64xf32>
    %92 = arith.addf %91, %2 : vector<64x64xf32>
    %cst_78 = arith.constant dense<0xFF800000> : vector<64xf32>
    %93 = vector.multi_reduction <maximumf>, %92, %cst_78 [1] : vector<64x64xf32> to vector<64xf32>
    %94 = vector.shape_cast %93 : vector<64xf32> to vector<64x1xf32>
    %95 = vector.broadcast %94 : vector<64x1xf32> to vector<64x64xf32>
    %96 = arith.subf %92, %95 : vector<64x64xf32>
    %97 = math.exp %96 : vector<64x64xf32>
    %cst_79 = arith.constant dense<0.000000e+00> : vector<64xf32>
    %98 = vector.multi_reduction <add>, %97, %cst_79 [1] : vector<64x64xf32> to vector<64xf32>
    %99 = vector.shape_cast %98 : vector<64xf32> to vector<64x1xf32>
    %100 = tpu.reciprocal %99 {approx = true} : vector<64x1xf32> -> vector<64x1xf32>
    %101 = vector.broadcast %100 : vector<64x1xf32> to vector<64x64xf32>
    %102 = arith.mulf %97, %101 : vector<64x64xf32>
    %cst_80 = arith.constant dense<0.000000e+00> : vector<64x8xf32>
    %103 = tpu.matmul %102, %90, %cst_80 {dimension_numbers = #tpu.dot_dimension_numbers<[1], [0], [0], [1], [0, 0, 1, 1], [], []>} : vector<64x64xf32>, vector<64x8xf32>, vector<64x8xf32> -> vector<64x8xf32>
    %104 = arith.truncf %103 : vector<64x8xf32> to vector<64x8xbf16>
    %c0_81 = arith.constant 0 : index
    %c1_82 = arith.constant 1 : index
    %c0_83 = arith.constant 0 : index
    %c0_84 = arith.constant 0 : index
    %105 = vector.load %arg11[%c0_81, %c1_82, %c0_83, %c0_84] : memref<2x4x8x32xbf16, #tpu.memory_space<vmem>>, vector<1x1x8x32xbf16>
    %106 = vector.shape_cast %105 : vector<1x1x8x32xbf16> to vector<8x32xbf16>
    %cst_85 = arith.constant dense<0.000000e+00> : vector<64x32xf32>
    %107 = tpu.matmul %104, %106, %cst_85 {dimension_numbers = #tpu.dot_dimension_numbers<[1], [0], [0], [1], [0, 0, 1, 1], [], []>} : vector<64x8xbf16>, vector<8x32xbf16>, vector<64x32xf32> -> vector<64x32xf32>
    %108 = arith.addf %69, %107 : vector<64x32xf32>
    %c0_86 = arith.constant 0 : index
    %c2 = arith.constant 2 : index
    %c0_87 = arith.constant 0 : index
    %c0_88 = arith.constant 0 : index
    %109 = vector.load %arg5[%c0_86, %c2, %c0_87, %c0_88] : memref<2x4x32x8xbf16, #tpu.memory_space<vmem>>, vector<1x1x32x8xbf16>
    %110 = vector.shape_cast %109 : vector<1x1x32x8xbf16> to vector<32x8xbf16>
    %cst_89 = arith.constant dense<0.000000e+00> : vector<64x8xf32>
    %111 = tpu.matmul %29, %110, %cst_89 {dimension_numbers = #tpu.dot_dimension_numbers<[1], [0], [0], [1], [0, 0, 1, 1], [], []>} : vector<64x32xbf16>, vector<32x8xbf16>, vector<64x8xf32> -> vector<64x8xf32>
    %c0_90 = arith.constant 0 : index
    %c2_91 = arith.constant 2 : index
    %c0_92 = arith.constant 0 : index
    %c0_93 = arith.constant 0 : index
    %112 = vector.load %arg6[%c0_90, %c2_91, %c0_92, %c0_93] : memref<2x4x1x8xf32, #tpu.memory_space<vmem>>, vector<1x1x1x8xf32>
    %113 = vector.shape_cast %112 : vector<1x1x1x8xf32> to vector<1x8xf32>
    %114 = vector.broadcast %113 : vector<1x8xf32> to vector<64x8xf32>
    %115 = arith.addf %111, %114 : vector<64x8xf32>
    %c0_94 = arith.constant 0 : index
    %c2_95 = arith.constant 2 : index
    %c0_96 = arith.constant 0 : index
    %c0_97 = arith.constant 0 : index
    %116 = vector.load %arg7[%c0_94, %c2_95, %c0_96, %c0_97] : memref<2x4x32x8xbf16, #tpu.memory_space<vmem>>, vector<1x1x32x8xbf16>
    %117 = vector.shape_cast %116 : vector<1x1x32x8xbf16> to vector<32x8xbf16>
    %cst_98 = arith.constant dense<0.000000e+00> : vector<64x8xf32>
    %118 = tpu.matmul %29, %117, %cst_98 {dimension_numbers = #tpu.dot_dimension_numbers<[1], [0], [0], [1], [0, 0, 1, 1], [], []>} : vector<64x32xbf16>, vector<32x8xbf16>, vector<64x8xf32> -> vector<64x8xf32>
    %c0_99 = arith.constant 0 : index
    %c2_100 = arith.constant 2 : index
    %c0_101 = arith.constant 0 : index
    %c0_102 = arith.constant 0 : index
    %119 = vector.load %arg8[%c0_99, %c2_100, %c0_101, %c0_102] : memref<2x4x1x8xf32, #tpu.memory_space<vmem>>, vector<1x1x1x8xf32>
    %120 = vector.shape_cast %119 : vector<1x1x1x8xf32> to vector<1x8xf32>
    %121 = vector.broadcast %120 : vector<1x8xf32> to vector<64x8xf32>
    %122 = arith.addf %118, %121 : vector<64x8xf32>
    %c0_103 = arith.constant 0 : index
    %c2_104 = arith.constant 2 : index
    %c0_105 = arith.constant 0 : index
    %c0_106 = arith.constant 0 : index
    %123 = vector.load %arg9[%c0_103, %c2_104, %c0_105, %c0_106] : memref<2x4x32x8xbf16, #tpu.memory_space<vmem>>, vector<1x1x32x8xbf16>
    %124 = vector.shape_cast %123 : vector<1x1x32x8xbf16> to vector<32x8xbf16>
    %cst_107 = arith.constant dense<0.000000e+00> : vector<64x8xf32>
    %125 = tpu.matmul %29, %124, %cst_107 {dimension_numbers = #tpu.dot_dimension_numbers<[1], [0], [0], [1], [0, 0, 1, 1], [], []>} : vector<64x32xbf16>, vector<32x8xbf16>, vector<64x8xf32> -> vector<64x8xf32>
    %c0_108 = arith.constant 0 : index
    %c2_109 = arith.constant 2 : index
    %c0_110 = arith.constant 0 : index
    %c0_111 = arith.constant 0 : index
    %126 = vector.load %arg10[%c0_108, %c2_109, %c0_110, %c0_111] : memref<2x4x1x8xf32, #tpu.memory_space<vmem>>, vector<1x1x1x8xf32>
    %127 = vector.shape_cast %126 : vector<1x1x1x8xf32> to vector<1x8xf32>
    %128 = vector.broadcast %127 : vector<1x8xf32> to vector<64x8xf32>
    %129 = arith.addf %125, %128 : vector<64x8xf32>
    %cst_112 = arith.constant dense<0.000000e+00> : vector<64x64xf32>
    %130 = tpu.matmul %115, %122, %cst_112 {dimension_numbers = #tpu.dot_dimension_numbers<[1], [1], [0], [0], [0, 0, 1, 0], [], []>} : vector<64x8xf32>, vector<64x8xf32>, vector<64x64xf32> -> vector<64x64xf32>
    %131 = arith.addf %130, %2 : vector<64x64xf32>
    %cst_113 = arith.constant dense<0xFF800000> : vector<64xf32>
    %132 = vector.multi_reduction <maximumf>, %131, %cst_113 [1] : vector<64x64xf32> to vector<64xf32>
    %133 = vector.shape_cast %132 : vector<64xf32> to vector<64x1xf32>
    %134 = vector.broadcast %133 : vector<64x1xf32> to vector<64x64xf32>
    %135 = arith.subf %131, %134 : vector<64x64xf32>
    %136 = math.exp %135 : vector<64x64xf32>
    %cst_114 = arith.constant dense<0.000000e+00> : vector<64xf32>
    %137 = vector.multi_reduction <add>, %136, %cst_114 [1] : vector<64x64xf32> to vector<64xf32>
    %138 = vector.shape_cast %137 : vector<64xf32> to vector<64x1xf32>
    %139 = tpu.reciprocal %138 {approx = true} : vector<64x1xf32> -> vector<64x1xf32>
    %140 = vector.broadcast %139 : vector<64x1xf32> to vector<64x64xf32>
    %141 = arith.mulf %136, %140 : vector<64x64xf32>
    %cst_115 = arith.constant dense<0.000000e+00> : vector<64x8xf32>
    %142 = tpu.matmul %141, %129, %cst_115 {dimension_numbers = #tpu.dot_dimension_numbers<[1], [0], [0], [1], [0, 0, 1, 1], [], []>} : vector<64x64xf32>, vector<64x8xf32>, vector<64x8xf32> -> vector<64x8xf32>
    %143 = arith.truncf %142 : vector<64x8xf32> to vector<64x8xbf16>
    %c0_116 = arith.constant 0 : index
    %c2_117 = arith.constant 2 : index
    %c0_118 = arith.constant 0 : index
    %c0_119 = arith.constant 0 : index
    %144 = vector.load %arg11[%c0_116, %c2_117, %c0_118, %c0_119] : memref<2x4x8x32xbf16, #tpu.memory_space<vmem>>, vector<1x1x8x32xbf16>
    %145 = vector.shape_cast %144 : vector<1x1x8x32xbf16> to vector<8x32xbf16>
    %cst_120 = arith.constant dense<0.000000e+00> : vector<64x32xf32>
    %146 = tpu.matmul %143, %145, %cst_120 {dimension_numbers = #tpu.dot_dimension_numbers<[1], [0], [0], [1], [0, 0, 1, 1], [], []>} : vector<64x8xbf16>, vector<8x32xbf16>, vector<64x32xf32> -> vector<64x32xf32>
    %147 = arith.addf %108, %146 : vector<64x32xf32>
    %c0_121 = arith.constant 0 : index
    %c3 = arith.constant 3 : index
    %c0_122 = arith.constant 0 : index
    %c0_123 = arith.constant 0 : index
    %148 = vector.load %arg5[%c0_121, %c3, %c0_122, %c0_123] : memref<2x4x32x8xbf16, #tpu.memory_space<vmem>>, vector<1x1x32x8xbf16>
    %149 = vector.shape_cast %148 : vector<1x1x32x8xbf16> to vector<32x8xbf16>
    %cst_124 = arith.constant dense<0.000000e+00> : vector<64x8xf32>
    %150 = tpu.matmul %29, %149, %cst_124 {dimension_numbers = #tpu.dot_dimension_numbers<[1], [0], [0], [1], [0, 0, 1, 1], [], []>} : vector<64x32xbf16>, vector<32x8xbf16>, vector<64x8xf32> -> vector<64x8xf32>
    %c0_125 = arith.constant 0 : index
    %c3_126 = arith.constant 3 : index
    %c0_127 = arith.constant 0 : index
    %c0_128 = arith.constant 0 : index
    %151 = vector.load %arg6[%c0_125, %c3_126, %c0_127, %c0_128] : memref<2x4x1x8xf32, #tpu.memory_space<vmem>>, vector<1x1x1x8xf32>
    %152 = vector.shape_cast %151 : vector<1x1x1x8xf32> to vector<1x8xf32>
    %153 = vector.broadcast %152 : vector<1x8xf32> to vector<64x8xf32>
    %154 = arith.addf %150, %153 : vector<64x8xf32>
    %c0_129 = arith.constant 0 : index
    %c3_130 = arith.constant 3 : index
    %c0_131 = arith.constant 0 : index
    %c0_132 = arith.constant 0 : index
    %155 = vector.load %arg7[%c0_129, %c3_130, %c0_131, %c0_132] : memref<2x4x32x8xbf16, #tpu.memory_space<vmem>>, vector<1x1x32x8xbf16>
    %156 = vector.shape_cast %155 : vector<1x1x32x8xbf16> to vector<32x8xbf16>
    %cst_133 = arith.constant dense<0.000000e+00> : vector<64x8xf32>
    %157 = tpu.matmul %29, %156, %cst_133 {dimension_numbers = #tpu.dot_dimension_numbers<[1], [0], [0], [1], [0, 0, 1, 1], [], []>} : vector<64x32xbf16>, vector<32x8xbf16>, vector<64x8xf32> -> vector<64x8xf32>
    %c0_134 = arith.constant 0 : index
    %c3_135 = arith.constant 3 : index
    %c0_136 = arith.constant 0 : index
    %c0_137 = arith.constant 0 : index
    %158 = vector.load %arg8[%c0_134, %c3_135, %c0_136, %c0_137] : memref<2x4x1x8xf32, #tpu.memory_space<vmem>>, vector<1x1x1x8xf32>
    %159 = vector.shape_cast %158 : vector<1x1x1x8xf32> to vector<1x8xf32>
    %160 = vector.broadcast %159 : vector<1x8xf32> to vector<64x8xf32>
    %161 = arith.addf %157, %160 : vector<64x8xf32>
    %c0_138 = arith.constant 0 : index
    %c3_139 = arith.constant 3 : index
    %c0_140 = arith.constant 0 : index
    %c0_141 = arith.constant 0 : index
    %162 = vector.load %arg9[%c0_138, %c3_139, %c0_140, %c0_141] : memref<2x4x32x8xbf16, #tpu.memory_space<vmem>>, vector<1x1x32x8xbf16>
    %163 = vector.shape_cast %162 : vector<1x1x32x8xbf16> to vector<32x8xbf16>
    %cst_142 = arith.constant dense<0.000000e+00> : vector<64x8xf32>
    %164 = tpu.matmul %29, %163, %cst_142 {dimension_numbers = #tpu.dot_dimension_numbers<[1], [0], [0], [1], [0, 0, 1, 1], [], []>} : vector<64x32xbf16>, vector<32x8xbf16>, vector<64x8xf32> -> vector<64x8xf32>
    %c0_143 = arith.constant 0 : index
    %c3_144 = arith.constant 3 : index
    %c0_145 = arith.constant 0 : index
    %c0_146 = arith.constant 0 : index
    %165 = vector.load %arg10[%c0_143, %c3_144, %c0_145, %c0_146] : memref<2x4x1x8xf32, #tpu.memory_space<vmem>>, vector<1x1x1x8xf32>
    %166 = vector.shape_cast %165 : vector<1x1x1x8xf32> to vector<1x8xf32>
    %167 = vector.broadcast %166 : vector<1x8xf32> to vector<64x8xf32>
    %168 = arith.addf %164, %167 : vector<64x8xf32>
    %cst_147 = arith.constant dense<0.000000e+00> : vector<64x64xf32>
    %169 = tpu.matmul %154, %161, %cst_147 {dimension_numbers = #tpu.dot_dimension_numbers<[1], [1], [0], [0], [0, 0, 1, 0], [], []>} : vector<64x8xf32>, vector<64x8xf32>, vector<64x64xf32> -> vector<64x64xf32>
    %170 = arith.addf %169, %2 : vector<64x64xf32>
    %cst_148 = arith.constant dense<0xFF800000> : vector<64xf32>
    %171 = vector.multi_reduction <maximumf>, %170, %cst_148 [1] : vector<64x64xf32> to vector<64xf32>
    %172 = vector.shape_cast %171 : vector<64xf32> to vector<64x1xf32>
    %173 = vector.broadcast %172 : vector<64x1xf32> to vector<64x64xf32>
    %174 = arith.subf %170, %173 : vector<64x64xf32>
    %175 = math.exp %174 : vector<64x64xf32>
    %cst_149 = arith.constant dense<0.000000e+00> : vector<64xf32>
    %176 = vector.multi_reduction <add>, %175, %cst_149 [1] : vector<64x64xf32> to vector<64xf32>
    %177 = vector.shape_cast %176 : vector<64xf32> to vector<64x1xf32>
    %178 = tpu.reciprocal %177 {approx = true} : vector<64x1xf32> -> vector<64x1xf32>
    %179 = vector.broadcast %178 : vector<64x1xf32> to vector<64x64xf32>
    %180 = arith.mulf %175, %179 : vector<64x64xf32>
    %cst_150 = arith.constant dense<0.000000e+00> : vector<64x8xf32>
    %181 = tpu.matmul %180, %168, %cst_150 {dimension_numbers = #tpu.dot_dimension_numbers<[1], [0], [0], [1], [0, 0, 1, 1], [], []>} : vector<64x64xf32>, vector<64x8xf32>, vector<64x8xf32> -> vector<64x8xf32>
    %182 = arith.truncf %181 : vector<64x8xf32> to vector<64x8xbf16>
    %c0_151 = arith.constant 0 : index
    %c3_152 = arith.constant 3 : index
    %c0_153 = arith.constant 0 : index
    %c0_154 = arith.constant 0 : index
    %183 = vector.load %arg11[%c0_151, %c3_152, %c0_153, %c0_154] : memref<2x4x8x32xbf16, #tpu.memory_space<vmem>>, vector<1x1x8x32xbf16>
    %184 = vector.shape_cast %183 : vector<1x1x8x32xbf16> to vector<8x32xbf16>
    %cst_155 = arith.constant dense<0.000000e+00> : vector<64x32xf32>
    %185 = tpu.matmul %182, %184, %cst_155 {dimension_numbers = #tpu.dot_dimension_numbers<[1], [0], [0], [1], [0, 0, 1, 1], [], []>} : vector<64x8xbf16>, vector<8x32xbf16>, vector<64x32xf32> -> vector<64x32xf32>
    %186 = arith.addf %147, %185 : vector<64x32xf32>
    %c0_156 = arith.constant 0 : index
    %c0_157 = arith.constant 0 : index
    %c0_158 = arith.constant 0 : index
    %187 = vector.load %arg13[%c0_156, %c0_157, %c0_158] : memref<2x1x32xf32, #tpu.memory_space<vmem>>, vector<1x1x32xf32>
    %188 = vector.shape_cast %187 : vector<1x1x32xf32> to vector<1x32xf32>
    %c0_159 = arith.constant 0 : index
    %c0_160 = arith.constant 0 : index
    %c0_161 = arith.constant 0 : index
    %189 = vector.load %arg12[%c0_159, %c0_160, %c0_161] : memref<2x1x32xf32, #tpu.memory_space<vmem>>, vector<1x1x32xf32>
    %190 = vector.shape_cast %189 : vector<1x1x32xf32> to vector<1x32xf32>
    %191 = vector.broadcast %190 : vector<1x32xf32> to vector<64x32xf32>
    %192 = arith.addf %186, %191 : vector<64x32xf32>
    %193 = vector.broadcast %188 : vector<1x32xf32> to vector<64x32xf32>
    %194 = arith.mulf %193, %192 : vector<64x32xf32>
    %195 = arith.addf %1, %194 : vector<64x32xf32>
    %c0_162 = arith.constant 0 : index
    %c0_163 = arith.constant 0 : index
    %c0_164 = arith.constant 0 : index
    %196 = vector.load %arg14[%c0_162, %c0_163, %c0_164] : memref<2x1x32xf32, #tpu.memory_space<vmem>>, vector<1x1x32xf32>
    %197 = vector.shape_cast %196 : vector<1x1x32xf32> to vector<1x32xf32>
    %c0_165 = arith.constant 0 : index
    %c0_166 = arith.constant 0 : index
    %c0_167 = arith.constant 0 : index
    %198 = vector.load %arg15[%c0_165, %c0_166, %c0_167] : memref<2x1x32xf32, #tpu.memory_space<vmem>>, vector<1x1x32xf32>
    %199 = vector.shape_cast %198 : vector<1x1x32xf32> to vector<1x32xf32>
    %cst_168 = arith.constant dense<0.000000e+00> : vector<64xf32>
    %200 = vector.multi_reduction <add>, %195, %cst_168 [1] : vector<64x32xf32> to vector<64xf32>
    %201 = vector.shape_cast %200 : vector<64xf32> to vector<64x1xf32>
    %cst_169 = arith.constant 3.200000e+01 : f32
    %202 = vector.broadcast %cst_169 : f32 to vector<64x1xf32>
    %203 = arith.divf %201, %202 : vector<64x1xf32>
    %204 = vector.broadcast %203 : vector<64x1xf32> to vector<64x32xf32>
    %205 = arith.subf %195, %204 : vector<64x32xf32>
    %206 = arith.mulf %205, %205 : vector<64x32xf32>
    %cst_170 = arith.constant dense<0.000000e+00> : vector<64xf32>
    %207 = vector.multi_reduction <add>, %206, %cst_170 [1] : vector<64x32xf32> to vector<64xf32>
    %208 = vector.shape_cast %207 : vector<64xf32> to vector<64x1xf32>
    %cst_171 = arith.constant 3.200000e+01 : f32
    %209 = vector.broadcast %cst_171 : f32 to vector<64x1xf32>
    %210 = arith.divf %208, %209 : vector<64x1xf32>
    %211 = vector.broadcast %203 : vector<64x1xf32> to vector<64x32xf32>
    %212 = arith.subf %195, %211 : vector<64x32xf32>
    %cst_172 = arith.constant 9.99999974E-6 : f32
    %213 = vector.broadcast %cst_172 : f32 to vector<64x1xf32>
    %214 = arith.addf %210, %213 : vector<64x1xf32>
    %215 = math.rsqrt %214 : vector<64x1xf32>
    %216 = vector.broadcast %215 : vector<64x1xf32> to vector<64x32xf32>
    %217 = arith.mulf %212, %216 : vector<64x32xf32>
    %218 = vector.broadcast %197 : vector<1x32xf32> to vector<64x32xf32>
    %219 = arith.mulf %217, %218 : vector<64x32xf32>
    %220 = vector.broadcast %199 : vector<1x32xf32> to vector<64x32xf32>
    %221 = arith.addf %219, %220 : vector<64x32xf32>
    %222 = arith.truncf %221 : vector<64x32xf32> to vector<64x32xbf16>
    %c0_173 = arith.constant 0 : index
    %c0_174 = arith.constant 0 : index
    %c0_175 = arith.constant 0 : index
    %223 = vector.load %arg16[%c0_173, %c0_174, %c0_175] : memref<2x32x128xbf16, #tpu.memory_space<vmem>>, vector<1x32x128xbf16>
    %224 = vector.shape_cast %223 : vector<1x32x128xbf16> to vector<32x128xbf16>
    %cst_176 = arith.constant dense<0.000000e+00> : vector<64x128xf32>
    %225 = tpu.matmul %222, %224, %cst_176 {dimension_numbers = #tpu.dot_dimension_numbers<[1], [0], [0], [1], [0, 0, 1, 1], [], []>} : vector<64x32xbf16>, vector<32x128xbf16>, vector<64x128xf32> -> vector<64x128xf32>
    %c0_177 = arith.constant 0 : index
    %c0_178 = arith.constant 0 : index
    %c0_179 = arith.constant 0 : index
    %226 = vector.load %arg17[%c0_177, %c0_178, %c0_179] : memref<2x1x128xf32, #tpu.memory_space<vmem>>, vector<1x1x128xf32>
    %227 = vector.shape_cast %226 : vector<1x1x128xf32> to vector<1x128xf32>
    %228 = vector.broadcast %227 : vector<1x128xf32> to vector<64x128xf32>
    %229 = arith.addf %225, %228 : vector<64x128xf32>
    %cst_180 = arith.constant 5.000000e-01 : f32
    %230 = vector.broadcast %cst_180 : f32 to vector<64x128xf32>
    %231 = arith.mulf %230, %229 : vector<64x128xf32>
    %cst_181 = arith.constant 0.707106769 : f32
    %232 = vector.broadcast %cst_181 : f32 to vector<64x128xf32>
    %233 = arith.mulf %229, %232 : vector<64x128xf32>
    %cst_182 = arith.constant 0.000000e+00 : f32
    %234 = vector.broadcast %cst_182 : f32 to vector<64x128xf32>
    %235 = arith.cmpf oge, %233, %234 : vector<64x128xf32>
    %cst_183 = arith.constant 1.000000e+00 : f32
    %cst_184 = arith.constant -1.000000e+00 : f32
    %236 = vector.broadcast %cst_183 : f32 to vector<64x128xf32>
    %237 = vector.broadcast %cst_184 : f32 to vector<64x128xf32>
    %238 = arith.select %235, %236, %237 : vector<64x128xi1>, vector<64x128xf32>
    %239 = math.absf %233 : vector<64x128xf32>
    %cst_185 = arith.constant 0.327591091 : f32
    %240 = vector.broadcast %cst_185 : f32 to vector<64x128xf32>
    %241 = arith.mulf %240, %239 : vector<64x128xf32>
    %cst_186 = arith.constant 1.000000e+00 : f32
    %242 = vector.broadcast %cst_186 : f32 to vector<64x128xf32>
    %243 = arith.addf %242, %241 : vector<64x128xf32>
    %cst_187 = arith.constant 1.000000e+00 : f32
    %244 = vector.broadcast %cst_187 : f32 to vector<64x128xf32>
    %245 = arith.divf %244, %243 : vector<64x128xf32>
    %cst_188 = arith.constant 1.06140542 : f32
    %246 = vector.broadcast %cst_188 : f32 to vector<64x128xf32>
    %247 = arith.mulf %246, %245 : vector<64x128xf32>
    %cst_189 = arith.constant -1.45315206 : f32
    %248 = vector.broadcast %cst_189 : f32 to vector<64x128xf32>
    %249 = arith.addf %247, %248 : vector<64x128xf32>
    %250 = arith.mulf %249, %245 : vector<64x128xf32>
    %cst_190 = arith.constant 1.42141378 : f32
    %251 = vector.broadcast %cst_190 : f32 to vector<64x128xf32>
    %252 = arith.addf %250, %251 : vector<64x128xf32>
    %253 = arith.mulf %252, %245 : vector<64x128xf32>
    %cst_191 = arith.constant -0.284496725 : f32
    %254 = vector.broadcast %cst_191 : f32 to vector<64x128xf32>
    %255 = arith.addf %253, %254 : vector<64x128xf32>
    %256 = arith.mulf %255, %245 : vector<64x128xf32>
    %cst_192 = arith.constant 0.254829586 : f32
    %257 = vector.broadcast %cst_192 : f32 to vector<64x128xf32>
    %258 = arith.addf %256, %257 : vector<64x128xf32>
    %259 = arith.mulf %258, %245 : vector<64x128xf32>
    %cst_193 = arith.constant 0.000000e+00 : f32
    %260 = vector.broadcast %cst_193 : f32 to vector<64x128xf32>
    %261 = arith.subf %260, %239 : vector<64x128xf32>
    %262 = arith.mulf %261, %239 : vector<64x128xf32>
    %263 = math.exp %262 : vector<64x128xf32>
    %264 = arith.mulf %259, %263 : vector<64x128xf32>
    %cst_194 = arith.constant 1.000000e+00 : f32
    %265 = vector.broadcast %cst_194 : f32 to vector<64x128xf32>
    %266 = arith.subf %265, %264 : vector<64x128xf32>
    %267 = arith.mulf %238, %266 : vector<64x128xf32>
    %cst_195 = arith.constant 1.000000e+00 : f32
    %268 = vector.broadcast %cst_195 : f32 to vector<64x128xf32>
    %269 = arith.addf %268, %267 : vector<64x128xf32>
    %270 = arith.mulf %231, %269 : vector<64x128xf32>
    %271 = arith.truncf %270 : vector<64x128xf32> to vector<64x128xbf16>
    %c0_196 = arith.constant 0 : index
    %c0_197 = arith.constant 0 : index
    %c0_198 = arith.constant 0 : index
    %272 = vector.load %arg18[%c0_196, %c0_197, %c0_198] : memref<2x128x32xbf16, #tpu.memory_space<vmem>>, vector<1x128x32xbf16>
    %273 = vector.shape_cast %272 : vector<1x128x32xbf16> to vector<128x32xbf16>
    %cst_199 = arith.constant dense<0.000000e+00> : vector<64x32xf32>
    %274 = tpu.matmul %271, %273, %cst_199 {dimension_numbers = #tpu.dot_dimension_numbers<[1], [0], [0], [1], [0, 0, 1, 1], [], []>} : vector<64x128xbf16>, vector<128x32xbf16>, vector<64x32xf32> -> vector<64x32xf32>
    %c0_200 = arith.constant 0 : index
    %c0_201 = arith.constant 0 : index
    %c0_202 = arith.constant 0 : index
    %275 = vector.load %arg19[%c0_200, %c0_201, %c0_202] : memref<2x1x32xf32, #tpu.memory_space<vmem>>, vector<1x1x32xf32>
    %276 = vector.shape_cast %275 : vector<1x1x32xf32> to vector<1x32xf32>
    %277 = vector.broadcast %276 : vector<1x32xf32> to vector<64x32xf32>
    %278 = arith.addf %274, %277 : vector<64x32xf32>
    %c0_203 = arith.constant 0 : index
    %c0_204 = arith.constant 0 : index
    %c0_205 = arith.constant 0 : index
    %279 = vector.load %arg20[%c0_203, %c0_204, %c0_205] : memref<2x1x32xf32, #tpu.memory_space<vmem>>, vector<1x1x32xf32>
    %280 = vector.shape_cast %279 : vector<1x1x32xf32> to vector<1x32xf32>
    %281 = vector.broadcast %280 : vector<1x32xf32> to vector<64x32xf32>
    %282 = arith.mulf %281, %278 : vector<64x32xf32>
    %283 = arith.addf %195, %282 : vector<64x32xf32>
    %c1_206 = arith.constant 1 : index
    %c0_207 = arith.constant 0 : index
    %c0_208 = arith.constant 0 : index
    %284 = vector.load %arg3[%c1_206, %c0_207, %c0_208] : memref<2x1x32xf32, #tpu.memory_space<vmem>>, vector<1x1x32xf32>
    %285 = vector.shape_cast %284 : vector<1x1x32xf32> to vector<1x32xf32>
    %c1_209 = arith.constant 1 : index
    %c0_210 = arith.constant 0 : index
    %c0_211 = arith.constant 0 : index
    %286 = vector.load %arg4[%c1_209, %c0_210, %c0_211] : memref<2x1x32xf32, #tpu.memory_space<vmem>>, vector<1x1x32xf32>
    %287 = vector.shape_cast %286 : vector<1x1x32xf32> to vector<1x32xf32>
    %cst_212 = arith.constant dense<0.000000e+00> : vector<64xf32>
    %288 = vector.multi_reduction <add>, %283, %cst_212 [1] : vector<64x32xf32> to vector<64xf32>
    %289 = vector.shape_cast %288 : vector<64xf32> to vector<64x1xf32>
    %cst_213 = arith.constant 3.200000e+01 : f32
    %290 = vector.broadcast %cst_213 : f32 to vector<64x1xf32>
    %291 = arith.divf %289, %290 : vector<64x1xf32>
    %292 = vector.broadcast %291 : vector<64x1xf32> to vector<64x32xf32>
    %293 = arith.subf %283, %292 : vector<64x32xf32>
    %294 = arith.mulf %293, %293 : vector<64x32xf32>
    %cst_214 = arith.constant dense<0.000000e+00> : vector<64xf32>
    %295 = vector.multi_reduction <add>, %294, %cst_214 [1] : vector<64x32xf32> to vector<64xf32>
    %296 = vector.shape_cast %295 : vector<64xf32> to vector<64x1xf32>
    %cst_215 = arith.constant 3.200000e+01 : f32
    %297 = vector.broadcast %cst_215 : f32 to vector<64x1xf32>
    %298 = arith.divf %296, %297 : vector<64x1xf32>
    %299 = vector.broadcast %291 : vector<64x1xf32> to vector<64x32xf32>
    %300 = arith.subf %283, %299 : vector<64x32xf32>
    %cst_216 = arith.constant 9.99999974E-6 : f32
    %301 = vector.broadcast %cst_216 : f32 to vector<64x1xf32>
    %302 = arith.addf %298, %301 : vector<64x1xf32>
    %303 = math.rsqrt %302 : vector<64x1xf32>
    %304 = vector.broadcast %303 : vector<64x1xf32> to vector<64x32xf32>
    %305 = arith.mulf %300, %304 : vector<64x32xf32>
    %306 = vector.broadcast %285 : vector<1x32xf32> to vector<64x32xf32>
    %307 = arith.mulf %305, %306 : vector<64x32xf32>
    %308 = vector.broadcast %287 : vector<1x32xf32> to vector<64x32xf32>
    %309 = arith.addf %307, %308 : vector<64x32xf32>
    %310 = arith.truncf %309 : vector<64x32xf32> to vector<64x32xbf16>
    %cst_217 = arith.constant 0.000000e+00 : f32
    %311 = vector.broadcast %cst_217 : f32 to vector<64x32xf32>
    %c1_218 = arith.constant 1 : index
    %c0_219 = arith.constant 0 : index
    %c0_220 = arith.constant 0 : index
    %c0_221 = arith.constant 0 : index
    %312 = vector.load %arg5[%c1_218, %c0_219, %c0_220, %c0_221] : memref<2x4x32x8xbf16, #tpu.memory_space<vmem>>, vector<1x1x32x8xbf16>
    %313 = vector.shape_cast %312 : vector<1x1x32x8xbf16> to vector<32x8xbf16>
    %cst_222 = arith.constant dense<0.000000e+00> : vector<64x8xf32>
    %314 = tpu.matmul %310, %313, %cst_222 {dimension_numbers = #tpu.dot_dimension_numbers<[1], [0], [0], [1], [0, 0, 1, 1], [], []>} : vector<64x32xbf16>, vector<32x8xbf16>, vector<64x8xf32> -> vector<64x8xf32>
    %c1_223 = arith.constant 1 : index
    %c0_224 = arith.constant 0 : index
    %c0_225 = arith.constant 0 : index
    %c0_226 = arith.constant 0 : index
    %315 = vector.load %arg6[%c1_223, %c0_224, %c0_225, %c0_226] : memref<2x4x1x8xf32, #tpu.memory_space<vmem>>, vector<1x1x1x8xf32>
    %316 = vector.shape_cast %315 : vector<1x1x1x8xf32> to vector<1x8xf32>
    %317 = vector.broadcast %316 : vector<1x8xf32> to vector<64x8xf32>
    %318 = arith.addf %314, %317 : vector<64x8xf32>
    %c1_227 = arith.constant 1 : index
    %c0_228 = arith.constant 0 : index
    %c0_229 = arith.constant 0 : index
    %c0_230 = arith.constant 0 : index
    %319 = vector.load %arg7[%c1_227, %c0_228, %c0_229, %c0_230] : memref<2x4x32x8xbf16, #tpu.memory_space<vmem>>, vector<1x1x32x8xbf16>
    %320 = vector.shape_cast %319 : vector<1x1x32x8xbf16> to vector<32x8xbf16>
    %cst_231 = arith.constant dense<0.000000e+00> : vector<64x8xf32>
    %321 = tpu.matmul %310, %320, %cst_231 {dimension_numbers = #tpu.dot_dimension_numbers<[1], [0], [0], [1], [0, 0, 1, 1], [], []>} : vector<64x32xbf16>, vector<32x8xbf16>, vector<64x8xf32> -> vector<64x8xf32>
    %c1_232 = arith.constant 1 : index
    %c0_233 = arith.constant 0 : index
    %c0_234 = arith.constant 0 : index
    %c0_235 = arith.constant 0 : index
    %322 = vector.load %arg8[%c1_232, %c0_233, %c0_234, %c0_235] : memref<2x4x1x8xf32, #tpu.memory_space<vmem>>, vector<1x1x1x8xf32>
    %323 = vector.shape_cast %322 : vector<1x1x1x8xf32> to vector<1x8xf32>
    %324 = vector.broadcast %323 : vector<1x8xf32> to vector<64x8xf32>
    %325 = arith.addf %321, %324 : vector<64x8xf32>
    %c1_236 = arith.constant 1 : index
    %c0_237 = arith.constant 0 : index
    %c0_238 = arith.constant 0 : index
    %c0_239 = arith.constant 0 : index
    %326 = vector.load %arg9[%c1_236, %c0_237, %c0_238, %c0_239] : memref<2x4x32x8xbf16, #tpu.memory_space<vmem>>, vector<1x1x32x8xbf16>
    %327 = vector.shape_cast %326 : vector<1x1x32x8xbf16> to vector<32x8xbf16>
    %cst_240 = arith.constant dense<0.000000e+00> : vector<64x8xf32>
    %328 = tpu.matmul %310, %327, %cst_240 {dimension_numbers = #tpu.dot_dimension_numbers<[1], [0], [0], [1], [0, 0, 1, 1], [], []>} : vector<64x32xbf16>, vector<32x8xbf16>, vector<64x8xf32> -> vector<64x8xf32>
    %c1_241 = arith.constant 1 : index
    %c0_242 = arith.constant 0 : index
    %c0_243 = arith.constant 0 : index
    %c0_244 = arith.constant 0 : index
    %329 = vector.load %arg10[%c1_241, %c0_242, %c0_243, %c0_244] : memref<2x4x1x8xf32, #tpu.memory_space<vmem>>, vector<1x1x1x8xf32>
    %330 = vector.shape_cast %329 : vector<1x1x1x8xf32> to vector<1x8xf32>
    %331 = vector.broadcast %330 : vector<1x8xf32> to vector<64x8xf32>
    %332 = arith.addf %328, %331 : vector<64x8xf32>
    %cst_245 = arith.constant dense<0.000000e+00> : vector<64x64xf32>
    %333 = tpu.matmul %318, %325, %cst_245 {dimension_numbers = #tpu.dot_dimension_numbers<[1], [1], [0], [0], [0, 0, 1, 0], [], []>} : vector<64x8xf32>, vector<64x8xf32>, vector<64x64xf32> -> vector<64x64xf32>
    %334 = arith.addf %333, %2 : vector<64x64xf32>
    %cst_246 = arith.constant dense<0xFF800000> : vector<64xf32>
    %335 = vector.multi_reduction <maximumf>, %334, %cst_246 [1] : vector<64x64xf32> to vector<64xf32>
    %336 = vector.shape_cast %335 : vector<64xf32> to vector<64x1xf32>
    %337 = vector.broadcast %336 : vector<64x1xf32> to vector<64x64xf32>
    %338 = arith.subf %334, %337 : vector<64x64xf32>
    %339 = math.exp %338 : vector<64x64xf32>
    %cst_247 = arith.constant dense<0.000000e+00> : vector<64xf32>
    %340 = vector.multi_reduction <add>, %339, %cst_247 [1] : vector<64x64xf32> to vector<64xf32>
    %341 = vector.shape_cast %340 : vector<64xf32> to vector<64x1xf32>
    %342 = tpu.reciprocal %341 {approx = true} : vector<64x1xf32> -> vector<64x1xf32>
    %343 = vector.broadcast %342 : vector<64x1xf32> to vector<64x64xf32>
    %344 = arith.mulf %339, %343 : vector<64x64xf32>
    %cst_248 = arith.constant dense<0.000000e+00> : vector<64x8xf32>
    %345 = tpu.matmul %344, %332, %cst_248 {dimension_numbers = #tpu.dot_dimension_numbers<[1], [0], [0], [1], [0, 0, 1, 1], [], []>} : vector<64x64xf32>, vector<64x8xf32>, vector<64x8xf32> -> vector<64x8xf32>
    %346 = arith.truncf %345 : vector<64x8xf32> to vector<64x8xbf16>
    %c1_249 = arith.constant 1 : index
    %c0_250 = arith.constant 0 : index
    %c0_251 = arith.constant 0 : index
    %c0_252 = arith.constant 0 : index
    %347 = vector.load %arg11[%c1_249, %c0_250, %c0_251, %c0_252] : memref<2x4x8x32xbf16, #tpu.memory_space<vmem>>, vector<1x1x8x32xbf16>
    %348 = vector.shape_cast %347 : vector<1x1x8x32xbf16> to vector<8x32xbf16>
    %cst_253 = arith.constant dense<0.000000e+00> : vector<64x32xf32>
    %349 = tpu.matmul %346, %348, %cst_253 {dimension_numbers = #tpu.dot_dimension_numbers<[1], [0], [0], [1], [0, 0, 1, 1], [], []>} : vector<64x8xbf16>, vector<8x32xbf16>, vector<64x32xf32> -> vector<64x32xf32>
    %350 = arith.addf %311, %349 : vector<64x32xf32>
    %c1_254 = arith.constant 1 : index
    %c1_255 = arith.constant 1 : index
    %c0_256 = arith.constant 0 : index
    %c0_257 = arith.constant 0 : index
    %351 = vector.load %arg5[%c1_254, %c1_255, %c0_256, %c0_257] : memref<2x4x32x8xbf16, #tpu.memory_space<vmem>>, vector<1x1x32x8xbf16>
    %352 = vector.shape_cast %351 : vector<1x1x32x8xbf16> to vector<32x8xbf16>
    %cst_258 = arith.constant dense<0.000000e+00> : vector<64x8xf32>
    %353 = tpu.matmul %310, %352, %cst_258 {dimension_numbers = #tpu.dot_dimension_numbers<[1], [0], [0], [1], [0, 0, 1, 1], [], []>} : vector<64x32xbf16>, vector<32x8xbf16>, vector<64x8xf32> -> vector<64x8xf32>
    %c1_259 = arith.constant 1 : index
    %c1_260 = arith.constant 1 : index
    %c0_261 = arith.constant 0 : index
    %c0_262 = arith.constant 0 : index
    %354 = vector.load %arg6[%c1_259, %c1_260, %c0_261, %c0_262] : memref<2x4x1x8xf32, #tpu.memory_space<vmem>>, vector<1x1x1x8xf32>
    %355 = vector.shape_cast %354 : vector<1x1x1x8xf32> to vector<1x8xf32>
    %356 = vector.broadcast %355 : vector<1x8xf32> to vector<64x8xf32>
    %357 = arith.addf %353, %356 : vector<64x8xf32>
    %c1_263 = arith.constant 1 : index
    %c1_264 = arith.constant 1 : index
    %c0_265 = arith.constant 0 : index
    %c0_266 = arith.constant 0 : index
    %358 = vector.load %arg7[%c1_263, %c1_264, %c0_265, %c0_266] : memref<2x4x32x8xbf16, #tpu.memory_space<vmem>>, vector<1x1x32x8xbf16>
    %359 = vector.shape_cast %358 : vector<1x1x32x8xbf16> to vector<32x8xbf16>
    %cst_267 = arith.constant dense<0.000000e+00> : vector<64x8xf32>
    %360 = tpu.matmul %310, %359, %cst_267 {dimension_numbers = #tpu.dot_dimension_numbers<[1], [0], [0], [1], [0, 0, 1, 1], [], []>} : vector<64x32xbf16>, vector<32x8xbf16>, vector<64x8xf32> -> vector<64x8xf32>
    %c1_268 = arith.constant 1 : index
    %c1_269 = arith.constant 1 : index
    %c0_270 = arith.constant 0 : index
    %c0_271 = arith.constant 0 : index
    %361 = vector.load %arg8[%c1_268, %c1_269, %c0_270, %c0_271] : memref<2x4x1x8xf32, #tpu.memory_space<vmem>>, vector<1x1x1x8xf32>
    %362 = vector.shape_cast %361 : vector<1x1x1x8xf32> to vector<1x8xf32>
    %363 = vector.broadcast %362 : vector<1x8xf32> to vector<64x8xf32>
    %364 = arith.addf %360, %363 : vector<64x8xf32>
    %c1_272 = arith.constant 1 : index
    %c1_273 = arith.constant 1 : index
    %c0_274 = arith.constant 0 : index
    %c0_275 = arith.constant 0 : index
    %365 = vector.load %arg9[%c1_272, %c1_273, %c0_274, %c0_275] : memref<2x4x32x8xbf16, #tpu.memory_space<vmem>>, vector<1x1x32x8xbf16>
    %366 = vector.shape_cast %365 : vector<1x1x32x8xbf16> to vector<32x8xbf16>
    %cst_276 = arith.constant dense<0.000000e+00> : vector<64x8xf32>
    %367 = tpu.matmul %310, %366, %cst_276 {dimension_numbers = #tpu.dot_dimension_numbers<[1], [0], [0], [1], [0, 0, 1, 1], [], []>} : vector<64x32xbf16>, vector<32x8xbf16>, vector<64x8xf32> -> vector<64x8xf32>
    %c1_277 = arith.constant 1 : index
    %c1_278 = arith.constant 1 : index
    %c0_279 = arith.constant 0 : index
    %c0_280 = arith.constant 0 : index
    %368 = vector.load %arg10[%c1_277, %c1_278, %c0_279, %c0_280] : memref<2x4x1x8xf32, #tpu.memory_space<vmem>>, vector<1x1x1x8xf32>
    %369 = vector.shape_cast %368 : vector<1x1x1x8xf32> to vector<1x8xf32>
    %370 = vector.broadcast %369 : vector<1x8xf32> to vector<64x8xf32>
    %371 = arith.addf %367, %370 : vector<64x8xf32>
    %cst_281 = arith.constant dense<0.000000e+00> : vector<64x64xf32>
    %372 = tpu.matmul %357, %364, %cst_281 {dimension_numbers = #tpu.dot_dimension_numbers<[1], [1], [0], [0], [0, 0, 1, 0], [], []>} : vector<64x8xf32>, vector<64x8xf32>, vector<64x64xf32> -> vector<64x64xf32>
    %373 = arith.addf %372, %2 : vector<64x64xf32>
    %cst_282 = arith.constant dense<0xFF800000> : vector<64xf32>
    %374 = vector.multi_reduction <maximumf>, %373, %cst_282 [1] : vector<64x64xf32> to vector<64xf32>
    %375 = vector.shape_cast %374 : vector<64xf32> to vector<64x1xf32>
    %376 = vector.broadcast %375 : vector<64x1xf32> to vector<64x64xf32>
    %377 = arith.subf %373, %376 : vector<64x64xf32>
    %378 = math.exp %377 : vector<64x64xf32>
    %cst_283 = arith.constant dense<0.000000e+00> : vector<64xf32>
    %379 = vector.multi_reduction <add>, %378, %cst_283 [1] : vector<64x64xf32> to vector<64xf32>
    %380 = vector.shape_cast %379 : vector<64xf32> to vector<64x1xf32>
    %381 = tpu.reciprocal %380 {approx = true} : vector<64x1xf32> -> vector<64x1xf32>
    %382 = vector.broadcast %381 : vector<64x1xf32> to vector<64x64xf32>
    %383 = arith.mulf %378, %382 : vector<64x64xf32>
    %cst_284 = arith.constant dense<0.000000e+00> : vector<64x8xf32>
    %384 = tpu.matmul %383, %371, %cst_284 {dimension_numbers = #tpu.dot_dimension_numbers<[1], [0], [0], [1], [0, 0, 1, 1], [], []>} : vector<64x64xf32>, vector<64x8xf32>, vector<64x8xf32> -> vector<64x8xf32>
    %385 = arith.truncf %384 : vector<64x8xf32> to vector<64x8xbf16>
    %c1_285 = arith.constant 1 : index
    %c1_286 = arith.constant 1 : index
    %c0_287 = arith.constant 0 : index
    %c0_288 = arith.constant 0 : index
    %386 = vector.load %arg11[%c1_285, %c1_286, %c0_287, %c0_288] : memref<2x4x8x32xbf16, #tpu.memory_space<vmem>>, vector<1x1x8x32xbf16>
    %387 = vector.shape_cast %386 : vector<1x1x8x32xbf16> to vector<8x32xbf16>
    %cst_289 = arith.constant dense<0.000000e+00> : vector<64x32xf32>
    %388 = tpu.matmul %385, %387, %cst_289 {dimension_numbers = #tpu.dot_dimension_numbers<[1], [0], [0], [1], [0, 0, 1, 1], [], []>} : vector<64x8xbf16>, vector<8x32xbf16>, vector<64x32xf32> -> vector<64x32xf32>
    %389 = arith.addf %350, %388 : vector<64x32xf32>
    %c1_290 = arith.constant 1 : index
    %c2_291 = arith.constant 2 : index
    %c0_292 = arith.constant 0 : index
    %c0_293 = arith.constant 0 : index
    %390 = vector.load %arg5[%c1_290, %c2_291, %c0_292, %c0_293] : memref<2x4x32x8xbf16, #tpu.memory_space<vmem>>, vector<1x1x32x8xbf16>
    %391 = vector.shape_cast %390 : vector<1x1x32x8xbf16> to vector<32x8xbf16>
    %cst_294 = arith.constant dense<0.000000e+00> : vector<64x8xf32>
    %392 = tpu.matmul %310, %391, %cst_294 {dimension_numbers = #tpu.dot_dimension_numbers<[1], [0], [0], [1], [0, 0, 1, 1], [], []>} : vector<64x32xbf16>, vector<32x8xbf16>, vector<64x8xf32> -> vector<64x8xf32>
    %c1_295 = arith.constant 1 : index
    %c2_296 = arith.constant 2 : index
    %c0_297 = arith.constant 0 : index
    %c0_298 = arith.constant 0 : index
    %393 = vector.load %arg6[%c1_295, %c2_296, %c0_297, %c0_298] : memref<2x4x1x8xf32, #tpu.memory_space<vmem>>, vector<1x1x1x8xf32>
    %394 = vector.shape_cast %393 : vector<1x1x1x8xf32> to vector<1x8xf32>
    %395 = vector.broadcast %394 : vector<1x8xf32> to vector<64x8xf32>
    %396 = arith.addf %392, %395 : vector<64x8xf32>
    %c1_299 = arith.constant 1 : index
    %c2_300 = arith.constant 2 : index
    %c0_301 = arith.constant 0 : index
    %c0_302 = arith.constant 0 : index
    %397 = vector.load %arg7[%c1_299, %c2_300, %c0_301, %c0_302] : memref<2x4x32x8xbf16, #tpu.memory_space<vmem>>, vector<1x1x32x8xbf16>
    %398 = vector.shape_cast %397 : vector<1x1x32x8xbf16> to vector<32x8xbf16>
    %cst_303 = arith.constant dense<0.000000e+00> : vector<64x8xf32>
    %399 = tpu.matmul %310, %398, %cst_303 {dimension_numbers = #tpu.dot_dimension_numbers<[1], [0], [0], [1], [0, 0, 1, 1], [], []>} : vector<64x32xbf16>, vector<32x8xbf16>, vector<64x8xf32> -> vector<64x8xf32>
    %c1_304 = arith.constant 1 : index
    %c2_305 = arith.constant 2 : index
    %c0_306 = arith.constant 0 : index
    %c0_307 = arith.constant 0 : index
    %400 = vector.load %arg8[%c1_304, %c2_305, %c0_306, %c0_307] : memref<2x4x1x8xf32, #tpu.memory_space<vmem>>, vector<1x1x1x8xf32>
    %401 = vector.shape_cast %400 : vector<1x1x1x8xf32> to vector<1x8xf32>
    %402 = vector.broadcast %401 : vector<1x8xf32> to vector<64x8xf32>
    %403 = arith.addf %399, %402 : vector<64x8xf32>
    %c1_308 = arith.constant 1 : index
    %c2_309 = arith.constant 2 : index
    %c0_310 = arith.constant 0 : index
    %c0_311 = arith.constant 0 : index
    %404 = vector.load %arg9[%c1_308, %c2_309, %c0_310, %c0_311] : memref<2x4x32x8xbf16, #tpu.memory_space<vmem>>, vector<1x1x32x8xbf16>
    %405 = vector.shape_cast %404 : vector<1x1x32x8xbf16> to vector<32x8xbf16>
    %cst_312 = arith.constant dense<0.000000e+00> : vector<64x8xf32>
    %406 = tpu.matmul %310, %405, %cst_312 {dimension_numbers = #tpu.dot_dimension_numbers<[1], [0], [0], [1], [0, 0, 1, 1], [], []>} : vector<64x32xbf16>, vector<32x8xbf16>, vector<64x8xf32> -> vector<64x8xf32>
    %c1_313 = arith.constant 1 : index
    %c2_314 = arith.constant 2 : index
    %c0_315 = arith.constant 0 : index
    %c0_316 = arith.constant 0 : index
    %407 = vector.load %arg10[%c1_313, %c2_314, %c0_315, %c0_316] : memref<2x4x1x8xf32, #tpu.memory_space<vmem>>, vector<1x1x1x8xf32>
    %408 = vector.shape_cast %407 : vector<1x1x1x8xf32> to vector<1x8xf32>
    %409 = vector.broadcast %408 : vector<1x8xf32> to vector<64x8xf32>
    %410 = arith.addf %406, %409 : vector<64x8xf32>
    %cst_317 = arith.constant dense<0.000000e+00> : vector<64x64xf32>
    %411 = tpu.matmul %396, %403, %cst_317 {dimension_numbers = #tpu.dot_dimension_numbers<[1], [1], [0], [0], [0, 0, 1, 0], [], []>} : vector<64x8xf32>, vector<64x8xf32>, vector<64x64xf32> -> vector<64x64xf32>
    %412 = arith.addf %411, %2 : vector<64x64xf32>
    %cst_318 = arith.constant dense<0xFF800000> : vector<64xf32>
    %413 = vector.multi_reduction <maximumf>, %412, %cst_318 [1] : vector<64x64xf32> to vector<64xf32>
    %414 = vector.shape_cast %413 : vector<64xf32> to vector<64x1xf32>
    %415 = vector.broadcast %414 : vector<64x1xf32> to vector<64x64xf32>
    %416 = arith.subf %412, %415 : vector<64x64xf32>
    %417 = math.exp %416 : vector<64x64xf32>
    %cst_319 = arith.constant dense<0.000000e+00> : vector<64xf32>
    %418 = vector.multi_reduction <add>, %417, %cst_319 [1] : vector<64x64xf32> to vector<64xf32>
    %419 = vector.shape_cast %418 : vector<64xf32> to vector<64x1xf32>
    %420 = tpu.reciprocal %419 {approx = true} : vector<64x1xf32> -> vector<64x1xf32>
    %421 = vector.broadcast %420 : vector<64x1xf32> to vector<64x64xf32>
    %422 = arith.mulf %417, %421 : vector<64x64xf32>
    %cst_320 = arith.constant dense<0.000000e+00> : vector<64x8xf32>
    %423 = tpu.matmul %422, %410, %cst_320 {dimension_numbers = #tpu.dot_dimension_numbers<[1], [0], [0], [1], [0, 0, 1, 1], [], []>} : vector<64x64xf32>, vector<64x8xf32>, vector<64x8xf32> -> vector<64x8xf32>
    %424 = arith.truncf %423 : vector<64x8xf32> to vector<64x8xbf16>
    %c1_321 = arith.constant 1 : index
    %c2_322 = arith.constant 2 : index
    %c0_323 = arith.constant 0 : index
    %c0_324 = arith.constant 0 : index
    %425 = vector.load %arg11[%c1_321, %c2_322, %c0_323, %c0_324] : memref<2x4x8x32xbf16, #tpu.memory_space<vmem>>, vector<1x1x8x32xbf16>
    %426 = vector.shape_cast %425 : vector<1x1x8x32xbf16> to vector<8x32xbf16>
    %cst_325 = arith.constant dense<0.000000e+00> : vector<64x32xf32>
    %427 = tpu.matmul %424, %426, %cst_325 {dimension_numbers = #tpu.dot_dimension_numbers<[1], [0], [0], [1], [0, 0, 1, 1], [], []>} : vector<64x8xbf16>, vector<8x32xbf16>, vector<64x32xf32> -> vector<64x32xf32>
    %428 = arith.addf %389, %427 : vector<64x32xf32>
    %c1_326 = arith.constant 1 : index
    %c3_327 = arith.constant 3 : index
    %c0_328 = arith.constant 0 : index
    %c0_329 = arith.constant 0 : index
    %429 = vector.load %arg5[%c1_326, %c3_327, %c0_328, %c0_329] : memref<2x4x32x8xbf16, #tpu.memory_space<vmem>>, vector<1x1x32x8xbf16>
    %430 = vector.shape_cast %429 : vector<1x1x32x8xbf16> to vector<32x8xbf16>
    %cst_330 = arith.constant dense<0.000000e+00> : vector<64x8xf32>
    %431 = tpu.matmul %310, %430, %cst_330 {dimension_numbers = #tpu.dot_dimension_numbers<[1], [0], [0], [1], [0, 0, 1, 1], [], []>} : vector<64x32xbf16>, vector<32x8xbf16>, vector<64x8xf32> -> vector<64x8xf32>
    %c1_331 = arith.constant 1 : index
    %c3_332 = arith.constant 3 : index
    %c0_333 = arith.constant 0 : index
    %c0_334 = arith.constant 0 : index
    %432 = vector.load %arg6[%c1_331, %c3_332, %c0_333, %c0_334] : memref<2x4x1x8xf32, #tpu.memory_space<vmem>>, vector<1x1x1x8xf32>
    %433 = vector.shape_cast %432 : vector<1x1x1x8xf32> to vector<1x8xf32>
    %434 = vector.broadcast %433 : vector<1x8xf32> to vector<64x8xf32>
    %435 = arith.addf %431, %434 : vector<64x8xf32>
    %c1_335 = arith.constant 1 : index
    %c3_336 = arith.constant 3 : index
    %c0_337 = arith.constant 0 : index
    %c0_338 = arith.constant 0 : index
    %436 = vector.load %arg7[%c1_335, %c3_336, %c0_337, %c0_338] : memref<2x4x32x8xbf16, #tpu.memory_space<vmem>>, vector<1x1x32x8xbf16>
    %437 = vector.shape_cast %436 : vector<1x1x32x8xbf16> to vector<32x8xbf16>
    %cst_339 = arith.constant dense<0.000000e+00> : vector<64x8xf32>
    %438 = tpu.matmul %310, %437, %cst_339 {dimension_numbers = #tpu.dot_dimension_numbers<[1], [0], [0], [1], [0, 0, 1, 1], [], []>} : vector<64x32xbf16>, vector<32x8xbf16>, vector<64x8xf32> -> vector<64x8xf32>
    %c1_340 = arith.constant 1 : index
    %c3_341 = arith.constant 3 : index
    %c0_342 = arith.constant 0 : index
    %c0_343 = arith.constant 0 : index
    %439 = vector.load %arg8[%c1_340, %c3_341, %c0_342, %c0_343] : memref<2x4x1x8xf32, #tpu.memory_space<vmem>>, vector<1x1x1x8xf32>
    %440 = vector.shape_cast %439 : vector<1x1x1x8xf32> to vector<1x8xf32>
    %441 = vector.broadcast %440 : vector<1x8xf32> to vector<64x8xf32>
    %442 = arith.addf %438, %441 : vector<64x8xf32>
    %c1_344 = arith.constant 1 : index
    %c3_345 = arith.constant 3 : index
    %c0_346 = arith.constant 0 : index
    %c0_347 = arith.constant 0 : index
    %443 = vector.load %arg9[%c1_344, %c3_345, %c0_346, %c0_347] : memref<2x4x32x8xbf16, #tpu.memory_space<vmem>>, vector<1x1x32x8xbf16>
    %444 = vector.shape_cast %443 : vector<1x1x32x8xbf16> to vector<32x8xbf16>
    %cst_348 = arith.constant dense<0.000000e+00> : vector<64x8xf32>
    %445 = tpu.matmul %310, %444, %cst_348 {dimension_numbers = #tpu.dot_dimension_numbers<[1], [0], [0], [1], [0, 0, 1, 1], [], []>} : vector<64x32xbf16>, vector<32x8xbf16>, vector<64x8xf32> -> vector<64x8xf32>
    %c1_349 = arith.constant 1 : index
    %c3_350 = arith.constant 3 : index
    %c0_351 = arith.constant 0 : index
    %c0_352 = arith.constant 0 : index
    %446 = vector.load %arg10[%c1_349, %c3_350, %c0_351, %c0_352] : memref<2x4x1x8xf32, #tpu.memory_space<vmem>>, vector<1x1x1x8xf32>
    %447 = vector.shape_cast %446 : vector<1x1x1x8xf32> to vector<1x8xf32>
    %448 = vector.broadcast %447 : vector<1x8xf32> to vector<64x8xf32>
    %449 = arith.addf %445, %448 : vector<64x8xf32>
    %cst_353 = arith.constant dense<0.000000e+00> : vector<64x64xf32>
    %450 = tpu.matmul %435, %442, %cst_353 {dimension_numbers = #tpu.dot_dimension_numbers<[1], [1], [0], [0], [0, 0, 1, 0], [], []>} : vector<64x8xf32>, vector<64x8xf32>, vector<64x64xf32> -> vector<64x64xf32>
    %451 = arith.addf %450, %2 : vector<64x64xf32>
    %cst_354 = arith.constant dense<0xFF800000> : vector<64xf32>
    %452 = vector.multi_reduction <maximumf>, %451, %cst_354 [1] : vector<64x64xf32> to vector<64xf32>
    %453 = vector.shape_cast %452 : vector<64xf32> to vector<64x1xf32>
    %454 = vector.broadcast %453 : vector<64x1xf32> to vector<64x64xf32>
    %455 = arith.subf %451, %454 : vector<64x64xf32>
    %456 = math.exp %455 : vector<64x64xf32>
    %cst_355 = arith.constant dense<0.000000e+00> : vector<64xf32>
    %457 = vector.multi_reduction <add>, %456, %cst_355 [1] : vector<64x64xf32> to vector<64xf32>
    %458 = vector.shape_cast %457 : vector<64xf32> to vector<64x1xf32>
    %459 = tpu.reciprocal %458 {approx = true} : vector<64x1xf32> -> vector<64x1xf32>
    %460 = vector.broadcast %459 : vector<64x1xf32> to vector<64x64xf32>
    %461 = arith.mulf %456, %460 : vector<64x64xf32>
    %cst_356 = arith.constant dense<0.000000e+00> : vector<64x8xf32>
    %462 = tpu.matmul %461, %449, %cst_356 {dimension_numbers = #tpu.dot_dimension_numbers<[1], [0], [0], [1], [0, 0, 1, 1], [], []>} : vector<64x64xf32>, vector<64x8xf32>, vector<64x8xf32> -> vector<64x8xf32>
    %463 = arith.truncf %462 : vector<64x8xf32> to vector<64x8xbf16>
    %c1_357 = arith.constant 1 : index
    %c3_358 = arith.constant 3 : index
    %c0_359 = arith.constant 0 : index
    %c0_360 = arith.constant 0 : index
    %464 = vector.load %arg11[%c1_357, %c3_358, %c0_359, %c0_360] : memref<2x4x8x32xbf16, #tpu.memory_space<vmem>>, vector<1x1x8x32xbf16>
    %465 = vector.shape_cast %464 : vector<1x1x8x32xbf16> to vector<8x32xbf16>
    %cst_361 = arith.constant dense<0.000000e+00> : vector<64x32xf32>
    %466 = tpu.matmul %463, %465, %cst_361 {dimension_numbers = #tpu.dot_dimension_numbers<[1], [0], [0], [1], [0, 0, 1, 1], [], []>} : vector<64x8xbf16>, vector<8x32xbf16>, vector<64x32xf32> -> vector<64x32xf32>
    %467 = arith.addf %428, %466 : vector<64x32xf32>
    %c1_362 = arith.constant 1 : index
    %c0_363 = arith.constant 0 : index
    %c0_364 = arith.constant 0 : index
    %468 = vector.load %arg13[%c1_362, %c0_363, %c0_364] : memref<2x1x32xf32, #tpu.memory_space<vmem>>, vector<1x1x32xf32>
    %469 = vector.shape_cast %468 : vector<1x1x32xf32> to vector<1x32xf32>
    %c1_365 = arith.constant 1 : index
    %c0_366 = arith.constant 0 : index
    %c0_367 = arith.constant 0 : index
    %470 = vector.load %arg12[%c1_365, %c0_366, %c0_367] : memref<2x1x32xf32, #tpu.memory_space<vmem>>, vector<1x1x32xf32>
    %471 = vector.shape_cast %470 : vector<1x1x32xf32> to vector<1x32xf32>
    %472 = vector.broadcast %471 : vector<1x32xf32> to vector<64x32xf32>
    %473 = arith.addf %467, %472 : vector<64x32xf32>
    %474 = vector.broadcast %469 : vector<1x32xf32> to vector<64x32xf32>
    %475 = arith.mulf %474, %473 : vector<64x32xf32>
    %476 = arith.addf %283, %475 : vector<64x32xf32>
    %c1_368 = arith.constant 1 : index
    %c0_369 = arith.constant 0 : index
    %c0_370 = arith.constant 0 : index
    %477 = vector.load %arg14[%c1_368, %c0_369, %c0_370] : memref<2x1x32xf32, #tpu.memory_space<vmem>>, vector<1x1x32xf32>
    %478 = vector.shape_cast %477 : vector<1x1x32xf32> to vector<1x32xf32>
    %c1_371 = arith.constant 1 : index
    %c0_372 = arith.constant 0 : index
    %c0_373 = arith.constant 0 : index
    %479 = vector.load %arg15[%c1_371, %c0_372, %c0_373] : memref<2x1x32xf32, #tpu.memory_space<vmem>>, vector<1x1x32xf32>
    %480 = vector.shape_cast %479 : vector<1x1x32xf32> to vector<1x32xf32>
    %cst_374 = arith.constant dense<0.000000e+00> : vector<64xf32>
    %481 = vector.multi_reduction <add>, %476, %cst_374 [1] : vector<64x32xf32> to vector<64xf32>
    %482 = vector.shape_cast %481 : vector<64xf32> to vector<64x1xf32>
    %cst_375 = arith.constant 3.200000e+01 : f32
    %483 = vector.broadcast %cst_375 : f32 to vector<64x1xf32>
    %484 = arith.divf %482, %483 : vector<64x1xf32>
    %485 = vector.broadcast %484 : vector<64x1xf32> to vector<64x32xf32>
    %486 = arith.subf %476, %485 : vector<64x32xf32>
    %487 = arith.mulf %486, %486 : vector<64x32xf32>
    %cst_376 = arith.constant dense<0.000000e+00> : vector<64xf32>
    %488 = vector.multi_reduction <add>, %487, %cst_376 [1] : vector<64x32xf32> to vector<64xf32>
    %489 = vector.shape_cast %488 : vector<64xf32> to vector<64x1xf32>
    %cst_377 = arith.constant 3.200000e+01 : f32
    %490 = vector.broadcast %cst_377 : f32 to vector<64x1xf32>
    %491 = arith.divf %489, %490 : vector<64x1xf32>
    %492 = vector.broadcast %484 : vector<64x1xf32> to vector<64x32xf32>
    %493 = arith.subf %476, %492 : vector<64x32xf32>
    %cst_378 = arith.constant 9.99999974E-6 : f32
    %494 = vector.broadcast %cst_378 : f32 to vector<64x1xf32>
    %495 = arith.addf %491, %494 : vector<64x1xf32>
    %496 = math.rsqrt %495 : vector<64x1xf32>
    %497 = vector.broadcast %496 : vector<64x1xf32> to vector<64x32xf32>
    %498 = arith.mulf %493, %497 : vector<64x32xf32>
    %499 = vector.broadcast %478 : vector<1x32xf32> to vector<64x32xf32>
    %500 = arith.mulf %498, %499 : vector<64x32xf32>
    %501 = vector.broadcast %480 : vector<1x32xf32> to vector<64x32xf32>
    %502 = arith.addf %500, %501 : vector<64x32xf32>
    %503 = arith.truncf %502 : vector<64x32xf32> to vector<64x32xbf16>
    %c1_379 = arith.constant 1 : index
    %c0_380 = arith.constant 0 : index
    %c0_381 = arith.constant 0 : index
    %504 = vector.load %arg16[%c1_379, %c0_380, %c0_381] : memref<2x32x128xbf16, #tpu.memory_space<vmem>>, vector<1x32x128xbf16>
    %505 = vector.shape_cast %504 : vector<1x32x128xbf16> to vector<32x128xbf16>
    %cst_382 = arith.constant dense<0.000000e+00> : vector<64x128xf32>
    %506 = tpu.matmul %503, %505, %cst_382 {dimension_numbers = #tpu.dot_dimension_numbers<[1], [0], [0], [1], [0, 0, 1, 1], [], []>} : vector<64x32xbf16>, vector<32x128xbf16>, vector<64x128xf32> -> vector<64x128xf32>
    %c1_383 = arith.constant 1 : index
    %c0_384 = arith.constant 0 : index
    %c0_385 = arith.constant 0 : index
    %507 = vector.load %arg17[%c1_383, %c0_384, %c0_385] : memref<2x1x128xf32, #tpu.memory_space<vmem>>, vector<1x1x128xf32>
    %508 = vector.shape_cast %507 : vector<1x1x128xf32> to vector<1x128xf32>
    %509 = vector.broadcast %508 : vector<1x128xf32> to vector<64x128xf32>
    %510 = arith.addf %506, %509 : vector<64x128xf32>
    %cst_386 = arith.constant 5.000000e-01 : f32
    %511 = vector.broadcast %cst_386 : f32 to vector<64x128xf32>
    %512 = arith.mulf %511, %510 : vector<64x128xf32>
    %cst_387 = arith.constant 0.707106769 : f32
    %513 = vector.broadcast %cst_387 : f32 to vector<64x128xf32>
    %514 = arith.mulf %510, %513 : vector<64x128xf32>
    %cst_388 = arith.constant 0.000000e+00 : f32
    %515 = vector.broadcast %cst_388 : f32 to vector<64x128xf32>
    %516 = arith.cmpf oge, %514, %515 : vector<64x128xf32>
    %cst_389 = arith.constant 1.000000e+00 : f32
    %cst_390 = arith.constant -1.000000e+00 : f32
    %517 = vector.broadcast %cst_389 : f32 to vector<64x128xf32>
    %518 = vector.broadcast %cst_390 : f32 to vector<64x128xf32>
    %519 = arith.select %516, %517, %518 : vector<64x128xi1>, vector<64x128xf32>
    %520 = math.absf %514 : vector<64x128xf32>
    %cst_391 = arith.constant 0.327591091 : f32
    %521 = vector.broadcast %cst_391 : f32 to vector<64x128xf32>
    %522 = arith.mulf %521, %520 : vector<64x128xf32>
    %cst_392 = arith.constant 1.000000e+00 : f32
    %523 = vector.broadcast %cst_392 : f32 to vector<64x128xf32>
    %524 = arith.addf %523, %522 : vector<64x128xf32>
    %cst_393 = arith.constant 1.000000e+00 : f32
    %525 = vector.broadcast %cst_393 : f32 to vector<64x128xf32>
    %526 = arith.divf %525, %524 : vector<64x128xf32>
    %cst_394 = arith.constant 1.06140542 : f32
    %527 = vector.broadcast %cst_394 : f32 to vector<64x128xf32>
    %528 = arith.mulf %527, %526 : vector<64x128xf32>
    %cst_395 = arith.constant -1.45315206 : f32
    %529 = vector.broadcast %cst_395 : f32 to vector<64x128xf32>
    %530 = arith.addf %528, %529 : vector<64x128xf32>
    %531 = arith.mulf %530, %526 : vector<64x128xf32>
    %cst_396 = arith.constant 1.42141378 : f32
    %532 = vector.broadcast %cst_396 : f32 to vector<64x128xf32>
    %533 = arith.addf %531, %532 : vector<64x128xf32>
    %534 = arith.mulf %533, %526 : vector<64x128xf32>
    %cst_397 = arith.constant -0.284496725 : f32
    %535 = vector.broadcast %cst_397 : f32 to vector<64x128xf32>
    %536 = arith.addf %534, %535 : vector<64x128xf32>
    %537 = arith.mulf %536, %526 : vector<64x128xf32>
    %cst_398 = arith.constant 0.254829586 : f32
    %538 = vector.broadcast %cst_398 : f32 to vector<64x128xf32>
    %539 = arith.addf %537, %538 : vector<64x128xf32>
    %540 = arith.mulf %539, %526 : vector<64x128xf32>
    %cst_399 = arith.constant 0.000000e+00 : f32
    %541 = vector.broadcast %cst_399 : f32 to vector<64x128xf32>
    %542 = arith.subf %541, %520 : vector<64x128xf32>
    %543 = arith.mulf %542, %520 : vector<64x128xf32>
    %544 = math.exp %543 : vector<64x128xf32>
    %545 = arith.mulf %540, %544 : vector<64x128xf32>
    %cst_400 = arith.constant 1.000000e+00 : f32
    %546 = vector.broadcast %cst_400 : f32 to vector<64x128xf32>
    %547 = arith.subf %546, %545 : vector<64x128xf32>
    %548 = arith.mulf %519, %547 : vector<64x128xf32>
    %cst_401 = arith.constant 1.000000e+00 : f32
    %549 = vector.broadcast %cst_401 : f32 to vector<64x128xf32>
    %550 = arith.addf %549, %548 : vector<64x128xf32>
    %551 = arith.mulf %512, %550 : vector<64x128xf32>
    %552 = arith.truncf %551 : vector<64x128xf32> to vector<64x128xbf16>
    %c1_402 = arith.constant 1 : index
    %c0_403 = arith.constant 0 : index
    %c0_404 = arith.constant 0 : index
    %553 = vector.load %arg18[%c1_402, %c0_403, %c0_404] : memref<2x128x32xbf16, #tpu.memory_space<vmem>>, vector<1x128x32xbf16>
    %554 = vector.shape_cast %553 : vector<1x128x32xbf16> to vector<128x32xbf16>
    %cst_405 = arith.constant dense<0.000000e+00> : vector<64x32xf32>
    %555 = tpu.matmul %552, %554, %cst_405 {dimension_numbers = #tpu.dot_dimension_numbers<[1], [0], [0], [1], [0, 0, 1, 1], [], []>} : vector<64x128xbf16>, vector<128x32xbf16>, vector<64x32xf32> -> vector<64x32xf32>
    %c1_406 = arith.constant 1 : index
    %c0_407 = arith.constant 0 : index
    %c0_408 = arith.constant 0 : index
    %556 = vector.load %arg19[%c1_406, %c0_407, %c0_408] : memref<2x1x32xf32, #tpu.memory_space<vmem>>, vector<1x1x32xf32>
    %557 = vector.shape_cast %556 : vector<1x1x32xf32> to vector<1x32xf32>
    %558 = vector.broadcast %557 : vector<1x32xf32> to vector<64x32xf32>
    %559 = arith.addf %555, %558 : vector<64x32xf32>
    %c1_409 = arith.constant 1 : index
    %c0_410 = arith.constant 0 : index
    %c0_411 = arith.constant 0 : index
    %560 = vector.load %arg20[%c1_409, %c0_410, %c0_411] : memref<2x1x32xf32, #tpu.memory_space<vmem>>, vector<1x1x32xf32>
    %561 = vector.shape_cast %560 : vector<1x1x32xf32> to vector<1x32xf32>
    %562 = vector.broadcast %561 : vector<1x32xf32> to vector<64x32xf32>
    %563 = arith.mulf %562, %559 : vector<64x32xf32>
    %564 = arith.addf %476, %563 : vector<64x32xf32>
    %565 = vector.shape_cast %564 : vector<64x32xf32> to vector<2x32x32xf32>
    %c0_412 = arith.constant 0 : index
    %c0_413 = arith.constant 0 : index
    %c0_414 = arith.constant 0 : index
    %566 = vector.load %arg21[%c0_412, %c0_413, %c0_414] : memref<2x32x32xf32, #tpu.memory_space<vmem>>, vector<2x32x32xf32>
    tpu.vector_store %arg21[%c0_412, %c0_413, %c0_414], %565 {strides = array<i32>} : memref<2x32x32xf32, #tpu.memory_space<vmem>>, vector<2x32x32xf32>,
    return
  }
  func.func @transform_0(%arg0: i32) -> (i32, i32, i32) {
    %c0_i32 = arith.constant 0 : i32
    %c0_i32_0 = arith.constant 0 : i32
    %c0_i32_1 = arith.constant 0 : i32
    return %arg0, %c0_i32, %c0_i32_0 : i32, i32, i32
  }
  func.func @transform_1(%arg0: i32) -> (i32, i32) {
    %c0_i32 = arith.constant 0 : i32
    %c0_i32_0 = arith.constant 0 : i32
    %c0_i32_1 = arith.constant 0 : i32
    return %c0_i32, %c0_i32_0 : i32, i32
  }
  func.func @transform_2(%arg0: i32) -> (i32, i32, i32) {
    %c0_i32 = arith.constant 0 : i32
    %c0_i32_0 = arith.constant 0 : i32
    %c0_i32_1 = arith.constant 0 : i32
    %c0_i32_2 = arith.constant 0 : i32
    return %c0_i32, %c0_i32_0, %c0_i32_1 : i32, i32, i32
  }
  func.func @transform_3(%arg0: i32) -> (i32, i32, i32) {
    %c0_i32 = arith.constant 0 : i32
    %c0_i32_0 = arith.constant 0 : i32
    %c0_i32_1 = arith.constant 0 : i32
    %c0_i32_2 = arith.constant 0 : i32
    return %c0_i32, %c0_i32_0, %c0_i32_1 : i32, i32, i32
  }
  func.func @transform_4(%arg0: i32) -> (i32, i32, i32, i32) {
    %c0_i32 = arith.constant 0 : i32
    %c0_i32_0 = arith.constant 0 : i32
    %c0_i32_1 = arith.constant 0 : i32
    %c0_i32_2 = arith.constant 0 : i32
    %c0_i32_3 = arith.constant 0 : i32
    return %c0_i32, %c0_i32_0, %c0_i32_1, %c0_i32_2 : i32, i32, i32, i32
  }
  func.func @transform_5(%arg0: i32) -> (i32, i32, i32, i32) {
    %c0_i32 = arith.constant 0 : i32
    %c0_i32_0 = arith.constant 0 : i32
    %c0_i32_1 = arith.constant 0 : i32
    %c0_i32_2 = arith.constant 0 : i32
    %c0_i32_3 = arith.constant 0 : i32
    return %c0_i32, %c0_i32_0, %c0_i32_1, %c0_i32_2 : i32, i32, i32, i32
  }
  func.func @transform_6(%arg0: i32) -> (i32, i32, i32, i32) {
    %c0_i32 = arith.constant 0 : i32
    %c0_i32_0 = arith.constant 0 : i32
    %c0_i32_1 = arith.constant 0 : i32
    %c0_i32_2 = arith.constant 0 : i32
    %c0_i32_3 = arith.constant 0 : i32
    return %c0_i32, %c0_i32_0, %c0_i32_1, %c0_i32_2 : i32, i32, i32, i32
  }
  func.func @transform_7(%arg0: i32) -> (i32, i32, i32, i32) {
    %c0_i32 = arith.constant 0 : i32
    %c0_i32_0 = arith.constant 0 : i32
    %c0_i32_1 = arith.constant 0 : i32
    %c0_i32_2 = arith.constant 0 : i32
    %c0_i32_3 = arith.constant 0 : i32
    return %c0_i32, %c0_i32_0, %c0_i32_1, %c0_i32_2 : i32, i32, i32, i32
  }
  func.func @transform_8(%arg0: i32) -> (i32, i32, i32, i32) {
    %c0_i32 = arith.constant 0 : i32
    %c0_i32_0 = arith.constant 0 : i32
    %c0_i32_1 = arith.constant 0 : i32
    %c0_i32_2 = arith.constant 0 : i32
    %c0_i32_3 = arith.constant 0 : i32
    return %c0_i32, %c0_i32_0, %c0_i32_1, %c0_i32_2 : i32, i32, i32, i32
  }
  func.func @transform_9(%arg0: i32) -> (i32, i32, i32, i32) {
    %c0_i32 = arith.constant 0 : i32
    %c0_i32_0 = arith.constant 0 : i32
    %c0_i32_1 = arith.constant 0 : i32
    %c0_i32_2 = arith.constant 0 : i32
    %c0_i32_3 = arith.constant 0 : i32
    return %c0_i32, %c0_i32_0, %c0_i32_1, %c0_i32_2 : i32, i32, i32, i32
  }
  func.func @transform_10(%arg0: i32) -> (i32, i32, i32, i32) {
    %c0_i32 = arith.constant 0 : i32
    %c0_i32_0 = arith.constant 0 : i32
    %c0_i32_1 = arith.constant 0 : i32
    %c0_i32_2 = arith.constant 0 : i32
    %c0_i32_3 = arith.constant 0 : i32
    return %c0_i32, %c0_i32_0, %c0_i32_1, %c0_i32_2 : i32, i32, i32, i32
  }
  func.func @transform_11(%arg0: i32) -> (i32, i32, i32) {
    %c0_i32 = arith.constant 0 : i32
    %c0_i32_0 = arith.constant 0 : i32
    %c0_i32_1 = arith.constant 0 : i32
    %c0_i32_2 = arith.constant 0 : i32
    return %c0_i32, %c0_i32_0, %c0_i32_1 : i32, i32, i32
  }
  func.func @transform_12(%arg0: i32) -> (i32, i32, i32) {
    %c0_i32 = arith.constant 0 : i32
    %c0_i32_0 = arith.constant 0 : i32
    %c0_i32_1 = arith.constant 0 : i32
    %c0_i32_2 = arith.constant 0 : i32
    return %c0_i32, %c0_i32_0, %c0_i32_1 : i32, i32, i32
  }
  func.func @transform_13(%arg0: i32) -> (i32, i32, i32) {
    %c0_i32 = arith.constant 0 : i32
    %c0_i32_0 = arith.constant 0 : i32
    %c0_i32_1 = arith.constant 0 : i32
    %c0_i32_2 = arith.constant 0 : i32
    return %c0_i32, %c0_i32_0, %c0_i32_1 : i32, i32, i32
  }
  func.func @transform_14(%arg0: i32) -> (i32, i32, i32) {
    %c0_i32 = arith.constant 0 : i32
    %c0_i32_0 = arith.constant 0 : i32
    %c0_i32_1 = arith.constant 0 : i32
    %c0_i32_2 = arith.constant 0 : i32
    return %c0_i32, %c0_i32_0, %c0_i32_1 : i32, i32, i32
  }
  func.func @transform_15(%arg0: i32) -> (i32, i32, i32) {
    %c0_i32 = arith.constant 0 : i32
    %c0_i32_0 = arith.constant 0 : i32
    %c0_i32_1 = arith.constant 0 : i32
    %c0_i32_2 = arith.constant 0 : i32
    return %c0_i32, %c0_i32_0, %c0_i32_1 : i32, i32, i32
  }
  func.func @transform_16(%arg0: i32) -> (i32, i32, i32) {
    %c0_i32 = arith.constant 0 : i32
    %c0_i32_0 = arith.constant 0 : i32
    %c0_i32_1 = arith.constant 0 : i32
    %c0_i32_2 = arith.constant 0 : i32
    return %c0_i32, %c0_i32_0, %c0_i32_1 : i32, i32, i32
  }
  func.func @transform_17(%arg0: i32) -> (i32, i32, i32) {
    %c0_i32 = arith.constant 0 : i32
    %c0_i32_0 = arith.constant 0 : i32
    %c0_i32_1 = arith.constant 0 : i32
    %c0_i32_2 = arith.constant 0 : i32
    return %c0_i32, %c0_i32_0, %c0_i32_1 : i32, i32, i32
  }
  func.func @transform_18(%arg0: i32) -> (i32, i32, i32) {
    %c0_i32 = arith.constant 0 : i32
    %c0_i32_0 = arith.constant 0 : i32
    %c0_i32_1 = arith.constant 0 : i32
    %c0_i32_2 = arith.constant 0 : i32
    return %c0_i32, %c0_i32_0, %c0_i32_1 : i32, i32, i32
  }
  func.func @transform_19(%arg0: i32) -> (i32, i32, i32) {
    %c0_i32 = arith.constant 0 : i32
    %c0_i32_0 = arith.constant 0 : i32
    %c0_i32_1 = arith.constant 0 : i32
    %c0_i32_2 = arith.constant 0 : i32
    return %c0_i32, %c0_i32_0, %c0_i32_1 : i32, i32, i32
  }
  func.func @transform_20(%arg0: i32) -> (i32, i32, i32) {
    %c0_i32 = arith.constant 0 : i32
    %c0_i32_0 = arith.constant 0 : i32
    %c0_i32_1 = arith.constant 0 : i32
    return %arg0, %c0_i32, %c0_i32_0 : i32, i32, i32
  }
}

</mosaic_0001>

<bundles_post_ra>
// kernel: tpu_custom_call.1
= control target key start
LH: loop header
LB: loop body
LE: loop exit
PB: predicated region body
PF: predicated region fallthrough
CT: control target
= control target key end

     0   :  { %s12892_s0 = inlined_call_operand.vmem [shape: f32[2,32,32], index: 0, kind: input, shape index: {}]   ;;  %s12893_s1 = inlined_call_operand.vmem [shape: f32[64,64], index: 1, kind: input, shape index: {}]   ;;  %s12894_s2 = inlined_call_operand.vmem [shape: f32[2,1,32], index: 2, kind: input, shape index: {}]   ;;  %s12895_s3 = inlined_call_operand.vmem [shape: f32[2,1,32], index: 3, kind: input, shape index: {}]   ;;  %s12896_s4 = inlined_call_operand.vmem [shape: bf16[2,4,32,8], index: 4, kind: input, shape index: {}]   ;;  %s12897_s5 = inlined_call_operand.vmem [shape: f32[2,4,1,8], index: 5, kind: input, shape index: {}]   ;;  %s12898_s6 = inlined_call_operand.vmem [shape: bf16[2,4,32,8], index: 6, kind: input, shape index: {}]   ;;  %s12899_s7 = inlined_call_operand.vmem [shape: f32[2,4,1,8], index: 7, kind: input, shape index: {}]   ;;  %s12900_s8 = inlined_call_operand.vmem [shape: bf16[2,4,32,8], index: 8, kind: input, shape index: {}]   ;;  %s12901_s9 = inlined_call_operand.vmem [shape: f32[2,4,1,8], index: 9, kind: input, shape index: {}]   ;;  %s12902_s10 = inlined_call_operand.vmem [shape: bf16[2,4,8,32], index: 10, kind: input, shape index: {}]   ;;  %s12903_s11 = inlined_call_operand.vmem [shape: f32[2,1,32], index: 11, kind: input, shape index: {}]   ;;  %s12904_s12 = inlined_call_operand.vmem [shape: f32[2,1,32], index: 12, kind: input, shape index: {}]   ;;  %s12905_s13 = inlined_call_operand.vmem [shape: f32[2,1,32], index: 13, kind: input, shape index: {}]   ;;  %s12906_s14 = inlined_call_operand.vmem [shape: f32[2,1,32], index: 14, kind: input, shape index: {}]   ;;  %s12907_s15 = inlined_call_operand.vmem [shape: bf16[2,32,128], index: 15, kind: input, shape index: {}]   ;;  %s12908_s16 = inlined_call_operand.vmem [shape: f32[2,1,128], index: 16, kind: input, shape index: {}]   ;;  %s12909_s17 = inlined_call_operand.vmem [shape: bf16[2,128,32], index: 17, kind: input, shape index: {}]   ;;  %s12910_s18 = inlined_call_operand.vmem [shape: f32[2,1,32], index: 18, kind: input, shape index: {}]   ;;  %s12911_s19 = inlined_call_operand.vmem [shape: f32[2,1,32], index: 19, kind: input, shape index: {}]   ;;  %s12912_s20 = inlined_call_operand.hbm [shape: f32[2,32,32], index: 20, kind: output, shape index: {}]  }
   0x1   :  { %12921 = sst [smem:[#allocation6_spill]] %s12892_s0 }
   0x2   :  { %12922 = sst [smem:[#allocation7_spill]] %s12893_s1 }
   0x3   :  { %12923 = sst [smem:[#allocation8_spill]] %s12894_s2 }
   0x4   :  { %12924 = sst [smem:[#allocation9_spill]] %s12895_s3 }
   0x5   :  { %12925 = sst [smem:[#allocation10_spill]] %s12896_s4 }
   0x6   :  { %s12926_s23 = sld [smem:[#allocation6_spill]]  ;;  %vm85_vm0 = vcmask 261120  }
   0xc   :  { %v67_v0 = vld [vmem:[%s12926_s23] sm:$0xff]  ;;  %v69_v1 = vld [vmem:[%s12926_s23 + $0x10] sm:$0xff]  ;;  %v68_v2 = vld [vmem:[%s12926_s23 + $0x8] sm:$0xff] }
   0xd   :  { %v86_v3 = vsel %vm85_vm0, %v67_v0, 0.0  ;;  %v92_v4 = vsel %vm85_vm0, %v69_v1, 0.0  ;;  %v70_v5 = vld [vmem:[%s12926_s23 + $0x18] sm:$0xff]  ;;  %v71_v6 = vld [vmem:[%s12926_s23 + $0x20] sm:$0xff]  ;;  %v72_v7 = vld [vmem:[%s12926_s23 + $0x28] sm:$0xff]  ;;  %v89_v8 = vsel %vm85_vm0, %v68_v2, 0.0 }
   0xe   :  { %87 = vadd.xlane.f32.xlu0 %v86_v3  ;;  %93 = vadd.xlane.f32.xlu1 %v92_v4  ;;  %v95_v9 = vsel %vm85_vm0, %v70_v5, 0.0  ;;  %v98_v10 = vsel %vm85_vm0, %v71_v6, 0.0  ;;  %v101_v11 = vsel %vm85_vm0, %v72_v7, 0.0  ;;  %v73_v12 = vld [vmem:[%s12926_s23 + $0x30] sm:$0xff]  ;;  %v74_v13 = vld [vmem:[%s12926_s23 + $0x38] sm:$0xff] }
   0xf   :  { %v104_v14 = vsel %vm85_vm0, %v73_v12, 0.0  ;;  %v107_v15 = vsel %vm85_vm0, %v74_v13, 0.0 }
  0x12   :  { %90 = vadd.xlane.f32.xlu0 %v89_v8  ;;  %96 = vadd.xlane.f32.xlu1 %v95_v9 }
  0x16   :  { %99 = vadd.xlane.f32.xlu0 %v98_v10  ;;  %102 = vadd.xlane.f32.xlu1 %v101_v11 }
  0x1a   :  { %105 = vadd.xlane.f32.xlu0 %v104_v14  ;;  %108 = vadd.xlane.f32.xlu1 %v107_v15 }
  0x1b   :  { %25 = vsyncpa [#allocation3], 0  ;;  %s12927_s25 = sld [smem:[#allocation10_spill]]  ;;  %v9890_v57 = vld [vmem:[%s12900_s8] sm:$0xff]   ;;  %v9892_v59 = vld [vmem:[%s12900_s8 + $0x8] sm:$0xff]   ;;  %s12928_s22 = sld [smem:[#allocation8_spill]] }
  0x1c   :  { %8645 = vmatprep.subr.bf16.mxu0 %v9890_v57  ;;  %v10593_v60 = vld [vmem:[%s12898_s6] sm:$0xff]   ;;  %s12929_s3 = sld [smem:[#allocation9_spill]]  ;;  %vm499_vm1 = vcmask 64512   ;;  %s12932_s4 = sld [smem:[#allocation7_spill]]  ;;  %vm653_vm3 = vcmask 523264   ;;  %vm1534_vm4 = vcmask 1043456  }
  0x1d   :  { %8646 = vmatpush3.bf16.msra.mxu0 %v9890_v57  ;;  %vm10668_vm2 = vmpackc.low %vm499_vm1, %vm499_vm1 }
  0x1e   :  { %8647 = vmatprep.subr.bf16.mxu0 %v9892_v59 }
  0x21   :  { %v9889_v56 = vld [vmem:[%s12927_s25] sm:$0xff]   ;;  %v9891_v58 = vld [vmem:[%s12927_s25 + $0x8] sm:$0xff]   ;;  %8648 = vmatpush3.bf16.msra.mxu0 %v9892_v59 }
  0x22   :  { %8621 = vmatprep.subr.bf16.mxu1 %v9889_v56 }
  0x23   :  { %8622 = vmatpush3.bf16.msra.mxu1 %v9889_v56 }
  0x24   :  { %8623 = vmatprep.subr.bf16.mxu1 %v9891_v58 }
  0x27   :  { %8624 = vmatpush3.bf16.msra.mxu1 %v9891_v58 }
  0x28   :  { %8633 = vmatprep.subr.bf16.mxu1 %v10593_v60 }
  0x9b   :  { %v88_v16 = vpop.xlane.xlu0 %87  ;;  %v94_v17 = vpop.xlane.xlu1 %93 }
  0x9c   :  { %v111_v18 = vmul.f32 0.03125, %v88_v16  ;;  %v113_v19 = vmul.f32 0.03125, %v94_v17 }
  0x9e   :  { %v10538_v20 = vsub.f32 %v67_v0, %v111_v18  ;;  %v10540_v21 = vsub.f32 %v69_v1, %v113_v19 }
  0x9f   :  { %v91_v22 = vpop.xlane.xlu0 %90  ;;  %v97_v23 = vpop.xlane.xlu1 %96 }
  0xa0   :  { %v112_v24 = vmul.f32 0.03125, %v91_v22  ;;  %v114_v25 = vmul.f32 0.03125, %v97_v23  ;;  %v127_v26 = vmul.f32 %v10538_v20, %v10538_v20  ;;  %v129_v27 = vmul.f32 %v10540_v21, %v10540_v21  ;;  %v7566_v23 = vld [vmem:[%s12928_s22] ss:$0 sm:$0xff] }
  0xa2   :  { %v10546_v28 = vsub.f32 %v68_v2, %v112_v24  ;;  %v10548_v29 = vsub.f32 %v70_v5, %v114_v25  ;;  %v135_v30 = vsel %vm85_vm0, %v127_v26, 0.0  ;;  %v141_v33 = vsel %vm85_vm0, %v129_v27, 0.0 }
  0xa3   :  { %136 = vadd.xlane.f32.xlu0 %v135_v30  ;;  %v100_v31 = vpop.xlane.xlu0 %99  ;;  %v103_v32 = vpop.xlane.xlu1 %102 }
  0xa4   :  { %v115_v34 = vmul.f32 0.03125, %v100_v31  ;;  %v116_v35 = vmul.f32 0.03125, %v103_v32  ;;  %v128_v36 = vmul.f32 %v10546_v28, %v10546_v28  ;;  %v130_v37 = vmul.f32 %v10548_v29, %v10548_v29  ;;  %v7567_v32 = vld [vmem:[%s12929_s3] ss:$0 sm:$0xff] }
  0xa6   :  { %v10556_v38 = vsub.f32 %v71_v6, %v115_v34  ;;  %v10558_v39 = vsub.f32 %v72_v7, %v116_v35  ;;  %v138_v40 = vsel %vm85_vm0, %v128_v36, 0.0  ;;  %v144_v43 = vsel %vm85_vm0, %v130_v37, 0.0 }
  0xa7   :  { %142 = vadd.xlane.f32.xlu0 %v141_v33  ;;  %139 = vadd.xlane.f32.xlu1 %v138_v40  ;;  %v106_v41 = vpop.xlane.xlu0 %105  ;;  %v109_v42 = vpop.xlane.xlu1 %108 }
  0xa8   :  { %v117_v44 = vmul.f32 0.03125, %v106_v41  ;;  %v118_v45 = vmul.f32 0.03125, %v109_v42  ;;  %v131_v46 = vmul.f32 %v10556_v38, %v10556_v38  ;;  %v132_v47 = vmul.f32 %v10558_v39, %v10558_v39 }
  0xaa   :  { %v10566_v48 = vsub.f32 %v73_v12, %v117_v44  ;;  %v10568_v49 = vsub.f32 %v74_v13, %v118_v45  ;;  %v147_v50 = vsel %vm85_vm0, %v131_v46, 0.0  ;;  %v150_v51 = vsel %vm85_vm0, %v132_v47, 0.0 }
  0xab   :  { %145 = vadd.xlane.f32.xlu1 %v144_v43  ;;  %148 = vadd.xlane.f32.xlu0 %v147_v50 }
  0xac   :  { %v133_v52 = vmul.f32 %v10566_v48, %v10566_v48  ;;  %v134_v53 = vmul.f32 %v10568_v49, %v10568_v49 }
  0xae   :  { %v153_v54 = vsel %vm85_vm0, %v133_v52, 0.0  ;;  %v156_v55 = vsel %vm85_vm0, %v134_v53, 0.0  ;;  %v9894_v52 = vld [vmem:[%s12898_s6 + $0x8] sm:$0xff]  }
  0xaf   :  { %151 = vadd.xlane.f32.xlu1 %v150_v51  ;;  %154 = vadd.xlane.f32.xlu0 %v153_v54 }
  0xb3   :  { %157 = vadd.xlane.f32.xlu1 %v156_v55 }
 0x130   :  { %v137_v61 = vpop.xlane.xlu0 %136 }
 0x131   :  { %v159_v62 = vmul.f32 0.03125, %v137_v61 }
 0x133   :  { %v167_v63 = vadd.f32 1e-05, %v159_v62 }
 0x134   :  { %v140_v0 = vpop.xlane.xlu1 %139  ;;  %v143_v1 = vpop.xlane.xlu0 %142 }
 0x135   :  { %9957 = vrsqrt.f32 %v167_v63  ;;  %v160_v2 = vmul.f32 0.03125, %v140_v0  ;;  %v161_v3 = vmul.f32 0.03125, %v143_v1  ;;  %v7582_v63 = vld [vmem:[%s12901_s9] ss:$0 sm:$0xff] }
 0x137   :  { %v168_v4 = vadd.f32 1e-05, %v160_v2  ;;  %v169_v5 = vadd.f32 1e-05, %v161_v3 }
 0x138   :  { %v146_v6 = vpop.xlane.xlu1 %145  ;;  %v149_v7 = vpop.xlane.xlu0 %148 }
 0x139   :  { %9959 = vrsqrt.f32 %v168_v4  ;;  %v162_v8 = vmul.f32 0.03125, %v146_v6  ;;  %v163_v9 = vmul.f32 0.03125, %v149_v7 }
 0x13a   :  { %9961 = vrsqrt.f32 %v169_v5 }
 0x13b   :  { %v170_v10 = vadd.f32 1e-05, %v162_v8  ;;  %v171_v11 = vadd.f32 1e-05, %v163_v9 }
 0x13c   :  { %v152_v12 = vpop.xlane.xlu1 %151  ;;  %v155_v13 = vpop.xlane.xlu0 %154 }
 0x13d   :  { %9963 = vrsqrt.f32 %v170_v10  ;;  %v164_v14 = vmul.f32 0.03125, %v152_v12  ;;  %v165_v15 = vmul.f32 0.03125, %v155_v13 }
 0x13e   :  { %9965 = vrsqrt.f32 %v171_v11 }
 0x13f   :  { %v9958_v16 = vpop.eup %9957  ;;  %v172_v17 = vadd.f32 1e-05, %v164_v14  ;;  %v173_v18 = vadd.f32 1e-05, %v165_v15 }
 0x140   :  { %v183_v19 = vmul.f32 %v9958_v16, %v10538_v20  ;;  %v158_v22 = vpop.xlane.xlu1 %157 }
 0x141   :  { %9967 = vrsqrt.f32 %v172_v17  ;;  %v166_v24 = vmul.f32 0.03125, %v158_v22 }
 0x142   :  { %9969 = vrsqrt.f32 %v173_v18  ;;  %v197_v30 = vmul.f32 %v7566_v23, %v183_v19 }
 0x143   :  { %v9960_v25 = vpop.eup %9959  ;;  %v174_v26 = vadd.f32 1e-05, %v166_v24 }
 0x144   :  { %v9962_v27 = vpop.eup %9961  ;;  %v184_v31 = vmul.f32 %v9960_v25, %v10546_v28  ;;  %v211_v36 = vadd.f32 %v7567_v32, %v197_v30 }
 0x145   :  { %v185_v20 = vmul.f32 %v9962_v27, %v10540_v21  ;;  %9971 = vrsqrt.f32 %v174_v26 }
 0x146   :  { %v198_v33 = vmul.f32 %v7566_v23, %v184_v31 }
 0x147   :  { %v9964_v34 = vpop.eup %9963  ;;  %v199_v40 = vmul.f32 %v7566_v23, %v185_v20  ;;  %v7575_v20 = vld [vmem:[%s12899_s7] ss:$0 sm:$0xff] }
 0x148   :  { %v9966_v35 = vpop.eup %9965  ;;  %v212_v37 = vadd.f32 %v7567_v32, %v198_v33  ;;  %v186_v41 = vmul.f32 %v9964_v34, %v10548_v29 }
 0x149   :  { %v187_v42 = vmul.f32 %v9966_v35, %v10556_v38  ;;  %v213_v47 = vadd.f32 %v7567_v32, %v199_v40 }
 0x14a   :  { %v10607_v43 = vpack.c.bf16 %v212_v37, %v211_v36  ;;  %v200_v28 = vmul.f32 %v7566_v23, %v186_v41 }
 0x14b   :  { %v9968_v44 = vpop.eup %9967  ;;  %v201_v45 = vmul.f32 %v7566_v23, %v187_v42 }
 0x14c   :  { %v9970_v46 = vpop.eup %9969  ;;  %v214_v50 = vadd.f32 %v7567_v32, %v200_v28  ;;  %v188_v21 = vmul.f32 %v9968_v44, %v10558_v39  ;;  %8625 = vmatprep.mubr.msk.bf16.mxu1 %vm85_vm0, %v10607_v43  ;;  %8649 = vmatprep.mubr.msk.bf16.mxu0 %vm85_vm0, %v10607_v43 }
 0x14d   :  { %v189_v29 = vmul.f32 %v9970_v46, %v10566_v48  ;;  %v215_v54 = vadd.f32 %v7567_v32, %v201_v45 }
 0x14e   :  { %v10615_v51 = vpack.c.bf16 %v214_v50, %v213_v47  ;;  %v202_v38 = vmul.f32 %v7566_v23, %v188_v21 }
 0x14f   :  { %v9972_v53 = vpop.eup %9971  ;;  %v203_v56 = vmul.f32 %v7566_v23, %v189_v29 }
 0x150   :  { %v216_v55 = vadd.f32 %v7567_v32, %v202_v38  ;;  %v190_v39 = vmul.f32 %v9972_v53, %v10568_v49  ;;  %8626 = vmatmul.mubr.msk.bf16.vlgmr.msra.gmra.mrb[0].mxu1 %vm85_vm0, %v10615_v51  ;;  %8650 = vmatmul.mubr.msk.bf16.vlgmr.msra.gmra.mrb[0].mxu0 %vm85_vm0, %v10615_v51 }
 0x151   :  { %8634 = vmatpush3.bf16.msra.mxu1 %v10593_v60  ;;  %v217_v58 = vadd.f32 %v7567_v32, %v203_v56  ;;  %v10649_v60 = vld [vmem:[%s12897_s5] ss:$0 sm:$0xff] }
 0x152   :  { %v10626_v48 = vpack.c.bf16 %v216_v55, %v215_v54  ;;  %v204_v57 = vmul.f32 %v7566_v23, %v190_v39  ;;  %8635 = vmatprep.subr.bf16.mxu1 %v9894_v52  ;;  %v9895_v55 = vld [vmem:[%s12898_s6 + $0x10] sm:$0xff]   ;;  %v9896_v39 = vld [vmem:[%s12898_s6 + $0x18] sm:$0xff]  }
 0x154   :  { %v218_v59 = vadd.f32 %v7567_v32, %v204_v57  ;;  %8629 = vmatprep.mubr.msk.bf16.mxu1 %vm85_vm0, %v10626_v48  ;;  %8653 = vmatprep.mubr.msk.bf16.mxu0 %vm85_vm0, %v10626_v48 }
 0x155   :  { %8636 = vmatpush3.bf16.msra.mxu1 %v9894_v52 }
 0x156   :  { %v10632_v49 = vpack.c.bf16 %v218_v59, %v217_v58 }
 0x158   :  { %8630 = vmatmul.mubr.msk.bf16.gmra.mrb[4].mxu1 %vm85_vm0, %v10632_v49  ;;  %8654 = vmatmul.mubr.msk.bf16.gmra.mrb[4].mxu0 %vm85_vm0, %v10632_v49 }
 0x159   :  { %8637 = vmatprep.mubr.msk.bf16.mxu1 %vm85_vm0, %v10607_v43 }
 0x160   :  { %8638 = vmatmul.mubr.msk.bf16.vlgmr.msra.gmra.mrb[8].mxu1 %vm85_vm0, %v10615_v51 }
 0x161   :  { %8641 = vmatprep.mubr.msk.bf16.mxu1 %vm85_vm0, %v10626_v48 }
 0x168   :  { %8642 = vmatmul.mubr.msk.bf16.gmra.mrb[12].mxu1 %vm85_vm0, %v10632_v49 }
 0x223   :  { %v10651_v61 = vpop.f32.mrb[0].mxu1  ;;  %v8651_v62 = vpop.f32.mrb[0].mxu0 }
 0x224   :  { %v292_v0 = vpop.f32.mrb[1].mxu1  ;;  %v468_v1 = vpop.f32.mrb[1].mxu0  ;;  %v477_v5 = vadd.f32 %v8651_v62, %v7582_v63  ;;  %v301_v57 = vadd.f32 %v10651_v61, %v10649_v60 }
 0x225   :  { %v293_v2 = vadd.f32 %v10649_v60, %v292_v0  ;;  %v10657_v3 = vpop.f32.mrb[2].mxu1  ;;  %v8652_v4 = vpop.f32.mrb[2].mxu0  ;;  %v469_v9 = vadd.f32 %v7582_v63, %v468_v1 }
 0x226   :  { %v480_v6 = vadd.f32 %v8652_v4, %v7582_v63  ;;  %v295_v7 = vpop.f32.mrb[3].mxu1  ;;  %v471_v8 = vpop.f32.mrb[3].mxu0  ;;  %v304_v58 = vadd.f32 %v10657_v3, %v10649_v60  ;;  %v10737_v4 = vld [vmem:[%s12932_s4 + $0x18] sm:$0xff] }
 0x227   :  { %v472_v10 = vadd.f32 %v7582_v63, %v471_v8  ;;  %8673 = vmatprep.mubr.msk.f32.mxu1 %vm499_vm1, %v293_v2  ;;  %v296_v56 = vadd.f32 %v10649_v60, %v295_v7 }
 0x228   :  { %v9537_v11 = vpack.c.bf16 %v480_v6, %v477_v5  ;;  %v10744_v6 = vld [vmem:[%s12932_s4 + $0x10] sm:$0xff] }
 0x229   :  { %v9533_v12 = vpack.c.bf16 %v472_v10, %v469_v9 }
 0x22b   :  { %v10660_v13 = vpop.f32.mrb[4].mxu1  ;;  %v8655_v14 = vpop.f32.mrb[4].mxu0  ;;  %9534 = vmatprep.subr.bf16.mxu0 %v9533_v12 }
 0x22c   :  { %v308_v15 = vpop.f32.mrb[5].mxu1  ;;  %v484_v16 = vpop.f32.mrb[5].mxu0  ;;  %9536 = vmatpush3.bf16.msra.mxu0 %v9533_v12  ;;  %v493_v19 = vadd.f32 %v8655_v14, %v7582_v63  ;;  %v317_v61 = vadd.f32 %v10660_v13, %v10649_v60  ;;  %v10757_v12 = vld [vmem:[%s12932_s4 + $0x28] sm:$0xff]  ;;  %v10764_v14 = vld [vmem:[%s12932_s4 + $0x20] sm:$0xff] }
 0x22d   :  { %v8632_v17 = vpop.f32.mrb[6].mxu1  ;;  %v8656_v18 = vpop.f32.mrb[6].mxu0  ;;  %9538 = vmatprep.subr.bf16.mxu0 %v9537_v11  ;;  %v485_v26 = vadd.f32 %v7582_v63, %v484_v16  ;;  %v309_v59 = vadd.f32 %v10649_v60, %v308_v15 }
 0x22e   :  { %v320_v22 = vadd.f32 %v8632_v17, %v10649_v60  ;;  %v496_v23 = vadd.f32 %v8656_v18, %v7582_v63  ;;  %v311_v24 = vpop.f32.mrb[7].mxu1  ;;  %v487_v25 = vpop.f32.mrb[7].mxu0 }
 0x22f   :  { %v488_v27 = vadd.f32 %v7582_v63, %v487_v25  ;;  %v312_v62 = vadd.f32 %v10649_v60, %v311_v24  ;;  %v10721_v60 = vld [vmem:[%s12932_s4 + $0x8] sm:$0xff]  ;;  %v10726_v63 = vld [vmem:[%s12932_s4] sm:$0xff]  ;;  %v10784_v24 = vld [vmem:[%s12932_s4 + $0x30] sm:$0xff] }
 0x230   :  { %v9545_v30 = vpack.c.bf16 %v496_v23, %v493_v19  ;;  %9540 = vmatpush3.bf16.msra.mxu0 %v9537_v11 }
 0x231   :  { %v9541_v31 = vpack.c.bf16 %v488_v27, %v485_v26 }
 0x233   :  { %v8639_v32 = vpop.f32.mrb[8].mxu1  ;;  %9542 = vmatprep.subr.bf16.mxu0 %v9541_v31 }
 0x234   :  { %v380_v33 = vpop.f32.mrb[9].mxu1  ;;  %9544 = vmatpush3.bf16.msra.mxu0 %v9541_v31  ;;  %v389_v35 = vadd.f32 %v8639_v32, %v7575_v20 }
 0x235   :  { %v8640_v34 = vpop.f32.mrb[10].mxu1  ;;  %9546 = vmatprep.subr.bf16.mxu0 %v9545_v30  ;;  %v381_v40 = vadd.f32 %v7575_v20, %v380_v33  ;;  %v7630_v33 = vld [vmem:[%s12899_s7 + $0x1] ss:$0 sm:$0xff] }
 0x236   :  { %v392_v36 = vadd.f32 %v8640_v34, %v7575_v20  ;;  %v383_v37 = vpop.f32.mrb[11].mxu1 }
 0x237   :  { %v384_v41 = vadd.f32 %v7575_v20, %v383_v37 }
 0x238   :  { %v9515_v42 = vpack.c.bf16 %v392_v36, %v389_v35  ;;  %9548 = vmatpush3.bf16.msra.mxu0 %v9545_v30 }
 0x239   :  { %v9509_v44 = vpack.c.bf16 %v384_v41, %v381_v40 }
 0x23b   :  { %v8643_v45 = vpop.f32.mrb[12].mxu1  ;;  %9511 = vmatprep.subr.msk.bf16.mxu1 %vm10668_vm2, %v9509_v44 }
 0x23c   :  { %v396_v46 = vpop.f32.mrb[13].mxu1  ;;  %9514 = vmatpush3.bf16.xpose.msk.msra.mxu1 %vm10668_vm2, %v9509_v44  ;;  %v405_v50 = vadd.f32 %v8643_v45, %v7575_v20 }
 0x23d   :  { %v8644_v47 = vpop.f32.mrb[14].mxu1  ;;  %9517 = vmatprep.subr.msk.bf16.mxu1 %vm10668_vm2, %v9515_v42  ;;  %v397_v38 = vadd.f32 %v7575_v20, %v396_v46 }
 0x23e   :  { %v408_v21 = vadd.f32 %v8644_v47, %v7575_v20  ;;  %v399_v29 = vpop.f32.mrb[15].mxu1 }
 0x23f   :  { %v400_v52 = vadd.f32 %v7575_v20, %v399_v29 }
 0x240   :  { %v9527_v53 = vpack.c.bf16 %v408_v21, %v405_v50 }
 0x241   :  { %v9521_v54 = vpack.c.bf16 %v400_v52, %v397_v38 }
 0x244   :  { %9520 = vmatpush3.bf16.xpose.msk.msra.mxu1 %vm10668_vm2, %v9515_v42 }
 0x245   :  { %9523 = vmatprep.subr.msk.bf16.mxu1 %vm10668_vm2, %v9521_v54 }
 0x24c   :  { %9526 = vmatpush3.bf16.xpose.msk.msra.mxu1 %vm10668_vm2, %v9521_v54 }
 0x24d   :  { %9529 = vmatprep.subr.msk.bf16.mxu1 %vm10668_vm2, %v9527_v53 }
 0x254   :  { %9532 = vmatpush3.bf16.xpose.msk.msra.mxu1 %vm10668_vm2, %v9527_v53 }
 0x255   :  { %8725 = vmatprep.subr.bf16.mxu1 %v9895_v55 }
 0x25b   :  { %8674 = vmatmul.mubr.msk.f32.vlgmr.msra.gmra.mrb[16].mxu1 %vm499_vm1, %v296_v56 }
 0x25c   :  { %8676 = vmatprep.mubr.msk.f32.mxu1 %vm499_vm1, %v301_v57  ;;  %8726 = vmatpush3.bf16.msra.mxu1 %v9895_v55 }
 0x25d   :  { %8727 = vmatprep.subr.bf16.mxu1 %v9896_v39 }
 0x25f   :  { %8677 = vmatmul.mubr.msk.f32.gmra.mrb[18].mxu1 %vm499_vm1, %v304_v58 }
 0x260   :  { %8679 = vmatprep.mubr.msk.f32.mxu1 %vm499_vm1, %v309_v59  ;;  %8728 = vmatpush3.bf16.msra.mxu1 %v9896_v39 }
 0x263   :  { %8680 = vmatmul.mubr.msk.f32.gmra.mrb[20].mxu1 %vm499_vm1, %v312_v62 }
 0x264   :  { %8682 = vmatprep.mubr.msk.f32.mxu1 %vm499_vm1, %v317_v61 }
 0x267   :  { %8683 = vmatmul.mubr.msk.f32.gmra.mrb[22].mxu1 %vm499_vm1, %v320_v22  ;;  %v10777_v22 = vld [vmem:[%s12932_s4 + $0x38] sm:$0xff] }
 0x268   :  { %8729 = vmatprep.mubr.msk.bf16.mxu1 %vm85_vm0, %v10607_v43 }
 0x26b   :  { %8730 = vmatmul.mubr.msk.bf16.vlgmr.msra.gmra.mrb[24].mxu1 %vm85_vm0, %v10615_v51 }
 0x26c   :  { %8733 = vmatprep.mubr.msk.bf16.mxu1 %vm85_vm0, %v10626_v48 }
 0x273   :  { %8734 = vmatmul.mubr.msk.bf16.gmra.mrb[28].mxu1 %vm85_vm0, %v10632_v49 }
 0x32e   :  { %v8675_v0 = vpop.f32.mrb[16].mxu1 }
 0x32f   :  { %v10729_v1 = vadd.f32 %v8675_v0, %v10721_v60  ;;  %v614_v2 = vpop.f32.mrb[17].mxu1 }
 0x330   :  { %v10732_v3 = vadd.f32 %v614_v2, %v10726_v63 }
 0x331   :  { %v657_v5 = vsel %vm653_vm3, %v10729_v1, -inf }
 0x332   :  { %658 = vmax.xlane.f32.xlu1 %v657_v5  ;;  %v8678_v7 = vpop.f32.mrb[18].mxu1  ;;  %v654_v8 = vsel %vm653_vm3, %v10732_v3, -inf }
 0x333   :  { %v10749_v9 = vadd.f32 %v8678_v7, %v10737_v4  ;;  %v624_v10 = vpop.f32.mrb[19].mxu1  ;;  %655 = vmax.xlane.f32.xlu0 %v654_v8 }
 0x334   :  { %v10752_v11 = vadd.f32 %v624_v10, %v10744_v6 }
 0x335   :  { %v663_v13 = vsel %vm653_vm3, %v10749_v9, -inf }
 0x336   :  { %664 = vmax.xlane.f32.xlu1 %v663_v13  ;;  %v8681_v15 = vpop.f32.mrb[20].mxu1  ;;  %v660_v16 = vsel %vm653_vm3, %v10752_v11, -inf }
 0x337   :  { %v10769_v17 = vadd.f32 %v8681_v15, %v10757_v12  ;;  %661 = vmax.xlane.f32.xlu0 %v660_v16  ;;  %v634_v18 = vpop.f32.mrb[21].mxu1 }
 0x338   :  { %v10772_v19 = vadd.f32 %v634_v18, %v10764_v14 }
 0x339   :  { %v669_v23 = vsel %vm653_vm3, %v10769_v17, -inf }
 0x33a   :  { %670 = vmax.xlane.f32.xlu1 %v669_v23  ;;  %v8684_v25 = vpop.f32.mrb[22].mxu1  ;;  %v666_v26 = vsel %vm653_vm3, %v10772_v19, -inf }
 0x33b   :  { %v10789_v27 = vadd.f32 %v8684_v25, %v10777_v22  ;;  %v644_v30 = vpop.f32.mrb[23].mxu1  ;;  %667 = vmax.xlane.f32.xlu0 %v666_v26 }
 0x33c   :  { %v10792_v31 = vadd.f32 %v644_v30, %v10784_v24 }
 0x33d   :  { %v675_v32 = vsel %vm653_vm3, %v10789_v27, -inf }
 0x33e   :  { %676 = vmax.xlane.f32.xlu1 %v675_v32  ;;  %v8731_v20 = vpop.f32.mrb[24].mxu1  ;;  %v672_v34 = vsel %vm653_vm3, %v10792_v31, -inf }
 0x33f   :  { %v1025_v35 = vpop.f32.mrb[25].mxu1  ;;  %673 = vmax.xlane.f32.xlu0 %v672_v34  ;;  %v1034_v37 = vadd.f32 %v8731_v20, %v7630_v33 }
 0x340   :  { %v8732_v36 = vpop.f32.mrb[26].mxu1  ;;  %v1026_v42 = vadd.f32 %v7630_v33, %v1025_v35 }
 0x341   :  { %v1037_v40 = vadd.f32 %v8732_v36, %v7630_v33  ;;  %v1028_v41 = vpop.f32.mrb[27].mxu1 }
 0x342   :  { %v1029_v44 = vadd.f32 %v7630_v33, %v1028_v41 }
 0x343   :  { %v9555_v45 = vpack.c.bf16 %v1037_v40, %v1034_v37 }
 0x344   :  { %v9549_v46 = vpack.c.bf16 %v1029_v44, %v1026_v42 }
 0x346   :  { %v8735_v47 = vpop.f32.mrb[28].mxu1  ;;  %9551 = vmatprep.subr.msk.bf16.mxu1 %vm10668_vm2, %v9549_v46 }
 0x347   :  { %v1041_v50 = vpop.f32.mrb[29].mxu1  ;;  %9554 = vmatpush3.bf16.xpose.msk.msra.mxu1 %vm10668_vm2, %v9549_v46  ;;  %v1050_v29 = vadd.f32 %v8735_v47, %v7630_v33  ;;  %v9897_v46 = vld [vmem:[%s12927_s25 + $0x10] sm:$0xff]  }
 0x348   :  { %v8736_v21 = vpop.f32.mrb[30].mxu1  ;;  %9557 = vmatprep.subr.msk.bf16.mxu1 %vm10668_vm2, %v9555_v45  ;;  %v1042_v53 = vadd.f32 %v7630_v33, %v1041_v50  ;;  %8713 = vmatprep.subr.bf16.mxu0 %v9897_v46 }
 0x349   :  { %v1053_v38 = vadd.f32 %v8736_v21, %v7630_v33  ;;  %v1044_v52 = vpop.f32.mrb[31].mxu1 }
 0x34a   :  { %v1045_v54 = vadd.f32 %v7630_v33, %v1044_v52 }
 0x34b   :  { %v9567_v55 = vpack.c.bf16 %v1053_v38, %v1050_v29 }
 0x34c   :  { %v9561_v56 = vpack.c.bf16 %v1045_v54, %v1042_v53 }
 0x34f   :  { %9560 = vmatpush3.bf16.xpose.msk.msra.mxu1 %vm10668_vm2, %v9555_v45 }
 0x350   :  { %9563 = vmatprep.subr.msk.bf16.mxu1 %vm10668_vm2, %v9561_v56 }
 0x357   :  { %9566 = vmatpush3.bf16.xpose.msk.msra.mxu1 %vm10668_vm2, %v9561_v56 }
 0x358   :  { %9569 = vmatprep.subr.msk.bf16.mxu1 %vm10668_vm2, %v9567_v55 }
 0x35f   :  { %9572 = vmatpush3.bf16.xpose.msk.msra.mxu1 %vm10668_vm2, %v9567_v55 }
 0x3bf   :  { %v659_v39 = vpop.xlane.xlu1 %658 }
 0x3c0   :  { %v679_v57 = vsub.f32 %v10729_v1, %v659_v39  ;;  %v656_v58 = vpop.xlane.xlu0 %655 }
 0x3c1   :  { %v678_v59 = vsub.f32 %v10732_v3, %v656_v58  ;;  %v9898_v58 = vld [vmem:[%s12927_s25 + $0x18] sm:$0xff]  }
 0x3c2   :  { %v688_v62 = vmul.f32 1.442695, %v679_v57 }
 0x3c3   :  { %v686_v61 = vmul.f32 1.442695, %v678_v59  ;;  %v665_v0 = vpop.xlane.xlu1 %664 }
 0x3c4   :  { %9973 = vpow2.f32 %v688_v62  ;;  %v681_v2 = vsub.f32 %v10749_v9, %v665_v0  ;;  %v662_v5 = vpop.xlane.xlu0 %661 }
 0x3c5   :  { %9975 = vpow2.f32 %v686_v61  ;;  %v680_v7 = vsub.f32 %v10752_v11, %v662_v5 }
 0x3c6   :  { %v692_v8 = vmul.f32 1.442695, %v681_v2  ;;  %v9899_v2 = vld [vmem:[%s12900_s8 + $0x10] sm:$0xff]  }
 0x3c7   :  { %v690_v10 = vmul.f32 1.442695, %v680_v7  ;;  %v671_v13 = vpop.xlane.xlu1 %670 }
 0x3c8   :  { %9977 = vpow2.f32 %v692_v8  ;;  %v683_v15 = vsub.f32 %v10769_v17, %v671_v13  ;;  %v668_v1 = vpop.xlane.xlu0 %667 }
 0x3c9   :  { %9979 = vpow2.f32 %v690_v10  ;;  %v682_v3 = vsub.f32 %v10772_v19, %v668_v1 }
 0x3ca   :  { %v696_v16 = vmul.f32 1.442695, %v683_v15 }
 0x3cb   :  { %v694_v18 = vmul.f32 1.442695, %v682_v3  ;;  %v677_v23 = vpop.xlane.xlu1 %676 }
 0x3cc   :  { %9981 = vpow2.f32 %v696_v16  ;;  %v685_v9 = vsub.f32 %v10789_v27, %v677_v23  ;;  %v674_v25 = vpop.xlane.xlu0 %673  ;;  %v9900_v16 = vld [vmem:[%s12900_s8 + $0x18] sm:$0xff]  }
 0x3cd   :  { %9983 = vpow2.f32 %v694_v18  ;;  %v684_v11 = vsub.f32 %v10792_v31, %v674_v25  ;;  %v9901_v18 = vld [vmem:[%s12927_s25 + $0x20] sm:$0xff]  }
 0x3ce   :  { %v9974_v26 = vpop.eup %9973  ;;  %v700_v30 = vmul.f32 1.442695, %v685_v9  ;;  %8825 = vmatprep.subr.bf16.mxu1 %v9901_v18 }
 0x3cf   :  { %v9976_v32 = vpop.eup %9975  ;;  %v698_v20 = vmul.f32 1.442695, %v684_v11  ;;  %v705_v17 = vsel %vm653_vm3, %v9974_v26, 0.0 }
 0x3d0   :  { %9985 = vpow2.f32 %v700_v30  ;;  %706 = vadd.xlane.f32.xlu1 %v705_v17  ;;  %v702_v19 = vsel %vm653_vm3, %v9976_v32, 0.0 }
 0x3d1   :  { %9987 = vpow2.f32 %v698_v20  ;;  %703 = vadd.xlane.f32.xlu0 %v702_v19 }
 0x3d2   :  { %v9978_v33 = vpop.eup %9977 }
 0x3d3   :  { %v9980_v34 = vpop.eup %9979  ;;  %v711_v27 = vsel %vm653_vm3, %v9978_v33, 0.0 }
 0x3d4   :  { %712 = vadd.xlane.f32.xlu1 %v711_v27  ;;  %v708_v35 = vsel %vm653_vm3, %v9980_v34, 0.0  ;;  %v7618_v27 = vld [vmem:[%s12897_s5 + $0x1] ss:$0 sm:$0xff] }
 0x3d5   :  { %709 = vadd.xlane.f32.xlu0 %v708_v35 }
 0x3d6   :  { %v9982_v31 = vpop.eup %9981 }
 0x3d7   :  { %v9984_v36 = vpop.eup %9983  ;;  %v717_v37 = vsel %vm653_vm3, %v9982_v31, 0.0 }
 0x3d8   :  { %718 = vadd.xlane.f32.xlu1 %v717_v37  ;;  %v714_v40 = vsel %vm653_vm3, %v9984_v36, 0.0 }
 0x3d9   :  { %715 = vadd.xlane.f32.xlu0 %v714_v40 }
 0x3da   :  { %v9986_v41 = vpop.eup %9985 }
 0x3db   :  { %v9988_v42 = vpop.eup %9987  ;;  %v723_v44 = vsel %vm653_vm3, %v9986_v41, 0.0 }
 0x3dc   :  { %724 = vadd.xlane.f32.xlu1 %v723_v44  ;;  %v720_v45 = vsel %vm653_vm3, %v9988_v42, 0.0 }
 0x3dd   :  { %721 = vadd.xlane.f32.xlu0 %v720_v45 }
 0x45d   :  { %v707_v47 = vpop.xlane.xlu1 %706 }
 0x45e   :  { %9989 = vrcp.f32 %v707_v47  ;;  %v704_v50 = vpop.xlane.xlu0 %703  ;;  %v9903_v47 = vld [vmem:[%s12898_s6 + $0x20] sm:$0xff]  }
 0x45f   :  { %9991 = vrcp.f32 %v704_v50 }
 0x461   :  { %v713_v21 = vpop.xlane.xlu1 %712 }
 0x462   :  { %9993 = vrcp.f32 %v713_v21  ;;  %v710_v29 = vpop.xlane.xlu0 %709 }
 0x463   :  { %9995 = vrcp.f32 %v710_v29 }
 0x465   :  { %v719_v38 = vpop.xlane.xlu1 %718 }
 0x466   :  { %9997 = vrcp.f32 %v719_v38  ;;  %v716_v52 = vpop.xlane.xlu0 %715 }
 0x467   :  { %9999 = vrcp.f32 %v716_v52 }
 0x468   :  { %v9990_v53 = vpop.eup %9989 }
 0x469   :  { %v9992_v54 = vpop.eup %9991  ;;  %v725_v55 = vpop.xlane.xlu1 %724  ;;  %v735_v57 = vmul.f32 %v9990_v53, %v9974_v26 }
 0x46a   :  { %10001 = vrcp.f32 %v725_v55  ;;  %v722_v56 = vpop.xlane.xlu0 %721  ;;  %v734_v39 = vmul.f32 %v9992_v54, %v9976_v32 }
 0x46b   :  { %10003 = vrcp.f32 %v722_v56  ;;  %v7642_v56 = vld [vmem:[%s12901_s9 + $0x1] ss:$0 sm:$0xff] }
 0x46c   :  { %v9994_v59 = vpop.eup %9993  ;;  %8701 = vmatprep.mubr.msk.f32.mxu0 %vm653_vm3, %v734_v39 }
 0x46d   :  { %v9996_v62 = vpop.eup %9995  ;;  %8702 = vmatmul.mubr.msk.f32.vlgmr.msra.gmra.mrb[8].mxu0 %vm653_vm3, %v735_v57  ;;  %v737_v0 = vmul.f32 %v9994_v59, %v9978_v33 }
 0x46e   :  { %8714 = vmatpush3.bf16.msra.mxu0 %v9897_v46  ;;  %v736_v61 = vmul.f32 %v9996_v62, %v9980_v34 }
 0x46f   :  { %8715 = vmatprep.subr.bf16.mxu0 %v9898_v58 }
 0x470   :  { %v9998_v5 = vpop.eup %9997  ;;  %8704 = vmatprep.mubr.msk.f32.mxu0 %vm653_vm3, %v736_v61 }
 0x471   :  { %v10000_v7 = vpop.eup %9999  ;;  %8705 = vmatmul.mubr.msk.f32.gmra.mrb[10].mxu0 %vm653_vm3, %v737_v0  ;;  %v739_v10 = vmul.f32 %v9998_v5, %v9982_v31 }
 0x472   :  { %v738_v8 = vmul.f32 %v10000_v7, %v9984_v36  ;;  %8716 = vmatpush3.bf16.msra.mxu0 %v9898_v58 }
 0x473   :  { %8737 = vmatprep.subr.bf16.mxu0 %v9899_v2 }
 0x474   :  { %v10002_v13 = vpop.eup %10001  ;;  %8707 = vmatprep.mubr.msk.f32.mxu0 %vm653_vm3, %v738_v8 }
 0x475   :  { %v10004_v15 = vpop.eup %10003  ;;  %8708 = vmatmul.mubr.msk.f32.gmra.mrb[12].mxu0 %vm653_vm3, %v739_v10  ;;  %v741_v3 = vmul.f32 %v10002_v13, %v9986_v41 }
 0x476   :  { %v740_v1 = vmul.f32 %v10004_v15, %v9988_v42  ;;  %v9902_v42 = vld [vmem:[%s12927_s25 + $0x28] sm:$0xff]  }
 0x478   :  { %8710 = vmatprep.mubr.msk.f32.mxu0 %vm653_vm3, %v740_v1 }
 0x479   :  { %8711 = vmatmul.mubr.msk.f32.gmra.mrb[14].mxu0 %vm653_vm3, %v741_v3 }
 0x47a   :  { %8717 = vmatprep.mubr.msk.bf16.mxu0 %vm85_vm0, %v10607_v43 }
 0x47d   :  { %8718 = vmatmul.mubr.msk.bf16.vlgmr.msra.gmra.mrb[16].mxu0 %vm85_vm0, %v10615_v51 }
 0x47e   :  { %8721 = vmatprep.mubr.msk.bf16.mxu0 %vm85_vm0, %v10626_v48  ;;  %8738 = vmatpush3.bf16.msra.mxu0 %v9899_v2  ;;  %v9904_v2 = vld [vmem:[%s12898_s6 + $0x28] sm:$0xff]  }
 0x47f   :  { %8739 = vmatprep.subr.bf16.mxu0 %v9900_v16 }
 0x482   :  { %8740 = vmatpush3.bf16.msra.mxu0 %v9900_v16 }
 0x485   :  { %8722 = vmatmul.mubr.msk.bf16.gmra.mrb[20].mxu0 %vm85_vm0, %v10632_v49 }
 0x486   :  { %8741 = vmatprep.mubr.msk.bf16.mxu0 %vm85_vm0, %v10607_v43 }
 0x48d   :  { %8742 = vmatmul.mubr.msk.bf16.vlgmr.msra.gmra.mrb[24].mxu0 %vm85_vm0, %v10615_v51 }
 0x48e   :  { %8745 = vmatprep.mubr.msk.bf16.mxu0 %vm85_vm0, %v10626_v48 }
 0x495   :  { %8746 = vmatmul.mubr.msk.bf16.gmra.mrb[28].mxu0 %vm85_vm0, %v10632_v49 }
 0x540   :  { %v10872_v23 = vpop.f32.mrb[8].mxu0 }
 0x541   :  { %v10874_v9 = vpop.f32.mrb[9].mxu0 }
 0x542   :  { %v871_v25 = vpack.c.bf16 %v10872_v23, %v10874_v9 }
 0x544   :  { %v10878_v11 = vpop.f32.mrb[10].mxu0 }
 0x545   :  { %v10880_v26 = vpop.f32.mrb[11].mxu0 }
 0x546   :  { %v872_v30 = vpack.c.bf16 %v10878_v11, %v10880_v26 }
 0x548   :  { %v10884_v32 = vpop.f32.mrb[12].mxu0 }
 0x549   :  { %v10886_v20 = vpop.f32.mrb[13].mxu0 }
 0x54a   :  { %v873_v17 = vpack.c.bf16 %v10884_v32, %v10886_v20 }
 0x54c   :  { %v10890_v19 = vpop.f32.mrb[14].mxu0 }
 0x54d   :  { %v10892_v33 = vpop.f32.mrb[15].mxu0 }
 0x54e   :  { %v874_v34 = vpack.c.bf16 %v10890_v19, %v10892_v33 }
 0x550   :  { %v8719_v35 = vpop.f32.mrb[16].mxu0 }
 0x551   :  { %v935_v31 = vpop.f32.mrb[17].mxu0  ;;  %v944_v44 = vadd.f32 %v8719_v35, %v7618_v27 }
 0x552   :  { %v936_v36 = vadd.f32 %v7618_v27, %v935_v31  ;;  %v8720_v37 = vpop.f32.mrb[18].mxu0 }
 0x553   :  { %v938_v40 = vpop.f32.mrb[19].mxu0  ;;  %v947_v45 = vadd.f32 %v8720_v37, %v7618_v27 }
 0x554   :  { %v939_v41 = vadd.f32 %v7618_v27, %v938_v40  ;;  %8765 = vmatprep.mubr.msk.f32.mxu1 %vm499_vm1, %v936_v36 }
 0x556   :  { %8766 = vmatmul.mubr.msk.f32.vlgmr.msra.gmra.mrb[32].mxu1 %vm499_vm1, %v939_v41 }
 0x557   :  { %8768 = vmatprep.mubr.msk.f32.mxu1 %vm499_vm1, %v944_v44  ;;  %8826 = vmatpush3.bf16.msra.mxu1 %v9901_v18 }
 0x558   :  { %v8723_v46 = vpop.f32.mrb[20].mxu0  ;;  %8827 = vmatprep.subr.bf16.mxu1 %v9902_v42 }
 0x559   :  { %v951_v50 = vpop.f32.mrb[21].mxu0  ;;  %v960_v53 = vadd.f32 %v8723_v46, %v7618_v27 }
 0x55a   :  { %v952_v21 = vadd.f32 %v7618_v27, %v951_v50  ;;  %v8724_v29 = vpop.f32.mrb[22].mxu0  ;;  %8769 = vmatmul.mubr.msk.f32.gmra.mrb[34].mxu1 %vm499_vm1, %v947_v45 }
 0x55b   :  { %v954_v38 = vpop.f32.mrb[23].mxu0  ;;  %8828 = vmatpush3.bf16.msra.mxu1 %v9902_v42  ;;  %v963_v54 = vadd.f32 %v8724_v29, %v7618_v27 }
 0x55c   :  { %v955_v52 = vadd.f32 %v7618_v27, %v954_v38  ;;  %8771 = vmatprep.mubr.msk.f32.mxu1 %vm499_vm1, %v952_v21  ;;  %8837 = vmatprep.subr.bf16.mxu1 %v9903_v47 }
 0x55e   :  { %8772 = vmatmul.mubr.msk.f32.gmra.mrb[36].mxu1 %vm499_vm1, %v955_v52 }
 0x55f   :  { %8774 = vmatprep.mubr.msk.f32.mxu1 %vm499_vm1, %v960_v53 }
 0x560   :  { %v8743_v55 = vpop.f32.mrb[24].mxu0 }
 0x561   :  { %v1115_v39 = vpop.f32.mrb[25].mxu0  ;;  %v1124_v58 = vadd.f32 %v8743_v55, %v7642_v56 }
 0x562   :  { %v8744_v57 = vpop.f32.mrb[26].mxu0  ;;  %8775 = vmatmul.mubr.msk.f32.gmra.mrb[38].mxu1 %vm499_vm1, %v963_v54  ;;  %v1116_v61 = vadd.f32 %v7642_v56, %v1115_v39 }
 0x563   :  { %v1127_v59 = vadd.f32 %v8744_v57, %v7642_v56  ;;  %v1118_v62 = vpop.f32.mrb[27].mxu0  ;;  %8829 = vmatprep.mubr.msk.bf16.mxu1 %vm85_vm0, %v10607_v43 }
 0x564   :  { %v1119_v0 = vadd.f32 %v7642_v56, %v1118_v62  ;;  %v7687_v62 = vld [vmem:[%s12897_s5 + $0x2] ss:$0 sm:$0xff] }
 0x565   :  { %v9577_v5 = vpack.c.bf16 %v1127_v59, %v1124_v58 }
 0x566   :  { %v9573_v7 = vpack.c.bf16 %v1119_v0, %v1116_v61  ;;  %8830 = vmatmul.mubr.msk.bf16.vlgmr.msra.gmra.mrb[40].mxu1 %vm85_vm0, %v10615_v51 }
 0x567   :  { %8833 = vmatprep.mubr.msk.bf16.mxu1 %vm85_vm0, %v10626_v48  ;;  %8838 = vmatpush3.bf16.msra.mxu1 %v9903_v47 }
 0x568   :  { %v8747_v8 = vpop.f32.mrb[28].mxu0  ;;  %9574 = vmatprep.subr.bf16.mxu0 %v9573_v7  ;;  %8839 = vmatprep.subr.bf16.mxu1 %v9904_v2 }
 0x569   :  { %v1131_v10 = vpop.f32.mrb[29].mxu0  ;;  %9576 = vmatpush3.bf16.msra.mxu0 %v9573_v7  ;;  %v1140_v15 = vadd.f32 %v8747_v8, %v7642_v56 }
 0x56a   :  { %v8748_v13 = vpop.f32.mrb[30].mxu0  ;;  %9578 = vmatprep.subr.bf16.mxu0 %v9577_v5  ;;  %v1132_v16 = vadd.f32 %v7642_v56, %v1131_v10 }
 0x56b   :  { %v1143_v1 = vadd.f32 %v8748_v13, %v7642_v56  ;;  %v1134_v3 = vpop.f32.mrb[31].mxu0  ;;  %8840 = vmatpush3.bf16.msra.mxu1 %v9904_v2 }
 0x56c   :  { %v1135_v18 = vadd.f32 %v7642_v56, %v1134_v3 }
 0x56d   :  { %v9585_v27 = vpack.c.bf16 %v1143_v1, %v1140_v15  ;;  %9580 = vmatpush3.bf16.msra.mxu0 %v9577_v5 }
 0x56e   :  { %v9581_v35 = vpack.c.bf16 %v1135_v18, %v1132_v16  ;;  %8834 = vmatmul.mubr.msk.bf16.gmra.mrb[44].mxu1 %vm85_vm0, %v10632_v49  ;;  %v7699_v18 = vld [vmem:[%s12899_s7 + $0x2] ss:$0 sm:$0xff] }
 0x56f   :  { %8841 = vmatprep.mubr.msk.bf16.mxu1 %vm85_vm0, %v10607_v43 }
 0x570   :  { %9582 = vmatprep.subr.bf16.mxu0 %v9581_v35 }
 0x571   :  { %9584 = vmatpush3.bf16.msra.mxu0 %v9581_v35 }
 0x572   :  { %9586 = vmatprep.subr.bf16.mxu0 %v9585_v27 }
 0x575   :  { %9588 = vmatpush3.bf16.msra.mxu0 %v9585_v27 }
 0x576   :  { %8842 = vmatmul.mubr.msk.bf16.vlgmr.msra.gmra.mrb[48].mxu1 %vm85_vm0, %v10615_v51 }
 0x577   :  { %8845 = vmatprep.mubr.msk.bf16.mxu1 %vm85_vm0, %v10626_v48 }
 0x57e   :  { %8846 = vmatmul.mubr.msk.bf16.gmra.mrb[52].mxu1 %vm85_vm0, %v10632_v49 }
 0x629   :  { %v8767_v31 = vpop.f32.mrb[32].mxu1 }
 0x62a   :  { %v10936_v36 = vadd.f32 %v8767_v31, %v10721_v60  ;;  %v1260_v37 = vpop.f32.mrb[33].mxu1 }
 0x62b   :  { %v10939_v40 = vadd.f32 %v1260_v37, %v10726_v63 }
 0x62c   :  { %v1302_v41 = vsel %vm653_vm3, %v10936_v36, -inf }
 0x62d   :  { %1303 = vmax.xlane.f32.xlu1 %v1302_v41  ;;  %v8770_v42 = vpop.f32.mrb[34].mxu1  ;;  %v1299_v44 = vsel %vm653_vm3, %v10939_v40, -inf }
 0x62e   :  { %v10946_v45 = vadd.f32 %v8770_v42, %v10737_v4  ;;  %v1270_v46 = vpop.f32.mrb[35].mxu1  ;;  %1300 = vmax.xlane.f32.xlu0 %v1299_v44 }
 0x62f   :  { %v10949_v47 = vadd.f32 %v1270_v46, %v10744_v6 }
 0x630   :  { %v1308_v50 = vsel %vm653_vm3, %v10946_v45, -inf }
 0x631   :  { %1309 = vmax.xlane.f32.xlu1 %v1308_v50  ;;  %v8773_v21 = vpop.f32.mrb[36].mxu1  ;;  %v1305_v29 = vsel %vm653_vm3, %v10949_v47, -inf }
 0x632   :  { %v10956_v38 = vadd.f32 %v8773_v21, %v10757_v12  ;;  %v1280_v52 = vpop.f32.mrb[37].mxu1  ;;  %1306 = vmax.xlane.f32.xlu0 %v1305_v29 }
 0x633   :  { %v10959_v53 = vadd.f32 %v1280_v52, %v10764_v14 }
 0x634   :  { %v1314_v54 = vsel %vm653_vm3, %v10956_v38, -inf }
 0x635   :  { %1315 = vmax.xlane.f32.xlu1 %v1314_v54  ;;  %v8776_v55 = vpop.f32.mrb[38].mxu1  ;;  %v1311_v56 = vsel %vm653_vm3, %v10959_v53, -inf }
 0x636   :  { %v10966_v39 = vadd.f32 %v8776_v55, %v10777_v22  ;;  %v1290_v57 = vpop.f32.mrb[39].mxu1  ;;  %1312 = vmax.xlane.f32.xlu0 %v1311_v56 }
 0x637   :  { %v10969_v58 = vadd.f32 %v1290_v57, %v10784_v24 }
 0x638   :  { %v1320_v59 = vsel %vm653_vm3, %v10966_v39, -inf }
 0x639   :  { %1321 = vmax.xlane.f32.xlu1 %v1320_v59  ;;  %v8831_v61 = vpop.f32.mrb[40].mxu1  ;;  %v1317_v0 = vsel %vm653_vm3, %v10969_v58, -inf }
 0x63a   :  { %v1742_v2 = vpop.f32.mrb[41].mxu1  ;;  %1318 = vmax.xlane.f32.xlu0 %v1317_v0 }
 0x63b   :  { %v1743_v5 = vadd.f32 %v7687_v62, %v1742_v2  ;;  %v8832_v7 = vpop.f32.mrb[42].mxu1 }
 0x63c   :  { %v1745_v8 = vpop.f32.mrb[43].mxu1 }
 0x63d   :  { %8877 = vmatprep.mubr.msk.f32.mxu1 %vm499_vm1, %v1743_v5  ;;  %v9905_v5 = vld [vmem:[%s12927_s25 + $0x30] sm:$0xff]  }
 0x641   :  { %v8835_v10 = vpop.f32.mrb[44].mxu1 }
 0x642   :  { %v1758_v13 = vpop.f32.mrb[45].mxu1 }
 0x643   :  { %v8836_v15 = vpop.f32.mrb[46].mxu1 }
 0x644   :  { %v1770_v1 = vadd.f32 %v8836_v15, %v7687_v62  ;;  %v1761_v3 = vpop.f32.mrb[47].mxu1  ;;  %v1746_v15 = vadd.f32 %v7687_v62, %v1745_v8 }
 0x645   :  { %v1762_v8 = vadd.f32 %v7687_v62, %v1761_v3 }
 0x649   :  { %v8843_v16 = vpop.f32.mrb[48].mxu1 }
 0x64a   :  { %v1832_v27 = vpop.f32.mrb[49].mxu1  ;;  %v1841_v31 = vadd.f32 %v8843_v16, %v7699_v18  ;;  %v9906_v16 = vld [vmem:[%s12927_s25 + $0x38] sm:$0xff]  }
 0x64b   :  { %v8844_v35 = vpop.f32.mrb[50].mxu1  ;;  %v1833_v42 = vadd.f32 %v7699_v18, %v1832_v27  ;;  %v1754_v27 = vadd.f32 %v8832_v7, %v7687_v62  ;;  %v9908_v7 = vld [vmem:[%s12900_s8 + $0x38] sm:$0xff]  }
 0x64c   :  { %v1844_v37 = vadd.f32 %v8844_v35, %v7699_v18  ;;  %v1835_v41 = vpop.f32.mrb[51].mxu1  ;;  %v9907_v35 = vld [vmem:[%s12900_s8 + $0x30] sm:$0xff]  }
 0x64d   :  { %v1836_v44 = vadd.f32 %v7699_v18, %v1835_v41 }
 0x64e   :  { %v9595_v46 = vpack.c.bf16 %v1844_v37, %v1841_v31  ;;  %v1759_v31 = vadd.f32 %v7687_v62, %v1758_v13 }
 0x64f   :  { %v9589_v50 = vpack.c.bf16 %v1836_v44, %v1833_v42 }
 0x651   :  { %v8847_v21 = vpop.f32.mrb[52].mxu1  ;;  %9591 = vmatprep.subr.msk.bf16.mxu1 %vm10668_vm2, %v9589_v50 }
 0x652   :  { %v1848_v29 = vpop.f32.mrb[53].mxu1  ;;  %9594 = vmatpush3.bf16.xpose.msk.msra.mxu1 %vm10668_vm2, %v9589_v50  ;;  %v1857_v54 = vadd.f32 %v8847_v21, %v7699_v18 }
 0x653   :  { %v8848_v52 = vpop.f32.mrb[54].mxu1  ;;  %9597 = vmatprep.subr.msk.bf16.mxu1 %vm10668_vm2, %v9595_v46  ;;  %v1849_v57 = vadd.f32 %v7699_v18, %v1848_v29 }
 0x654   :  { %v1860_v55 = vadd.f32 %v8848_v52, %v7699_v18  ;;  %v1851_v56 = vpop.f32.mrb[55].mxu1 }
 0x655   :  { %v1852_v59 = vadd.f32 %v7699_v18, %v1851_v56  ;;  %v1751_v18 = vadd.f32 %v8831_v61, %v7687_v62  ;;  %v1767_v61 = vadd.f32 %v8835_v10, %v7687_v62 }
 0x656   :  { %v9607_v0 = vpack.c.bf16 %v1860_v55, %v1857_v54 }
 0x657   :  { %v9601_v2 = vpack.c.bf16 %v1852_v59, %v1849_v57 }
 0x65a   :  { %9600 = vmatpush3.bf16.xpose.msk.msra.mxu1 %vm10668_vm2, %v9595_v46 }
 0x65b   :  { %9603 = vmatprep.subr.msk.bf16.mxu1 %vm10668_vm2, %v9601_v2 }
 0x662   :  { %9606 = vmatpush3.bf16.xpose.msk.msra.mxu1 %vm10668_vm2, %v9601_v2 }
 0x663   :  { %9609 = vmatprep.subr.msk.bf16.mxu1 %vm10668_vm2, %v9607_v0 }
 0x66a   :  { %9612 = vmatpush3.bf16.xpose.msk.msra.mxu1 %vm10668_vm2, %v9607_v0 }
 0x66b   :  { %8927 = vmatprep.subr.bf16.mxu1 %v9905_v5 }
 0x671   :  { %8878 = vmatmul.mubr.msk.f32.vlgmr.msra.gmra.mrb[56].mxu1 %vm499_vm1, %v1746_v15 }
 0x672   :  { %8880 = vmatprep.mubr.msk.f32.mxu1 %vm499_vm1, %v1751_v18  ;;  %8928 = vmatpush3.bf16.msra.mxu1 %v9905_v5 }
 0x673   :  { %8929 = vmatprep.subr.bf16.mxu1 %v9906_v16 }
 0x675   :  { %8881 = vmatmul.mubr.msk.f32.gmra.mrb[58].mxu1 %vm499_vm1, %v1754_v27 }
 0x676   :  { %8883 = vmatprep.mubr.msk.f32.mxu1 %vm499_vm1, %v1759_v31  ;;  %8930 = vmatpush3.bf16.msra.mxu1 %v9906_v16 }
 0x677   :  { %8951 = vmatprep.subr.bf16.mxu1 %v9907_v35 }
 0x679   :  { %8884 = vmatmul.mubr.msk.f32.gmra.mrb[60].mxu1 %vm499_vm1, %v1762_v8 }
 0x67a   :  { %8886 = vmatprep.mubr.msk.f32.mxu1 %vm499_vm1, %v1767_v61 }
 0x67d   :  { %8887 = vmatmul.mubr.msk.f32.gmra.mrb[62].mxu1 %vm499_vm1, %v1770_v1 }
 0x67e   :  { %8931 = vmatprep.mubr.msk.bf16.mxu1 %vm85_vm0, %v10607_v43 }
 0x681   :  { %8932 = vmatmul.mubr.msk.bf16.vlgmr.msra.gmra.mrb[64].mxu1 %vm85_vm0, %v10615_v51 }
 0x682   :  { %8935 = vmatprep.mubr.msk.bf16.mxu1 %vm85_vm0, %v10626_v48  ;;  %8952 = vmatpush3.bf16.msra.mxu1 %v9907_v35 }
 0x683   :  { %8953 = vmatprep.subr.bf16.mxu1 %v9908_v7 }
 0x686   :  { %8954 = vmatpush3.bf16.msra.mxu1 %v9908_v7 }
 0x689   :  { %8936 = vmatmul.mubr.msk.bf16.gmra.mrb[68].mxu1 %vm85_vm0, %v10632_v49 }
 0x68a   :  { %8955 = vmatprep.mubr.msk.bf16.mxu1 %vm85_vm0, %v10607_v43 }
 0x691   :  { %8956 = vmatmul.mubr.msk.bf16.vlgmr.msra.gmra.mrb[72].mxu1 %vm85_vm0, %v10615_v51 }
 0x692   :  { %8959 = vmatprep.mubr.msk.bf16.mxu1 %vm85_vm0, %v10626_v48 }
 0x699   :  { %8960 = vmatmul.mubr.msk.bf16.gmra.mrb[76].mxu1 %vm85_vm0, %v10632_v49 }
 0x6ba   :  { %v1304_v62 = vpop.xlane.xlu1 %1303 }
 0x6bb   :  { %v1324_v10 = vsub.f32 %v10936_v36, %v1304_v62  ;;  %v1301_v13 = vpop.xlane.xlu0 %1300 }
 0x6bc   :  { %v1323_v1 = vsub.f32 %v10939_v40, %v1301_v13 }
 0x6bd   :  { %v1333_v3 = vmul.f32 1.442695, %v1324_v10 }
 0x6be   :  { %v1331_v37 = vmul.f32 1.442695, %v1323_v1  ;;  %v1310_v41 = vpop.xlane.xlu1 %1309 }
 0x6bf   :  { %10005 = vpow2.f32 %v1333_v3  ;;  %v1326_v42 = vsub.f32 %v10946_v45, %v1310_v41  ;;  %v1307_v44 = vpop.xlane.xlu0 %1306 }
 0x6c0   :  { %10007 = vpow2.f32 %v1331_v37  ;;  %v1325_v46 = vsub.f32 %v10949_v47, %v1307_v44 }
 0x6c1   :  { %v1337_v50 = vmul.f32 1.442695, %v1326_v42 }
 0x6c2   :  { %v1335_v21 = vmul.f32 1.442695, %v1325_v46  ;;  %v1316_v29 = vpop.xlane.xlu1 %1315 }
 0x6c3   :  { %10009 = vpow2.f32 %v1337_v50  ;;  %v1328_v52 = vsub.f32 %v10956_v38, %v1316_v29  ;;  %v1313_v36 = vpop.xlane.xlu0 %1312 }
 0x6c4   :  { %10011 = vpow2.f32 %v1335_v21  ;;  %v1327_v40 = vsub.f32 %v10959_v53, %v1313_v36 }
 0x6c5   :  { %v1341_v54 = vmul.f32 1.442695, %v1328_v52 }
 0x6c6   :  { %v1339_v55 = vmul.f32 1.442695, %v1327_v40  ;;  %v1322_v56 = vpop.xlane.xlu1 %1321 }
 0x6c7   :  { %10013 = vpow2.f32 %v1341_v54  ;;  %v1330_v45 = vsub.f32 %v10966_v39, %v1322_v56  ;;  %v1319_v57 = vpop.xlane.xlu0 %1318 }
 0x6c8   :  { %10015 = vpow2.f32 %v1339_v55  ;;  %v1329_v47 = vsub.f32 %v10969_v58, %v1319_v57 }
 0x6c9   :  { %v11041_v59 = vpop.eup %10005  ;;  %v1345_v0 = vmul.f32 1.442695, %v1330_v45 }
 0x6ca   :  { %v11043_v2 = vpop.eup %10007  ;;  %v1343_v38 = vmul.f32 1.442695, %v1329_v47  ;;  %v1350_v5 = vsel %vm653_vm3, %v11041_v59, 0.0 }
 0x6cb   :  { %10017 = vpow2.f32 %v1345_v0  ;;  %1351 = vadd.xlane.f32.xlu1 %v1350_v5  ;;  %v1347_v53 = vsel %vm653_vm3, %v11043_v2, 0.0 }
 0x6cc   :  { %10019 = vpow2.f32 %v1343_v38  ;;  %1348 = vadd.xlane.f32.xlu0 %v1347_v53 }
 0x6cd   :  { %v11049_v39 = vpop.eup %10009 }
 0x6ce   :  { %v11051_v15 = vpop.eup %10011  ;;  %v1356_v58 = vsel %vm653_vm3, %v11049_v39, 0.0 }
 0x6cf   :  { %1357 = vadd.xlane.f32.xlu1 %v1356_v58  ;;  %v1353_v16 = vsel %vm653_vm3, %v11051_v15, 0.0 }
 0x6d0   :  { %1354 = vadd.xlane.f32.xlu0 %v1353_v16 }
 0x6d1   :  { %v11057_v18 = vpop.eup %10013 }
 0x6d2   :  { %v11059_v27 = vpop.eup %10015  ;;  %v1362_v35 = vsel %vm653_vm3, %v11057_v18, 0.0 }
 0x6d3   :  { %1363 = vadd.xlane.f32.xlu1 %v1362_v35  ;;  %v1359_v31 = vsel %vm653_vm3, %v11059_v27, 0.0 }
 0x6d4   :  { %1360 = vadd.xlane.f32.xlu0 %v1359_v31 }
 0x6d5   :  { %v11065_v8 = vpop.eup %10017 }
 0x6d6   :  { %v11067_v61 = vpop.eup %10019  ;;  %v1368_v7 = vsel %vm653_vm3, %v11065_v8, 0.0 }
 0x6d7   :  { %1369 = vadd.xlane.f32.xlu1 %v1368_v7  ;;  %v1365_v62 = vsel %vm653_vm3, %v11067_v61, 0.0 }
 0x6d8   :  { %1366 = vadd.xlane.f32.xlu0 %v1365_v62 }
 0x744   :  { %v8879_v10 = vpop.f32.mrb[56].mxu1 }
 0x745   :  { %v11074_v13 = vadd.f32 %v8879_v10, %v10721_v60  ;;  %v2067_v1 = vpop.f32.mrb[57].mxu1 }
 0x746   :  { %v11077_v3 = vadd.f32 %v2067_v1, %v10726_v63 }
 0x747   :  { %v2109_v37 = vsel %vm653_vm3, %v11074_v13, -inf }
 0x748   :  { %2110 = vmax.xlane.f32.xlu1 %v2109_v37  ;;  %v8882_v41 = vpop.f32.mrb[58].mxu1  ;;  %v2106_v42 = vsel %vm653_vm3, %v11077_v3, -inf }
 0x749   :  { %v11084_v44 = vadd.f32 %v8882_v41, %v10737_v4  ;;  %v2077_v46 = vpop.f32.mrb[59].mxu1  ;;  %2107 = vmax.xlane.f32.xlu0 %v2106_v42 }
 0x74a   :  { %v11087_v60 = vadd.f32 %v2077_v46, %v10744_v6 }
 0x74b   :  { %v2115_v63 = vsel %vm653_vm3, %v11084_v44, -inf }
 0x74c   :  { %2116 = vmax.xlane.f32.xlu1 %v2115_v63  ;;  %v8885_v50 = vpop.f32.mrb[60].mxu1  ;;  %v2112_v21 = vsel %vm653_vm3, %v11087_v60, -inf }
 0x74d   :  { %v11094_v29 = vadd.f32 %v8885_v50, %v10757_v12  ;;  %v2087_v52 = vpop.f32.mrb[61].mxu1  ;;  %2113 = vmax.xlane.f32.xlu0 %v2112_v21 }
 0x74e   :  { %v11097_v4 = vadd.f32 %v2087_v52, %v10764_v14  ;;  %v11112_v14 = vld [vmem:[%s12897_s5 + $0x3] ss:$0 sm:$0xff] }
 0x74f   :  { %v2121_v6 = vsel %vm653_vm3, %v11094_v29, -inf }
 0x750   :  { %2122 = vmax.xlane.f32.xlu1 %v2121_v6  ;;  %v8888_v36 = vpop.f32.mrb[62].mxu1  ;;  %v2118_v40 = vsel %vm653_vm3, %v11097_v4, -inf }
 0x751   :  { %v11104_v54 = vadd.f32 %v8888_v36, %v10777_v22  ;;  %v2097_v55 = vpop.f32.mrb[63].mxu1  ;;  %2119 = vmax.xlane.f32.xlu0 %v2118_v40  ;;  %v7776_v36 = vld [vmem:[%s12901_s9 + $0x3] ss:$0 sm:$0xff] }
 0x752   :  { %v11107_v12 = vadd.f32 %v2097_v55, %v10784_v24 }
 0x753   :  { %v2127_v56 = vsel %vm653_vm3, %v11104_v54, -inf }
 0x754   :  { %2128 = vmax.xlane.f32.xlu1 %v2127_v56  ;;  %v8933_v45 = vpop.f32.mrb[64].mxu1  ;;  %v2124_v57 = vsel %vm653_vm3, %v11107_v12, -inf }
 0x755   :  { %v11119_v22 = vadd.f32 %v8933_v45, %v11112_v14  ;;  %v11121_v47 = vpop.f32.mrb[65].mxu1  ;;  %2125 = vmax.xlane.f32.xlu0 %v2124_v57 }
 0x756   :  { %v8934_v24 = vpop.f32.mrb[66].mxu1 }
 0x757   :  { %v11124_v0 = vadd.f32 %v8934_v24, %v11112_v14  ;;  %v2479_v38 = vpop.f32.mrb[67].mxu1 }
 0x758   :  { %v11127_v5 = vadd.f32 %v11112_v14, %v2479_v38  ;;  %v1352_v53 = vpop.xlane.xlu1 %1351 }
 0x759   :  { %10021 = vrcp.f32 %v1352_v53  ;;  %v1349_v58 = vpop.xlane.xlu0 %1348 }
 0x75a   :  { %10023 = vrcp.f32 %v1349_v58 }
 0x75c   :  { %v1358_v16 = vpop.xlane.xlu1 %1357  ;;  %v8937_v35 = vpop.f32.mrb[68].mxu1 }
 0x75d   :  { %10025 = vrcp.f32 %v1358_v16  ;;  %v11130_v31 = vadd.f32 %v8937_v35, %v11112_v14  ;;  %v2492_v7 = vpop.f32.mrb[69].mxu1  ;;  %v1355_v62 = vpop.xlane.xlu0 %1354 }
 0x75e   :  { %v11133_v10 = vadd.f32 %v11112_v14, %v2492_v7  ;;  %10027 = vrcp.f32 %v1355_v62  ;;  %v8938_v1 = vpop.f32.mrb[70].mxu1 }
 0x75f   :  { %v11136_v37 = vadd.f32 %v8938_v1, %v11112_v14  ;;  %v2495_v41 = vpop.f32.mrb[71].mxu1 }
 0x760   :  { %v11139_v42 = vadd.f32 %v11112_v14, %v2495_v41  ;;  %v1364_v46 = vpop.xlane.xlu1 %1363 }
 0x761   :  { %10029 = vrcp.f32 %v1364_v46  ;;  %v1361_v63 = vpop.xlane.xlu0 %1360 }
 0x762   :  { %10031 = vrcp.f32 %v1361_v63 }
 0x763   :  { %v10022_v50 = vpop.eup %10021 }
 0x764   :  { %v10024_v21 = vpop.eup %10023  ;;  %v1370_v52 = vpop.xlane.xlu1 %1369  ;;  %v1380_v45 = vmul.f32 %v10022_v50, %v11041_v59 }
 0x765   :  { %v8957_v6 = vpop.f32.mrb[72].mxu1  ;;  %10033 = vrcp.f32 %v1370_v52  ;;  %v1367_v55 = vpop.xlane.xlu0 %1366  ;;  %v1379_v56 = vmul.f32 %v10024_v21, %v11043_v2 }
 0x766   :  { %v2656_v40 = vpop.f32.mrb[73].mxu1  ;;  %10035 = vrcp.f32 %v1367_v55  ;;  %v2665_v38 = vadd.f32 %v8957_v6, %v7776_v36 }
 0x767   :  { %v8958_v57 = vpop.f32.mrb[74].mxu1  ;;  %v10026_v24 = vpop.eup %10025  ;;  %8793 = vmatprep.mubr.msk.f32.mxu0 %vm653_vm3, %v1379_v56  ;;  %v2657_v35 = vadd.f32 %v7776_v36, %v2656_v40 }
 0x768   :  { %v2668_v53 = vadd.f32 %v8958_v57, %v7776_v36  ;;  %v2659_v58 = vpop.f32.mrb[75].mxu1  ;;  %v10028_v16 = vpop.eup %10027  ;;  %8794 = vmatmul.mubr.msk.f32.vlgmr.msra.gmra.mrb[32].mxu0 %vm653_vm3, %v1380_v45  ;;  %v1382_v2 = vmul.f32 %v10026_v24, %v11049_v39 }
 0x769   :  { %v2660_v7 = vadd.f32 %v7776_v36, %v2659_v58  ;;  %v1381_v1 = vmul.f32 %v10028_v16, %v11051_v15 }
 0x76a   :  { %v9657_v62 = vpack.c.bf16 %v2668_v53, %v2665_v38 }
 0x76b   :  { %v9653_v41 = vpack.c.bf16 %v2660_v7, %v2657_v35  ;;  %v10030_v59 = vpop.eup %10029  ;;  %8796 = vmatprep.mubr.msk.f32.mxu0 %vm653_vm3, %v1381_v1 }
 0x76c   :  { %v10032_v46 = vpop.eup %10031  ;;  %8797 = vmatmul.mubr.msk.f32.gmra.mrb[34].mxu0 %vm653_vm3, %v1382_v2  ;;  %v8961_v63 = vpop.f32.mrb[76].mxu1  ;;  %v1384_v6 = vmul.f32 %v10030_v59, %v11057_v18  ;;  %v7673_v18 = vld [vmem:[%s12902_s10 + $0x4] sm:$0xf] }
 0x76d   :  { %9654 = vmatprep.subr.bf16.mxu1 %v9653_v41  ;;  %v2672_v50 = vpop.f32.mrb[77].mxu1  ;;  %v1383_v21 = vmul.f32 %v10032_v46, %v11059_v27  ;;  %v2681_v40 = vadd.f32 %v8961_v63, %v7776_v36  ;;  %9877 = vmatprep.subr.msk.bf16.mxu0 %vm1534_vm4, %v7673_v18 }
 0x76e   :  { %9656 = vmatpush3.bf16.msra.mxu1 %v9653_v41  ;;  %v8962_v52 = vpop.f32.mrb[78].mxu1  ;;  %v2673_v45 = vadd.f32 %v7776_v36, %v2672_v50 }
 0x76f   :  { %9658 = vmatprep.subr.bf16.mxu1 %v9657_v62  ;;  %v10034_v15 = vpop.eup %10033  ;;  %v2684_v55 = vadd.f32 %v8962_v52, %v7776_v36  ;;  %8799 = vmatprep.mubr.msk.f32.mxu0 %vm653_vm3, %v1383_v21  ;;  %v2675_v39 = vpop.f32.mrb[79].mxu1 }
 0x770   :  { %v10036_v56 = vpop.eup %10035  ;;  %v2676_v57 = vadd.f32 %v7776_v36, %v2675_v39  ;;  %8800 = vmatmul.mubr.msk.f32.gmra.mrb[36].mxu0 %vm653_vm3, %v1384_v6  ;;  %v1386_v53 = vmul.f32 %v10034_v15, %v11065_v8  ;;  %v1536_v36 = vsel %vm1534_vm4, %v7673_v18, 0  ;;  %v11168_v8 = vld [vmem:[%s12902_s10] sm:$0xf] }
 0x771   :  { %v9665_v24 = vpack.c.bf16 %v2684_v55, %v2681_v40  ;;  %v1385_v38 = vmul.f32 %v10036_v56, %v11067_v61  ;;  %8806 = vmatpush3.bf16.msra.mxu0 %v1536_v36 }
 0x772   :  { %9660 = vmatpush3.bf16.msra.mxu1 %v9657_v62  ;;  %v9661_v27 = vpack.c.bf16 %v2676_v57, %v2673_v45  ;;  %9878 = vmatprep.subr.msk.bf16.mxu0 %vm1534_vm4, %v11168_v8 }
 0x773   :  { %8802 = vmatprep.mubr.msk.f32.mxu0 %vm653_vm3, %v1385_v38 }
 0x774   :  { %8803 = vmatmul.mubr.msk.f32.gmra.mrb[38].mxu0 %vm653_vm3, %v1386_v53  ;;  %9662 = vmatprep.subr.bf16.mxu1 %v9661_v27 }
 0x776   :  { %9664 = vmatpush3.bf16.msra.mxu1 %v9661_v27 }
 0x777   :  { %9666 = vmatprep.subr.bf16.mxu1 %v9665_v24 }
 0x77a   :  { %9668 = vmatpush3.bf16.msra.mxu1 %v9665_v24 }
 0x7d5   :  { %v2111_v61 = vpop.xlane.xlu1 %2110 }
 0x7d6   :  { %v2131_v58 = vsub.f32 %v11074_v13, %v2111_v61  ;;  %v2108_v16 = vpop.xlane.xlu0 %2107 }
 0x7d7   :  { %v2130_v35 = vsub.f32 %v11077_v3, %v2108_v16 }
 0x7d8   :  { %v2140_v7 = vmul.f32 1.442695, %v2131_v58 }
 0x7d9   :  { %v2138_v62 = vmul.f32 1.442695, %v2130_v35  ;;  %v2117_v1 = vpop.xlane.xlu1 %2116 }
 0x7da   :  { %10037 = vpow2.f32 %v2140_v7  ;;  %v2133_v41 = vsub.f32 %v11084_v44, %v2117_v1  ;;  %v2114_v2 = vpop.xlane.xlu0 %2113 }
 0x7db   :  { %10039 = vpow2.f32 %v2138_v62  ;;  %v2132_v59 = vsub.f32 %v11087_v60, %v2114_v2 }
 0x7dc   :  { %v2144_v46 = vmul.f32 1.442695, %v2133_v41 }
 0x7dd   :  { %v2142_v63 = vmul.f32 1.442695, %v2132_v59  ;;  %v2123_v50 = vpop.xlane.xlu1 %2122  ;;  %v1616_v59 = vsel %vm1534_vm4, %v11168_v8, 0  ;;  %v9910_v8 = vld [vmem:[%s12900_s8 + $0x28] sm:$0xff]  }
 0x7de   :  { %10041 = vpow2.f32 %v2144_v46  ;;  %v2135_v21 = vsub.f32 %v11094_v29, %v2123_v50  ;;  %v2120_v13 = vpop.xlane.xlu0 %2119  ;;  %v9909_v46 = vld [vmem:[%s12900_s8 + $0x20] sm:$0xff]  }
 0x7df   :  { %10043 = vpow2.f32 %v2142_v63  ;;  %v2134_v3 = vsub.f32 %v11097_v4, %v2120_v13 }
 0x7e0   :  { %v2148_v52 = vmul.f32 1.442695, %v2135_v21 }
 0x7e1   :  { %v2146_v6 = vmul.f32 1.442695, %v2134_v3  ;;  %v2129_v15 = vpop.xlane.xlu1 %2128 }
 0x7e2   :  { %10045 = vpow2.f32 %v2148_v52  ;;  %v2137_v44 = vsub.f32 %v11104_v54, %v2129_v15  ;;  %v2126_v40 = vpop.xlane.xlu0 %2125 }
 0x7e3   :  { %10047 = vpow2.f32 %v2146_v6  ;;  %v2136_v60 = vsub.f32 %v11107_v12, %v2126_v40 }
 0x7e4   :  { %v11180_v55 = vpop.eup %10037  ;;  %v2152_v39 = vmul.f32 1.442695, %v2137_v44 }
 0x7e5   :  { %v10040_v56 = vpop.eup %10039  ;;  %v2150_v45 = vmul.f32 1.442695, %v2136_v60  ;;  %v2157_v29 = vsel %vm653_vm3, %v11180_v55, 0.0 }
 0x7e6   :  { %10049 = vpow2.f32 %v2152_v39  ;;  %2158 = vadd.xlane.f32.xlu1 %v2157_v29  ;;  %v2154_v4 = vsel %vm653_vm3, %v10040_v56, 0.0 }
 0x7e7   :  { %10051 = vpow2.f32 %v2150_v45  ;;  %2155 = vadd.xlane.f32.xlu0 %v2154_v4 }
 0x7e8   :  { %v11185_v57 = vpop.eup %10041 }
 0x7e9   :  { %v11187_v54 = vpop.eup %10043  ;;  %v2163_v12 = vsel %vm653_vm3, %v11185_v57, 0.0 }
 0x7ea   :  { %2164 = vadd.xlane.f32.xlu1 %v2163_v12  ;;  %v2160_v24 = vsel %vm653_vm3, %v11187_v54, 0.0 }
 0x7eb   :  { %2161 = vadd.xlane.f32.xlu0 %v2160_v24 }
 0x7ec   :  { %v11193_v38 = vpop.eup %10045 }
 0x7ed   :  { %v11195_v27 = vpop.eup %10047  ;;  %v2169_v53 = vsel %vm653_vm3, %v11193_v38, 0.0 }
 0x7ee   :  { %2170 = vadd.xlane.f32.xlu1 %v2169_v53  ;;  %v2166_v18 = vsel %vm653_vm3, %v11195_v27, 0.0 }
 0x7ef   :  { %2167 = vadd.xlane.f32.xlu0 %v2166_v18 }
 0x7f0   :  { %v11201_v36 = vpop.eup %10049 }
 0x7f1   :  { %v11203_v61 = vpop.eup %10051  ;;  %v2175_v58 = vsel %vm653_vm3, %v11201_v36, 0.0 }
 0x7f2   :  { %2176 = vadd.xlane.f32.xlu1 %v2175_v58  ;;  %v2172_v16 = vsel %vm653_vm3, %v11203_v61, 0.0 }
 0x7f3   :  { %2173 = vadd.xlane.f32.xlu0 %v2172_v16 }
 0x83b   :  { %v8795_v35 = vpop.f32.mrb[32].mxu0 }
 0x83c   :  { %v1477_v7 = vpop.f32.mrb[33].mxu0 }
 0x83d   :  { %v1516_v62 = vpack.c.bf16 %v8795_v35, %v1477_v7 }
 0x83f   :  { %v8798_v1 = vpop.f32.mrb[34].mxu0  ;;  %8807 = vmatprep.mubr.msk.bf16.mxu0 %vm499_vm1, %v1516_v62 }
 0x840   :  { %v1487_v41 = vpop.f32.mrb[35].mxu0 }
 0x841   :  { %v1517_v2 = vpack.c.bf16 %v8798_v1, %v1487_v41  ;;  %v7742_v41 = vld [vmem:[%s12902_s10 + $0x8] sm:$0xf] }
 0x843   :  { %v8801_v63 = vpop.f32.mrb[36].mxu0  ;;  %8808 = vmatmul.mubr.msk.bf16.vlgmr.msra.gmra.mrb[40].mxu0 %vm499_vm1, %v1517_v2 }
 0x844   :  { %v1497_v50 = vpop.f32.mrb[37].mxu0  ;;  %8816 = vmatpush3.bf16.msra.mxu0 %v1616_v59 }
 0x845   :  { %v1518_v21 = vpack.c.bf16 %v8801_v63, %v1497_v50  ;;  %8849 = vmatprep.subr.bf16.mxu0 %v9909_v46 }
 0x847   :  { %v8804_v13 = vpop.f32.mrb[38].mxu0  ;;  %8811 = vmatprep.mubr.msk.bf16.mxu0 %vm499_vm1, %v1518_v21 }
 0x848   :  { %v1507_v3 = vpop.f32.mrb[39].mxu0 }
 0x849   :  { %v1519_v52 = vpack.c.bf16 %v8804_v13, %v1507_v3 }
 0x84b   :  { %8812 = vmatmul.mubr.msk.bf16.gmra.mrb[44].mxu0 %vm499_vm1, %v1519_v52 }
 0x84c   :  { %8817 = vmatprep.mubr.msk.bf16.mxu0 %vm499_vm1, %v871_v25 }
 0x853   :  { %8818 = vmatmul.mubr.msk.bf16.vlgmr.msra.gmra.mrb[40].mxu0 %vm499_vm1, %v872_v30  ;;  %v7711_v30 = vld [vmem:[%s12901_s9 + $0x2] ss:$0 sm:$0xff] }
 0x854   :  { %8821 = vmatprep.mubr.msk.bf16.mxu0 %vm499_vm1, %v873_v17  ;;  %8850 = vmatpush3.bf16.msra.mxu0 %v9909_v46  ;;  %v2342_v46 = vsel %vm1534_vm4, %v7742_v41, 0 }
 0x855   :  { %8851 = vmatprep.subr.bf16.mxu0 %v9910_v8 }
 0x858   :  { %8852 = vmatpush3.bf16.msra.mxu0 %v9910_v8 }
 0x85b   :  { %8822 = vmatmul.mubr.msk.bf16.gmra.mrb[44].mxu0 %vm499_vm1, %v874_v34 }
 0x85c   :  { %8853 = vmatprep.mubr.msk.bf16.mxu0 %vm85_vm0, %v10607_v43 }
 0x863   :  { %8854 = vmatmul.mubr.msk.bf16.vlgmr.msra.gmra.mrb[48].mxu0 %vm85_vm0, %v10615_v51 }
 0x864   :  { %8857 = vmatprep.mubr.msk.bf16.mxu0 %vm85_vm0, %v10626_v48 }
 0x86b   :  { %8858 = vmatmul.mubr.msk.bf16.gmra.mrb[52].mxu0 %vm85_vm0, %v10632_v49 }
 0x873   :  { %v2159_v11 = vpop.xlane.xlu1 %2158 }
 0x874   :  { %v2156_v23 = vpop.xlane.xlu0 %2155 }
 0x875   :  { %10053 = vrcp.f32 %v2156_v23 }
 0x876   :  { %10055 = vrcp.f32 %v2159_v11 }
 0x877   :  { %v2165_v40 = vpop.xlane.xlu1 %2164 }
 0x878   :  { %v2162_v17 = vpop.xlane.xlu0 %2161 }
 0x879   :  { %10057 = vrcp.f32 %v2162_v17 }
 0x87a   :  { %10059 = vrcp.f32 %v2165_v40 }
 0x87b   :  { %v2171_v53 = vpop.xlane.xlu1 %2170 }
 0x87f   :  { %v10054_v9 = vpop.eup %10053  ;;  %v2177_v62 = vpop.xlane.xlu1 %2176 }
 0x880   :  { %v2186_v25 = vmul.f32 %v10054_v9, %v10040_v56  ;;  %v2168_v56 = vpop.xlane.xlu0 %2167  ;;  %v10056_v1 = vpop.eup %10055 }
 0x881   :  { %10061 = vrcp.f32 %v2168_v56  ;;  %v2187_v59 = vmul.f32 %v10056_v1, %v11180_v55 }
 0x882   :  { %8905 = vmatprep.mubr.msk.f32.mxu0 %vm653_vm3, %v2186_v25  ;;  %10063 = vrcp.f32 %v2171_v53 }
 0x883   :  { %v10058_v2 = vpop.eup %10057 }
 0x884   :  { %v2174_v7 = vpop.xlane.xlu0 %2173  ;;  %v10060_v63 = vpop.eup %10059  ;;  %v2188_v50 = vmul.f32 %v10058_v2, %v11187_v54 }
 0x885   :  { %10065 = vrcp.f32 %v2174_v7  ;;  %v2189_v13 = vmul.f32 %v10060_v63, %v11185_v57  ;;  %v9911_v57 = vld [vmem:[%s12898_s6 + $0x30] sm:$0xff]  }
 0x886   :  { %10067 = vrcp.f32 %v2177_v62 }
 0x88b   :  { %v10062_v21 = vpop.eup %10061 }
 0x88c   :  { %v10064_v3 = vpop.eup %10063  ;;  %v2190_v52 = vmul.f32 %v10062_v21, %v11195_v27 }
 0x88d   :  { %v2191_v55 = vmul.f32 %v10064_v3, %v11193_v38  ;;  %v10346_v3 = vld [vmem:[%s12932_s4 + $0x20] sm:$0xff] }
 0x88f   :  { %v10066_v8 = vpop.eup %10065 }
 0x890   :  { %v10068_v23 = vpop.eup %10067  ;;  %v2192_v54 = vmul.f32 %v10066_v8, %v11203_v61 }
 0x891   :  { %v2193_v9 = vmul.f32 %v10068_v23, %v11201_v36 }
 0x936   :  { %v8855_v26 = vpop.f32.mrb[48].mxu0 }
 0x937   :  { %v1922_v32 = vpop.f32.mrb[49].mxu0  ;;  %v1931_v19 = vadd.f32 %v8855_v26, %v7711_v30 }
 0x938   :  { %v8856_v20 = vpop.f32.mrb[50].mxu0  ;;  %v1923_v6 = vadd.f32 %v7711_v30, %v1922_v32 }
 0x939   :  { %v1934_v33 = vadd.f32 %v8856_v20, %v7711_v30  ;;  %v1925_v34 = vpop.f32.mrb[51].mxu0 }
 0x93a   :  { %v1926_v15 = vadd.f32 %v7711_v30, %v1925_v34  ;;  %v2477_v34 = vadd.f32 %v11112_v14, %v11121_v47 }
 0x93b   :  { %v9617_v44 = vpack.c.bf16 %v1934_v33, %v1931_v19 }
 0x93c   :  { %v9613_v60 = vpack.c.bf16 %v1926_v15, %v1923_v6  ;;  %v7764_v15 = vld [vmem:[%s12899_s7 + $0x3] ss:$0 sm:$0xff] }
 0x93e   :  { %v8859_v39 = vpop.f32.mrb[52].mxu0  ;;  %9614 = vmatprep.subr.bf16.mxu0 %v9613_v60 }
 0x93f   :  { %v1938_v45 = vpop.f32.mrb[53].mxu0  ;;  %9616 = vmatpush3.bf16.msra.mxu0 %v9613_v60  ;;  %v1947_v4 = vadd.f32 %v8859_v39, %v7711_v30 }
 0x940   :  { %v8860_v29 = vpop.f32.mrb[54].mxu0  ;;  %9618 = vmatprep.subr.bf16.mxu0 %v9617_v44  ;;  %v1939_v18 = vadd.f32 %v7711_v30, %v1938_v45 }
 0x941   :  { %v1950_v12 = vadd.f32 %v8860_v29, %v7711_v30  ;;  %v1941_v24 = vpop.f32.mrb[55].mxu0 }
 0x942   :  { %v1942_v58 = vadd.f32 %v7711_v30, %v1941_v24  ;;  %v9912_v30 = vld [vmem:[%s12898_s6 + $0x38] sm:$0xff]  }
 0x943   :  { %v9625_v16 = vpack.c.bf16 %v1950_v12, %v1947_v4  ;;  %9620 = vmatpush3.bf16.msra.mxu0 %v9617_v44 }
 0x944   :  { %v9621_v35 = vpack.c.bf16 %v1942_v58, %v1939_v18 }
 0x946   :  { %9622 = vmatprep.subr.bf16.mxu0 %v9621_v35 }
 0x947   :  { %9624 = vmatpush3.bf16.msra.mxu0 %v9621_v35 }
 0x948   :  { %9626 = vmatprep.subr.bf16.mxu0 %v9625_v16 }
 0x94b   :  { %9628 = vmatpush3.bf16.msra.mxu0 %v9625_v16 }
 0x94c   :  { %9879 = vmatprep.subr.msk.bf16.mxu0 %vm1534_vm4, %v7742_v41  ;;  %v10344_v41 = vld [vmem:[%s12932_s4 + $0x10] sm:$0xff] }
 0x94e   :  { %8906 = vmatmul.mubr.msk.f32.vlgmr.msra.gmra.mrb[56].mxu0 %vm653_vm3, %v2187_v59 }
 0x94f   :  { %8908 = vmatprep.mubr.msk.f32.mxu0 %vm653_vm3, %v2188_v50  ;;  %8918 = vmatpush3.bf16.msra.mxu0 %v2342_v46  ;;  %v10345_v50 = vld [vmem:[%s12932_s4 + $0x28] sm:$0xff] }
 0x950   :  { %8939 = vmatprep.subr.bf16.mxu0 %v9911_v57 }
 0x952   :  { %8909 = vmatmul.mubr.msk.f32.gmra.mrb[58].mxu0 %vm653_vm3, %v2189_v13 }
 0x953   :  { %8911 = vmatprep.mubr.msk.f32.mxu0 %vm653_vm3, %v2190_v52 }
 0x956   :  { %8912 = vmatmul.mubr.msk.f32.gmra.mrb[60].mxu0 %vm653_vm3, %v2191_v55 }
 0x957   :  { %8914 = vmatprep.mubr.msk.f32.mxu0 %vm653_vm3, %v2192_v54  ;;  %v10347_v54 = vld [vmem:[%s12932_s4 + $0x38] sm:$0xff] }
 0x95a   :  { %8915 = vmatmul.mubr.msk.f32.gmra.mrb[62].mxu0 %vm653_vm3, %v2193_v9 }
 0xa21   :  { %v8907_v27 = vpop.f32.mrb[56].mxu0 }
 0xa22   :  { %v2284_v25 = vpop.f32.mrb[57].mxu0 }
 0xa23   :  { %v2323_v11 = vpack.c.bf16 %v8907_v27, %v2284_v25  ;;  %v10348_v27 = vld [vmem:[%s12932_s4 + $0x30] sm:$0xff] }
 0xa25   :  { %v8910_v38 = vpop.f32.mrb[58].mxu0  ;;  %8919 = vmatprep.mubr.msk.bf16.mxu0 %vm499_vm1, %v2323_v11 }
 0xa26   :  { %v2294_v61 = vpop.f32.mrb[59].mxu0 }
 0xa27   :  { %v2324_v26 = vpack.c.bf16 %v8910_v38, %v2294_v61 }
 0xa29   :  { %v8913_v36 = vpop.f32.mrb[60].mxu0  ;;  %8920 = vmatmul.mubr.msk.bf16.vlgmr.msra.gmra.mrb[40].mxu0 %vm499_vm1, %v2324_v26 }
 0xa2a   :  { %v2304_v32 = vpop.f32.mrb[61].mxu0  ;;  %8940 = vmatpush3.bf16.msra.mxu0 %v9911_v57 }
 0xa2b   :  { %v2325_v20 = vpack.c.bf16 %v8913_v36, %v2304_v32  ;;  %8941 = vmatprep.subr.bf16.mxu0 %v9912_v30 }
 0xa2d   :  { %v8916_v17 = vpop.f32.mrb[62].mxu0  ;;  %8923 = vmatprep.mubr.msk.bf16.mxu0 %vm499_vm1, %v2325_v20 }
 0xa2e   :  { %v2314_v19 = vpop.f32.mrb[63].mxu0  ;;  %8942 = vmatpush3.bf16.msra.mxu0 %v9912_v30 }
 0xa2f   :  { %v2326_v33 = vpack.c.bf16 %v8916_v17, %v2314_v19 }
 0xa31   :  { %8924 = vmatmul.mubr.msk.bf16.gmra.mrb[44].mxu0 %vm499_vm1, %v2326_v33 }
 0xa32   :  { %8943 = vmatprep.mubr.msk.bf16.mxu0 %vm85_vm0, %v10607_v43 }
 0xa39   :  { %8944 = vmatmul.mubr.msk.bf16.vlgmr.msra.gmra.mrb[64].mxu0 %vm85_vm0, %v10615_v51 }
 0xa3a   :  { %8947 = vmatprep.mubr.msk.bf16.mxu0 %vm85_vm0, %v10626_v48 }
 0xa41   :  { %8948 = vmatmul.mubr.msk.bf16.gmra.mrb[68].mxu0 %vm85_vm0, %v10632_v49 }
 0xa42   :  { %8979 = vmatprep.mubr.msk.f32.mxu0 %vm499_vm1, %v2477_v34 }
 0xb0c   :  { %v8945_v6 = vpop.f32.mrb[64].mxu0 }
 0xb0d   :  { %v2566_v43 = vpop.f32.mrb[65].mxu0  ;;  %v2575_v40 = vadd.f32 %v8945_v6, %v7764_v15 }
 0xb0e   :  { %v8946_v44 = vpop.f32.mrb[66].mxu0  ;;  %v2567_v39 = vadd.f32 %v7764_v15, %v2566_v43 }
 0xb0f   :  { %v2578_v51 = vadd.f32 %v8946_v44, %v7764_v15  ;;  %v2569_v60 = vpop.f32.mrb[67].mxu0 }
 0xb10   :  { %v2570_v48 = vadd.f32 %v7764_v15, %v2569_v60 }
 0xb11   :  { %v9635_v56 = vpack.c.bf16 %v2578_v51, %v2575_v40 }
 0xb12   :  { %v9629_v45 = vpack.c.bf16 %v2570_v48, %v2567_v39 }
 0xb14   :  { %v8949_v14 = vpop.f32.mrb[68].mxu0  ;;  %9631 = vmatprep.subr.msk.bf16.mxu0 %vm10668_vm2, %v9629_v45 }
 0xb15   :  { %v2582_v49 = vpop.f32.mrb[69].mxu0  ;;  %9634 = vmatpush3.bf16.xpose.msk.msra.mxu0 %vm10668_vm2, %v9629_v45  ;;  %v2591_v29 = vadd.f32 %v8949_v14, %v7764_v15 }
 0xb16   :  { %v8950_v47 = vpop.f32.mrb[70].mxu0  ;;  %9637 = vmatprep.subr.msk.bf16.mxu0 %vm10668_vm2, %v9635_v56  ;;  %v2583_v24 = vadd.f32 %v7764_v15, %v2582_v49 }
 0xb17   :  { %v2594_v4 = vadd.f32 %v8950_v47, %v7764_v15  ;;  %v2585_v12 = vpop.f32.mrb[71].mxu0 }
 0xb18   :  { %v2586_v53 = vadd.f32 %v7764_v15, %v2585_v12 }
 0xb19   :  { %v9647_v18 = vpack.c.bf16 %v2594_v4, %v2591_v29 }
 0xb1a   :  { %v9641_v58 = vpack.c.bf16 %v2586_v53, %v2583_v24 }
 0xb1d   :  { %9640 = vmatpush3.bf16.xpose.msk.msra.mxu0 %vm10668_vm2, %v9635_v56 }
 0xb1e   :  { %9643 = vmatprep.subr.msk.bf16.mxu0 %vm10668_vm2, %v9641_v58 }
 0xb25   :  { %9646 = vmatpush3.bf16.xpose.msk.msra.mxu0 %vm10668_vm2, %v9641_v58 }
 0xb26   :  { %9649 = vmatprep.subr.msk.bf16.mxu0 %vm10668_vm2, %v9647_v18 }
 0xb2d   :  { %9652 = vmatpush3.bf16.xpose.msk.msra.mxu0 %vm10668_vm2, %v9647_v18 }
 0xb34   :  { %8980 = vmatmul.mubr.msk.f32.vlgmr.msra.gmra.mrb[72].mxu0 %vm499_vm1, %v11127_v5 }
 0xb35   :  { %8982 = vmatprep.mubr.msk.f32.mxu0 %vm499_vm1, %v11119_v22  ;;  %v10341_v22 = vld [vmem:[%s12932_s4 + $0x8] sm:$0xff] }
 0xb38   :  { %8983 = vmatmul.mubr.msk.f32.gmra.mrb[74].mxu0 %vm499_vm1, %v11124_v0  ;;  %v10342_v0 = vld [vmem:[%s12932_s4] sm:$0xff] }
 0xb39   :  { %8985 = vmatprep.mubr.msk.f32.mxu0 %vm499_vm1, %v11133_v10 }
 0xb3c   :  { %8986 = vmatmul.mubr.msk.f32.gmra.mrb[76].mxu0 %vm499_vm1, %v11139_v42 }
 0xb3d   :  { %8988 = vmatprep.mubr.msk.f32.mxu0 %vm499_vm1, %v11130_v31 }
 0xb40   :  { %8989 = vmatmul.mubr.msk.f32.gmra.mrb[78].mxu0 %vm499_vm1, %v11136_v37  ;;  %v10343_v37 = vld [vmem:[%s12932_s4 + $0x18] sm:$0xff] }
 0xc07   :  { %v8981_v16 = vpop.f32.mrb[72].mxu0 }
 0xc08   :  { %v2807_v5 = vadd.f32 %v10341_v22, %v8981_v16  ;;  %v2801_v35 = vpop.f32.mrb[73].mxu0 }
 0xc09   :  { %v2802_v10 = vadd.f32 %v10342_v0, %v2801_v35 }
 0xc0a   :  { %v2843_v42 = vsel %vm653_vm3, %v2807_v5, -inf }
 0xc0b   :  { %2844 = vmax.xlane.f32.xlu1 %v2843_v42  ;;  %v8984_v7 = vpop.f32.mrb[74].mxu0  ;;  %v2840_v31 = vsel %vm653_vm3, %v2802_v10, -inf }
 0xc0c   :  { %v2817_v62 = vadd.f32 %v10343_v37, %v8984_v7  ;;  %v2811_v1 = vpop.f32.mrb[75].mxu0  ;;  %2841 = vmax.xlane.f32.xlu0 %v2840_v31  ;;  %v7807_v37 = vld [vmem:[%s12902_s10 + $0xc] sm:$0xf] }
 0xc0d   :  { %v2812_v2 = vadd.f32 %v10344_v41, %v2811_v1  ;;  %9880 = vmatprep.subr.msk.bf16.mxu0 %vm1534_vm4, %v7807_v37 }
 0xc0e   :  { %v2849_v59 = vsel %vm653_vm3, %v2817_v62, -inf }
 0xc0f   :  { %2850 = vmax.xlane.f32.xlu1 %v2849_v59  ;;  %v8987_v46 = vpop.f32.mrb[76].mxu0  ;;  %v2846_v63 = vsel %vm653_vm3, %v2812_v2, -inf }
 0xc10   :  { %v2827_v21 = vadd.f32 %v10345_v50, %v8987_v46  ;;  %v2821_v13 = vpop.f32.mrb[77].mxu0  ;;  %2847 = vmax.xlane.f32.xlu0 %v2846_v63 }
 0xc11   :  { %v2822_v52 = vadd.f32 %v10346_v3, %v2821_v13 }
 0xc12   :  { %v2855_v8 = vsel %vm653_vm3, %v2827_v21, -inf }
 0xc13   :  { %2856 = vmax.xlane.f32.xlu1 %v2855_v8  ;;  %v8990_v55 = vpop.f32.mrb[78].mxu0  ;;  %v2852_v23 = vsel %vm653_vm3, %v2822_v52, -inf }
 0xc14   :  { %v2837_v9 = vadd.f32 %v10347_v54, %v8990_v55  ;;  %v2831_v57 = vpop.f32.mrb[79].mxu0  ;;  %2853 = vmax.xlane.f32.xlu0 %v2852_v23 }
 0xc15   :  { %v2832_v25 = vadd.f32 %v10348_v27, %v2831_v57 }
 0xc16   :  { %v2861_v11 = vsel %vm653_vm3, %v2837_v9, -inf }
 0xc17   :  { %2862 = vmax.xlane.f32.xlu1 %v2861_v11  ;;  %v2858_v38 = vsel %vm653_vm3, %v2832_v25, -inf }
 0xc18   :  { %2859 = vmax.xlane.f32.xlu0 %v2858_v38 }
 0xc98   :  { %v2845_v61 = vpop.xlane.xlu1 %2844 }
 0xc99   :  { %v2865_v26 = vsub.f32 %v2807_v5, %v2845_v61  ;;  %v2842_v30 = vpop.xlane.xlu0 %2841 }
 0xc9a   :  { %v2864_v36 = vsub.f32 %v2802_v10, %v2842_v30 }
 0xc9b   :  { %v2874_v32 = vmul.f32 1.442695, %v2865_v26 }
 0xc9c   :  { %v2872_v20 = vmul.f32 1.442695, %v2864_v36  ;;  %v2851_v17 = vpop.xlane.xlu1 %2850 }
 0xc9d   :  { %10069 = vpow2.f32 %v2874_v32  ;;  %v2867_v19 = vsub.f32 %v2817_v62, %v2851_v17  ;;  %v2848_v33 = vpop.xlane.xlu0 %2847  ;;  %v3076_v62 = vsel %vm1534_vm4, %v7807_v37, 0 }
 0xc9e   :  { %10071 = vpow2.f32 %v2872_v20  ;;  %v2866_v34 = vsub.f32 %v2812_v2, %v2848_v33  ;;  %9020 = vmatpush3.bf16.msra.mxu0 %v3076_v62 }
 0xc9f   :  { %v2878_v6 = vmul.f32 1.442695, %v2867_v19 }
 0xca0   :  { %v2876_v15 = vmul.f32 1.442695, %v2866_v34  ;;  %v2857_v43 = vpop.xlane.xlu1 %2856 }
 0xca1   :  { %10073 = vpow2.f32 %v2878_v6  ;;  %v2869_v44 = vsub.f32 %v2827_v21, %v2857_v43  ;;  %v2854_v40 = vpop.xlane.xlu0 %2853 }
 0xca2   :  { %10075 = vpow2.f32 %v2876_v15  ;;  %v2868_v51 = vsub.f32 %v2822_v52, %v2854_v40 }
 0xca3   :  { %v2882_v60 = vmul.f32 1.442695, %v2869_v44 }
 0xca4   :  { %v2880_v39 = vmul.f32 1.442695, %v2868_v51  ;;  %v2863_v48 = vpop.xlane.xlu1 %2862  ;;  %v7812_v51 = vld [vmem:[%s12903_s11] ss:$0 sm:$0xff] }
 0xca5   :  { %10077 = vpow2.f32 %v2882_v60  ;;  %v2871_v56 = vsub.f32 %v2837_v9, %v2863_v48  ;;  %v2860_v45 = vpop.xlane.xlu0 %2859 }
 0xca6   :  { %10079 = vpow2.f32 %v2880_v39  ;;  %v2870_v14 = vsub.f32 %v2832_v25, %v2860_v45  ;;  %v7813_v39 = vld [vmem:[%s12904_s12] ss:$0 sm:$0xff] }
 0xca7   :  { %v10070_v49 = vpop.eup %10069  ;;  %v2886_v47 = vmul.f32 1.442695, %v2871_v56 }
 0xca8   :  { %v10072_v29 = vpop.eup %10071  ;;  %v2884_v4 = vmul.f32 1.442695, %v2870_v14  ;;  %v2891_v12 = vsel %vm653_vm3, %v10070_v49, 0.0 }
 0xca9   :  { %10081 = vpow2.f32 %v2886_v47  ;;  %2892 = vadd.xlane.f32.xlu1 %v2891_v12  ;;  %v2888_v24 = vsel %vm653_vm3, %v10072_v29, 0.0 }
 0xcaa   :  { %10083 = vpow2.f32 %v2884_v4  ;;  %2889 = vadd.xlane.f32.xlu0 %v2888_v24  ;;  %v10349_v24 = vld [vmem:[%s12926_s23] sm:$0xff] }
 0xcab   :  { %v10074_v53 = vpop.eup %10073 }
 0xcac   :  { %v10076_v18 = vpop.eup %10075  ;;  %v2897_v58 = vsel %vm653_vm3, %v10074_v53, 0.0 }
 0xcad   :  { %2898 = vadd.xlane.f32.xlu1 %v2897_v58  ;;  %v2894_v16 = vsel %vm653_vm3, %v10076_v18, 0.0 }
 0xcae   :  { %2895 = vadd.xlane.f32.xlu0 %v2894_v16  ;;  %v10350_v16 = vld [vmem:[%s12926_s23 + $0x10] sm:$0xff] }
 0xcaf   :  { %v10078_v22 = vpop.eup %10077 }
 0xcb0   :  { %v10080_v5 = vpop.eup %10079  ;;  %v2903_v35 = vsel %vm653_vm3, %v10078_v22, 0.0 }
 0xcb1   :  { %2904 = vadd.xlane.f32.xlu1 %v2903_v35  ;;  %v2900_v0 = vsel %vm653_vm3, %v10080_v5, 0.0 }
 0xcb2   :  { %2901 = vadd.xlane.f32.xlu0 %v2900_v0 }
 0xcb3   :  { %v10082_v10 = vpop.eup %10081 }
 0xcb4   :  { %v10084_v42 = vpop.eup %10083  ;;  %v2909_v7 = vsel %vm653_vm3, %v10082_v10, 0.0 }
 0xcb5   :  { %2910 = vadd.xlane.f32.xlu1 %v2909_v7  ;;  %v2906_v31 = vsel %vm653_vm3, %v10084_v42, 0.0 }
 0xcb6   :  { %2907 = vadd.xlane.f32.xlu0 %v2906_v31  ;;  %v10352_v31 = vld [vmem:[%s12926_s23 + $0x18] sm:$0xff] }
 0xd36   :  { %v2893_v1 = vpop.xlane.xlu1 %2892 }
 0xd37   :  { %10085 = vrcp.f32 %v2893_v1  ;;  %v2890_v41 = vpop.xlane.xlu0 %2889 }
 0xd38   :  { %10087 = vrcp.f32 %v2890_v41 }
 0xd3a   :  { %v2899_v2 = vpop.xlane.xlu1 %2898 }
 0xd3b   :  { %10089 = vrcp.f32 %v2899_v2  ;;  %v2896_v59 = vpop.xlane.xlu0 %2895 }
 0xd3c   :  { %10091 = vrcp.f32 %v2896_v59 }
 0xd3e   :  { %v2905_v46 = vpop.xlane.xlu1 %2904 }
 0xd3f   :  { %10093 = vrcp.f32 %v2905_v46  ;;  %v2902_v63 = vpop.xlane.xlu0 %2901 }
 0xd40   :  { %10095 = vrcp.f32 %v2902_v63 }
 0xd41   :  { %v10086_v50 = vpop.eup %10085 }
 0xd42   :  { %v10088_v21 = vpop.eup %10087  ;;  %v2911_v13 = vpop.xlane.xlu1 %2910  ;;  %v2921_v8 = vmul.f32 %v10086_v50, %v10070_v49 }
 0xd43   :  { %10097 = vrcp.f32 %v2911_v13  ;;  %v2908_v3 = vpop.xlane.xlu0 %2907  ;;  %v2920_v52 = vmul.f32 %v10088_v21, %v10072_v29  ;;  %v10353_v13 = vld [vmem:[%s12926_s23 + $0x20] sm:$0xff] }
 0xd44   :  { %10099 = vrcp.f32 %v2908_v3 }
 0xd45   :  { %v10090_v55 = vpop.eup %10089  ;;  %9007 = vmatprep.mubr.msk.f32.mxu1 %vm653_vm3, %v2920_v52 }
 0xd46   :  { %v10092_v23 = vpop.eup %10091  ;;  %9008 = vmatmul.mubr.msk.f32.vlgmr.msra.gmra.mrb[80].mxu1 %vm653_vm3, %v2921_v8  ;;  %v2923_v9 = vmul.f32 %v10090_v55, %v10074_v53 }
 0xd47   :  { %v2922_v54 = vmul.f32 %v10092_v23, %v10076_v18  ;;  %v10354_v23 = vld [vmem:[%s12926_s23 + $0x30] sm:$0xff] }
 0xd49   :  { %v10094_v57 = vpop.eup %10093  ;;  %9010 = vmatprep.mubr.msk.f32.mxu1 %vm653_vm3, %v2922_v54 }
 0xd4a   :  { %v10096_v27 = vpop.eup %10095  ;;  %9011 = vmatmul.mubr.msk.f32.gmra.mrb[82].mxu1 %vm653_vm3, %v2923_v9  ;;  %v2925_v11 = vmul.f32 %v10094_v57, %v10078_v22  ;;  %v10355_v9 = vld [vmem:[%s12926_s23 + $0x28] sm:$0xff] }
 0xd4b   :  { %v2924_v25 = vmul.f32 %v10096_v27, %v10080_v5  ;;  %v10351_v5 = vld [vmem:[%s12926_s23 + $0x8] sm:$0xff] }
 0xd4d   :  { %v10098_v38 = vpop.eup %10097  ;;  %9013 = vmatprep.mubr.msk.f32.mxu1 %vm653_vm3, %v2924_v25  ;;  %v10356_v25 = vld [vmem:[%s12926_s23 + $0x38] sm:$0xff] }
 0xd4e   :  { %v10100_v61 = vpop.eup %10099  ;;  %9014 = vmatmul.mubr.msk.f32.gmra.mrb[84].mxu1 %vm653_vm3, %v2925_v11  ;;  %v2927_v30 = vmul.f32 %v10098_v38, %v10082_v10 }
 0xd4f   :  { %v2926_v26 = vmul.f32 %v10100_v61, %v10084_v42 }
 0xd51   :  { %9016 = vmatprep.mubr.msk.f32.mxu1 %vm653_vm3, %v2926_v26 }
 0xd52   :  { %9017 = vmatmul.mubr.msk.f32.gmra.mrb[86].mxu1 %vm653_vm3, %v2927_v30 }
 0xe19   :  { %v9009_v36 = vpop.f32.mrb[80].mxu1 }
 0xe1a   :  { %v3018_v32 = vpop.f32.mrb[81].mxu1 }
 0xe1b   :  { %v3057_v20 = vpack.c.bf16 %v9009_v36, %v3018_v32 }
 0xe1d   :  { %v9012_v17 = vpop.f32.mrb[82].mxu1  ;;  %9021 = vmatprep.mubr.msk.bf16.mxu0 %vm499_vm1, %v3057_v20 }
 0xe1e   :  { %v3028_v19 = vpop.f32.mrb[83].mxu1 }
 0xe1f   :  { %v3058_v33 = vpack.c.bf16 %v9012_v17, %v3028_v19 }
 0xe21   :  { %v9015_v34 = vpop.f32.mrb[84].mxu1  ;;  %9022 = vmatmul.mubr.msk.bf16.vlgmr.msra.gmra.mrb[40].mxu0 %vm499_vm1, %v3058_v33 }
 0xe22   :  { %v3038_v6 = vpop.f32.mrb[85].mxu1 }
 0xe23   :  { %v3059_v15 = vpack.c.bf16 %v9015_v34, %v3038_v6 }
 0xe25   :  { %v9018_v43 = vpop.f32.mrb[86].mxu1  ;;  %9025 = vmatprep.mubr.msk.bf16.mxu0 %vm499_vm1, %v3059_v15 }
 0xe26   :  { %v3048_v44 = vpop.f32.mrb[87].mxu1 }
 0xe27   :  { %v3060_v40 = vpack.c.bf16 %v9018_v43, %v3048_v44 }
 0xe29   :  { %9026 = vmatmul.mubr.msk.bf16.gmra.mrb[44].mxu0 %vm499_vm1, %v3060_v40 }
 0xef4   :  { %v9023_v60 = vpop.f32.mrb[40].mxu0 }
 0xef5   :  { %v3161_v48 = vadd.f32 %v9023_v60, %v7812_v51  ;;  %v3112_v56 = vpop.f32.mrb[41].mxu0 }
 0xef6   :  { %v3159_v45 = vadd.f32 %v7812_v51, %v3112_v56  ;;  %v9024_v14 = vpop.f32.mrb[42].mxu0 }
 0xef7   :  { %v3162_v49 = vadd.f32 %v9024_v14, %v7812_v51  ;;  %v3115_v47 = vpop.f32.mrb[43].mxu0  ;;  %v3175_v29 = vmul.f32 %v7813_v39, %v3161_v48 }
 0xef8   :  { %v3173_v4 = vmul.f32 %v7813_v39, %v3159_v45  ;;  %v3160_v12 = vadd.f32 %v7812_v51, %v3115_v47 }
 0xef9   :  { %v3176_v18 = vmul.f32 %v7813_v39, %v3162_v49  ;;  %v11393_v22 = vadd.f32 %v10350_v16, %v3175_v29 }
 0xefa   :  { %v11388_v53 = vadd.f32 %v10349_v24, %v3173_v4  ;;  %v3174_v58 = vmul.f32 %v7813_v39, %v3160_v12 }
 0xefb   :  { %v11405_v37 = vadd.f32 %v10352_v31, %v3176_v18  ;;  %v3197_v21 = vsel %vm85_vm0, %v11393_v22, 0.0 }
 0xefc   :  { %v11398_v35 = vadd.f32 %v10351_v5, %v3174_v58  ;;  %v9027_v0 = vpop.f32.mrb[44].mxu0  ;;  %v3191_v10 = vsel %vm85_vm0, %v11388_v53, 0.0 }
 0xefd   :  { %v3165_v42 = vadd.f32 %v9027_v0, %v7812_v51  ;;  %3192 = vadd.xlane.f32.xlu0 %v3191_v10  ;;  %v3128_v7 = vpop.f32.mrb[45].mxu0  ;;  %v3200_v55 = vsel %vm85_vm0, %v11405_v37, 0.0 }
 0xefe   :  { %v3163_v62 = vadd.f32 %v7812_v51, %v3128_v7  ;;  %v9028_v1 = vpop.f32.mrb[46].mxu0  ;;  %v3194_v41 = vsel %vm85_vm0, %v11398_v35, 0.0 }
 0xeff   :  { %v3166_v2 = vadd.f32 %v9028_v1, %v7812_v51  ;;  %3195 = vadd.xlane.f32.xlu1 %v3194_v41  ;;  %v3131_v59 = vpop.f32.mrb[47].mxu0  ;;  %v3179_v46 = vmul.f32 %v7813_v39, %v3165_v42 }
 0xf00   :  { %v3177_v63 = vmul.f32 %v7813_v39, %v3163_v62  ;;  %v3164_v50 = vadd.f32 %v7812_v51, %v3131_v59 }
 0xf01   :  { %3198 = vadd.xlane.f32.xlu0 %v3197_v21  ;;  %v3180_v52 = vmul.f32 %v7813_v39, %v3166_v2  ;;  %v11421_v54 = vadd.f32 %v10354_v23, %v3179_v46  ;;  %v9913_v46 = vld [vmem:[%s12907_s15] sm:$0xff]  }
 0xf02   :  { %v11414_v3 = vadd.f32 %v10353_v13, %v3177_v63  ;;  %v3178_v8 = vmul.f32 %v7813_v39, %v3164_v50  ;;  %9029 = vmatprep.subr.bf16.mxu1 %v9913_v46  ;;  %v9914_v63 = vld [vmem:[%s12907_s15 + $0x8] sm:$0xff]  }
 0xf03   :  { %3201 = vadd.xlane.f32.xlu1 %v3200_v55  ;;  %v11433_v11 = vadd.f32 %v10356_v25, %v3180_v52  ;;  %v3209_v61 = vsel %vm85_vm0, %v11421_v54, 0.0  ;;  %9030 = vmatpush3.bf16.msra.mxu1 %v9913_v46 }
 0xf04   :  { %v11426_v57 = vadd.f32 %v10355_v9, %v3178_v8  ;;  %v3203_v27 = vsel %vm85_vm0, %v11414_v3, 0.0  ;;  %9031 = vmatprep.subr.bf16.mxu1 %v9914_v63 }
 0xf05   :  { %3204 = vadd.xlane.f32.xlu0 %v3203_v27  ;;  %v3212_v26 = vsel %vm85_vm0, %v11433_v11, 0.0 }
 0xf06   :  { %v3206_v38 = vsel %vm85_vm0, %v11426_v57, 0.0 }
 0xf07   :  { %3207 = vadd.xlane.f32.xlu1 %v3206_v38  ;;  %9032 = vmatpush3.bf16.msra.mxu1 %v9914_v63 }
 0xf09   :  { %3210 = vadd.xlane.f32.xlu0 %v3209_v61 }
 0xf0b   :  { %3213 = vadd.xlane.f32.xlu1 %v3212_v26 }
 0xf8a   :  { %v3193_v30 = vpop.xlane.xlu0 %3192 }
 0xf8b   :  { %v3215_v36 = vmul.f32 0.03125, %v3193_v30 }
 0xf8c   :  { %v3196_v32 = vpop.xlane.xlu1 %3195 }
 0xf8d   :  { %v11442_v20 = vsub.f32 %v11388_v53, %v3215_v36  ;;  %v3216_v17 = vmul.f32 0.03125, %v3196_v32 }
 0xf8e   :  { %v3199_v19 = vpop.xlane.xlu0 %3198 }
 0xf8f   :  { %v11445_v33 = vsub.f32 %v11398_v35, %v3216_v17  ;;  %v3217_v34 = vmul.f32 0.03125, %v3199_v19  ;;  %v3231_v6 = vmul.f32 %v11442_v20, %v11442_v20 }
 0xf90   :  { %v3202_v15 = vpop.xlane.xlu1 %3201 }
 0xf91   :  { %v11450_v43 = vsub.f32 %v11393_v22, %v3217_v34  ;;  %v3218_v44 = vmul.f32 0.03125, %v3202_v15  ;;  %v3239_v40 = vsel %vm85_vm0, %v3231_v6, 0.0  ;;  %v3232_v51 = vmul.f32 %v11445_v33, %v11445_v33 }
 0xf92   :  { %3240 = vadd.xlane.f32.xlu0 %v3239_v40  ;;  %v3205_v60 = vpop.xlane.xlu0 %3204  ;;  %v7814_v40 = vld [vmem:[%s12905_s13] ss:$0 sm:$0xff] }
 0xf93   :  { %v11456_v39 = vsub.f32 %v11405_v37, %v3218_v44  ;;  %v3219_v48 = vmul.f32 0.03125, %v3205_v60  ;;  %v3242_v56 = vsel %vm85_vm0, %v3232_v51, 0.0  ;;  %v3233_v45 = vmul.f32 %v11450_v43, %v11450_v43 }
 0xf94   :  { %3243 = vadd.xlane.f32.xlu1 %v3242_v56  ;;  %v3208_v14 = vpop.xlane.xlu1 %3207 }
 0xf95   :  { %v11462_v49 = vsub.f32 %v11414_v3, %v3219_v48  ;;  %v3220_v47 = vmul.f32 0.03125, %v3208_v14  ;;  %v3245_v29 = vsel %vm85_vm0, %v3233_v45, 0.0  ;;  %v3234_v4 = vmul.f32 %v11456_v39, %v11456_v39 }
 0xf96   :  { %3246 = vadd.xlane.f32.xlu0 %v3245_v29  ;;  %v3211_v12 = vpop.xlane.xlu0 %3210 }
 0xf97   :  { %v11468_v24 = vsub.f32 %v11426_v57, %v3220_v47  ;;  %v3221_v18 = vmul.f32 0.03125, %v3211_v12  ;;  %v3248_v58 = vsel %vm85_vm0, %v3234_v4, 0.0  ;;  %v3235_v16 = vmul.f32 %v11462_v49, %v11462_v49  ;;  %v7815_v4 = vld [vmem:[%s12906_s14] ss:$0 sm:$0xff] }
 0xf98   :  { %3249 = vadd.xlane.f32.xlu1 %v3248_v58  ;;  %v3214_v5 = vpop.xlane.xlu1 %3213 }
 0xf99   :  { %v11474_v0 = vsub.f32 %v11421_v54, %v3221_v18  ;;  %v3222_v10 = vmul.f32 0.03125, %v3214_v5  ;;  %v3251_v42 = vsel %vm85_vm0, %v3235_v16, 0.0  ;;  %v3236_v7 = vmul.f32 %v11468_v24, %v11468_v24 }
 0xf9a   :  { %3252 = vadd.xlane.f32.xlu0 %v3251_v42 }
 0xf9b   :  { %v11480_v31 = vsub.f32 %v11433_v11, %v3222_v10  ;;  %v3254_v62 = vsel %vm85_vm0, %v3236_v7, 0.0  ;;  %v3237_v1 = vmul.f32 %v11474_v0, %v11474_v0 }
 0xf9c   :  { %3255 = vadd.xlane.f32.xlu1 %v3254_v62 }
 0xf9d   :  { %v3257_v41 = vsel %vm85_vm0, %v3237_v1, 0.0  ;;  %v3238_v2 = vmul.f32 %v11480_v31, %v11480_v31 }
 0xf9e   :  { %3258 = vadd.xlane.f32.xlu0 %v3257_v41 }
 0xf9f   :  { %v3260_v59 = vsel %vm85_vm0, %v3238_v2, 0.0 }
 0xfa0   :  { %3261 = vadd.xlane.f32.xlu1 %v3260_v59 }
0x101f   :  { %v3241_v50 = vpop.xlane.xlu0 %3240 }
0x1020   :  { %v3263_v21 = vmul.f32 0.03125, %v3241_v50 }
0x1021   :  { %v3244_v13 = vpop.xlane.xlu1 %3243 }
0x1022   :  { %v3271_v52 = vadd.f32 1e-05, %v3263_v21  ;;  %v3264_v8 = vmul.f32 0.03125, %v3244_v13 }
0x1023   :  { %v3247_v55 = vpop.xlane.xlu0 %3246 }
0x1024   :  { %10101 = vrsqrt.f32 %v3271_v52  ;;  %v3272_v23 = vadd.f32 1e-05, %v3264_v8  ;;  %v3265_v9 = vmul.f32 0.03125, %v3247_v55 }
0x1025   :  { %v3250_v27 = vpop.xlane.xlu1 %3249 }
0x1026   :  { %10103 = vrsqrt.f32 %v3272_v23  ;;  %v3273_v25 = vadd.f32 1e-05, %v3265_v9  ;;  %v3266_v38 = vmul.f32 0.03125, %v3250_v27 }
0x1027   :  { %v3253_v61 = vpop.xlane.xlu0 %3252 }
0x1028   :  { %10105 = vrsqrt.f32 %v3273_v25  ;;  %v3274_v26 = vadd.f32 1e-05, %v3266_v38  ;;  %v3267_v30 = vmul.f32 0.03125, %v3253_v61  ;;  %v9917_v25 = vld [vmem:[%s12909_s17 + $0x10] sm:$0xff]   ;;  %v9918_v38 = vld [vmem:[%s12909_s17 + $0x18] sm:$0xff]   ;;  %v9919_v61 = vld [vmem:[%s12909_s17 + $0x20] sm:$0xff]  }
0x1029   :  { %v3256_v36 = vpop.xlane.xlu1 %3255 }
0x102a   :  { %10107 = vrsqrt.f32 %v3274_v26  ;;  %v3275_v32 = vadd.f32 1e-05, %v3267_v30  ;;  %v3268_v17 = vmul.f32 0.03125, %v3256_v36  ;;  %v9920_v26 = vld [vmem:[%s12909_s17 + $0x28] sm:$0xff]   ;;  %v9921_v30 = vld [vmem:[%s12909_s17 + $0x30] sm:$0xff]   ;;  %v9922_v36 = vld [vmem:[%s12909_s17 + $0x38] sm:$0xff]  }
0x102b   :  { %v3259_v19 = vpop.xlane.xlu0 %3258 }
0x102c   :  { %10109 = vrsqrt.f32 %v3275_v32  ;;  %v3276_v34 = vadd.f32 1e-05, %v3268_v17  ;;  %v3269_v6 = vmul.f32 0.03125, %v3259_v19  ;;  %v11540_v32 = vld [vmem:[%s12908_s16] ss:$0 sm:$0xff] }
0x102d   :  { %v3262_v15 = vpop.xlane.xlu1 %3261 }
0x102e   :  { %v10102_v44 = vpop.eup %10101  ;;  %10111 = vrsqrt.f32 %v3276_v34  ;;  %v3277_v51 = vadd.f32 1e-05, %v3269_v6  ;;  %v3270_v60 = vmul.f32 0.03125, %v3262_v15 }
0x102f   :  { %v3287_v48 = vmul.f32 %v10102_v44, %v11442_v20 }
0x1030   :  { %v10104_v56 = vpop.eup %10103  ;;  %10113 = vrsqrt.f32 %v3277_v51  ;;  %v3278_v45 = vadd.f32 1e-05, %v3270_v60 }
0x1031   :  { %v3288_v14 = vmul.f32 %v10104_v56, %v11445_v33  ;;  %v3301_v47 = vmul.f32 %v7814_v40, %v3287_v48 }
0x1032   :  { %v10106_v29 = vpop.eup %10105  ;;  %10115 = vrsqrt.f32 %v3278_v45 }
0x1033   :  { %v3289_v12 = vmul.f32 %v10106_v29, %v11450_v43  ;;  %v3302_v18 = vmul.f32 %v7814_v40, %v3288_v14  ;;  %v3315_v20 = vadd.f32 %v7815_v4, %v3301_v47 }
0x1034   :  { %v10108_v58 = vpop.eup %10107 }
0x1035   :  { %v3303_v16 = vmul.f32 %v7814_v40, %v3289_v12  ;;  %v3290_v5 = vmul.f32 %v10108_v58, %v11456_v39  ;;  %v3316_v10 = vadd.f32 %v7815_v4, %v3302_v18 }
0x1036   :  { %v10110_v42 = vpop.eup %10109 }
0x1037   :  { %v3304_v7 = vmul.f32 %v7814_v40, %v3290_v5  ;;  %v3323_v62 = vpack.c.bf16 %v3316_v10, %v3315_v20  ;;  %v3291_v33 = vmul.f32 %v10110_v42, %v11462_v49  ;;  %v3317_v41 = vadd.f32 %v7815_v4, %v3303_v16 }
0x1038   :  { %v10112_v1 = vpop.eup %10111 }
0x1039   :  { %v3318_v2 = vadd.f32 %v7815_v4, %v3304_v7  ;;  %9033 = vmatprep.mubr.msk.bf16.mxu1 %vm85_vm0, %v3323_v62  ;;  %v3292_v59 = vmul.f32 %v10112_v1, %v11468_v24  ;;  %v3305_v43 = vmul.f32 %v7814_v40, %v3291_v33 }
0x103a   :  { %v10114_v46 = vpop.eup %10113 }
0x103b   :  { %v3293_v63 = vmul.f32 %v10114_v46, %v11474_v0  ;;  %v3324_v50 = vpack.c.bf16 %v3318_v2, %v3317_v41  ;;  %v3306_v39 = vmul.f32 %v7814_v40, %v3292_v59  ;;  %v3319_v52 = vadd.f32 %v7815_v4, %v3305_v43  ;;  %v9915_v0 = vld [vmem:[%s12909_s17] sm:$0xff]  }
0x103c   :  { %v10116_v21 = vpop.eup %10115  ;;  %9041 = vmatprep.subr.bf16.mxu1 %v9915_v0 }
0x103d   :  { %v3294_v13 = vmul.f32 %v10116_v21, %v11480_v31  ;;  %9034 = vmatmul.mubr.msk.bf16.vlgmr.msra.gmra.mrb[88].mxu1 %vm85_vm0, %v3324_v50  ;;  %v3320_v49 = vadd.f32 %v7815_v4, %v3306_v39  ;;  %v3307_v8 = vmul.f32 %v7814_v40, %v3293_v63  ;;  %v9916_v31 = vld [vmem:[%s12909_s17 + $0x8] sm:$0xff]  }
0x103e   :  { %9042 = vmatpush3.bf16.msra.mxu1 %v9915_v0 }
0x103f   :  { %v3325_v55 = vpack.c.bf16 %v3320_v49, %v3319_v52  ;;  %v3308_v23 = vmul.f32 %v7814_v40, %v3294_v13  ;;  %v3321_v9 = vadd.f32 %v7815_v4, %v3307_v8  ;;  %9043 = vmatprep.subr.bf16.mxu1 %v9916_v31 }
0x1041   :  { %9037 = vmatprep.mubr.msk.bf16.mxu1 %vm85_vm0, %v3325_v55  ;;  %v3322_v24 = vadd.f32 %v7815_v4, %v3308_v23  ;;  %v12918_v23 = vmov -1.0  }
0x1042   :  { %9044 = vmatpush3.bf16.msra.mxu1 %v9916_v31 }
0x1043   :  { %v3326_v27 = vpack.c.bf16 %v3322_v24, %v3321_v9  ;;  %9045 = vmatprep.subr.bf16.mxu1 %v9917_v25 }
0x1045   :  { %9038 = vmatmul.mubr.msk.bf16.gmra.mrb[92].mxu1 %vm85_vm0, %v3326_v27 }
0x1046   :  { %9046 = vmatpush3.bf16.msra.mxu1 %v9917_v25 }
0x1047   :  { %9047 = vmatprep.subr.bf16.mxu1 %v9918_v38 }
0x104a   :  { %9048 = vmatpush3.bf16.msra.mxu1 %v9918_v38 }
0x104b   :  { %9049 = vmatprep.subr.bf16.mxu1 %v9919_v61 }
0x104e   :  { %9050 = vmatpush3.bf16.msra.mxu1 %v9919_v61 }
0x104f   :  { %9051 = vmatprep.subr.bf16.mxu1 %v9920_v26 }
0x1052   :  { %9052 = vmatpush3.bf16.msra.mxu1 %v9920_v26 }
0x1053   :  { %9053 = vmatprep.subr.bf16.mxu1 %v9921_v30 }
0x1056   :  { %9054 = vmatpush3.bf16.msra.mxu1 %v9921_v30 }
0x1057   :  { %9055 = vmatprep.subr.bf16.mxu1 %v9922_v36 }
0x105a   :  { %9056 = vmatpush3.bf16.msra.mxu1 %v9922_v36 }
0x1110   :  { %v9035_v17 = vpop.f32.mrb[88].mxu1 }
0x1111   :  { %v3405_v19 = vadd.f32 %v9035_v17, %v11540_v32  ;;  %v3396_v34 = vpop.f32.mrb[89].mxu1 }
0x1112   :  { %v3397_v6 = vadd.f32 %v11540_v32, %v3396_v34  ;;  %v9036_v15 = vpop.f32.mrb[90].mxu1 }
0x1113   :  { %v3437_v44 = vmul.f32 0.70710677, %v3405_v19  ;;  %v3408_v40 = vadd.f32 %v9036_v15, %v11540_v32  ;;  %v3399_v51 = vpop.f32.mrb[91].mxu1  ;;  %v11577_v49 = vmul.f32 0.5, %v3405_v19 }
0x1114   :  { %v11545_v60 = vmul.f32 0.70710677, %v3397_v6  ;;  %v11550_v45 = vadd.f32 %v11540_v32, %v3399_v51  ;;  %v11579_v8 = vmul.f32 0.5, %v3397_v6 }
0x1115   :  { %v3461_v48 = vand.u32 2147483647, %v3437_v44  ;;  %v11547_v56 = vmul.f32 0.70710677, %v3408_v40  ;;  %vm3445_vm5 = vcmp.ge.f32.partialorder %v3437_v44, 0.0  ;;  %v11585_v27 = vmul.f32 0.5, %v3408_v40 }
0x1116   :  { %v3459_v14 = vand.u32 2147483647, %v11545_v60  ;;  %v11555_v18 = vmul.f32 0.70710677, %v11550_v45  ;;  %v11583_v9 = vsel %vm3445_vm5, 1.0, %v12918_v23  ;;  %vm3443_vm6 = vcmp.ge.f32.partialorder %v11545_v60, 0.0 }
0x1117   :  { %v3469_v47 = vmul.f32 0.3275911, %v3461_v48  ;;  %v3462_v4 = vand.u32 2147483647, %v11547_v56  ;;  %v3573_v1 = vsub.f32 0.0, %v3461_v48  ;;  %vm3446_vm7 = vcmp.ge.f32.partialorder %v11547_v56, 0.0 }
0x1118   :  { %v3467_v29 = vmul.f32 0.3275911, %v3459_v14  ;;  %v9039_v58 = vpop.f32.mrb[92].mxu1  ;;  %v3460_v10 = vand.u32 2147483647, %v11555_v18  ;;  %v3571_v46 = vsub.f32 0.0, %v3459_v14 }
0x1119   :  { %v3477_v12 = vadd.f32 1.0, %v3469_v47  ;;  %v3470_v5 = vmul.f32 0.3275911, %v3462_v4  ;;  %v3412_v20 = vpop.f32.mrb[93].mxu1  ;;  %v11559_v41 = vadd.f32 %v9039_v58, %v11540_v32  ;;  %v3581_v39 = vmul.f32 %v3573_v1, %v3461_v48 }
0x111a   :  { %v3475_v16 = vadd.f32 1.0, %v3467_v29  ;;  %v9040_v42 = vpop.f32.mrb[94].mxu1  ;;  %v3468_v33 = vmul.f32 0.3275911, %v3460_v10  ;;  %v11562_v2 = vadd.f32 %v11540_v32, %v3412_v20  ;;  %v3574_v21 = vsub.f32 0.0, %v3462_v4 }
0x111b   :  { %10117 = vrcp.f32 %v3477_v12  ;;  %v3478_v7 = vadd.f32 1.0, %v3470_v5  ;;  %v3415_v62 = vpop.f32.mrb[95].mxu1  ;;  %v11565_v43 = vadd.f32 %v9040_v42, %v11540_v32  ;;  %v11568_v63 = vmul.f32 0.70710677, %v11559_v41 }
0x111c   :  { %10119 = vrcp.f32 %v3475_v16  ;;  %v3476_v59 = vadd.f32 1.0, %v3468_v33  ;;  %v11571_v50 = vmul.f32 0.70710677, %v11562_v2  ;;  %v3579_v24 = vmul.f32 %v3571_v46, %v3459_v14 }
0x111d   :  { %10121 = vrcp.f32 %v3478_v7  ;;  %v3465_v13 = vand.u32 2147483647, %v11568_v63  ;;  %v11575_v52 = vmul.f32 0.70710677, %v11565_v43  ;;  %v3572_v25 = vsub.f32 0.0, %v3460_v10 }
0x111e   :  { %10123 = vrcp.f32 %v3476_v59  ;;  %v3463_v55 = vand.u32 2147483647, %v11571_v50  ;;  %v3591_v36 = vmul.f32 1.442695, %v3581_v39  ;;  %v3582_v17 = vmul.f32 %v3574_v21, %v3462_v4 }
0x111f   :  { %v3473_v0 = vmul.f32 0.3275911, %v3465_v13  ;;  %v11591_v61 = vand.u32 2147483647, %v11575_v52  ;;  %v11599_v44 = vadd.f32 %v11540_v32, %v3415_v62  ;;  %v3587_v51 = vmul.f32 1.442695, %v3579_v24 }
0x1120   :  { %v3471_v38 = vmul.f32 0.3275911, %v3463_v55  ;;  %v3580_v47 = vmul.f32 %v3572_v25, %v3460_v10  ;;  %v3577_v58 = vsub.f32 0.0, %v3465_v13  ;;  %v3593_v5 = vmul.f32 1.442695, %v3582_v17 }
0x1121   :  { %v3481_v19 = vadd.f32 1.0, %v3473_v0  ;;  %v3474_v15 = vmul.f32 0.3275911, %v11591_v61  ;;  %v3575_v20 = vsub.f32 0.0, %v3463_v55  ;;  %v11610_v42 = vmul.f32 0.70710677, %v11599_v44 }
0x1122   :  { %v3479_v6 = vadd.f32 1.0, %v3471_v38  ;;  %v11616_v33 = vsel %vm3443_vm6, 1.0, %v12918_v23  ;;  %v3589_v59 = vmul.f32 1.442695, %v3580_v47  ;;  %v3585_v24 = vmul.f32 %v3577_v58, %v3465_v13 }
0x1123   :  { %10125 = vrcp.f32 %v3481_v19  ;;  %v3482_v29 = vadd.f32 1.0, %v3474_v15  ;;  %v11624_v25 = vsel %vm3446_vm7, 1.0, %v12918_v23  ;;  %v3583_v38 = vmul.f32 %v3575_v20, %v3463_v55 }
0x1124   :  { %10127 = vrcp.f32 %v3479_v6  ;;  %v11627_v60 = vand.u32 2147483647, %v11610_v42  ;;  %v3578_v13 = vsub.f32 0.0, %v11591_v61  ;;  %vm3444_vm8 = vcmp.ge.f32.partialorder %v11555_v18, 0.0 }
0x1125   :  { %v11587_v31 = vpop.eup %10117  ;;  %10129 = vpow2.f32 %v3591_v36  ;;  %vm3449_vm9 = vcmp.ge.f32.partialorder %v11568_v63, 0.0  ;;  %vm3450_vm10 = vcmp.ge.f32.partialorder %v11575_v52, 0.0  ;;  %vm3447_vm11 = vcmp.ge.f32.partialorder %v11571_v50, 0.0 }
0x1126   :  { %v11593_v26 = vpop.eup %10119  ;;  %v3501_v30 = vmul.f32 1.0614054, %v11587_v31  ;;  %10131 = vrcp.f32 %v3482_v29  ;;  %v3595_v29 = vmul.f32 1.442695, %v3583_v38  ;;  %vm3448_vm12 = vcmp.ge.f32.partialorder %v11610_v42, 0.0 }
0x1127   :  { %v3499_v34 = vmul.f32 1.0614054, %v11593_v26  ;;  %v11602_v48 = vpop.eup %10121  ;;  %10133 = vpow2.f32 %v3587_v51  ;;  %v3431_v50 = vmul.f32 0.5, %v11562_v2  ;;  %v7823_v42 = vld [vmem:[%s12910_s18] ss:$0 sm:$0xff] }
0x1128   :  { %v3509_v40 = vadd.f32 -1.4531521, %v3501_v30  ;;  %v3502_v12 = vmul.f32 1.0614054, %v11602_v48  ;;  %v11606_v16 = vpop.eup %10123  ;;  %10135 = vpow2.f32 %v3593_v5 }
0x1129   :  { %v3507_v14 = vadd.f32 -1.4531521, %v3499_v34  ;;  %v3500_v10 = vmul.f32 1.0614054, %v11606_v16  ;;  %10137 = vpow2.f32 %v3589_v59  ;;  %v3472_v34 = vmul.f32 0.3275911, %v11627_v60 }
0x112a   :  { %v3517_v4 = vmul.f32 %v11587_v31, %v3509_v40  ;;  %v3510_v62 = vadd.f32 -1.4531521, %v3502_v12  ;;  %v3599_v40 = vmul.f32 1.442695, %v3585_v24 }
0x112b   :  { %v3515_v32 = vmul.f32 %v11593_v26, %v3507_v14  ;;  %v3508_v21 = vadd.f32 -1.4531521, %v3500_v10  ;;  %v3586_v10 = vmul.f32 %v3578_v13, %v11591_v61 }
0x112c   :  { %v3525_v7 = vadd.f32 1.4214138, %v3517_v4  ;;  %v3518_v39 = vmul.f32 %v11602_v48, %v3510_v62  ;;  %v3480_v4 = vadd.f32 1.0, %v3472_v34 }
0x112d   :  { %v3523_v1 = vadd.f32 1.4214138, %v3515_v32  ;;  %v3516_v17 = vmul.f32 %v11606_v16, %v3508_v21  ;;  %v11632_v6 = vpop.eup %10125 }
0x112e   :  { %v3533_v46 = vmul.f32 %v11587_v31, %v3525_v7  ;;  %v3526_v36 = vadd.f32 1.4214138, %v3518_v39  ;;  %v11637_v51 = vpop.eup %10127  ;;  %v3505_v47 = vmul.f32 1.0614054, %v11632_v6  ;;  %10139 = vrcp.f32 %v3480_v4 }
0x112f   :  { %v3531_v0 = vmul.f32 %v11593_v26, %v3523_v1  ;;  %v3524_v15 = vadd.f32 1.4214138, %v3516_v17  ;;  %v10130_v12 = vpop.eup %10129  ;;  %v3503_v20 = vmul.f32 1.0614054, %v11637_v51  ;;  %10141 = vpow2.f32 %v3599_v40 }
0x1130   :  { %v3541_v30 = vadd.f32 -0.28449672, %v3533_v46  ;;  %v3534_v55 = vmul.f32 %v11602_v48, %v3526_v36  ;;  %v3513_v62 = vadd.f32 -1.4531521, %v3505_v47  ;;  %v11644_v1 = vpop.eup %10131 }
0x1131   :  { %v3539_v19 = vadd.f32 -0.28449672, %v3531_v0  ;;  %v3532_v5 = vmul.f32 %v11606_v16, %v3524_v15  ;;  %v3511_v21 = vadd.f32 -1.4531521, %v3503_v20  ;;  %v10134_v24 = vpop.eup %10133 }
0x1132   :  { %v3549_v56 = vmul.f32 %v11587_v31, %v3541_v30  ;;  %v3542_v32 = vadd.f32 -0.28449672, %v3534_v55  ;;  %v3521_v38 = vmul.f32 %v11632_v6, %v3513_v62  ;;  %v3506_v30 = vmul.f32 1.0614054, %v11644_v1  ;;  %v10136_v55 = vpop.eup %10135 }
0x1133   :  { %v3547_v14 = vmul.f32 %v11593_v26, %v3539_v19  ;;  %v3540_v39 = vadd.f32 -0.28449672, %v3532_v5  ;;  %v3519_v19 = vmul.f32 %v11637_v51, %v3511_v21  ;;  %v10138_v4 = vpop.eup %10137 }
0x1134   :  { %v3557_v58 = vadd.f32 0.2548296, %v3549_v56  ;;  %v3550_v46 = vmul.f32 %v11602_v48, %v3542_v32  ;;  %v3514_v34 = vadd.f32 -1.4531521, %v3506_v30  ;;  %v3601_v56 = vmul.f32 1.442695, %v3586_v10 }
0x1135   :  { %v3555_v7 = vadd.f32 0.2548296, %v3547_v14  ;;  %v3548_v61 = vmul.f32 %v11606_v16, %v3540_v39  ;;  %v3527_v47 = vadd.f32 1.4214138, %v3519_v19  ;;  %v3576_v32 = vsub.f32 0.0, %v11627_v60 }
0x1136   :  { %v3565_v59 = vmul.f32 %v11587_v31, %v3557_v58  ;;  %v3558_v17 = vadd.f32 0.2548296, %v3550_v46  ;;  %v3529_v31 = vadd.f32 1.4214138, %v3521_v38  ;;  %10143 = vpow2.f32 %v3601_v56 }
0x1137   :  { %v3563_v0 = vmul.f32 %v11593_v26, %v3555_v7  ;;  %v3556_v26 = vadd.f32 0.2548296, %v3548_v61  ;;  %v3535_v62 = vmul.f32 %v11637_v51, %v3527_v47  ;;  %10145 = vpow2.f32 %v3595_v29 }
0x1138   :  { %v3605_v36 = vmul.f32 %v10130_v12, %v3565_v59  ;;  %v3566_v14 = vmul.f32 %v11602_v48, %v3558_v17  ;;  %v3537_v58 = vmul.f32 %v11632_v6, %v3529_v31  ;;  %v3522_v12 = vmul.f32 %v11644_v1, %v3514_v34 }
0x1139   :  { %v3603_v13 = vmul.f32 %v10134_v24, %v3563_v0  ;;  %v3564_v7 = vmul.f32 %v11606_v16, %v3556_v26  ;;  %v3452_v48 = vsel %vm3444_vm8, 1.0, %v12918_v23  ;;  %v3543_v24 = vadd.f32 -0.28449672, %v3535_v62  ;;  %v10140_v0 = vpop.eup %10139 }
0x113a   :  { %v3613_v15 = vsub.f32 1.0, %v3605_v36  ;;  %v3606_v20 = vmul.f32 %v10136_v55, %v3566_v14  ;;  %v3545_v10 = vadd.f32 -0.28449672, %v3537_v58  ;;  %v3530_v59 = vadd.f32 1.4214138, %v3522_v12  ;;  %v10142_v61 = vpop.eup %10141 }
0x113b   :  { %v3611_v40 = vsub.f32 1.0, %v3603_v13  ;;  %v3604_v21 = vmul.f32 %v10138_v4, %v3564_v7  ;;  %v3584_v38 = vmul.f32 %v3576_v32, %v11627_v60  ;;  %v3551_v17 = vmul.f32 %v11637_v51, %v3543_v24 }
0x113c   :  { %v3621_v5 = vmul.f32 %v3613_v15, %v11583_v9  ;;  %v3614_v39 = vsub.f32 1.0, %v3606_v20  ;;  %v3553_v9 = vmul.f32 %v11632_v6, %v3545_v10  ;;  %v3538_v16 = vmul.f32 %v11644_v1, %v3530_v59 }
0x113d   :  { %v3619_v46 = vmul.f32 %v3611_v40, %v11616_v33  ;;  %v3612_v36 = vsub.f32 1.0, %v3604_v21  ;;  %v3504_v13 = vmul.f32 1.0614054, %v10140_v0  ;;  %v3428_v56 = vmul.f32 0.5, %v11550_v45 }
0x113e   :  { %v3629_v30 = vadd.f32 1.0, %v3621_v5  ;;  %v3622_v18 = vmul.f32 %v3614_v39, %v11624_v25  ;;  %v3561_v19 = vadd.f32 0.2548296, %v3553_v9  ;;  %v3546_v33 = vadd.f32 -0.28449672, %v3538_v16 }
0x113f   :  { %v3627_v31 = vadd.f32 1.0, %v3619_v46  ;;  %v3620_v55 = vmul.f32 %v3612_v36, %v3452_v48  ;;  %v3559_v15 = vadd.f32 0.2548296, %v3551_v17  ;;  %v3512_v14 = vadd.f32 -1.4531521, %v3504_v13 }
0x1140   :  { %v3630_v34 = vadd.f32 1.0, %v3622_v18  ;;  %v3569_v29 = vmul.f32 %v11632_v6, %v3561_v19  ;;  %v3554_v60 = vmul.f32 %v11644_v1, %v3546_v33  ;;  %v3637_v25 = vmul.f32 %v3629_v30, %v11577_v49  ;;  %v10144_v6 = vpop.eup %10143 }
0x1141   :  { %v3628_v47 = vadd.f32 1.0, %v3620_v55  ;;  %v3597_v4 = vmul.f32 1.442695, %v3584_v38  ;;  %v3520_v12 = vmul.f32 %v10140_v0, %v3512_v14  ;;  %v3635_v45 = vmul.f32 %v3627_v31, %v11579_v8  ;;  %v10146_v10 = vpop.eup %10145 }
0x1142   :  { %v3638_v26 = vmul.f32 %v3630_v34, %v11585_v27  ;;  %v3609_v40 = vmul.f32 %v10142_v61, %v3569_v29  ;;  %v3562_v58 = vadd.f32 0.2548296, %v3554_v60  ;;  %v3567_v7 = vmul.f32 %v11637_v51, %v3559_v15 }
0x1143   :  { %v3636_v5 = vmul.f32 %v3628_v47, %v3428_v56  ;;  %v3528_v49 = vadd.f32 1.4214138, %v3520_v12  ;;  %v3457_v27 = vsel %vm3449_vm9, 1.0, %v12918_v23  ;;  %10147 = vpow2.f32 %v3597_v4  ;;  %v7832_v47 = vld [vmem:[%s12911_s19] ss:$0 sm:$0xff] }
0x1144   :  { %v3644_v32 = vpack.c.bf16 %v3638_v26, %v3637_v25  ;;  %v3617_v20 = vsub.f32 1.0, %v3609_v40  ;;  %v3570_v62 = vmul.f32 %v11644_v1, %v3562_v58  ;;  %v3607_v8 = vmul.f32 %v10146_v10, %v3567_v7 }
0x1145   :  { %v3643_v48 = vpack.c.bf16 %v3636_v5, %v3635_v45  ;;  %v3536_v46 = vmul.f32 %v10140_v0, %v3528_v49  ;;  %v3458_v51 = vsel %vm3450_vm10, 1.0, %v12918_v23  ;;  %v3433_v16 = vmul.f32 0.5, %v11559_v41 }
0x1146   :  { %v3625_v63 = vmul.f32 %v3617_v20, %v3457_v27  ;;  %v3610_v59 = vmul.f32 %v10144_v6, %v3570_v62  ;;  %v3434_v38 = vmul.f32 0.5, %v11565_v43  ;;  %v3615_v30 = vsub.f32 1.0, %v3607_v8 }
0x1147   :  { %9057 = vmatprep.mubr.bf16.mxu1 %v3643_v48  ;;  %v3544_v21 = vadd.f32 -0.28449672, %v3536_v46  ;;  %v3455_v33 = vsel %vm3447_vm11, 1.0, %v12918_v23  ;;  %v3456_v41 = vsel %vm3448_vm12, 1.0, %v12918_v23  ;;  %v3432_v29 = vmul.f32 0.5, %v11599_v44 }
0x1148   :  { %v3618_v39 = vsub.f32 1.0, %v3610_v59  ;;  %9058 = vmatmul.mubr.bf16.vlgmr.msra.gmra.mrb[96].mxu1 %v3644_v32  ;;  %v3633_v24 = vadd.f32 1.0, %v3625_v63  ;;  %v3623_v13 = vmul.f32 %v3615_v30, %v3455_v33 }
0x1149   :  { %v3552_v9 = vmul.f32 %v10140_v0, %v3544_v21 }
0x114a   :  { %v3626_v1 = vmul.f32 %v3618_v39, %v3458_v51  ;;  %v3641_v36 = vmul.f32 %v3633_v24, %v3433_v16  ;;  %v3631_v43 = vadd.f32 1.0, %v3623_v13 }
0x114b   :  { %v3560_v18 = vadd.f32 0.2548296, %v3552_v9 }
0x114c   :  { %v3634_v52 = vadd.f32 1.0, %v3626_v1  ;;  %v3639_v60 = vmul.f32 %v3631_v43, %v3431_v50 }
0x114d   :  { %v3568_v61 = vmul.f32 %v10140_v0, %v3560_v18  ;;  %v10148_v19 = vpop.eup %10147 }
0x114e   :  { %v3642_v17 = vmul.f32 %v3634_v52, %v3434_v38 }
0x114f   :  { %v3608_v31 = vmul.f32 %v10148_v19, %v3568_v61 }
0x1150   :  { %v3646_v34 = vpack.c.bf16 %v3642_v17, %v3641_v36 }
0x1151   :  { %v3616_v56 = vsub.f32 1.0, %v3608_v31 }
0x1153   :  { %v3624_v55 = vmul.f32 %v3616_v56, %v3456_v41 }
0x1155   :  { %v3632_v15 = vadd.f32 1.0, %v3624_v55 }
0x1157   :  { %v3640_v0 = vmul.f32 %v3632_v15, %v3432_v29 }
0x1159   :  { %v3645_v14 = vpack.c.bf16 %v3640_v0, %v3639_v60 }
0x115b   :  { %9061 = vmatprep.mubr.bf16.mxu1 %v3645_v14 }
0x115c   :  { %9062 = vmatmul.mubr.bf16.gmra.mrb[100].mxu1 %v3646_v34 }
0x121b   :  { %v9059_v25 = vpop.f32.mrb[96].mxu1 }
0x121c   :  { %v3761_v26 = vadd.f32 %v9059_v25, %v7823_v42  ;;  %v3752_v4 = vpop.f32.mrb[97].mxu1 }
0x121d   :  { %v3753_v2 = vadd.f32 %v7823_v42, %v3752_v4  ;;  %v9060_v40 = vpop.f32.mrb[98].mxu1 }
0x121e   :  { %v3764_v44 = vadd.f32 %v9060_v40, %v7823_v42  ;;  %v3755_v58 = vpop.f32.mrb[99].mxu1  ;;  %v3792_v12 = vmul.f32 %v7832_v47, %v3761_v26 }
0x121f   :  { %v3790_v45 = vmul.f32 %v7832_v47, %v3753_v2  ;;  %v3756_v32 = vadd.f32 %v7823_v42, %v3755_v58 }
0x1220   :  { %v3793_v6 = vmul.f32 %v7832_v47, %v3764_v44  ;;  %v11699_v7 = vadd.f32 %v3792_v12, %v11393_v22 }
0x1221   :  { %v11696_v5 = vadd.f32 %v3790_v45, %v11388_v53  ;;  %v3791_v20 = vmul.f32 %v7832_v47, %v3756_v32 }
0x1222   :  { %v11707_v27 = vadd.f32 %v3793_v6, %v11405_v37  ;;  %v3816_v53 = vsel %vm85_vm0, %v11699_v7, 0.0 }
0x1223   :  { %v11702_v62 = vadd.f32 %v3791_v20, %v11398_v35  ;;  %v3810_v49 = vsel %vm85_vm0, %v11696_v5, 0.0 }
0x1224   :  { %3811 = vadd.xlane.f32.xlu0 %v3810_v49  ;;  %v3819_v22 = vsel %vm85_vm0, %v11707_v27, 0.0 }
0x1225   :  { %v3813_v48 = vsel %vm85_vm0, %v11702_v62, 0.0 }
0x1226   :  { %3814 = vadd.xlane.f32.xlu1 %v3813_v48 }
0x1228   :  { %3817 = vadd.xlane.f32.xlu0 %v3816_v53 }
0x122a   :  { %3820 = vadd.xlane.f32.xlu1 %v3819_v22 }
0x122f   :  { %v9063_v35 = vpop.f32.mrb[100].mxu1 }
0x1230   :  { %v3777_v10 = vadd.f32 %v9063_v35, %v7823_v42  ;;  %v3768_v63 = vpop.f32.mrb[101].mxu1 }
0x1231   :  { %v3769_v59 = vadd.f32 %v7823_v42, %v3768_v63  ;;  %v9064_v46 = vpop.f32.mrb[102].mxu1  ;;  %v9923_v63 = vld [vmem:[%s12927_s25 + $0x40] sm:$0xff]  }
0x1232   :  { %v3780_v8 = vadd.f32 %v9064_v46, %v7823_v42  ;;  %v3771_v37 = vpop.f32.mrb[103].mxu1  ;;  %v3796_v39 = vmul.f32 %v7832_v47, %v3777_v10  ;;  %9065 = vmatprep.subr.bf16.mxu0 %v9923_v63  ;;  %v9924_v46 = vld [vmem:[%s12927_s25 + $0x48] sm:$0xff]  }
0x1233   :  { %v3794_v21 = vmul.f32 %v7832_v47, %v3769_v59  ;;  %v3772_v51 = vadd.f32 %v7823_v42, %v3771_v37  ;;  %v9925_v59 = vld [vmem:[%s12900_s8 + $0x40] sm:$0xff]   ;;  %9066 = vmatpush3.bf16.msra.mxu0 %v9923_v63 }
0x1234   :  { %v3797_v1 = vmul.f32 %v7832_v47, %v3780_v8  ;;  %v11719_v16 = vadd.f32 %v3796_v39, %v11421_v54  ;;  %9089 = vmatprep.subr.bf16.mxu1 %v9925_v59  ;;  %v9926_v8 = vld [vmem:[%s12900_s8 + $0x48] sm:$0xff]   ;;  %9067 = vmatprep.subr.bf16.mxu0 %v9924_v46  ;;  %v9927_v37 = vld [vmem:[%s12898_s6 + $0x40] sm:$0xff]  }
0x1235   :  { %v11716_v24 = vadd.f32 %v3794_v21, %v11414_v3  ;;  %v3795_v9 = vmul.f32 %v7832_v47, %v3772_v51  ;;  %9090 = vmatpush3.bf16.msra.mxu1 %v9925_v59 }
0x1236   :  { %v11727_v52 = vadd.f32 %v3797_v1, %v11433_v11  ;;  %v3828_v3 = vsel %vm85_vm0, %v11719_v16, 0.0  ;;  %9091 = vmatprep.subr.bf16.mxu1 %v9926_v8 }
0x1237   :  { %v11722_v38 = vadd.f32 %v3795_v9, %v11426_v57  ;;  %v3822_v30 = vsel %vm85_vm0, %v11716_v24, 0.0  ;;  %9068 = vmatpush3.bf16.msra.mxu0 %v9924_v46 }
0x1238   :  { %3823 = vadd.xlane.f32.xlu0 %v3822_v30  ;;  %12933 = vst [vmem:[#allocation5_spill] sm:$0xff] %v11727_v52  ;;  %v3831_v54 = vsel %vm85_vm0, %v11727_v52, 0.0  ;;  %9077 = vmatprep.subr.bf16.mxu0 %v9927_v37 }
0x1239   :  { %v3825_v18 = vsel %vm85_vm0, %v11722_v38, 0.0  ;;  %9092 = vmatpush3.bf16.msra.mxu1 %v9926_v8 }
0x123a   :  { %3826 = vadd.xlane.f32.xlu1 %v3825_v18 }
0x123c   :  { %3829 = vadd.xlane.f32.xlu0 %v3828_v3 }
0x123e   :  { %3832 = vadd.xlane.f32.xlu1 %v3831_v54 }
0x12b1   :  { %v3812_v57 = vpop.xlane.xlu0 %3811 }
0x12b2   :  { %v3834_v36 = vmul.f32 0.03125, %v3812_v57 }
0x12b3   :  { %v3815_v17 = vpop.xlane.xlu1 %3814 }
0x12b4   :  { %v11736_v61 = vsub.f32 %v11696_v5, %v3834_v36  ;;  %v3835_v11 = vmul.f32 0.03125, %v3815_v17 }
0x12b5   :  { %v3818_v19 = vpop.xlane.xlu0 %3817 }
0x12b6   :  { %v11739_v33 = vsub.f32 %v11702_v62, %v3835_v11  ;;  %v3836_v13 = vmul.f32 0.03125, %v3818_v19  ;;  %v3850_v31 = vmul.f32 %v11736_v61, %v11736_v61  ;;  %v7835_v19 = vld [vmem:[%s12928_s22 + $0x1] ss:$0 sm:$0xff] }
0x12b7   :  { %v3821_v34 = vpop.xlane.xlu1 %3820 }
0x12b8   :  { %v11744_v56 = vsub.f32 %v11699_v7, %v3836_v13  ;;  %v3837_v41 = vmul.f32 0.03125, %v3821_v34  ;;  %v3858_v43 = vsel %vm85_vm0, %v3850_v31, 0.0  ;;  %v3851_v55 = vmul.f32 %v11739_v33, %v11739_v33  ;;  %v7836_v34 = vld [vmem:[%s12929_s3 + $0x1] ss:$0 sm:$0xff] }
0x12b9   :  { %3859 = vadd.xlane.f32.xlu0 %v3858_v43 }
0x12ba   :  { %v11750_v50 = vsub.f32 %v11707_v27, %v3837_v41  ;;  %v3861_v29 = vsel %vm85_vm0, %v3851_v55, 0.0  ;;  %v3852_v15 = vmul.f32 %v11744_v56, %v11744_v56 }
0x12bb   :  { %3862 = vadd.xlane.f32.xlu1 %v3861_v29 }
0x12bc   :  { %v3864_v60 = vsel %vm85_vm0, %v3852_v15, 0.0  ;;  %v3853_v0 = vmul.f32 %v11750_v50, %v11750_v50 }
0x12bd   :  { %3865 = vadd.xlane.f32.xlu0 %v3864_v60 }
0x12be   :  { %v3867_v14 = vsel %vm85_vm0, %v3853_v0, 0.0 }
0x12bf   :  { %3868 = vadd.xlane.f32.xlu1 %v3867_v14 }
0x12c5   :  { %v3824_v42 = vpop.xlane.xlu0 %3823 }
0x12c6   :  { %v3838_v25 = vmul.f32 0.03125, %v3824_v42 }
0x12c7   :  { %v3827_v26 = vpop.xlane.xlu1 %3826 }
0x12c8   :  { %v11760_v47 = vsub.f32 %v11716_v24, %v3838_v25  ;;  %v3839_v4 = vmul.f32 0.03125, %v3827_v26 }
0x12c9   :  { %v3830_v2 = vpop.xlane.xlu0 %3829 }
0x12ca   :  { %v11763_v40 = vsub.f32 %v11722_v38, %v3839_v4  ;;  %v3840_v44 = vmul.f32 0.03125, %v3830_v2  ;;  %v3854_v58 = vmul.f32 %v11760_v47, %v11760_v47 }
0x12cb   :  { %v3833_v12 = vpop.xlane.xlu1 %3832 }
0x12cc   :  { %v11768_v45 = vsub.f32 %v11719_v16, %v3840_v44  ;;  %v3841_v32 = vmul.f32 0.03125, %v3833_v12  ;;  %v3870_v6 = vsel %vm85_vm0, %v3854_v58, 0.0  ;;  %v3855_v20 = vmul.f32 %v11763_v40, %v11763_v40 }
0x12cd   :  { %3871 = vadd.xlane.f32.xlu0 %v3870_v6 }
0x12ce   :  { %v11774_v49 = vsub.f32 %v11727_v52, %v3841_v32  ;;  %v3873_v48 = vsel %vm85_vm0, %v3855_v20, 0.0  ;;  %v3856_v53 = vmul.f32 %v11768_v45, %v11768_v45 }
0x12cf   :  { %3874 = vadd.xlane.f32.xlu1 %v3873_v48 }
0x12d0   :  { %v3876_v22 = vsel %vm85_vm0, %v3856_v53, 0.0  ;;  %v3857_v35 = vmul.f32 %v11774_v49, %v11774_v49 }
0x12d1   :  { %3877 = vadd.xlane.f32.xlu0 %v3876_v22 }
0x12d2   :  { %v3879_v10 = vsel %vm85_vm0, %v3857_v35, 0.0  ;;  %v9928_v35 = vld [vmem:[%s12898_s6 + $0x48] sm:$0xff]  }
0x12d3   :  { %3880 = vadd.xlane.f32.xlu1 %v3879_v10 }
0x1346   :  { %v3860_v39 = vpop.xlane.xlu0 %3859 }
0x1347   :  { %v3882_v21 = vmul.f32 0.03125, %v3860_v39 }
0x1348   :  { %v3863_v51 = vpop.xlane.xlu1 %3862 }
0x1349   :  { %v3890_v1 = vadd.f32 1e-05, %v3882_v21  ;;  %v3883_v9 = vmul.f32 0.03125, %v3863_v51 }
0x134a   :  { %v3866_v30 = vpop.xlane.xlu0 %3865 }
0x134b   :  { %10149 = vrsqrt.f32 %v3890_v1  ;;  %v3891_v18 = vadd.f32 1e-05, %v3883_v9  ;;  %v3884_v3 = vmul.f32 0.03125, %v3866_v30 }
0x134c   :  { %v3869_v54 = vpop.xlane.xlu1 %3868 }
0x134d   :  { %10151 = vrsqrt.f32 %v3891_v18  ;;  %v3892_v57 = vadd.f32 1e-05, %v3884_v3  ;;  %v3885_v36 = vmul.f32 0.03125, %v3869_v54 }
0x134f   :  { %10153 = vrsqrt.f32 %v3892_v57  ;;  %v3893_v17 = vadd.f32 1e-05, %v3885_v36 }
0x1351   :  { %10155 = vrsqrt.f32 %v3893_v17 }
0x1355   :  { %v10150_v11 = vpop.eup %10149 }
0x1356   :  { %v3906_v13 = vmul.f32 %v10150_v11, %v11736_v61  ;;  %v7866_v11 = vld [vmem:[%s12901_s9 + $0x4] ss:$0 sm:$0xff] }
0x1357   :  { %v10152_v31 = vpop.eup %10151 }
0x1358   :  { %v3920_v41 = vmul.f32 %v7835_v19, %v3906_v13  ;;  %v3907_v43 = vmul.f32 %v10152_v31, %v11739_v33 }
0x1359   :  { %v10154_v55 = vpop.eup %10153 }
0x135a   :  { %v3921_v29 = vmul.f32 %v7835_v19, %v3907_v43  ;;  %v3908_v15 = vmul.f32 %v10154_v55, %v11744_v56  ;;  %v3934_v0 = vadd.f32 %v7836_v34, %v3920_v41  ;;  %v3872_v14 = vpop.xlane.xlu0 %3871 }
0x135b   :  { %v10156_v60 = vpop.eup %10155  ;;  %v3886_v61 = vmul.f32 0.03125, %v3872_v14 }
0x135c   :  { %v3935_v42 = vadd.f32 %v7836_v34, %v3921_v29  ;;  %v3922_v25 = vmul.f32 %v7835_v19, %v3908_v15  ;;  %v3909_v26 = vmul.f32 %v10156_v60, %v11750_v50  ;;  %v3875_v4 = vpop.xlane.xlu1 %3874 }
0x135d   :  { %v3894_v58 = vadd.f32 1e-05, %v3886_v61  ;;  %v3887_v12 = vmul.f32 0.03125, %v3875_v4 }
0x135e   :  { %v11808_v2 = vpack.c.bf16 %v3935_v42, %v3934_v0  ;;  %v3923_v44 = vmul.f32 %v7835_v19, %v3909_v26  ;;  %v3878_v32 = vpop.xlane.xlu0 %3877  ;;  %v3936_v33 = vadd.f32 %v7836_v34, %v3922_v25 }
0x135f   :  { %10157 = vrsqrt.f32 %v3894_v58  ;;  %v3888_v20 = vmul.f32 0.03125, %v3878_v32  ;;  %v3895_v56 = vadd.f32 1e-05, %v3887_v12 }
0x1360   :  { %v3937_v6 = vadd.f32 %v7836_v34, %v3923_v44  ;;  %9069 = vmatprep.mubr.msk.bf16.mxu0 %vm85_vm0, %v11808_v2  ;;  %9093 = vmatprep.mubr.msk.bf16.mxu1 %vm85_vm0, %v11808_v2  ;;  %v3881_v50 = vpop.xlane.xlu1 %3880 }
0x1361   :  { %v3896_v53 = vadd.f32 1e-05, %v3888_v20  ;;  %v3889_v22 = vmul.f32 0.03125, %v3881_v50  ;;  %10159 = vrsqrt.f32 %v3895_v56 }
0x1362   :  { %v11814_v48 = vpack.c.bf16 %v3937_v6, %v3936_v33 }
0x1363   :  { %10161 = vrsqrt.f32 %v3896_v53  ;;  %v3897_v10 = vadd.f32 1e-05, %v3889_v22 }
0x1364   :  { %9070 = vmatmul.mubr.msk.bf16.vlgmr.msra.gmra.mrb[80].mxu0 %vm85_vm0, %v11814_v48  ;;  %9094 = vmatmul.mubr.msk.bf16.vlgmr.msra.gmra.mrb[104].mxu1 %vm85_vm0, %v11814_v48 }
0x1365   :  { %9078 = vmatpush3.bf16.msra.mxu0 %v9927_v37  ;;  %10163 = vrsqrt.f32 %v3897_v10 }
0x1366   :  { %9079 = vmatprep.subr.bf16.mxu0 %v9928_v35 }
0x1369   :  { %9080 = vmatpush3.bf16.msra.mxu0 %v9928_v35  ;;  %v10158_v63 = vpop.eup %10157 }
0x136a   :  { %v3910_v59 = vmul.f32 %v10158_v63, %v11760_v47 }
0x136b   :  { %v10160_v46 = vpop.eup %10159 }
0x136c   :  { %v3924_v39 = vmul.f32 %v7835_v19, %v3910_v59  ;;  %v3911_v21 = vmul.f32 %v10160_v46, %v11763_v40  ;;  %v7842_v40 = vld [vmem:[%s12897_s5 + $0x4] ss:$0 sm:$0xff] }
0x136d   :  { %v10162_v8 = vpop.eup %10161 }
0x136e   :  { %v3912_v51 = vmul.f32 %v10162_v8, %v11768_v45  ;;  %v3925_v9 = vmul.f32 %v7835_v19, %v3911_v21  ;;  %v3938_v3 = vadd.f32 %v7836_v34, %v3924_v39  ;;  %v7854_v21 = vld [vmem:[%s12899_s7 + $0x4] ss:$0 sm:$0xff] }
0x136f   :  { %v10164_v1 = vpop.eup %10163 }
0x1370   :  { %v3926_v30 = vmul.f32 %v7835_v19, %v3912_v51  ;;  %v3913_v18 = vmul.f32 %v10164_v1, %v11774_v49  ;;  %v3939_v37 = vadd.f32 %v7836_v34, %v3925_v9 }
0x1372   :  { %v3927_v54 = vmul.f32 %v7835_v19, %v3913_v18  ;;  %v11827_v57 = vpack.c.bf16 %v3939_v37, %v3938_v3  ;;  %v3940_v36 = vadd.f32 %v7836_v34, %v3926_v30 }
0x1374   :  { %v3941_v17 = vadd.f32 %v7836_v34, %v3927_v54  ;;  %9073 = vmatprep.mubr.msk.bf16.mxu0 %vm85_vm0, %v11827_v57  ;;  %9097 = vmatprep.mubr.msk.bf16.mxu1 %vm85_vm0, %v11827_v57 }
0x1376   :  { %v11833_v47 = vpack.c.bf16 %v3941_v17, %v3940_v36 }
0x1378   :  { %9074 = vmatmul.mubr.msk.bf16.gmra.mrb[84].mxu0 %vm85_vm0, %v11833_v47  ;;  %9098 = vmatmul.mubr.msk.bf16.gmra.mrb[108].mxu1 %vm85_vm0, %v11833_v47 }
0x1379   :  { %9081 = vmatprep.mubr.msk.bf16.mxu0 %vm85_vm0, %v11808_v2 }
0x1380   :  { %9082 = vmatmul.mubr.msk.bf16.vlgmr.msra.gmra.mrb[88].mxu0 %vm85_vm0, %v11814_v48 }
0x1381   :  { %9085 = vmatprep.mubr.msk.bf16.mxu0 %vm85_vm0, %v11827_v57 }
0x1388   :  { %9086 = vmatmul.mubr.msk.bf16.gmra.mrb[92].mxu0 %vm85_vm0, %v11833_v47 }
0x1437   :  { %v9071_v45 = vpop.f32.mrb[80].mxu0  ;;  %v9095_v49 = vpop.f32.mrb[104].mxu1 }
0x1438   :  { %v11853_v19 = vadd.f32 %v9071_v45, %v7842_v40  ;;  %v4017_v13 = vpop.f32.mrb[81].mxu0  ;;  %v4197_v31 = vpop.f32.mrb[105].mxu1  ;;  %v4206_v55 = vadd.f32 %v9095_v49, %v7866_v11 }
0x1439   :  { %v4018_v34 = vadd.f32 %v7842_v40, %v4017_v13  ;;  %v9072_v41 = vpop.f32.mrb[82].mxu0  ;;  %v9096_v43 = vpop.f32.mrb[106].mxu1  ;;  %v4198_v14 = vadd.f32 %v7866_v11, %v4197_v31 }
0x143a   :  { %v11855_v29 = vadd.f32 %v9072_v41, %v7842_v40  ;;  %v4209_v15 = vadd.f32 %v9096_v43, %v7866_v11  ;;  %v4020_v60 = vpop.f32.mrb[83].mxu0  ;;  %v4200_v0 = vpop.f32.mrb[107].mxu1 }
0x143b   :  { %v11857_v42 = vadd.f32 %v7842_v40, %v4020_v60  ;;  %v4201_v25 = vadd.f32 %v7866_v11, %v4200_v0  ;;  %9117 = vmatprep.mubr.msk.f32.mxu0 %vm499_vm1, %v4018_v34 }
0x143c   :  { %v9697_v26 = vpack.c.bf16 %v4209_v15, %v4206_v55  ;;  %v9929_v55 = vld [vmem:[%s12898_s6 + $0x50] sm:$0xff]   ;;  %v9930_v15 = vld [vmem:[%s12898_s6 + $0x58] sm:$0xff]  }
0x143d   :  { %v9693_v61 = vpack.c.bf16 %v4201_v25, %v4198_v14  ;;  %v11914_v14 = vld [vmem:[%s12932_s4] sm:$0xff] }
0x143f   :  { %9694 = vmatprep.subr.bf16.mxu1 %v9693_v61 }
0x1440   :  { %9696 = vmatpush3.bf16.msra.mxu1 %v9693_v61 }
0x1441   :  { %9698 = vmatprep.subr.bf16.mxu1 %v9697_v26 }
0x1444   :  { %9700 = vmatpush3.bf16.msra.mxu1 %v9697_v26 }
0x144b   :  { %v9075_v4 = vpop.f32.mrb[84].mxu0  ;;  %v9099_v44 = vpop.f32.mrb[108].mxu1 }
0x144c   :  { %v4042_v58 = vadd.f32 %v9075_v4, %v7842_v40  ;;  %v4033_v12 = vpop.f32.mrb[85].mxu0  ;;  %v4213_v32 = vpop.f32.mrb[109].mxu1  ;;  %v4222_v56 = vadd.f32 %v9099_v44, %v7866_v11  ;;  %v11926_v4 = vld [vmem:[%s12932_s4 + $0x18] sm:$0xff] }
0x144d   :  { %v4034_v33 = vadd.f32 %v7842_v40, %v4033_v12  ;;  %v9076_v6 = vpop.f32.mrb[86].mxu0  ;;  %v9100_v20 = vpop.f32.mrb[110].mxu1  ;;  %v4214_v10 = vadd.f32 %v7866_v11, %v4213_v32  ;;  %v11934_v12 = vld [vmem:[%s12932_s4 + $0x10] sm:$0xff] }
0x144e   :  { %v4045_v50 = vadd.f32 %v9076_v6, %v7842_v40  ;;  %v4225_v53 = vadd.f32 %v9100_v20, %v7866_v11  ;;  %v4036_v22 = vpop.f32.mrb[87].mxu0  ;;  %v4216_v35 = vpop.f32.mrb[111].mxu1 }
0x144f   :  { %v4037_v63 = vadd.f32 %v7842_v40, %v4036_v22  ;;  %v4217_v59 = vadd.f32 %v7866_v11, %v4216_v35  ;;  %v11954_v22 = vld [vmem:[%s12932_s4 + $0x20] sm:$0xff] }
0x1450   :  { %v9705_v46 = vpack.c.bf16 %v4225_v53, %v4222_v56  ;;  %v11946_v56 = vld [vmem:[%s12932_s4 + $0x28] sm:$0xff] }
0x1451   :  { %v9701_v8 = vpack.c.bf16 %v4217_v59, %v4214_v10 }
0x1453   :  { %v9083_v39 = vpop.f32.mrb[88].mxu0  ;;  %9702 = vmatprep.subr.bf16.mxu1 %v9701_v8 }
0x1454   :  { %v4107_v51 = vpop.f32.mrb[89].mxu0  ;;  %9704 = vmatpush3.bf16.msra.mxu1 %v9701_v8  ;;  %v4116_v9 = vadd.f32 %v9083_v39, %v7854_v21 }
0x1455   :  { %v9084_v1 = vpop.f32.mrb[90].mxu0  ;;  %9706 = vmatprep.subr.bf16.mxu1 %v9705_v46  ;;  %v4108_v3 = vadd.f32 %v7854_v21, %v4107_v51 }
0x1456   :  { %v4119_v30 = vadd.f32 %v9084_v1, %v7854_v21  ;;  %v4110_v18 = vpop.f32.mrb[91].mxu0 }
0x1457   :  { %v4111_v37 = vadd.f32 %v7854_v21, %v4110_v18 }
0x1458   :  { %v9675_v54 = vpack.c.bf16 %v4119_v30, %v4116_v9  ;;  %9708 = vmatpush3.bf16.msra.mxu1 %v9705_v46  ;;  %v11966_v46 = vld [vmem:[%s12932_s4 + $0x38] sm:$0xff]  ;;  %v7915_v30 = vld [vmem:[%s12899_s7 + $0x5] ss:$0 sm:$0xff] }
0x1459   :  { %v9669_v36 = vpack.c.bf16 %v4111_v37, %v4108_v3 }
0x145b   :  { %v9087_v17 = vpop.f32.mrb[92].mxu0  ;;  %9671 = vmatprep.subr.msk.bf16.mxu0 %vm10668_vm2, %v9669_v36 }
0x145c   :  { %v4123_v40 = vpop.f32.mrb[93].mxu0  ;;  %9674 = vmatpush3.bf16.xpose.msk.msra.mxu0 %vm10668_vm2, %v9669_v36  ;;  %v4132_v49 = vadd.f32 %v9087_v17, %v7854_v21 }
0x145d   :  { %v9088_v45 = vpop.f32.mrb[94].mxu0  ;;  %9677 = vmatprep.subr.msk.bf16.mxu0 %vm10668_vm2, %v9675_v54  ;;  %v4124_v31 = vadd.f32 %v7854_v21, %v4123_v40 }
0x145e   :  { %v4135_v11 = vadd.f32 %v9088_v45, %v7854_v21  ;;  %v4126_v13 = vpop.f32.mrb[95].mxu0 }
0x145f   :  { %v4127_v34 = vadd.f32 %v7854_v21, %v4126_v13  ;;  %v11974_v21 = vld [vmem:[%s12932_s4 + $0x30] sm:$0xff] }
0x1460   :  { %v9687_v41 = vpack.c.bf16 %v4135_v11, %v4132_v49 }
0x1461   :  { %v9681_v43 = vpack.c.bf16 %v4127_v34, %v4124_v31 }
0x1464   :  { %9680 = vmatpush3.bf16.xpose.msk.msra.mxu0 %vm10668_vm2, %v9675_v54 }
0x1465   :  { %9683 = vmatprep.subr.msk.bf16.mxu0 %vm10668_vm2, %v9681_v43 }
0x146c   :  { %9686 = vmatpush3.bf16.xpose.msk.msra.mxu0 %vm10668_vm2, %v9681_v43 }
0x146d   :  { %9689 = vmatprep.subr.msk.bf16.mxu0 %vm10668_vm2, %v9687_v41 }
0x1474   :  { %9692 = vmatpush3.bf16.xpose.msk.msra.mxu0 %vm10668_vm2, %v9687_v41 }
0x1475   :  { %9169 = vmatprep.subr.bf16.mxu0 %v9929_v55 }
0x147b   :  { %9118 = vmatmul.mubr.msk.f32.vlgmr.msra.gmra.mrb[96].mxu0 %vm499_vm1, %v11857_v42 }
0x147c   :  { %9120 = vmatprep.mubr.msk.f32.mxu0 %vm499_vm1, %v11853_v19  ;;  %9170 = vmatpush3.bf16.msra.mxu0 %v9929_v55 }
0x147d   :  { %9171 = vmatprep.subr.bf16.mxu0 %v9930_v15 }
0x147f   :  { %9121 = vmatmul.mubr.msk.f32.gmra.mrb[98].mxu0 %vm499_vm1, %v11855_v29  ;;  %v11906_v29 = vld [vmem:[%s12932_s4 + $0x8] sm:$0xff] }
0x1480   :  { %9123 = vmatprep.mubr.msk.f32.mxu0 %vm499_vm1, %v4034_v33  ;;  %9172 = vmatpush3.bf16.msra.mxu0 %v9930_v15 }
0x1483   :  { %9124 = vmatmul.mubr.msk.f32.gmra.mrb[100].mxu0 %vm499_vm1, %v4037_v63 }
0x1484   :  { %9126 = vmatprep.mubr.msk.f32.mxu0 %vm499_vm1, %v4042_v58 }
0x1487   :  { %9127 = vmatmul.mubr.msk.f32.gmra.mrb[102].mxu0 %vm499_vm1, %v4045_v50 }
0x1488   :  { %9173 = vmatprep.mubr.msk.bf16.mxu0 %vm85_vm0, %v11808_v2 }
0x148b   :  { %9174 = vmatmul.mubr.msk.bf16.vlgmr.msra.gmra.mrb[104].mxu0 %vm85_vm0, %v11814_v48 }
0x148c   :  { %9177 = vmatprep.mubr.msk.bf16.mxu0 %vm85_vm0, %v11827_v57 }
0x1493   :  { %9178 = vmatmul.mubr.msk.bf16.gmra.mrb[108].mxu0 %vm85_vm0, %v11833_v47 }
0x154e   :  { %v9119_v19 = vpop.f32.mrb[96].mxu0 }
0x154f   :  { %v11909_v60 = vadd.f32 %v11906_v29, %v9119_v19  ;;  %v4342_v0 = vpop.f32.mrb[97].mxu0 }
0x1550   :  { %v11917_v42 = vadd.f32 %v11914_v14, %v4342_v0 }
0x1551   :  { %v4384_v25 = vsel %vm653_vm3, %v11909_v60, -inf }
0x1552   :  { %4385 = vmax.xlane.f32.xlu1 %v4384_v25  ;;  %v9122_v26 = vpop.f32.mrb[98].mxu0  ;;  %v4381_v61 = vsel %vm653_vm3, %v11917_v42, -inf }
0x1553   :  { %v11929_v44 = vadd.f32 %v11926_v4, %v9122_v26  ;;  %v4352_v58 = vpop.f32.mrb[99].mxu0  ;;  %4382 = vmax.xlane.f32.xlu0 %v4381_v61 }
0x1554   :  { %v11937_v32 = vadd.f32 %v11934_v12, %v4352_v58 }
0x1555   :  { %v4390_v33 = vsel %vm653_vm3, %v11929_v44, -inf }
0x1556   :  { %4391 = vmax.xlane.f32.xlu1 %v4390_v33  ;;  %v9125_v6 = vpop.f32.mrb[100].mxu0  ;;  %v4387_v20 = vsel %vm653_vm3, %v11937_v32, -inf }
0x1557   :  { %v11949_v50 = vadd.f32 %v11946_v56, %v9125_v6  ;;  %4388 = vmax.xlane.f32.xlu0 %v4387_v20  ;;  %v4362_v53 = vpop.f32.mrb[101].mxu0 }
0x1558   :  { %v11957_v35 = vadd.f32 %v11954_v22, %v4362_v53 }
0x1559   :  { %v4396_v10 = vsel %vm653_vm3, %v11949_v50, -inf }
0x155a   :  { %4397 = vmax.xlane.f32.xlu1 %v4396_v10  ;;  %v9128_v63 = vpop.f32.mrb[102].mxu0  ;;  %v4393_v59 = vsel %vm653_vm3, %v11957_v35, -inf }
0x155b   :  { %v11969_v8 = vadd.f32 %v11966_v46, %v9128_v63  ;;  %v4372_v39 = vpop.f32.mrb[103].mxu0  ;;  %4394 = vmax.xlane.f32.xlu0 %v4393_v59 }
0x155c   :  { %v11977_v51 = vadd.f32 %v11974_v21, %v4372_v39 }
0x155d   :  { %v4402_v1 = vsel %vm653_vm3, %v11969_v8, -inf }
0x155e   :  { %4403 = vmax.xlane.f32.xlu1 %v4402_v1  ;;  %v9175_v9 = vpop.f32.mrb[104].mxu0  ;;  %v4399_v18 = vsel %vm653_vm3, %v11977_v51, -inf }
0x155f   :  { %v4753_v3 = vpop.f32.mrb[105].mxu0  ;;  %4400 = vmax.xlane.f32.xlu0 %v4399_v18  ;;  %v4762_v54 = vadd.f32 %v9175_v9, %v7915_v30 }
0x1560   :  { %v9176_v37 = vpop.f32.mrb[106].mxu0  ;;  %v4754_v40 = vadd.f32 %v7915_v30, %v4753_v3 }
0x1561   :  { %v4765_v36 = vadd.f32 %v9176_v37, %v7915_v30  ;;  %v4756_v17 = vpop.f32.mrb[107].mxu0 }
0x1562   :  { %v4757_v45 = vadd.f32 %v7915_v30, %v4756_v17 }
0x1563   :  { %v9715_v49 = vpack.c.bf16 %v4765_v36, %v4762_v54 }
0x1564   :  { %v9709_v11 = vpack.c.bf16 %v4757_v45, %v4754_v40 }
0x1566   :  { %v9179_v13 = vpop.f32.mrb[108].mxu0  ;;  %9711 = vmatprep.subr.msk.bf16.mxu0 %vm10668_vm2, %v9709_v11 }
0x1567   :  { %v4769_v31 = vpop.f32.mrb[109].mxu0  ;;  %9714 = vmatpush3.bf16.xpose.msk.msra.mxu0 %vm10668_vm2, %v9709_v11  ;;  %v4778_v41 = vadd.f32 %v9179_v13, %v7915_v30 }
0x1568   :  { %v9180_v34 = vpop.f32.mrb[110].mxu0  ;;  %9717 = vmatprep.subr.msk.bf16.mxu0 %vm10668_vm2, %v9715_v49  ;;  %v4770_v15 = vadd.f32 %v7915_v30, %v4769_v31 }
0x1569   :  { %v4781_v43 = vadd.f32 %v9180_v34, %v7915_v30  ;;  %v4772_v55 = vpop.f32.mrb[111].mxu0 }
0x156a   :  { %v4773_v19 = vadd.f32 %v7915_v30, %v4772_v55 }
0x156b   :  { %v9727_v0 = vpack.c.bf16 %v4781_v43, %v4778_v41 }
0x156c   :  { %v9721_v25 = vpack.c.bf16 %v4773_v19, %v4770_v15 }
0x156f   :  { %9720 = vmatpush3.bf16.xpose.msk.msra.mxu0 %vm10668_vm2, %v9715_v49 }
0x1570   :  { %9723 = vmatprep.subr.msk.bf16.mxu0 %vm10668_vm2, %v9721_v25 }
0x1577   :  { %9726 = vmatpush3.bf16.xpose.msk.msra.mxu0 %vm10668_vm2, %v9721_v25 }
0x1578   :  { %9729 = vmatprep.subr.msk.bf16.mxu0 %vm10668_vm2, %v9727_v0 }
0x157f   :  { %9732 = vmatpush3.bf16.xpose.msk.msra.mxu0 %vm10668_vm2, %v9727_v0  ;;  %v9931_v0 = vld [vmem:[%s12927_s25 + $0x50] sm:$0xff]  }
0x1580   :  { %9157 = vmatprep.subr.bf16.mxu1 %v9931_v0 }
0x15df   :  { %v4386_v26 = vpop.xlane.xlu1 %4385 }
0x15e0   :  { %v4406_v61 = vsub.f32 %v11909_v60, %v4386_v26  ;;  %v4383_v58 = vpop.xlane.xlu0 %4382 }
0x15e1   :  { %v4405_v33 = vsub.f32 %v11917_v42, %v4383_v58 }
0x15e2   :  { %v4415_v6 = vmul.f32 1.442695, %v4406_v61 }
0x15e3   :  { %v4413_v20 = vmul.f32 1.442695, %v4405_v33  ;;  %v4392_v53 = vpop.xlane.xlu1 %4391 }
0x15e4   :  { %10165 = vpow2.f32 %v4415_v6  ;;  %v4408_v10 = vsub.f32 %v11929_v44, %v4392_v53  ;;  %v4389_v63 = vpop.xlane.xlu0 %4388 }
0x15e5   :  { %10167 = vpow2.f32 %v4413_v20  ;;  %v4407_v59 = vsub.f32 %v11937_v32, %v4389_v63 }
0x15e6   :  { %v4419_v39 = vmul.f32 1.442695, %v4408_v10 }
0x15e7   :  { %v4417_v1 = vmul.f32 1.442695, %v4407_v59  ;;  %v4398_v9 = vpop.xlane.xlu1 %4397 }
0x15e8   :  { %10169 = vpow2.f32 %v4419_v39  ;;  %v4410_v30 = vsub.f32 %v11949_v50, %v4398_v9  ;;  %v4395_v60 = vpop.xlane.xlu0 %4394 }
0x15e9   :  { %10171 = vpow2.f32 %v4417_v1  ;;  %v4409_v42 = vsub.f32 %v11957_v35, %v4395_v60  ;;  %v9932_v1 = vld [vmem:[%s12927_s25 + $0x58] sm:$0xff]  }
0x15ea   :  { %v4423_v18 = vmul.f32 1.442695, %v4410_v30 }
0x15eb   :  { %v4421_v3 = vmul.f32 1.442695, %v4409_v42  ;;  %v4404_v37 = vpop.xlane.xlu1 %4403 }
0x15ec   :  { %10173 = vpow2.f32 %v4423_v18  ;;  %v4412_v44 = vsub.f32 %v11969_v8, %v4404_v37  ;;  %v4401_v54 = vpop.xlane.xlu0 %4400  ;;  %v9933_v18 = vld [vmem:[%s12900_s8 + $0x50] sm:$0xff]  }
0x15ed   :  { %10175 = vpow2.f32 %v4421_v3  ;;  %v4411_v32 = vsub.f32 %v11977_v51, %v4401_v54 }
0x15ee   :  { %v10166_v36 = vpop.eup %10165  ;;  %v4427_v17 = vmul.f32 1.442695, %v4412_v44 }
0x15ef   :  { %v10168_v40 = vpop.eup %10167  ;;  %v4425_v45 = vmul.f32 1.442695, %v4411_v32  ;;  %v4432_v50 = vsel %vm653_vm3, %v10166_v36, 0.0 }
0x15f0   :  { %10177 = vpow2.f32 %v4427_v17  ;;  %4433 = vadd.xlane.f32.xlu1 %v4432_v50  ;;  %v4429_v35 = vsel %vm653_vm3, %v10168_v40, 0.0  ;;  %v9935_v50 = vld [vmem:[%s12927_s25 + $0x60] sm:$0xff]  }
0x15f1   :  { %10179 = vpow2.f32 %v4425_v45  ;;  %4430 = vadd.xlane.f32.xlu0 %v4429_v35  ;;  %v9934_v45 = vld [vmem:[%s12900_s8 + $0x58] sm:$0xff]   ;;  %9269 = vmatprep.subr.bf16.mxu0 %v9935_v50 }
0x15f2   :  { %v10170_v49 = vpop.eup %10169 }
0x15f3   :  { %v10172_v11 = vpop.eup %10171  ;;  %v4438_v8 = vsel %vm653_vm3, %v10170_v49, 0.0 }
0x15f4   :  { %4439 = vadd.xlane.f32.xlu1 %v4438_v8  ;;  %v4435_v13 = vsel %vm653_vm3, %v10172_v11, 0.0 }
0x15f5   :  { %4436 = vadd.xlane.f32.xlu0 %v4435_v13 }
0x15f6   :  { %v10174_v51 = vpop.eup %10173 }
0x15f7   :  { %v10176_v31 = vpop.eup %10175  ;;  %v4444_v34 = vsel %vm653_vm3, %v10174_v51, 0.0 }
0x15f8   :  { %4445 = vadd.xlane.f32.xlu1 %v4444_v34  ;;  %v4441_v41 = vsel %vm653_vm3, %v10176_v31, 0.0 }
0x15f9   :  { %4442 = vadd.xlane.f32.xlu0 %v4441_v41 }
0x15fa   :  { %v10178_v43 = vpop.eup %10177 }
0x15fb   :  { %v10180_v55 = vpop.eup %10179  ;;  %v4450_v15 = vsel %vm653_vm3, %v10178_v43, 0.0 }
0x15fc   :  { %4451 = vadd.xlane.f32.xlu1 %v4450_v15  ;;  %v4447_v19 = vsel %vm653_vm3, %v10180_v55, 0.0 }
0x15fd   :  { %4448 = vadd.xlane.f32.xlu0 %v4447_v19  ;;  %v7903_v19 = vld [vmem:[%s12897_s5 + $0x5] ss:$0 sm:$0xff] }
0x167d   :  { %v4434_v25 = vpop.xlane.xlu1 %4433 }
0x167e   :  { %10181 = vrcp.f32 %v4434_v25  ;;  %v4431_v26 = vpop.xlane.xlu0 %4430 }
0x167f   :  { %10183 = vrcp.f32 %v4431_v26 }
0x1681   :  { %v4440_v61 = vpop.xlane.xlu1 %4439 }
0x1682   :  { %10185 = vrcp.f32 %v4440_v61  ;;  %v4437_v58 = vpop.xlane.xlu0 %4436 }
0x1683   :  { %10187 = vrcp.f32 %v4437_v58 }
0x1685   :  { %v4446_v33 = vpop.xlane.xlu1 %4445 }
0x1686   :  { %10189 = vrcp.f32 %v4446_v33  ;;  %v4443_v6 = vpop.xlane.xlu0 %4442 }
0x1687   :  { %10191 = vrcp.f32 %v4443_v6  ;;  %v9936_v6 = vld [vmem:[%s12927_s25 + $0x68] sm:$0xff]  }
0x1688   :  { %v10182_v20 = vpop.eup %10181 }
0x1689   :  { %v10184_v53 = vpop.eup %10183  ;;  %v4452_v10 = vpop.xlane.xlu1 %4451  ;;  %v4462_v39 = vmul.f32 %v10182_v20, %v10166_v36 }
0x168a   :  { %10193 = vrcp.f32 %v4452_v10  ;;  %v4449_v63 = vpop.xlane.xlu0 %4448  ;;  %v4461_v59 = vmul.f32 %v10184_v53, %v10168_v40 }
0x168b   :  { %10195 = vrcp.f32 %v4449_v63  ;;  %v9937_v63 = vld [vmem:[%s12898_s6 + $0x60] sm:$0xff]  }
0x168c   :  { %v10186_v9 = vpop.eup %10185  ;;  %9145 = vmatprep.mubr.msk.f32.mxu1 %vm653_vm3, %v4461_v59 }
0x168d   :  { %v10188_v30 = vpop.eup %10187  ;;  %9146 = vmatmul.mubr.msk.f32.vlgmr.msra.gmra.mrb[112].mxu1 %vm653_vm3, %v4462_v39  ;;  %v4464_v42 = vmul.f32 %v10186_v9, %v10170_v49 }
0x168e   :  { %9158 = vmatpush3.bf16.msra.mxu1 %v9931_v0  ;;  %v4463_v60 = vmul.f32 %v10188_v30, %v10172_v11 }
0x168f   :  { %9159 = vmatprep.subr.bf16.mxu1 %v9932_v1 }
0x1690   :  { %v10190_v3 = vpop.eup %10189  ;;  %9148 = vmatprep.mubr.msk.f32.mxu1 %vm653_vm3, %v4463_v60 }
0x1691   :  { %v10192_v37 = vpop.eup %10191  ;;  %9149 = vmatmul.mubr.msk.f32.gmra.mrb[114].mxu1 %vm653_vm3, %v4464_v42  ;;  %v4466_v54 = vmul.f32 %v10190_v3, %v10174_v51  ;;  %v7927_v3 = vld [vmem:[%s12901_s9 + $0x5] ss:$0 sm:$0xff] }
0x1692   :  { %v4465_v44 = vmul.f32 %v10192_v37, %v10176_v31  ;;  %9160 = vmatpush3.bf16.msra.mxu1 %v9932_v1 }
0x1693   :  { %9181 = vmatprep.subr.bf16.mxu1 %v9933_v18 }
0x1694   :  { %v10194_v32 = vpop.eup %10193  ;;  %9151 = vmatprep.mubr.msk.f32.mxu1 %vm653_vm3, %v4465_v44 }
0x1695   :  { %v10196_v36 = vpop.eup %10195  ;;  %9152 = vmatmul.mubr.msk.f32.gmra.mrb[116].mxu1 %vm653_vm3, %v4466_v54  ;;  %v4468_v40 = vmul.f32 %v10194_v32, %v10178_v43 }
0x1696   :  { %v4467_v17 = vmul.f32 %v10196_v36, %v10180_v55 }
0x1698   :  { %9154 = vmatprep.mubr.msk.f32.mxu1 %vm653_vm3, %v4467_v17 }
0x1699   :  { %9155 = vmatmul.mubr.msk.f32.gmra.mrb[118].mxu1 %vm653_vm3, %v4468_v40 }
0x169a   :  { %9161 = vmatprep.mubr.msk.bf16.mxu1 %vm85_vm0, %v11808_v2 }
0x169d   :  { %9162 = vmatmul.mubr.msk.bf16.vlgmr.msra.gmra.mrb[120].mxu1 %vm85_vm0, %v11814_v48 }
0x169e   :  { %9165 = vmatprep.mubr.msk.bf16.mxu1 %vm85_vm0, %v11827_v57  ;;  %9182 = vmatpush3.bf16.msra.mxu1 %v9933_v18 }
0x169f   :  { %9183 = vmatprep.subr.bf16.mxu1 %v9934_v45 }
0x16a2   :  { %9184 = vmatpush3.bf16.msra.mxu1 %v9934_v45  ;;  %v9938_v45 = vld [vmem:[%s12898_s6 + $0x68] sm:$0xff]  }
0x16a5   :  { %9166 = vmatmul.mubr.msk.bf16.gmra.mrb[124].mxu1 %vm85_vm0, %v11833_v47 }
0x16a6   :  { %9185 = vmatprep.mubr.msk.bf16.mxu1 %vm85_vm0, %v11808_v2 }
0x16ad   :  { %9186 = vmatmul.mubr.msk.bf16.vlgmr.msra.gmra.mrb[128].mxu1 %vm85_vm0, %v11814_v48 }
0x16ae   :  { %9189 = vmatprep.mubr.msk.bf16.mxu1 %vm85_vm0, %v11827_v57 }
0x16b5   :  { %9190 = vmatmul.mubr.msk.bf16.gmra.mrb[132].mxu1 %vm85_vm0, %v11833_v47 }
0x1760   :  { %v12057_v35 = vpop.f32.mrb[112].mxu1 }
0x1761   :  { %v12059_v49 = vpop.f32.mrb[113].mxu1 }
0x1764   :  { %v12063_v8 = vpop.f32.mrb[114].mxu1 }
0x1765   :  { %v12065_v13 = vpop.f32.mrb[115].mxu1 }
0x1768   :  { %v12069_v31 = vpop.f32.mrb[116].mxu1 }
0x1769   :  { %v12071_v34 = vpop.f32.mrb[117].mxu1 }
0x176c   :  { %v12075_v43 = vpop.f32.mrb[118].mxu1 }
0x176d   :  { %v12077_v55 = vpop.f32.mrb[119].mxu1 }
0x1770   :  { %v9163_v0 = vpop.f32.mrb[120].mxu1 }
0x1771   :  { %v4663_v25 = vpop.f32.mrb[121].mxu1  ;;  %v4672_v20 = vadd.f32 %v9163_v0, %v7903_v19 }
0x1772   :  { %v4664_v26 = vadd.f32 %v7903_v19, %v4663_v25  ;;  %v9164_v61 = vpop.f32.mrb[122].mxu1 }
0x1773   :  { %v4666_v58 = vpop.f32.mrb[123].mxu1  ;;  %v4675_v53 = vadd.f32 %v9164_v61, %v7903_v19 }
0x1774   :  { %v4667_v33 = vadd.f32 %v7903_v19, %v4666_v58  ;;  %9209 = vmatprep.mubr.msk.f32.mxu0 %vm499_vm1, %v4664_v26 }
0x1776   :  { %9210 = vmatmul.mubr.msk.f32.vlgmr.msra.gmra.mrb[112].mxu0 %vm499_vm1, %v4667_v33 }
0x1777   :  { %9212 = vmatprep.mubr.msk.f32.mxu0 %vm499_vm1, %v4672_v20  ;;  %9270 = vmatpush3.bf16.msra.mxu0 %v9935_v50 }
0x1778   :  { %v9167_v10 = vpop.f32.mrb[124].mxu1  ;;  %9271 = vmatprep.subr.bf16.mxu0 %v9936_v6 }
0x1779   :  { %v4679_v59 = vpop.f32.mrb[125].mxu1  ;;  %v4688_v60 = vadd.f32 %v9167_v10, %v7903_v19 }
0x177a   :  { %v4680_v39 = vadd.f32 %v7903_v19, %v4679_v59  ;;  %v9168_v1 = vpop.f32.mrb[126].mxu1  ;;  %9213 = vmatmul.mubr.msk.f32.gmra.mrb[114].mxu0 %vm499_vm1, %v4675_v53 }
0x177b   :  { %v4682_v9 = vpop.f32.mrb[127].mxu1  ;;  %9272 = vmatpush3.bf16.msra.mxu0 %v9936_v6  ;;  %v4691_v42 = vadd.f32 %v9168_v1, %v7903_v19 }
0x177c   :  { %v4683_v30 = vadd.f32 %v7903_v19, %v4682_v9  ;;  %9215 = vmatprep.mubr.msk.f32.mxu0 %vm499_vm1, %v4680_v39  ;;  %9281 = vmatprep.subr.bf16.mxu0 %v9937_v63 }
0x177e   :  { %9216 = vmatmul.mubr.msk.f32.gmra.mrb[116].mxu0 %vm499_vm1, %v4683_v30 }
0x177f   :  { %9218 = vmatprep.mubr.msk.f32.mxu0 %vm499_vm1, %v4688_v60 }
0x1780   :  { %v9187_v18 = vpop.f32.mrb[128].mxu1 }
0x1781   :  { %v4843_v37 = vpop.f32.mrb[129].mxu1  ;;  %v4852_v54 = vadd.f32 %v9187_v18, %v7927_v3 }
0x1782   :  { %v9188_v44 = vpop.f32.mrb[130].mxu1  ;;  %9219 = vmatmul.mubr.msk.f32.gmra.mrb[118].mxu0 %vm499_vm1, %v4691_v42  ;;  %v4844_v17 = vadd.f32 %v7927_v3, %v4843_v37 }
0x1783   :  { %v4855_v32 = vadd.f32 %v9188_v44, %v7927_v3  ;;  %v4846_v36 = vpop.f32.mrb[131].mxu1  ;;  %9273 = vmatprep.mubr.msk.bf16.mxu0 %vm85_vm0, %v11808_v2 }
0x1784   :  { %v4847_v40 = vadd.f32 %v7927_v3, %v4846_v36 }
0x1785   :  { %v9737_v50 = vpack.c.bf16 %v4855_v32, %v4852_v54 }
0x1786   :  { %v9733_v19 = vpack.c.bf16 %v4847_v40, %v4844_v17  ;;  %9274 = vmatmul.mubr.msk.bf16.vlgmr.msra.gmra.mrb[120].mxu0 %vm85_vm0, %v11814_v48 }
0x1787   :  { %9277 = vmatprep.mubr.msk.bf16.mxu0 %vm85_vm0, %v11827_v57  ;;  %9282 = vmatpush3.bf16.msra.mxu0 %v9937_v63 }
0x1788   :  { %v9191_v0 = vpop.f32.mrb[132].mxu1  ;;  %9734 = vmatprep.subr.bf16.mxu1 %v9733_v19  ;;  %9283 = vmatprep.subr.bf16.mxu0 %v9938_v45 }
0x1789   :  { %v4859_v25 = vpop.f32.mrb[133].mxu1  ;;  %9736 = vmatpush3.bf16.msra.mxu1 %v9733_v19  ;;  %v4868_v61 = vadd.f32 %v9191_v0, %v7927_v3 }
0x178a   :  { %v9192_v26 = vpop.f32.mrb[134].mxu1  ;;  %9738 = vmatprep.subr.bf16.mxu1 %v9737_v50  ;;  %v4860_v6 = vadd.f32 %v7927_v3, %v4859_v25 }
0x178b   :  { %v4871_v58 = vadd.f32 %v9192_v26, %v7927_v3  ;;  %v4862_v33 = vpop.f32.mrb[135].mxu1  ;;  %9284 = vmatpush3.bf16.msra.mxu0 %v9938_v45 }
0x178c   :  { %v4863_v20 = vadd.f32 %v7927_v3, %v4862_v33 }
0x178d   :  { %v9745_v53 = vpack.c.bf16 %v4871_v58, %v4868_v61  ;;  %9740 = vmatpush3.bf16.msra.mxu1 %v9737_v50  ;;  %v7972_v61 = vld [vmem:[%s12897_s5 + $0x6] ss:$0 sm:$0xff] }
0x178e   :  { %v9741_v10 = vpack.c.bf16 %v4863_v20, %v4860_v6  ;;  %9278 = vmatmul.mubr.msk.bf16.gmra.mrb[124].mxu0 %vm85_vm0, %v11833_v47 }
0x178f   :  { %9285 = vmatprep.mubr.msk.bf16.mxu0 %vm85_vm0, %v11808_v2 }
0x1790   :  { %9742 = vmatprep.subr.bf16.mxu1 %v9741_v10 }
0x1791   :  { %9744 = vmatpush3.bf16.msra.mxu1 %v9741_v10 }
0x1792   :  { %9746 = vmatprep.subr.bf16.mxu1 %v9745_v53 }
0x1795   :  { %9748 = vmatpush3.bf16.msra.mxu1 %v9745_v53 }
0x1796   :  { %9286 = vmatmul.mubr.msk.bf16.vlgmr.msra.gmra.mrb[128].mxu0 %vm85_vm0, %v11814_v48 }
0x1797   :  { %9289 = vmatprep.mubr.msk.bf16.mxu0 %vm85_vm0, %v11827_v57 }
0x179e   :  { %9290 = vmatmul.mubr.msk.bf16.gmra.mrb[132].mxu0 %vm85_vm0, %v11833_v47 }
0x1849   :  { %v9211_v63 = vpop.f32.mrb[112].mxu0 }
0x184a   :  { %v12121_v59 = vadd.f32 %v11906_v29, %v9211_v63  ;;  %v4988_v39 = vpop.f32.mrb[113].mxu0 }
0x184b   :  { %v12124_v1 = vadd.f32 %v11914_v14, %v4988_v39 }
0x184c   :  { %v5030_v9 = vsel %vm653_vm3, %v12121_v59, -inf }
0x184d   :  { %5031 = vmax.xlane.f32.xlu1 %v5030_v9  ;;  %v9214_v30 = vpop.f32.mrb[114].mxu0  ;;  %v5027_v60 = vsel %vm653_vm3, %v12124_v1, -inf }
0x184e   :  { %v12131_v42 = vadd.f32 %v11926_v4, %v9214_v30  ;;  %v4998_v18 = vpop.f32.mrb[115].mxu0  ;;  %5028 = vmax.xlane.f32.xlu0 %v5027_v60 }
0x184f   :  { %v12134_v3 = vadd.f32 %v11934_v12, %v4998_v18 }
0x1850   :  { %v5036_v37 = vsel %vm653_vm3, %v12131_v42, -inf }
0x1851   :  { %5037 = vmax.xlane.f32.xlu1 %v5036_v37  ;;  %v9217_v44 = vpop.f32.mrb[116].mxu0  ;;  %v5033_v54 = vsel %vm653_vm3, %v12134_v3, -inf  ;;  %v7984_v37 = vld [vmem:[%s12899_s7 + $0x6] ss:$0 sm:$0xff] }
0x1852   :  { %v12141_v32 = vadd.f32 %v11946_v56, %v9217_v44  ;;  %v5008_v36 = vpop.f32.mrb[117].mxu0  ;;  %5034 = vmax.xlane.f32.xlu0 %v5033_v54 }
0x1853   :  { %v12144_v17 = vadd.f32 %v11954_v22, %v5008_v36 }
0x1854   :  { %v5042_v40 = vsel %vm653_vm3, %v12141_v32, -inf }
0x1855   :  { %5043 = vmax.xlane.f32.xlu1 %v5042_v40  ;;  %v9220_v45 = vpop.f32.mrb[118].mxu0  ;;  %v5039_v50 = vsel %vm653_vm3, %v12144_v17, -inf }
0x1856   :  { %v12151_v19 = vadd.f32 %v11966_v46, %v9220_v45  ;;  %v5018_v0 = vpop.f32.mrb[119].mxu0  ;;  %5040 = vmax.xlane.f32.xlu0 %v5039_v50 }
0x1857   :  { %v12154_v25 = vadd.f32 %v11974_v21, %v5018_v0 }
0x1858   :  { %v5048_v26 = vsel %vm653_vm3, %v12151_v19, -inf }
0x1859   :  { %5049 = vmax.xlane.f32.xlu1 %v5048_v26  ;;  %v9275_v58 = vpop.f32.mrb[120].mxu0  ;;  %v5045_v33 = vsel %vm653_vm3, %v12154_v25, -inf }
0x185a   :  { %v5469_v6 = vpop.f32.mrb[121].mxu0  ;;  %5046 = vmax.xlane.f32.xlu0 %v5045_v33 }
0x185b   :  { %v5470_v20 = vadd.f32 %v7972_v61, %v5469_v6  ;;  %v9276_v53 = vpop.f32.mrb[122].mxu0 }
0x185c   :  { %v5472_v10 = vpop.f32.mrb[123].mxu0 }
0x185d   :  { %9321 = vmatprep.mubr.msk.f32.mxu0 %vm499_vm1, %v5470_v20 }
0x1861   :  { %v9279_v63 = vpop.f32.mrb[124].mxu0 }
0x1862   :  { %v5485_v39 = vpop.f32.mrb[125].mxu0 }
0x1863   :  { %v9280_v9 = vpop.f32.mrb[126].mxu0 }
0x1864   :  { %v5497_v30 = vadd.f32 %v9280_v9, %v7972_v61  ;;  %v5488_v60 = vpop.f32.mrb[127].mxu0 }
0x1869   :  { %v9287_v18 = vpop.f32.mrb[128].mxu0 }
0x186a   :  { %v5559_v44 = vpop.f32.mrb[129].mxu0  ;;  %v5568_v36 = vadd.f32 %v9287_v18, %v7984_v37 }
0x186b   :  { %v9288_v54 = vpop.f32.mrb[130].mxu0  ;;  %v5560_v50 = vadd.f32 %v7984_v37, %v5559_v44 }
0x186c   :  { %v5571_v40 = vadd.f32 %v9288_v54, %v7984_v37  ;;  %v5562_v45 = vpop.f32.mrb[131].mxu0 }
0x186d   :  { %v5563_v0 = vadd.f32 %v7984_v37, %v5562_v45 }
0x186e   :  { %v9755_v26 = vpack.c.bf16 %v5571_v40, %v5568_v36  ;;  %v9939_v40 = vld [vmem:[%s12927_s25 + $0x70] sm:$0xff]  }
0x186f   :  { %v9749_v33 = vpack.c.bf16 %v5563_v0, %v5560_v50  ;;  %v5481_v50 = vadd.f32 %v9276_v53, %v7972_v61  ;;  %v9941_v0 = vld [vmem:[%s12900_s8 + $0x70] sm:$0xff]   ;;  %v9942_v53 = vld [vmem:[%s12900_s8 + $0x78] sm:$0xff]  }
0x1871   :  { %v9291_v6 = vpop.f32.mrb[132].mxu0  ;;  %9751 = vmatprep.subr.msk.bf16.mxu0 %vm10668_vm2, %v9749_v33 }
0x1872   :  { %v5575_v20 = vpop.f32.mrb[133].mxu0  ;;  %9754 = vmatpush3.bf16.xpose.msk.msra.mxu0 %vm10668_vm2, %v9749_v33  ;;  %v5584_v23 = vadd.f32 %v9291_v6, %v7984_v37 }
0x1873   :  { %v9292_v9 = vpop.f32.mrb[134].mxu0  ;;  %9757 = vmatprep.subr.msk.bf16.mxu0 %vm10668_vm2, %v9755_v26  ;;  %v5576_v15 = vadd.f32 %v7984_v37, %v5575_v20 }
0x1874   :  { %v5587_v18 = vadd.f32 %v9292_v9, %v7984_v37  ;;  %v5578_v54 = vpop.f32.mrb[135].mxu0 }
0x1875   :  { %v5579_v44 = vadd.f32 %v7984_v37, %v5578_v54  ;;  %v5478_v37 = vadd.f32 %v9275_v58, %v7972_v61  ;;  %v5494_v58 = vadd.f32 %v9279_v63, %v7972_v61 }
0x1876   :  { %v9767_v45 = vpack.c.bf16 %v5587_v18, %v5584_v23  ;;  %v5473_v23 = vadd.f32 %v7972_v61, %v5472_v10  ;;  %v5489_v10 = vadd.f32 %v7972_v61, %v5488_v60 }
0x1877   :  { %v9761_v36 = vpack.c.bf16 %v5579_v44, %v5576_v15  ;;  %v9940_v15 = vld [vmem:[%s12927_s25 + $0x78] sm:$0xff]  }
0x187a   :  { %9760 = vmatpush3.bf16.xpose.msk.msra.mxu0 %vm10668_vm2, %v9755_v26  ;;  %v5486_v26 = vadd.f32 %v7972_v61, %v5485_v39 }
0x187b   :  { %9763 = vmatprep.subr.msk.bf16.mxu0 %vm10668_vm2, %v9761_v36 }
0x1882   :  { %9766 = vmatpush3.bf16.xpose.msk.msra.mxu0 %vm10668_vm2, %v9761_v36 }
0x1883   :  { %9769 = vmatprep.subr.msk.bf16.mxu0 %vm10668_vm2, %v9767_v45 }
0x188a   :  { %9772 = vmatpush3.bf16.xpose.msk.msra.mxu0 %vm10668_vm2, %v9767_v45 }
0x188b   :  { %9371 = vmatprep.subr.bf16.mxu0 %v9939_v40 }
0x1891   :  { %9322 = vmatmul.mubr.msk.f32.vlgmr.msra.gmra.mrb[136].mxu0 %vm499_vm1, %v5473_v23 }
0x1892   :  { %9324 = vmatprep.mubr.msk.f32.mxu0 %vm499_vm1, %v5478_v37  ;;  %9372 = vmatpush3.bf16.msra.mxu0 %v9939_v40 }
0x1893   :  { %9373 = vmatprep.subr.bf16.mxu0 %v9940_v15 }
0x1895   :  { %9325 = vmatmul.mubr.msk.f32.gmra.mrb[138].mxu0 %vm499_vm1, %v5481_v50 }
0x1896   :  { %9327 = vmatprep.mubr.msk.f32.mxu0 %vm499_vm1, %v5486_v26  ;;  %9374 = vmatpush3.bf16.msra.mxu0 %v9940_v15 }
0x1897   :  { %9395 = vmatprep.subr.bf16.mxu0 %v9941_v0 }
0x1899   :  { %9328 = vmatmul.mubr.msk.f32.gmra.mrb[140].mxu0 %vm499_vm1, %v5489_v10 }
0x189a   :  { %9330 = vmatprep.mubr.msk.f32.mxu0 %vm499_vm1, %v5494_v58 }
0x189d   :  { %9331 = vmatmul.mubr.msk.f32.gmra.mrb[142].mxu0 %vm499_vm1, %v5497_v30 }
0x189e   :  { %9375 = vmatprep.mubr.msk.bf16.mxu0 %vm85_vm0, %v11808_v2 }
0x18a1   :  { %9376 = vmatmul.mubr.msk.bf16.vlgmr.msra.gmra.mrb[144].mxu0 %vm85_vm0, %v11814_v48 }
0x18a2   :  { %9379 = vmatprep.mubr.msk.bf16.mxu0 %vm85_vm0, %v11827_v57  ;;  %9396 = vmatpush3.bf16.msra.mxu0 %v9941_v0 }
0x18a3   :  { %9397 = vmatprep.subr.bf16.mxu0 %v9942_v53 }
0x18a6   :  { %9398 = vmatpush3.bf16.msra.mxu0 %v9942_v53 }
0x18a9   :  { %9380 = vmatmul.mubr.msk.bf16.gmra.mrb[148].mxu0 %vm85_vm0, %v11833_v47 }
0x18aa   :  { %9399 = vmatprep.mubr.msk.bf16.mxu0 %vm85_vm0, %v11808_v2 }
0x18b1   :  { %9400 = vmatmul.mubr.msk.bf16.vlgmr.msra.gmra.mrb[152].mxu0 %vm85_vm0, %v11814_v48 }
0x18b2   :  { %9403 = vmatprep.mubr.msk.bf16.mxu0 %vm85_vm0, %v11827_v57 }
0x18b9   :  { %9404 = vmatmul.mubr.msk.bf16.gmra.mrb[156].mxu0 %vm85_vm0, %v11833_v47 }
0x18da   :  { %v5032_v61 = vpop.xlane.xlu1 %5031 }
0x18db   :  { %v5052_v63 = vsub.f32 %v12121_v59, %v5032_v61  ;;  %v5029_v39 = vpop.xlane.xlu0 %5028 }
0x18dc   :  { %v5051_v30 = vsub.f32 %v12124_v1, %v5029_v39 }
0x18dd   :  { %v5061_v60 = vmul.f32 1.442695, %v5052_v63 }
0x18de   :  { %v5059_v33 = vmul.f32 1.442695, %v5051_v30  ;;  %v5038_v6 = vpop.xlane.xlu1 %5037 }
0x18df   :  { %10197 = vpow2.f32 %v5061_v60  ;;  %v5054_v20 = vsub.f32 %v12131_v42, %v5038_v6  ;;  %v5035_v9 = vpop.xlane.xlu0 %5034 }
0x18e0   :  { %10199 = vpow2.f32 %v5059_v33  ;;  %v5053_v18 = vsub.f32 %v12134_v3, %v5035_v9 }
0x18e1   :  { %v5065_v54 = vmul.f32 1.442695, %v5054_v20 }
0x18e2   :  { %v5063_v44 = vmul.f32 1.442695, %v5053_v18  ;;  %v5044_v45 = vpop.xlane.xlu1 %5043 }
0x18e3   :  { %10201 = vpow2.f32 %v5065_v54  ;;  %v5056_v36 = vsub.f32 %v12141_v32, %v5044_v45  ;;  %v5041_v59 = vpop.xlane.xlu0 %5040 }
0x18e4   :  { %10203 = vpow2.f32 %v5063_v44  ;;  %v5055_v1 = vsub.f32 %v12144_v17, %v5041_v59 }
0x18e5   :  { %v5069_v40 = vmul.f32 1.442695, %v5056_v36 }
0x18e6   :  { %v5067_v23 = vmul.f32 1.442695, %v5055_v1  ;;  %v5050_v15 = vpop.xlane.xlu1 %5049 }
0x18e7   :  { %10205 = vpow2.f32 %v5069_v40  ;;  %v5058_v42 = vsub.f32 %v12151_v19, %v5050_v15  ;;  %v5047_v37 = vpop.xlane.xlu0 %5046 }
0x18e8   :  { %10207 = vpow2.f32 %v5067_v23  ;;  %v5057_v3 = vsub.f32 %v12154_v25, %v5047_v37 }
0x18e9   :  { %v12226_v50 = vpop.eup %10197  ;;  %v5073_v0 = vmul.f32 1.442695, %v5058_v42 }
0x18ea   :  { %v12228_v26 = vpop.eup %10199  ;;  %v5071_v32 = vmul.f32 1.442695, %v5057_v3  ;;  %v5078_v10 = vsel %vm653_vm3, %v12226_v50, 0.0 }
0x18eb   :  { %10209 = vpow2.f32 %v5073_v0  ;;  %5079 = vadd.xlane.f32.xlu1 %v5078_v10  ;;  %v5075_v17 = vsel %vm653_vm3, %v12228_v26, 0.0 }
0x18ec   :  { %10211 = vpow2.f32 %v5071_v32  ;;  %5076 = vadd.xlane.f32.xlu0 %v5075_v17 }
0x18ed   :  { %v12234_v19 = vpop.eup %10201 }
0x18ee   :  { %v12236_v58 = vpop.eup %10203  ;;  %v5084_v25 = vsel %vm653_vm3, %v12234_v19, 0.0 }
0x18ef   :  { %5085 = vadd.xlane.f32.xlu1 %v5084_v25  ;;  %v5081_v53 = vsel %vm653_vm3, %v12236_v58, 0.0 }
0x18f0   :  { %5082 = vadd.xlane.f32.xlu0 %v5081_v53 }
0x18f1   :  { %v12242_v61 = vpop.eup %10205 }
0x18f2   :  { %v12244_v63 = vpop.eup %10207  ;;  %v5090_v39 = vsel %vm653_vm3, %v12242_v61, 0.0 }
0x18f3   :  { %5091 = vadd.xlane.f32.xlu1 %v5090_v39  ;;  %v5087_v30 = vsel %vm653_vm3, %v12244_v63, 0.0 }
0x18f4   :  { %5088 = vadd.xlane.f32.xlu0 %v5087_v30 }
0x18f5   :  { %v12250_v60 = vpop.eup %10209 }
0x18f6   :  { %v12252_v33 = vpop.eup %10211  ;;  %v5096_v6 = vsel %vm653_vm3, %v12250_v60, 0.0 }
0x18f7   :  { %5097 = vadd.xlane.f32.xlu1 %v5096_v6  ;;  %v5093_v20 = vsel %vm653_vm3, %v12252_v33, 0.0 }
0x18f8   :  { %5094 = vadd.xlane.f32.xlu0 %v5093_v20 }
0x1964   :  { %v9323_v9 = vpop.f32.mrb[136].mxu0 }
0x1965   :  { %v12259_v18 = vadd.f32 %v11906_v29, %v9323_v9  ;;  %v5794_v54 = vpop.f32.mrb[137].mxu0 }
0x1966   :  { %v12262_v44 = vadd.f32 %v11914_v14, %v5794_v54 }
0x1967   :  { %v5836_v45 = vsel %vm653_vm3, %v12259_v18, -inf }
0x1968   :  { %5837 = vmax.xlane.f32.xlu1 %v5836_v45  ;;  %v9326_v36 = vpop.f32.mrb[138].mxu0  ;;  %v5833_v59 = vsel %vm653_vm3, %v12262_v44, -inf }
0x1969   :  { %v12269_v1 = vadd.f32 %v11926_v4, %v9326_v36  ;;  %v5804_v40 = vpop.f32.mrb[139].mxu0  ;;  %5834 = vmax.xlane.f32.xlu0 %v5833_v59 }
0x196a   :  { %v12272_v29 = vadd.f32 %v11934_v12, %v5804_v40 }
0x196b   :  { %v5842_v14 = vsel %vm653_vm3, %v12269_v1, -inf }
0x196c   :  { %5843 = vmax.xlane.f32.xlu1 %v5842_v14  ;;  %v9329_v23 = vpop.f32.mrb[140].mxu0  ;;  %v5839_v15 = vsel %vm653_vm3, %v12272_v29, -inf }
0x196d   :  { %v12279_v42 = vadd.f32 %v11946_v56, %v9329_v23  ;;  %v5814_v37 = vpop.f32.mrb[141].mxu0  ;;  %5840 = vmax.xlane.f32.xlu0 %v5839_v15 }
0x196e   :  { %v12282_v4 = vadd.f32 %v11954_v22, %v5814_v37  ;;  %v12297_v22 = vld [vmem:[%s12897_s5 + $0x7] ss:$0 sm:$0xff] }
0x196f   :  { %v5848_v12 = vsel %vm653_vm3, %v12279_v42, -inf }
0x1970   :  { %5849 = vmax.xlane.f32.xlu1 %v5848_v12  ;;  %v9332_v3 = vpop.f32.mrb[142].mxu0  ;;  %v5845_v0 = vsel %vm653_vm3, %v12282_v4, -inf }
0x1971   :  { %v12289_v32 = vadd.f32 %v11966_v46, %v9332_v3  ;;  %v5824_v10 = vpop.f32.mrb[143].mxu0  ;;  %5846 = vmax.xlane.f32.xlu0 %v5845_v0 }
0x1972   :  { %v12292_v56 = vadd.f32 %v11974_v21, %v5824_v10 }
0x1973   :  { %v5854_v17 = vsel %vm653_vm3, %v12289_v32, -inf }
0x1974   :  { %5855 = vmax.xlane.f32.xlu1 %v5854_v17  ;;  %v9377_v25 = vpop.f32.mrb[144].mxu0  ;;  %v5851_v53 = vsel %vm653_vm3, %v12292_v56, -inf }
0x1975   :  { %v12304_v46 = vadd.f32 %v9377_v25, %v12297_v22  ;;  %v12306_v39 = vpop.f32.mrb[145].mxu0  ;;  %5852 = vmax.xlane.f32.xlu0 %v5851_v53 }
0x1976   :  { %v9378_v21 = vpop.f32.mrb[146].mxu0 }
0x1977   :  { %v12309_v30 = vadd.f32 %v9378_v21, %v12297_v22  ;;  %v6206_v6 = vpop.f32.mrb[147].mxu0 }
0x1978   :  { %v12312_v20 = vadd.f32 %v12297_v22, %v6206_v6  ;;  %v5080_v9 = vpop.xlane.xlu1 %5079  ;;  %v8061_v6 = vld [vmem:[%s12901_s9 + $0x7] ss:$0 sm:$0xff] }
0x1979   :  { %10213 = vrcp.f32 %v5080_v9  ;;  %v5077_v54 = vpop.xlane.xlu0 %5076 }
0x197a   :  { %10215 = vrcp.f32 %v5077_v54 }
0x197c   :  { %v5086_v45 = vpop.xlane.xlu1 %5085  ;;  %v9381_v36 = vpop.f32.mrb[148].mxu0 }
0x197d   :  { %10217 = vrcp.f32 %v5086_v45  ;;  %v12315_v59 = vadd.f32 %v9381_v36, %v12297_v22  ;;  %v6219_v40 = vpop.f32.mrb[149].mxu0  ;;  %v5083_v14 = vpop.xlane.xlu0 %5082 }
0x197e   :  { %v12318_v23 = vadd.f32 %v12297_v22, %v6219_v40  ;;  %10219 = vrcp.f32 %v5083_v14  ;;  %v9382_v15 = vpop.f32.mrb[150].mxu0 }
0x197f   :  { %v12321_v37 = vadd.f32 %v9382_v15, %v12297_v22  ;;  %v6222_v12 = vpop.f32.mrb[151].mxu0 }
0x1980   :  { %v12324_v3 = vadd.f32 %v12297_v22, %v6222_v12  ;;  %v5092_v0 = vpop.xlane.xlu1 %5091 }
0x1981   :  { %10221 = vrcp.f32 %v5092_v0  ;;  %v5089_v10 = vpop.xlane.xlu0 %5088 }
0x1982   :  { %10223 = vrcp.f32 %v5089_v10 }
0x1983   :  { %v10214_v17 = vpop.eup %10213 }
0x1984   :  { %v10216_v25 = vpop.eup %10215  ;;  %v5098_v53 = vpop.xlane.xlu1 %5097  ;;  %v5108_v36 = vmul.f32 %v10214_v17, %v12226_v50 }
0x1985   :  { %v9401_v21 = vpop.f32.mrb[152].mxu0  ;;  %10225 = vrcp.f32 %v5098_v53  ;;  %v5095_v54 = vpop.xlane.xlu0 %5094  ;;  %v5107_v45 = vmul.f32 %v10216_v25, %v12228_v26 }
0x1986   :  { %v6383_v9 = vpop.f32.mrb[153].mxu0  ;;  %10227 = vrcp.f32 %v5095_v54  ;;  %v6392_v15 = vadd.f32 %v9401_v21, %v8061_v6 }
0x1987   :  { %v9402_v40 = vpop.f32.mrb[154].mxu0  ;;  %v10218_v14 = vpop.eup %10217  ;;  %9237 = vmatprep.mubr.msk.f32.mxu1 %vm653_vm3, %v5107_v45  ;;  %v6384_v41 = vadd.f32 %v8061_v6, %v6383_v9 }
0x1988   :  { %v6395_v12 = vadd.f32 %v9402_v40, %v8061_v6  ;;  %v6386_v0 = vpop.f32.mrb[155].mxu0  ;;  %v10220_v10 = vpop.eup %10219  ;;  %9238 = vmatmul.mubr.msk.f32.vlgmr.msra.gmra.mrb[136].mxu1 %vm653_vm3, %v5108_v36  ;;  %v5110_v26 = vmul.f32 %v10218_v14, %v12234_v19 }
0x1989   :  { %v6387_v51 = vadd.f32 %v8061_v6, %v6386_v0  ;;  %v5109_v11 = vmul.f32 %v10220_v10, %v12236_v58 }
0x198a   :  { %v9817_v53 = vpack.c.bf16 %v6395_v12, %v6392_v15 }
0x198b   :  { %v9813_v52 = vpack.c.bf16 %v6387_v51, %v6384_v41  ;;  %v10222_v50 = vpop.eup %10221  ;;  %9240 = vmatprep.mubr.msk.f32.mxu1 %vm653_vm3, %v5109_v11 }
0x198c   :  { %v10224_v17 = vpop.eup %10223  ;;  %9241 = vmatmul.mubr.msk.f32.gmra.mrb[138].mxu1 %vm653_vm3, %v5110_v26  ;;  %v9405_v25 = vpop.f32.mrb[156].mxu0  ;;  %v5112_v45 = vmul.f32 %v10222_v50, %v12242_v61  ;;  %v7958_v61 = vld [vmem:[%s12902_s10 + $0x14] sm:$0xf] }
0x198d   :  { %9814 = vmatprep.subr.bf16.mxu0 %v9813_v52  ;;  %v6399_v21 = vpop.f32.mrb[157].mxu0  ;;  %v5111_v9 = vmul.f32 %v10224_v17, %v12244_v63  ;;  %v6408_v51 = vadd.f32 %v9405_v25, %v8061_v6  ;;  %9881 = vmatprep.subr.msk.bf16.mxu1 %vm1534_vm4, %v7958_v61 }
0x198e   :  { %9816 = vmatpush3.bf16.msra.mxu0 %v9813_v52  ;;  %v9406_v54 = vpop.f32.mrb[158].mxu0  ;;  %v6400_v36 = vadd.f32 %v8061_v6, %v6399_v21 }
0x198f   :  { %9818 = vmatprep.subr.bf16.mxu0 %v9817_v53  ;;  %v10226_v58 = vpop.eup %10225  ;;  %v6411_v41 = vadd.f32 %v9406_v54, %v8061_v6  ;;  %9243 = vmatprep.mubr.msk.f32.mxu1 %vm653_vm3, %v5111_v9  ;;  %v6402_v19 = vpop.f32.mrb[159].mxu0 }
0x1990   :  { %v10228_v11 = vpop.eup %10227  ;;  %v6403_v40 = vadd.f32 %v8061_v6, %v6402_v19  ;;  %9244 = vmatmul.mubr.msk.f32.gmra.mrb[140].mxu1 %vm653_vm3, %v5112_v45  ;;  %v5114_v15 = vmul.f32 %v10226_v58, %v12250_v60  ;;  %v5263_v6 = vsel %vm1534_vm4, %v7958_v61, 0  ;;  %v12353_v60 = vld [vmem:[%s12902_s10 + $0x10] sm:$0xf] }
0x1991   :  { %v9825_v14 = vpack.c.bf16 %v6411_v41, %v6408_v51  ;;  %v5113_v52 = vmul.f32 %v10228_v11, %v12252_v33  ;;  %9250 = vmatpush3.bf16.msra.mxu1 %v5263_v6 }
0x1992   :  { %9820 = vmatpush3.bf16.msra.mxu0 %v9817_v53  ;;  %v9821_v63 = vpack.c.bf16 %v6403_v40, %v6400_v36  ;;  %9882 = vmatprep.subr.msk.bf16.mxu1 %vm1534_vm4, %v12353_v60 }
0x1993   :  { %9246 = vmatprep.mubr.msk.f32.mxu1 %vm653_vm3, %v5113_v52 }
0x1994   :  { %9247 = vmatmul.mubr.msk.f32.gmra.mrb[142].mxu1 %vm653_vm3, %v5114_v15  ;;  %9822 = vmatprep.subr.bf16.mxu0 %v9821_v63 }
0x1996   :  { %9824 = vmatpush3.bf16.msra.mxu0 %v9821_v63 }
0x1997   :  { %9826 = vmatprep.subr.bf16.mxu0 %v9825_v14 }
0x199a   :  { %9828 = vmatpush3.bf16.msra.mxu0 %v9825_v14 }
0x19f5   :  { %v5838_v33 = vpop.xlane.xlu1 %5837 }
0x19f6   :  { %v5858_v12 = vsub.f32 %v12259_v18, %v5838_v33  ;;  %v5835_v0 = vpop.xlane.xlu0 %5834 }
0x19f7   :  { %v5857_v10 = vsub.f32 %v12262_v44, %v5835_v0 }
0x19f8   :  { %v5867_v53 = vmul.f32 1.442695, %v5858_v12 }
0x19f9   :  { %v5865_v26 = vmul.f32 1.442695, %v5857_v10  ;;  %v5844_v50 = vpop.xlane.xlu1 %5843 }
0x19fa   :  { %10229 = vpow2.f32 %v5867_v53  ;;  %v5860_v17 = vsub.f32 %v12269_v1, %v5844_v50  ;;  %v5841_v25 = vpop.xlane.xlu0 %5840 }
0x19fb   :  { %10231 = vpow2.f32 %v5865_v26  ;;  %v5859_v21 = vsub.f32 %v12272_v29, %v5841_v25 }
0x19fc   :  { %v5871_v9 = vmul.f32 1.442695, %v5860_v17 }
0x19fd   :  { %v5869_v54 = vmul.f32 1.442695, %v5859_v21  ;;  %v5850_v45 = vpop.xlane.xlu1 %5849 }
0x19fe   :  { %10233 = vpow2.f32 %v5871_v9  ;;  %v5862_v58 = vsub.f32 %v12279_v42, %v5850_v45  ;;  %v5847_v18 = vpop.xlane.xlu0 %5846  ;;  %v5343_v45 = vsel %vm1534_vm4, %v12353_v60, 0  ;;  %v12934_v60 = vpack.c.bf16 %v12057_v35, %v12059_v49 }
0x19ff   :  { %10235 = vpow2.f32 %v5869_v54  ;;  %v5861_v44 = vsub.f32 %v12282_v4, %v5847_v18  ;;  %v12937_v35 = vpack.c.bf16 %v12075_v43, %v12077_v55  ;;  %v7996_v43 = vld [vmem:[%s12901_s9 + $0x6] ss:$0 sm:$0xff] }
0x1a00   :  { %v5875_v51 = vmul.f32 1.442695, %v5862_v58  ;;  %v9943_v58 = vld [vmem:[%s12900_s8 + $0x60] sm:$0xff]  }
0x1a01   :  { %v5873_v41 = vmul.f32 1.442695, %v5861_v44  ;;  %v5856_v19 = vpop.xlane.xlu1 %5855 }
0x1a02   :  { %10237 = vpow2.f32 %v5875_v51  ;;  %v5864_v1 = vsub.f32 %v12289_v32, %v5856_v19  ;;  %v5853_v11 = vpop.xlane.xlu0 %5852 }
0x1a03   :  { %10239 = vpow2.f32 %v5873_v41  ;;  %v5863_v29 = vsub.f32 %v12292_v56, %v5853_v11  ;;  %v9944_v11 = vld [vmem:[%s12900_s8 + $0x68] sm:$0xff]  }
0x1a04   :  { %v12365_v36 = vpop.eup %10229  ;;  %v5879_v40 = vmul.f32 1.442695, %v5864_v1 }
0x1a05   :  { %v10232_v14 = vpop.eup %10231  ;;  %v5877_v52 = vmul.f32 1.442695, %v5863_v29  ;;  %v5884_v42 = vsel %vm653_vm3, %v12365_v36, 0.0  ;;  %v12935_v29 = vpack.c.bf16 %v12063_v8, %v12065_v13 }
0x1a06   :  { %10241 = vpow2.f32 %v5879_v40  ;;  %5885 = vadd.xlane.f32.xlu1 %v5884_v42  ;;  %v5881_v4 = vsel %vm653_vm3, %v10232_v14, 0.0  ;;  %v12936_v40 = vpack.c.bf16 %v12069_v31, %v12071_v34 }
0x1a07   :  { %10243 = vpow2.f32 %v5877_v52  ;;  %5882 = vadd.xlane.f32.xlu0 %v5881_v4 }
0x1a08   :  { %v12370_v63 = vpop.eup %10233 }
0x1a09   :  { %v12372_v32 = vpop.eup %10235  ;;  %v5890_v56 = vsel %vm653_vm3, %v12370_v63, 0.0 }
0x1a0a   :  { %5891 = vadd.xlane.f32.xlu1 %v5890_v56  ;;  %v5887_v15 = vsel %vm653_vm3, %v12372_v32, 0.0 }
0x1a0b   :  { %5888 = vadd.xlane.f32.xlu0 %v5887_v15 }
0x1a0c   :  { %v12378_v61 = vpop.eup %10237 }
0x1a0d   :  { %v12380_v6 = vpop.eup %10239  ;;  %v5896_v33 = vsel %vm653_vm3, %v12378_v61, 0.0 }
0x1a0e   :  { %5897 = vadd.xlane.f32.xlu1 %v5896_v33  ;;  %v5893_v12 = vsel %vm653_vm3, %v12380_v6, 0.0 }
0x1a0f   :  { %5894 = vadd.xlane.f32.xlu0 %v5893_v12 }
0x1a10   :  { %v12386_v0 = vpop.eup %10241 }
0x1a11   :  { %v12388_v10 = vpop.eup %10243  ;;  %v5902_v53 = vsel %vm653_vm3, %v12386_v0, 0.0 }
0x1a12   :  { %5903 = vadd.xlane.f32.xlu1 %v5902_v53  ;;  %v5899_v26 = vsel %vm653_vm3, %v12388_v10, 0.0 }
0x1a13   :  { %5900 = vadd.xlane.f32.xlu0 %v5899_v26 }
0x1a5b   :  { %v9239_v50 = vpop.f32.mrb[136].mxu1 }
0x1a5c   :  { %v5205_v17 = vpop.f32.mrb[137].mxu1 }
0x1a5d   :  { %v5244_v25 = vpack.c.bf16 %v9239_v50, %v5205_v17 }
0x1a5f   :  { %v9242_v21 = vpop.f32.mrb[138].mxu1  ;;  %9251 = vmatprep.mubr.msk.bf16.mxu1 %vm499_vm1, %v5244_v25 }
0x1a60   :  { %v5215_v9 = vpop.f32.mrb[139].mxu1 }
0x1a61   :  { %v5245_v54 = vpack.c.bf16 %v9242_v21, %v5215_v9 }
0x1a63   :  { %v9245_v18 = vpop.f32.mrb[140].mxu1  ;;  %9252 = vmatmul.mubr.msk.bf16.vlgmr.msra.gmra.mrb[144].mxu1 %vm499_vm1, %v5245_v54 }
0x1a64   :  { %v5225_v44 = vpop.f32.mrb[141].mxu1  ;;  %9260 = vmatpush3.bf16.msra.mxu1 %v5343_v45 }
0x1a65   :  { %v5246_v51 = vpack.c.bf16 %v9245_v18, %v5225_v44  ;;  %9293 = vmatprep.subr.bf16.mxu1 %v9943_v58 }
0x1a67   :  { %v9248_v41 = vpop.f32.mrb[142].mxu1  ;;  %9255 = vmatprep.mubr.msk.bf16.mxu1 %vm499_vm1, %v5246_v51 }
0x1a68   :  { %v5235_v19 = vpop.f32.mrb[143].mxu1 }
0x1a69   :  { %v5247_v1 = vpack.c.bf16 %v9248_v41, %v5235_v19 }
0x1a6b   :  { %9256 = vmatmul.mubr.msk.bf16.gmra.mrb[148].mxu1 %vm499_vm1, %v5247_v1 }
0x1a6c   :  { %9261 = vmatprep.mubr.msk.bf16.mxu1 %vm499_vm1, %v12934_v60 }
0x1a73   :  { %9262 = vmatmul.mubr.msk.bf16.vlgmr.msra.gmra.mrb[144].mxu1 %vm499_vm1, %v12935_v29 }
0x1a74   :  { %9265 = vmatprep.mubr.msk.bf16.mxu1 %vm499_vm1, %v12936_v40  ;;  %9294 = vmatpush3.bf16.msra.mxu1 %v9943_v58 }
0x1a75   :  { %9295 = vmatprep.subr.bf16.mxu1 %v9944_v11 }
0x1a78   :  { %9296 = vmatpush3.bf16.msra.mxu1 %v9944_v11  ;;  %v8027_v11 = vld [vmem:[%s12902_s10 + $0x18] sm:$0xf] }
0x1a7b   :  { %9266 = vmatmul.mubr.msk.bf16.gmra.mrb[148].mxu1 %vm499_vm1, %v12937_v35  ;;  %v6069_v35 = vsel %vm1534_vm4, %v8027_v11, 0 }
0x1a7c   :  { %9297 = vmatprep.mubr.msk.bf16.mxu1 %vm85_vm0, %v11808_v2 }
0x1a83   :  { %9298 = vmatmul.mubr.msk.bf16.vlgmr.msra.gmra.mrb[152].mxu1 %vm85_vm0, %v11814_v48 }
0x1a84   :  { %9301 = vmatprep.mubr.msk.bf16.mxu1 %vm85_vm0, %v11827_v57 }
0x1a8b   :  { %9302 = vmatmul.mubr.msk.bf16.gmra.mrb[156].mxu1 %vm85_vm0, %v11833_v47 }
0x1a93   :  { %v5886_v31 = vpop.xlane.xlu1 %5885 }
0x1a94   :  { %v5883_v49 = vpop.xlane.xlu0 %5882 }
0x1a95   :  { %10245 = vrcp.f32 %v5883_v49 }
0x1a96   :  { %10247 = vrcp.f32 %v5886_v31 }
0x1a97   :  { %v5892_v26 = vpop.xlane.xlu1 %5891 }
0x1a98   :  { %v5889_v42 = vpop.xlane.xlu0 %5888 }
0x1a99   :  { %10249 = vrcp.f32 %v5889_v42 }
0x1a9a   :  { %10251 = vrcp.f32 %v5892_v26 }
0x1a9b   :  { %v5898_v58 = vpop.xlane.xlu1 %5897 }
0x1a9c   :  { %v5895_v17 = vpop.xlane.xlu0 %5894 }
0x1a9d   :  { %10253 = vrcp.f32 %v5895_v17  ;;  %v6204_v17 = vadd.f32 %v12297_v22, %v12306_v39 }
0x1a9e   :  { %10255 = vrcp.f32 %v5898_v58 }
0x1a9f   :  { %v10246_v8 = vpop.eup %10245  ;;  %v5904_v1 = vpop.xlane.xlu1 %5903 }
0x1aa0   :  { %v5913_v13 = vmul.f32 %v10246_v8, %v10232_v14  ;;  %v5901_v19 = vpop.xlane.xlu0 %5900  ;;  %v10248_v60 = vpop.eup %10247 }
0x1aa1   :  { %10257 = vrcp.f32 %v5901_v19  ;;  %v5914_v40 = vmul.f32 %v10248_v60, %v12365_v36 }
0x1aa2   :  { %9349 = vmatprep.mubr.msk.f32.mxu1 %vm653_vm3, %v5913_v13  ;;  %10259 = vrcp.f32 %v5904_v1 }
0x1aa3   :  { %v10250_v29 = vpop.eup %10249 }
0x1aa4   :  { %v10252_v49 = vpop.eup %10251  ;;  %v5915_v8 = vmul.f32 %v10250_v29, %v12372_v32 }
0x1aa5   :  { %v5916_v31 = vmul.f32 %v10252_v49, %v12370_v63  ;;  %v9945_v63 = vld [vmem:[%s12898_s6 + $0x70] sm:$0xff]  }
0x1aa7   :  { %v10254_v13 = vpop.eup %10253 }
0x1b56   :  { %v9299_v34 = vpop.f32.mrb[152].mxu1 }
0x1b57   :  { %v5649_v55 = vpop.f32.mrb[153].mxu1  ;;  %v5658_v4 = vadd.f32 %v9299_v34, %v7996_v43  ;;  %v10256_v34 = vpop.eup %10255 }
0x1b58   :  { %v9300_v52 = vpop.f32.mrb[154].mxu1  ;;  %v5650_v33 = vadd.f32 %v7996_v43, %v5649_v55  ;;  %v10258_v55 = vpop.eup %10257  ;;  %v5918_v36 = vmul.f32 %v10256_v34, %v12378_v61 }
0x1b59   :  { %v5661_v56 = vadd.f32 %v9300_v52, %v7996_v43  ;;  %v5652_v15 = vpop.f32.mrb[155].mxu1  ;;  %v10260_v52 = vpop.eup %10259  ;;  %v5919_v32 = vmul.f32 %v10258_v55, %v12388_v10 }
0x1b5a   :  { %v5653_v12 = vadd.f32 %v7996_v43, %v5652_v15  ;;  %v5920_v42 = vmul.f32 %v10260_v52, %v12386_v0 }
0x1b5b   :  { %v9777_v53 = vpack.c.bf16 %v5661_v56, %v5658_v4 }
0x1b5c   :  { %v9773_v50 = vpack.c.bf16 %v5653_v12, %v5650_v33  ;;  %v9946_v33 = vld [vmem:[%s12898_s6 + $0x78] sm:$0xff]  }
0x1b5e   :  { %v9303_v14 = vpop.f32.mrb[156].mxu1  ;;  %9774 = vmatprep.subr.bf16.mxu1 %v9773_v50 }
0x1b5f   :  { %v5665_v25 = vpop.f32.mrb[157].mxu1  ;;  %9776 = vmatpush3.bf16.msra.mxu1 %v9773_v50  ;;  %v5674_v9 = vadd.f32 %v9303_v14, %v7996_v43 }
0x1b60   :  { %v9304_v21 = vpop.f32.mrb[158].mxu1  ;;  %9778 = vmatprep.subr.bf16.mxu1 %v9777_v53  ;;  %v5666_v18 = vadd.f32 %v7996_v43, %v5665_v25 }
0x1b61   :  { %v5677_v54 = vadd.f32 %v9304_v21, %v7996_v43  ;;  %v5668_v45 = vpop.f32.mrb[159].mxu1  ;;  %v8049_v21 = vld [vmem:[%s12899_s7 + $0x7] ss:$0 sm:$0xff] }
0x1b62   :  { %v5669_v44 = vadd.f32 %v7996_v43, %v5668_v45  ;;  %v5917_v43 = vmul.f32 %v10254_v13, %v12380_v6  ;;  %v10368_v13 = vld [vmem:[%s12932_s4 + $0x10] sm:$0xff] }
0x1b63   :  { %v9785_v51 = vpack.c.bf16 %v5677_v54, %v5674_v9  ;;  %9780 = vmatpush3.bf16.msra.mxu1 %v9777_v53 }
0x1b64   :  { %v9781_v41 = vpack.c.bf16 %v5669_v44, %v5666_v18 }
0x1b66   :  { %9782 = vmatprep.subr.bf16.mxu1 %v9781_v41 }
0x1b67   :  { %9784 = vmatpush3.bf16.msra.mxu1 %v9781_v41 }
0x1b68   :  { %9786 = vmatprep.subr.bf16.mxu1 %v9785_v51 }
0x1b6b   :  { %9788 = vmatpush3.bf16.msra.mxu1 %v9785_v51 }
0x1b6c   :  { %9883 = vmatprep.subr.msk.bf16.mxu1 %vm1534_vm4, %v8027_v11 }
0x1b6e   :  { %9350 = vmatmul.mubr.msk.f32.vlgmr.msra.gmra.mrb[160].mxu1 %vm653_vm3, %v5914_v40 }
0x1b6f   :  { %9352 = vmatprep.mubr.msk.f32.mxu1 %vm653_vm3, %v5915_v8  ;;  %9362 = vmatpush3.bf16.msra.mxu1 %v6069_v35 }
0x1b70   :  { %9383 = vmatprep.subr.bf16.mxu1 %v9945_v63 }
0x1b72   :  { %9353 = vmatmul.mubr.msk.f32.gmra.mrb[162].mxu1 %vm653_vm3, %v5916_v31 }
0x1b73   :  { %9355 = vmatprep.mubr.msk.f32.mxu1 %vm653_vm3, %v5917_v43 }
0x1b76   :  { %9356 = vmatmul.mubr.msk.f32.gmra.mrb[164].mxu1 %vm653_vm3, %v5918_v36  ;;  %v10369_v36 = vld [vmem:[%s12932_s4 + $0x28] sm:$0xff] }
0x1b77   :  { %9358 = vmatprep.mubr.msk.f32.mxu1 %vm653_vm3, %v5919_v32 }
0x1b7a   :  { %9359 = vmatmul.mubr.msk.f32.gmra.mrb[166].mxu1 %vm653_vm3, %v5920_v42  ;;  %v10370_v42 = vld [vmem:[%s12932_s4 + $0x20] sm:$0xff] }
0x1c41   :  { %v9351_v6 = vpop.f32.mrb[160].mxu1 }
0x1c42   :  { %v6011_v4 = vpop.f32.mrb[161].mxu1 }
0x1c43   :  { %v6050_v56 = vpack.c.bf16 %v9351_v6, %v6011_v4 }
0x1c45   :  { %v9354_v61 = vpop.f32.mrb[162].mxu1  ;;  %9363 = vmatprep.mubr.msk.bf16.mxu1 %vm499_vm1, %v6050_v56 }
0x1c46   :  { %v6021_v10 = vpop.f32.mrb[163].mxu1 }
0x1c47   :  { %v6051_v15 = vpack.c.bf16 %v9354_v61, %v6021_v10  ;;  %v10371_v61 = vld [vmem:[%s12932_s4 + $0x38] sm:$0xff] }
0x1c49   :  { %v9357_v0 = vpop.f32.mrb[164].mxu1  ;;  %9364 = vmatmul.mubr.msk.bf16.vlgmr.msra.gmra.mrb[144].mxu1 %vm499_vm1, %v6051_v15 }
0x1c4a   :  { %v6031_v12 = vpop.f32.mrb[165].mxu1  ;;  %9384 = vmatpush3.bf16.msra.mxu1 %v9945_v63 }
0x1c4b   :  { %v6052_v53 = vpack.c.bf16 %v9357_v0, %v6031_v12  ;;  %9385 = vmatprep.subr.bf16.mxu1 %v9946_v33 }
0x1c4d   :  { %v9360_v26 = vpop.f32.mrb[166].mxu1  ;;  %9367 = vmatprep.mubr.msk.bf16.mxu1 %vm499_vm1, %v6052_v53 }
0x1c4e   :  { %v6041_v50 = vpop.f32.mrb[167].mxu1  ;;  %9386 = vmatpush3.bf16.msra.mxu1 %v9946_v33  ;;  %v10372_v33 = vld [vmem:[%s12932_s4 + $0x30] sm:$0xff] }
0x1c4f   :  { %v6053_v14 = vpack.c.bf16 %v9360_v26, %v6041_v50 }
0x1c51   :  { %9368 = vmatmul.mubr.msk.bf16.gmra.mrb[148].mxu1 %vm499_vm1, %v6053_v14 }
0x1c52   :  { %9387 = vmatprep.mubr.msk.bf16.mxu1 %vm85_vm0, %v11808_v2 }
0x1c59   :  { %9388 = vmatmul.mubr.msk.bf16.vlgmr.msra.gmra.mrb[168].mxu1 %vm85_vm0, %v11814_v48 }
0x1c5a   :  { %9391 = vmatprep.mubr.msk.bf16.mxu1 %vm85_vm0, %v11827_v57 }
0x1c61   :  { %9392 = vmatmul.mubr.msk.bf16.gmra.mrb[172].mxu1 %vm85_vm0, %v11833_v47 }
0x1c62   :  { %9423 = vmatprep.mubr.msk.f32.mxu1 %vm499_vm1, %v6204_v17 }
0x1d2c   :  { %v9389_v25 = vpop.f32.mrb[168].mxu1 }
0x1d2d   :  { %v6293_v2 = vpop.f32.mrb[169].mxu1  ;;  %v6302_v54 = vadd.f32 %v9389_v25, %v8049_v21 }
0x1d2e   :  { %v9390_v9 = vpop.f32.mrb[170].mxu1  ;;  %v6294_v58 = vadd.f32 %v8049_v21, %v6293_v2 }
0x1d2f   :  { %v6305_v48 = vadd.f32 %v9390_v9, %v8049_v21  ;;  %v6296_v45 = vpop.f32.mrb[171].mxu1 }
0x1d30   :  { %v6297_v57 = vadd.f32 %v8049_v21, %v6296_v45 }
0x1d31   :  { %v9795_v18 = vpack.c.bf16 %v6305_v48, %v6302_v54 }
0x1d32   :  { %v9789_v44 = vpack.c.bf16 %v6297_v57, %v6294_v58 }
0x1d34   :  { %v9393_v22 = vpop.f32.mrb[172].mxu1  ;;  %9791 = vmatprep.subr.msk.bf16.mxu1 %vm10668_vm2, %v9789_v44 }
0x1d35   :  { %v6309_v47 = vpop.f32.mrb[173].mxu1  ;;  %9794 = vmatpush3.bf16.xpose.msk.msra.mxu1 %vm10668_vm2, %v9789_v44  ;;  %v6318_v51 = vadd.f32 %v9393_v22, %v8049_v21 }
0x1d36   :  { %v9394_v39 = vpop.f32.mrb[174].mxu1  ;;  %9797 = vmatprep.subr.msk.bf16.mxu1 %vm10668_vm2, %v9795_v18  ;;  %v6310_v1 = vadd.f32 %v8049_v21, %v6309_v47 }
0x1d37   :  { %v6321_v41 = vadd.f32 %v9394_v39, %v8049_v21  ;;  %v6312_v19 = vpop.f32.mrb[175].mxu1 }
0x1d38   :  { %v6313_v60 = vadd.f32 %v8049_v21, %v6312_v19 }
0x1d39   :  { %v9807_v11 = vpack.c.bf16 %v6321_v41, %v6318_v51 }
0x1d3a   :  { %v9801_v29 = vpack.c.bf16 %v6313_v60, %v6310_v1 }
0x1d3d   :  { %9800 = vmatpush3.bf16.xpose.msk.msra.mxu1 %vm10668_vm2, %v9795_v18 }
0x1d3e   :  { %9803 = vmatprep.subr.msk.bf16.mxu1 %vm10668_vm2, %v9801_v29 }
0x1d45   :  { %9806 = vmatpush3.bf16.xpose.msk.msra.mxu1 %vm10668_vm2, %v9801_v29 }
0x1d46   :  { %9809 = vmatprep.subr.msk.bf16.mxu1 %vm10668_vm2, %v9807_v11 }
0x1d4d   :  { %9812 = vmatpush3.bf16.xpose.msk.msra.mxu1 %vm10668_vm2, %v9807_v11 }
0x1d54   :  { %9424 = vmatmul.mubr.msk.f32.vlgmr.msra.gmra.mrb[176].mxu1 %vm499_vm1, %v12312_v20 }
0x1d55   :  { %9426 = vmatprep.mubr.msk.f32.mxu1 %vm499_vm1, %v12304_v46  ;;  %v10365_v46 = vld [vmem:[%s12932_s4 + $0x8] sm:$0xff] }
0x1d58   :  { %9427 = vmatmul.mubr.msk.f32.gmra.mrb[178].mxu1 %vm499_vm1, %v12309_v30  ;;  %v10366_v30 = vld [vmem:[%s12932_s4] sm:$0xff] }
0x1d59   :  { %9429 = vmatprep.mubr.msk.f32.mxu1 %vm499_vm1, %v12318_v23 }
0x1d5c   :  { %9430 = vmatmul.mubr.msk.f32.gmra.mrb[180].mxu1 %vm499_vm1, %v12324_v3 }
0x1d5d   :  { %9432 = vmatprep.mubr.msk.f32.mxu1 %vm499_vm1, %v12315_v59 }
0x1d60   :  { %9433 = vmatmul.mubr.msk.f32.gmra.mrb[182].mxu1 %vm499_vm1, %v12321_v37  ;;  %v10367_v37 = vld [vmem:[%s12932_s4 + $0x18] sm:$0xff] }
0x1e27   :  { %v9425_v28 = vpop.f32.mrb[176].mxu1 }
0x1e28   :  { %v6534_v20 = vadd.f32 %v10365_v46, %v9425_v28  ;;  %v6528_v40 = vpop.f32.mrb[177].mxu1 }
0x1e29   :  { %v6529_v23 = vadd.f32 %v10366_v30, %v6528_v40 }
0x1e2a   :  { %v6570_v3 = vsel %vm653_vm3, %v6534_v20, -inf }
0x1e2b   :  { %6571 = vmax.xlane.f32.xlu1 %v6570_v3  ;;  %v9428_v35 = vpop.f32.mrb[178].mxu1  ;;  %v6567_v59 = vsel %vm653_vm3, %v6529_v23, -inf }
0x1e2c   :  { %v6544_v49 = vadd.f32 %v10367_v37, %v9428_v35  ;;  %v6538_v8 = vpop.f32.mrb[179].mxu1  ;;  %6568 = vmax.xlane.f32.xlu0 %v6567_v59 }
0x1e2d   :  { %v6539_v31 = vadd.f32 %v10368_v13, %v6538_v8 }
0x1e2e   :  { %v6576_v34 = vsel %vm653_vm3, %v6544_v49, -inf }
0x1e2f   :  { %6577 = vmax.xlane.f32.xlu1 %v6576_v34  ;;  %v9431_v43 = vpop.f32.mrb[180].mxu1  ;;  %v6573_v55 = vsel %vm653_vm3, %v6539_v31, -inf }
0x1e30   :  { %v6554_v52 = vadd.f32 %v10369_v36, %v9431_v43  ;;  %v6548_v32 = vpop.f32.mrb[181].mxu1  ;;  %6574 = vmax.xlane.f32.xlu0 %v6573_v55  ;;  %v8092_v43 = vld [vmem:[%s12902_s10 + $0x1c] sm:$0xf] }
0x1e31   :  { %v6549_v63 = vadd.f32 %v10370_v42, %v6548_v32  ;;  %9884 = vmatprep.subr.msk.bf16.mxu1 %vm1534_vm4, %v8092_v43  ;;  %v6803_v55 = vsel %vm1534_vm4, %v8092_v43, 0 }
0x1e32   :  { %v6582_v6 = vsel %vm653_vm3, %v6554_v52, -inf  ;;  %9464 = vmatpush3.bf16.msra.mxu1 %v6803_v55 }
0x1e33   :  { %6583 = vmax.xlane.f32.xlu1 %v6582_v6  ;;  %v9434_v4 = vpop.f32.mrb[182].mxu1  ;;  %v6579_v56 = vsel %vm653_vm3, %v6549_v63, -inf }
0x1e34   :  { %v6564_v10 = vadd.f32 %v10371_v61, %v9434_v4  ;;  %v6558_v15 = vpop.f32.mrb[183].mxu1  ;;  %6580 = vmax.xlane.f32.xlu0 %v6579_v56 }
0x1e35   :  { %v6559_v0 = vadd.f32 %v10372_v33, %v6558_v15 }
0x1e36   :  { %v6588_v12 = vsel %vm653_vm3, %v6564_v10, -inf }
0x1e37   :  { %6589 = vmax.xlane.f32.xlu1 %v6588_v12  ;;  %v6585_v53 = vsel %vm653_vm3, %v6559_v0, -inf }
0x1e38   :  { %6586 = vmax.xlane.f32.xlu0 %v6585_v53 }
0x1eb8   :  { %v6572_v26 = vpop.xlane.xlu1 %6571 }
0x1eb9   :  { %v6592_v50 = vsub.f32 %v6534_v20, %v6572_v26  ;;  %v6569_v14 = vpop.xlane.xlu0 %6568 }
0x1eba   :  { %v6591_v17 = vsub.f32 %v6529_v23, %v6569_v14 }
0x1ebb   :  { %v6601_v25 = vmul.f32 1.442695, %v6592_v50 }
0x1ebc   :  { %v6599_v21 = vmul.f32 1.442695, %v6591_v17  ;;  %v6578_v2 = vpop.xlane.xlu1 %6577 }
0x1ebd   :  { %10261 = vpow2.f32 %v6601_v25  ;;  %v6594_v9 = vsub.f32 %v6544_v49, %v6578_v2  ;;  %v6575_v54 = vpop.xlane.xlu0 %6574 }
0x1ebe   :  { %10263 = vpow2.f32 %v6599_v21  ;;  %v6593_v48 = vsub.f32 %v6539_v31, %v6575_v54 }
0x1ebf   :  { %v6605_v45 = vmul.f32 1.442695, %v6594_v9 }
0x1ec0   :  { %v6603_v58 = vmul.f32 1.442695, %v6593_v48  ;;  %v6584_v57 = vpop.xlane.xlu1 %6583 }
0x1ec1   :  { %10265 = vpow2.f32 %v6605_v45  ;;  %v6596_v18 = vsub.f32 %v6554_v52, %v6584_v57  ;;  %v6581_v44 = vpop.xlane.xlu0 %6580 }
0x1ec2   :  { %10267 = vpow2.f32 %v6603_v58  ;;  %v6595_v22 = vsub.f32 %v6549_v63, %v6581_v44 }
0x1ec3   :  { %v6609_v47 = vmul.f32 1.442695, %v6596_v18 }
0x1ec4   :  { %v6607_v39 = vmul.f32 1.442695, %v6595_v22  ;;  %v6590_v51 = vpop.xlane.xlu1 %6589 }
0x1ec5   :  { %10269 = vpow2.f32 %v6609_v47  ;;  %v6598_v41 = vsub.f32 %v6564_v10, %v6590_v51  ;;  %v6587_v19 = vpop.xlane.xlu0 %6586 }
0x1ec6   :  { %10271 = vpow2.f32 %v6607_v39  ;;  %v6597_v1 = vsub.f32 %v6559_v0, %v6587_v19 }
0x1ec7   :  { %v10262_v60 = vpop.eup %10261  ;;  %v6613_v11 = vmul.f32 1.442695, %v6598_v41 }
0x1ec8   :  { %v10264_v29 = vpop.eup %10263  ;;  %v6611_v28 = vmul.f32 1.442695, %v6597_v1  ;;  %v6618_v46 = vsel %vm653_vm3, %v10262_v60, 0.0  ;;  %v8099_v1 = vld [vmem:[%s12903_s11 + $0x1] ss:$0 sm:$0xff] }
0x1ec9   :  { %10273 = vpow2.f32 %v6613_v11  ;;  %6619 = vadd.xlane.f32.xlu1 %v6618_v46  ;;  %v6615_v20 = vsel %vm653_vm3, %v10264_v29, 0.0  ;;  %v8100_v11 = vld [vmem:[%s12904_s12 + $0x1] ss:$0 sm:$0xff] }
0x1eca   :  { %10275 = vpow2.f32 %v6611_v28  ;;  %6616 = vadd.xlane.f32.xlu0 %v6615_v20 }
0x1ecb   :  { %v10266_v40 = vpop.eup %10265 }
0x1ecc   :  { %v10268_v30 = vpop.eup %10267  ;;  %v6624_v23 = vsel %vm653_vm3, %v10266_v40, 0.0 }
0x1ecd   :  { %6625 = vadd.xlane.f32.xlu1 %v6624_v23  ;;  %v6621_v3 = vsel %vm653_vm3, %v10268_v30, 0.0 }
0x1ece   :  { %6622 = vadd.xlane.f32.xlu0 %v6621_v3 }
0x1ecf   :  { %v10270_v35 = vpop.eup %10269 }
0x1ed0   :  { %v10272_v59 = vpop.eup %10271  ;;  %v6630_v37 = vsel %vm653_vm3, %v10270_v35, 0.0 }
0x1ed1   :  { %6631 = vadd.xlane.f32.xlu1 %v6630_v37  ;;  %v6627_v49 = vsel %vm653_vm3, %v10272_v59, 0.0 }
0x1ed2   :  { %6628 = vadd.xlane.f32.xlu0 %v6627_v49 }
0x1ed3   :  { %v10274_v8 = vpop.eup %10273 }
0x1ed4   :  { %v10276_v13 = vpop.eup %10275  ;;  %v6636_v31 = vsel %vm653_vm3, %v10274_v8, 0.0 }
0x1ed5   :  { %6637 = vadd.xlane.f32.xlu1 %v6636_v31  ;;  %v6633_v34 = vsel %vm653_vm3, %v10276_v13, 0.0 }
0x1ed6   :  { %6634 = vadd.xlane.f32.xlu0 %v6633_v34 }
0x1f56   :  { %v6620_v36 = vpop.xlane.xlu1 %6619 }
0x1f57   :  { %10277 = vrcp.f32 %v6620_v36  ;;  %v6617_v52 = vpop.xlane.xlu0 %6616 }
0x1f58   :  { %10279 = vrcp.f32 %v6617_v52 }
0x1f5a   :  { %v6626_v32 = vpop.xlane.xlu1 %6625 }
0x1f5b   :  { %10281 = vrcp.f32 %v6626_v32  ;;  %v6623_v42 = vpop.xlane.xlu0 %6622 }
0x1f5c   :  { %10283 = vrcp.f32 %v6623_v42 }
0x1f5e   :  { %v6632_v63 = vpop.xlane.xlu1 %6631 }
0x1f5f   :  { %10285 = vrcp.f32 %v6632_v63  ;;  %v6629_v6 = vpop.xlane.xlu0 %6628 }
0x1f60   :  { %10287 = vrcp.f32 %v6629_v6 }
0x1f61   :  { %v10278_v4 = vpop.eup %10277 }
0x1f62   :  { %v10280_v56 = vpop.eup %10279  ;;  %v6638_v61 = vpop.xlane.xlu1 %6637  ;;  %v6648_v33 = vmul.f32 %v10278_v4, %v10262_v60 }
0x1f63   :  { %10289 = vrcp.f32 %v6638_v61  ;;  %v6635_v10 = vpop.xlane.xlu0 %6634  ;;  %v6647_v15 = vmul.f32 %v10280_v56, %v10264_v29 }
0x1f64   :  { %10291 = vrcp.f32 %v6635_v10 }
0x1f65   :  { %v10282_v0 = vpop.eup %10281  ;;  %9451 = vmatprep.mubr.msk.f32.mxu0 %vm653_vm3, %v6647_v15 }
0x1f66   :  { %v10284_v12 = vpop.eup %10283  ;;  %9452 = vmatmul.mubr.msk.f32.vlgmr.msra.gmra.mrb[160].mxu0 %vm653_vm3, %v6648_v33  ;;  %v6650_v26 = vmul.f32 %v10282_v0, %v10266_v40 }
0x1f67   :  { %v6649_v53 = vmul.f32 %v10284_v12, %v10268_v30  ;;  %v12938_v12 = vld [vmem:[#allocation5_spill] sm:$0xff] }
0x1f69   :  { %v10286_v50 = vpop.eup %10285  ;;  %9454 = vmatprep.mubr.msk.f32.mxu0 %vm653_vm3, %v6649_v53 }
0x1f6a   :  { %v10288_v14 = vpop.eup %10287  ;;  %9455 = vmatmul.mubr.msk.f32.gmra.mrb[162].mxu0 %vm653_vm3, %v6650_v26  ;;  %v6652_v25 = vmul.f32 %v10286_v50, %v10270_v35 }
0x1f6b   :  { %v6651_v17 = vmul.f32 %v10288_v14, %v10272_v59 }
0x1f6d   :  { %v10290_v21 = vpop.eup %10289  ;;  %9457 = vmatprep.mubr.msk.f32.mxu0 %vm653_vm3, %v6651_v17 }
0x1f6e   :  { %v10292_v2 = vpop.eup %10291  ;;  %9458 = vmatmul.mubr.msk.f32.gmra.mrb[164].mxu0 %vm653_vm3, %v6652_v25  ;;  %v6654_v54 = vmul.f32 %v10290_v21, %v10274_v8 }
0x1f6f   :  { %v6653_v9 = vmul.f32 %v10292_v2, %v10276_v13 }
0x1f71   :  { %9460 = vmatprep.mubr.msk.f32.mxu0 %vm653_vm3, %v6653_v9 }
0x1f72   :  { %9461 = vmatmul.mubr.msk.f32.gmra.mrb[166].mxu0 %vm653_vm3, %v6654_v54 }
0x2039   :  { %v9453_v48 = vpop.f32.mrb[160].mxu0 }
0x203a   :  { %v6745_v45 = vpop.f32.mrb[161].mxu0 }
0x203b   :  { %v6784_v58 = vpack.c.bf16 %v9453_v48, %v6745_v45 }
0x203d   :  { %v9456_v57 = vpop.f32.mrb[162].mxu0  ;;  %9465 = vmatprep.mubr.msk.bf16.mxu1 %vm499_vm1, %v6784_v58 }
0x203e   :  { %v6755_v18 = vpop.f32.mrb[163].mxu0 }
0x203f   :  { %v6785_v44 = vpack.c.bf16 %v9456_v57, %v6755_v18 }
0x2041   :  { %v9459_v22 = vpop.f32.mrb[164].mxu0  ;;  %9466 = vmatmul.mubr.msk.bf16.vlgmr.msra.gmra.mrb[144].mxu1 %vm499_vm1, %v6785_v44 }
0x2042   :  { %v6765_v47 = vpop.f32.mrb[165].mxu0 }
0x2043   :  { %v6786_v39 = vpack.c.bf16 %v9459_v22, %v6765_v47 }
0x2045   :  { %v9462_v51 = vpop.f32.mrb[166].mxu0  ;;  %9469 = vmatprep.mubr.msk.bf16.mxu1 %vm499_vm1, %v6786_v39 }
0x2046   :  { %v6775_v41 = vpop.f32.mrb[167].mxu0 }
0x2047   :  { %v6787_v19 = vpack.c.bf16 %v9462_v51, %v6775_v41 }
0x2049   :  { %9470 = vmatmul.mubr.msk.bf16.gmra.mrb[148].mxu1 %vm499_vm1, %v6787_v19 }
0x2114   :  { %v9467_v60 = vpop.f32.mrb[144].mxu1 }
0x2115   :  { %v6890_v29 = vadd.f32 %v9467_v60, %v8099_v1  ;;  %v6839_v28 = vpop.f32.mrb[145].mxu1 }
0x2116   :  { %v6888_v46 = vadd.f32 %v8099_v1, %v6839_v28  ;;  %v9468_v20 = vpop.f32.mrb[146].mxu1 }
0x2117   :  { %v6891_v40 = vadd.f32 %v9468_v20, %v8099_v1  ;;  %v6842_v30 = vpop.f32.mrb[147].mxu1  ;;  %v6904_v23 = vmul.f32 %v8100_v11, %v6890_v29 }
0x2118   :  { %v6902_v3 = vmul.f32 %v8100_v11, %v6888_v46  ;;  %v6889_v35 = vadd.f32 %v8099_v1, %v6842_v30 }
0x2119   :  { %v6905_v37 = vmul.f32 %v8100_v11, %v6891_v40  ;;  %v12574_v8 = vadd.f32 %v6904_v23, %v11699_v7 }
0x211a   :  { %v12571_v59 = vadd.f32 %v6902_v3, %v11696_v5  ;;  %v6903_v49 = vmul.f32 %v8100_v11, %v6889_v35 }
0x211b   :  { %v12582_v36 = vadd.f32 %v6905_v37, %v11707_v27  ;;  %v6928_v4 = vsel %vm85_vm0, %v12574_v8, 0.0 }
0x211c   :  { %v12577_v13 = vadd.f32 %v6903_v49, %v11702_v62  ;;  %v9471_v31 = vpop.f32.mrb[148].mxu1  ;;  %v6922_v34 = vsel %vm85_vm0, %v12571_v59, 0.0 }
0x211d   :  { %v6894_v43 = vadd.f32 %v9471_v31, %v8099_v1  ;;  %6923 = vadd.xlane.f32.xlu0 %v6922_v34  ;;  %v6855_v55 = vpop.f32.mrb[149].mxu1  ;;  %v6931_v10 = vsel %vm85_vm0, %v12582_v36, 0.0 }
0x211e   :  { %v6892_v5 = vadd.f32 %v8099_v1, %v6855_v55  ;;  %v9472_v52 = vpop.f32.mrb[150].mxu1  ;;  %v6925_v32 = vsel %vm85_vm0, %v12577_v13, 0.0 }
0x211f   :  { %v6895_v7 = vadd.f32 %v9472_v52, %v8099_v1  ;;  %6926 = vadd.xlane.f32.xlu1 %v6925_v32  ;;  %v6858_v42 = vpop.f32.mrb[151].mxu1  ;;  %v6908_v62 = vmul.f32 %v8100_v11, %v6894_v43  ;;  %v9947_v52 = vld [vmem:[%s12907_s15 + $0x10] sm:$0xff]   ;;  %v9948_v32 = vld [vmem:[%s12907_s15 + $0x18] sm:$0xff]  }
0x2120   :  { %v6906_v63 = vmul.f32 %v8100_v11, %v6892_v5  ;;  %v6893_v6 = vadd.f32 %v8099_v1, %v6858_v42  ;;  %9473 = vmatprep.subr.bf16.mxu0 %v9947_v52 }
0x2121   :  { %6929 = vadd.xlane.f32.xlu0 %v6928_v4  ;;  %v6909_v27 = vmul.f32 %v8100_v11, %v6895_v7  ;;  %v12594_v15 = vadd.f32 %v6908_v62, %v11719_v16  ;;  %9474 = vmatpush3.bf16.msra.mxu0 %v9947_v52 }
0x2122   :  { %v12589_v56 = vadd.f32 %v6906_v63, %v11716_v24  ;;  %v6907_v61 = vmul.f32 %v8100_v11, %v6893_v6  ;;  %9475 = vmatprep.subr.bf16.mxu0 %v9948_v32 }
0x2123   :  { %6932 = vadd.xlane.f32.xlu1 %v6931_v10  ;;  %v12602_v53 = vadd.f32 %v6909_v27, %v12938_v12  ;;  %v6940_v26 = vsel %vm85_vm0, %v12594_v15, 0.0 }
0x2124   :  { %v12597_v33 = vadd.f32 %v6907_v61, %v11722_v38  ;;  %v6934_v0 = vsel %vm85_vm0, %v12589_v56, 0.0 }
0x2125   :  { %6935 = vadd.xlane.f32.xlu0 %v6934_v0  ;;  %v6943_v16 = vsel %vm85_vm0, %v12602_v53, 0.0  ;;  %9476 = vmatpush3.bf16.msra.mxu0 %v9948_v32 }
0x2126   :  { %v6937_v24 = vsel %vm85_vm0, %v12597_v33, 0.0 }
0x2127   :  { %6938 = vadd.xlane.f32.xlu1 %v6937_v24 }
0x2129   :  { %6941 = vadd.xlane.f32.xlu0 %v6940_v26 }
0x212b   :  { %6944 = vadd.xlane.f32.xlu1 %v6943_v16 }
0x21aa   :  { %v6924_v38 = vpop.xlane.xlu0 %6923 }
0x21ab   :  { %v6946_v50 = vmul.f32 0.03125, %v6924_v38 }
0x21ac   :  { %v6927_v14 = vpop.xlane.xlu1 %6926 }
0x21ad   :  { %v12611_v17 = vsub.f32 %v12571_v59, %v6946_v50  ;;  %v6947_v25 = vmul.f32 0.03125, %v6927_v14 }
0x21ae   :  { %v6930_v21 = vpop.xlane.xlu0 %6929 }
0x21af   :  { %v12614_v2 = vsub.f32 %v12577_v13, %v6947_v25  ;;  %v6948_v9 = vmul.f32 0.03125, %v6930_v21  ;;  %v6962_v54 = vmul.f32 %v12611_v17, %v12611_v17 }
0x21b0   :  { %v6933_v48 = vpop.xlane.xlu1 %6932 }
0x21b1   :  { %v12619_v45 = vsub.f32 %v12574_v8, %v6948_v9  ;;  %v6949_v58 = vmul.f32 0.03125, %v6933_v48  ;;  %v6970_v57 = vsel %vm85_vm0, %v6962_v54, 0.0  ;;  %v6963_v18 = vmul.f32 %v12614_v2, %v12614_v2 }
0x21b2   :  { %6971 = vadd.xlane.f32.xlu0 %v6970_v57  ;;  %v6936_v44 = vpop.xlane.xlu0 %6935 }
0x21b3   :  { %v12625_v22 = vsub.f32 %v12582_v36, %v6949_v58  ;;  %v6950_v47 = vmul.f32 0.03125, %v6936_v44  ;;  %v6973_v39 = vsel %vm85_vm0, %v6963_v18, 0.0  ;;  %v6964_v51 = vmul.f32 %v12619_v45, %v12619_v45  ;;  %v8103_v58 = vld [vmem:[%s12905_s13 + $0x1] ss:$0 sm:$0xff] }
0x21b4   :  { %6974 = vadd.xlane.f32.xlu1 %v6973_v39  ;;  %v6939_v41 = vpop.xlane.xlu1 %6938 }
0x21b5   :  { %v12631_v19 = vsub.f32 %v12589_v56, %v6950_v47  ;;  %v6951_v1 = vmul.f32 0.03125, %v6939_v41  ;;  %v6976_v60 = vsel %vm85_vm0, %v6964_v51, 0.0  ;;  %v6965_v11 = vmul.f32 %v12625_v22, %v12625_v22 }
0x21b6   :  { %6977 = vadd.xlane.f32.xlu0 %v6976_v60  ;;  %v6942_v29 = vpop.xlane.xlu0 %6941  ;;  %v8104_v60 = vld [vmem:[%s12906_s14 + $0x1] ss:$0 sm:$0xff] }
0x21b7   :  { %v12637_v28 = vsub.f32 %v12597_v33, %v6951_v1  ;;  %v6952_v46 = vmul.f32 0.03125, %v6942_v29  ;;  %v6979_v20 = vsel %vm85_vm0, %v6965_v11, 0.0  ;;  %v6966_v40 = vmul.f32 %v12631_v19, %v12631_v19 }
0x21b8   :  { %6980 = vadd.xlane.f32.xlu1 %v6979_v20  ;;  %v6945_v30 = vpop.xlane.xlu1 %6944 }
0x21b9   :  { %v12643_v23 = vsub.f32 %v12594_v15, %v6952_v46  ;;  %v6953_v3 = vmul.f32 0.03125, %v6945_v30  ;;  %v6982_v35 = vsel %vm85_vm0, %v6966_v40, 0.0  ;;  %v6967_v37 = vmul.f32 %v12637_v28, %v12637_v28 }
0x21ba   :  { %6983 = vadd.xlane.f32.xlu0 %v6982_v35 }
0x21bb   :  { %v12649_v49 = vsub.f32 %v12602_v53, %v6953_v3  ;;  %v6985_v31 = vsel %vm85_vm0, %v6967_v37, 0.0  ;;  %v6968_v34 = vmul.f32 %v12643_v23, %v12643_v23 }
0x21bc   :  { %6986 = vadd.xlane.f32.xlu1 %v6985_v31 }
0x21bd   :  { %v6988_v43 = vsel %vm85_vm0, %v6968_v34, 0.0  ;;  %v6969_v55 = vmul.f32 %v12649_v49, %v12649_v49 }
0x21be   :  { %6989 = vadd.xlane.f32.xlu0 %v6988_v43 }
0x21bf   :  { %v6991_v5 = vsel %vm85_vm0, %v6969_v55, 0.0 }
0x21c0   :  { %6992 = vadd.xlane.f32.xlu1 %v6991_v5 }
0x223f   :  { %v6972_v7 = vpop.xlane.xlu0 %6971 }
0x2240   :  { %v6994_v42 = vmul.f32 0.03125, %v6972_v7 }
0x2241   :  { %v6975_v62 = vpop.xlane.xlu1 %6974 }
0x2242   :  { %v7002_v63 = vadd.f32 1e-05, %v6994_v42  ;;  %v6995_v6 = vmul.f32 0.03125, %v6975_v62 }
0x2243   :  { %v6978_v4 = vpop.xlane.xlu0 %6977 }
0x2244   :  { %10293 = vrsqrt.f32 %v7002_v63  ;;  %v7003_v27 = vadd.f32 1e-05, %v6995_v6  ;;  %v6996_v61 = vmul.f32 0.03125, %v6978_v4 }
0x2245   :  { %v6981_v10 = vpop.xlane.xlu1 %6980 }
0x2246   :  { %10295 = vrsqrt.f32 %v7003_v27  ;;  %v7004_v0 = vadd.f32 1e-05, %v6996_v61  ;;  %v6997_v12 = vmul.f32 0.03125, %v6981_v10  ;;  %v9951_v10 = vld [vmem:[%s12909_s17 + $0x50] sm:$0xff]  }
0x2247   :  { %v6984_v24 = vpop.xlane.xlu0 %6983 }
0x2248   :  { %10297 = vrsqrt.f32 %v7004_v0  ;;  %v7005_v26 = vadd.f32 1e-05, %v6997_v12  ;;  %v6998_v16 = vmul.f32 0.03125, %v6984_v24  ;;  %v9952_v0 = vld [vmem:[%s12909_s17 + $0x58] sm:$0xff]   ;;  %v9953_v12 = vld [vmem:[%s12909_s17 + $0x60] sm:$0xff]   ;;  %v9954_v24 = vld [vmem:[%s12909_s17 + $0x68] sm:$0xff]  }
0x2249   :  { %v6987_v38 = vpop.xlane.xlu1 %6986 }
0x224a   :  { %10299 = vrsqrt.f32 %v7005_v26  ;;  %v7006_v50 = vadd.f32 1e-05, %v6998_v16  ;;  %v6999_v14 = vmul.f32 0.03125, %v6987_v38  ;;  %v9955_v26 = vld [vmem:[%s12909_s17 + $0x70] sm:$0xff]   ;;  %v9956_v16 = vld [vmem:[%s12909_s17 + $0x78] sm:$0xff]  }
0x224b   :  { %v6990_v25 = vpop.xlane.xlu0 %6989  ;;  %v12709_v38 = vld [vmem:[%s12908_s16 + $0x1] ss:$0 sm:$0xff] }
0x224c   :  { %10301 = vrsqrt.f32 %v7006_v50  ;;  %v7007_v21 = vadd.f32 1e-05, %v6999_v14  ;;  %v7000_v9 = vmul.f32 0.03125, %v6990_v25 }
0x224d   :  { %v6993_v54 = vpop.xlane.xlu1 %6992 }
0x224e   :  { %v10294_v48 = vpop.eup %10293  ;;  %10303 = vrsqrt.f32 %v7007_v21  ;;  %v7008_v57 = vadd.f32 1e-05, %v7000_v9  ;;  %v7001_v18 = vmul.f32 0.03125, %v6993_v54 }
0x224f   :  { %v7018_v44 = vmul.f32 %v10294_v48, %v12611_v17 }
0x2250   :  { %v10296_v47 = vpop.eup %10295  ;;  %10305 = vrsqrt.f32 %v7008_v57  ;;  %v7009_v39 = vadd.f32 1e-05, %v7001_v18 }
0x2251   :  { %v7019_v51 = vmul.f32 %v10296_v47, %v12614_v2  ;;  %v7032_v41 = vmul.f32 %v8103_v58, %v7018_v44 }
0x2252   :  { %v10298_v1 = vpop.eup %10297  ;;  %10307 = vrsqrt.f32 %v7009_v39 }
0x2253   :  { %v7020_v11 = vmul.f32 %v10298_v1, %v12619_v45  ;;  %v7033_v29 = vmul.f32 %v8103_v58, %v7019_v51  ;;  %v7046_v17 = vadd.f32 %v8104_v60, %v7032_v41 }
0x2254   :  { %v10300_v46 = vpop.eup %10299 }
0x2255   :  { %v7034_v20 = vmul.f32 %v8103_v58, %v7020_v11  ;;  %v7021_v40 = vmul.f32 %v10300_v46, %v12625_v22  ;;  %v7047_v30 = vadd.f32 %v8104_v60, %v7033_v29 }
0x2256   :  { %v10302_v3 = vpop.eup %10301 }
0x2257   :  { %v7035_v35 = vmul.f32 %v8103_v58, %v7021_v40  ;;  %v7022_v2 = vmul.f32 %v10302_v3, %v12631_v19  ;;  %v7054_v37 = vpack.c.bf16 %v7047_v30, %v7046_v17  ;;  %v7048_v34 = vadd.f32 %v8104_v60, %v7034_v20 }
0x2258   :  { %v10304_v31 = vpop.eup %10303 }
0x2259   :  { %v7049_v43 = vadd.f32 %v8104_v60, %v7035_v35  ;;  %v7023_v55 = vmul.f32 %v10304_v31, %v12637_v28  ;;  %9477 = vmatprep.mubr.msk.bf16.mxu0 %vm85_vm0, %v7054_v37  ;;  %v7036_v45 = vmul.f32 %v8103_v58, %v7022_v2 }
0x225a   :  { %v10306_v5 = vpop.eup %10305 }
0x225b   :  { %v7024_v52 = vmul.f32 %v10306_v5, %v12643_v23  ;;  %v7055_v32 = vpack.c.bf16 %v7049_v43, %v7048_v34  ;;  %v7037_v22 = vmul.f32 %v8103_v58, %v7023_v55  ;;  %v7050_v19 = vadd.f32 %v8104_v60, %v7036_v45  ;;  %v9949_v23 = vld [vmem:[%s12909_s17 + $0x40] sm:$0xff]  }
0x225c   :  { %v10308_v7 = vpop.eup %10307  ;;  %9485 = vmatprep.subr.bf16.mxu0 %v9949_v23 }
0x225d   :  { %v7025_v42 = vmul.f32 %v10308_v7, %v12649_v49  ;;  %9478 = vmatmul.mubr.msk.bf16.vlgmr.msra.gmra.mrb[168].mxu0 %vm85_vm0, %v7055_v32  ;;  %v7051_v62 = vadd.f32 %v8104_v60, %v7037_v22  ;;  %v7038_v63 = vmul.f32 %v8103_v58, %v7024_v52  ;;  %v9950_v49 = vld [vmem:[%s12909_s17 + $0x48] sm:$0xff]  }
0x225e   :  { %9486 = vmatpush3.bf16.msra.mxu0 %v9949_v23 }
0x225f   :  { %v7056_v6 = vpack.c.bf16 %v7051_v62, %v7050_v19  ;;  %v7039_v4 = vmul.f32 %v8103_v58, %v7025_v42  ;;  %v7052_v28 = vadd.f32 %v8104_v60, %v7038_v63  ;;  %9487 = vmatprep.subr.bf16.mxu0 %v9950_v49 }
0x2261   :  { %9481 = vmatprep.mubr.msk.bf16.mxu0 %vm85_vm0, %v7056_v6  ;;  %v7053_v27 = vadd.f32 %v8104_v60, %v7039_v4  ;;  %v12939_v6 = vmov -1.0  }
0x2262   :  { %9488 = vmatpush3.bf16.msra.mxu0 %v9950_v49 }
0x2263   :  { %v7057_v61 = vpack.c.bf16 %v7053_v27, %v7052_v28  ;;  %9489 = vmatprep.subr.bf16.mxu0 %v9951_v10 }
0x2265   :  { %9482 = vmatmul.mubr.msk.bf16.gmra.mrb[172].mxu0 %vm85_vm0, %v7057_v61 }
0x2266   :  { %9490 = vmatpush3.bf16.msra.mxu0 %v9951_v10 }
0x2267   :  { %9491 = vmatprep.subr.bf16.mxu0 %v9952_v0 }
0x226a   :  { %9492 = vmatpush3.bf16.msra.mxu0 %v9952_v0 }
0x226b   :  { %9493 = vmatprep.subr.bf16.mxu0 %v9953_v12 }
0x226e   :  { %9494 = vmatpush3.bf16.msra.mxu0 %v9953_v12 }
0x226f   :  { %9495 = vmatprep.subr.bf16.mxu0 %v9954_v24 }
0x2272   :  { %9496 = vmatpush3.bf16.msra.mxu0 %v9954_v24 }
0x2273   :  { %9497 = vmatprep.subr.bf16.mxu0 %v9955_v26 }
0x2276   :  { %9498 = vmatpush3.bf16.msra.mxu0 %v9955_v26 }
0x2277   :  { %9499 = vmatprep.subr.bf16.mxu0 %v9956_v16 }
0x227a   :  { %9500 = vmatpush3.bf16.msra.mxu0 %v9956_v16 }
0x2330   :  { %v9479_v50 = vpop.f32.mrb[168].mxu0 }
0x2331   :  { %v7138_v14 = vadd.f32 %v9479_v50, %v12709_v38  ;;  %v7129_v25 = vpop.f32.mrb[169].mxu0 }
0x2332   :  { %v7130_v21 = vadd.f32 %v12709_v38, %v7129_v25  ;;  %v9480_v9 = vpop.f32.mrb[170].mxu0 }
0x2333   :  { %v7170_v54 = vmul.f32 0.70710677, %v7138_v14  ;;  %v7141_v48 = vadd.f32 %v9480_v9, %v12709_v38  ;;  %v7132_v58 = vpop.f32.mrb[171].mxu0  ;;  %v12746_v19 = vmul.f32 0.5, %v7138_v14 }
0x2334   :  { %v12714_v57 = vmul.f32 0.70710677, %v7130_v21  ;;  %v12719_v47 = vadd.f32 %v12709_v38, %v7132_v58  ;;  %v12748_v62 = vmul.f32 0.5, %v7130_v21 }
0x2335   :  { %v7194_v18 = vand.u32 2147483647, %v7170_v54  ;;  %v12716_v44 = vmul.f32 0.70710677, %v7141_v48  ;;  %vm7178_vm13 = vcmp.ge.f32.partialorder %v7170_v54, 0.0  ;;  %v12754_v27 = vmul.f32 0.5, %v7141_v48 }
0x2336   :  { %v7192_v39 = vand.u32 2147483647, %v12714_v57  ;;  %v12724_v11 = vmul.f32 0.70710677, %v12719_v47  ;;  %v12752_v4 = vsel %vm7178_vm13, 1.0, %v12939_v6  ;;  %vm7176_vm14 = vcmp.ge.f32.partialorder %v12714_v57, 0.0 }
0x2337   :  { %v7202_v51 = vmul.f32 0.3275911, %v7194_v18  ;;  %v7195_v1 = vand.u32 2147483647, %v12716_v44  ;;  %v7306_v37 = vsub.f32 0.0, %v7194_v18  ;;  %vm7179_vm15 = vcmp.ge.f32.partialorder %v12716_v44, 0.0 }
0x2338   :  { %v7200_v41 = vmul.f32 0.3275911, %v7192_v39  ;;  %v9483_v29 = vpop.f32.mrb[172].mxu0  ;;  %v7193_v17 = vand.u32 2147483647, %v12724_v11  ;;  %v7304_v45 = vsub.f32 0.0, %v7192_v39 }
0x2339   :  { %v7210_v60 = vadd.f32 1.0, %v7202_v51  ;;  %v7203_v20 = vmul.f32 0.3275911, %v7195_v1  ;;  %v7145_v40 = vpop.f32.mrb[173].mxu0  ;;  %v12728_v31 = vadd.f32 %v9483_v29, %v12709_v38  ;;  %v7314_v32 = vmul.f32 %v7306_v37, %v7194_v18 }
0x233a   :  { %v7208_v46 = vadd.f32 1.0, %v7200_v41  ;;  %v9484_v30 = vpop.f32.mrb[174].mxu0  ;;  %v7201_v2 = vmul.f32 0.3275911, %v7193_v17  ;;  %v12731_v34 = vadd.f32 %v12709_v38, %v7145_v40  ;;  %v7307_v22 = vsub.f32 0.0, %v7195_v1 }
0x233b   :  { %10309 = vrcp.f32 %v7210_v60  ;;  %v7211_v3 = vadd.f32 1.0, %v7203_v20  ;;  %v7148_v35 = vpop.f32.mrb[175].mxu0  ;;  %v12734_v55 = vadd.f32 %v9484_v30, %v12709_v38  ;;  %v12737_v5 = vmul.f32 0.70710677, %v12728_v31 }
0x233c   :  { %10311 = vrcp.f32 %v7208_v46  ;;  %v7209_v43 = vadd.f32 1.0, %v7201_v2  ;;  %v12740_v52 = vmul.f32 0.70710677, %v12731_v34  ;;  %v7312_v28 = vmul.f32 %v7304_v45, %v7192_v39 }
0x233d   :  { %10313 = vrcp.f32 %v7211_v3  ;;  %v7198_v7 = vand.u32 2147483647, %v12737_v5  ;;  %v12744_v42 = vmul.f32 0.70710677, %v12734_v55  ;;  %v7305_v49 = vsub.f32 0.0, %v7193_v17 }
0x233e   :  { %10315 = vrcp.f32 %v7209_v43  ;;  %v7196_v63 = vand.u32 2147483647, %v12740_v52  ;;  %v7324_v26 = vmul.f32 1.442695, %v7314_v32  ;;  %v7315_v16 = vmul.f32 %v7307_v22, %v7195_v1 }
0x233f   :  { %v7206_v61 = vmul.f32 0.3275911, %v7198_v7  ;;  %v12760_v0 = vand.u32 2147483647, %v12744_v42  ;;  %v12768_v9 = vadd.f32 %v12709_v38, %v7148_v35  ;;  %v7320_v48 = vmul.f32 1.442695, %v7312_v28 }
0x2340   :  { %v7204_v10 = vmul.f32 0.3275911, %v7196_v63  ;;  %v7313_v39 = vmul.f32 %v7305_v49, %v7193_v17  ;;  %v7310_v60 = vsub.f32 0.0, %v7198_v7  ;;  %v7326_v46 = vmul.f32 1.442695, %v7315_v16 }
0x2341   :  { %v7214_v50 = vadd.f32 1.0, %v7206_v61  ;;  %v7207_v21 = vmul.f32 0.3275911, %v12760_v0  ;;  %v7308_v20 = vsub.f32 0.0, %v7196_v63  ;;  %v12779_v40 = vmul.f32 0.70710677, %v12768_v9 }
0x2342   :  { %v7212_v25 = vadd.f32 1.0, %v7204_v10  ;;  %v12785_v35 = vsel %vm7176_vm14, 1.0, %v12939_v6  ;;  %v7322_v37 = vmul.f32 1.442695, %v7313_v39  ;;  %v7318_v22 = vmul.f32 %v7310_v60, %v7198_v7 }
0x2343   :  { %10317 = vrcp.f32 %v7214_v50  ;;  %v7215_v51 = vadd.f32 1.0, %v7207_v21  ;;  %v12793_v61 = vsel %vm7179_vm15, 1.0, %v12939_v6  ;;  %v7316_v49 = vmul.f32 %v7308_v20, %v7196_v63 }
0x2344   :  { %10319 = vrcp.f32 %v7212_v25  ;;  %v12796_v57 = vand.u32 2147483647, %v12779_v40  ;;  %v7311_v7 = vsub.f32 0.0, %v12760_v0  ;;  %vm7177_vm1 = vcmp.ge.f32.partialorder %v12724_v11, 0.0 }
0x2345   :  { %v12756_v23 = vpop.eup %10309  ;;  %10321 = vpow2.f32 %v7324_v26  ;;  %v7332_v21 = vmul.f32 1.442695, %v7318_v22  ;;  %v7328_v39 = vmul.f32 1.442695, %v7316_v49  ;;  %vm7182_vm2 = vcmp.ge.f32.partialorder %v12737_v5, 0.0 }
0x2346   :  { %v12762_v12 = vpop.eup %10311  ;;  %v7234_v24 = vmul.f32 1.0614054, %v12756_v23  ;;  %10323 = vrcp.f32 %v7215_v51  ;;  %v7205_v50 = vmul.f32 0.3275911, %v12796_v57  ;;  %vm7183_vm3 = vcmp.ge.f32.partialorder %v12744_v42, 0.0 }
0x2347   :  { %v7232_v14 = vmul.f32 1.0614054, %v12762_v12  ;;  %v12771_v58 = vpop.eup %10313  ;;  %10325 = vpow2.f32 %v7320_v48  ;;  %vm7180_vm4 = vcmp.ge.f32.partialorder %v12740_v52, 0.0  ;;  %vm7181_vm5 = vcmp.ge.f32.partialorder %v12779_v40, 0.0  ;;  %v8134_v40 = vld [vmem:[%s12910_s18 + $0x1] ss:$0 sm:$0xff] }
0x2348   :  { %v7242_v54 = vadd.f32 -1.4531521, %v7234_v24  ;;  %v7235_v1 = vmul.f32 1.0614054, %v12771_v58  ;;  %v12775_v29 = vpop.eup %10315  ;;  %10327 = vpow2.f32 %v7326_v46  ;;  %v7213_v51 = vadd.f32 1.0, %v7205_v50  ;;  %s10398_s18 = smov [#allocation2]  }
0x2349   :  { %v7240_v18 = vadd.f32 -1.4531521, %v7232_v14  ;;  %v7233_v17 = vmul.f32 1.0614054, %v12775_v29  ;;  %10329 = vpow2.f32 %v7322_v37  ;;  %v7164_v52 = vmul.f32 0.5, %v12731_v34 }
0x234a   :  { %v7250_v41 = vmul.f32 %v12756_v23, %v7242_v54  ;;  %v7243_v3 = vadd.f32 -1.4531521, %v7235_v1  ;;  %10331 = vrcp.f32 %v7213_v51 }
0x234b   :  { %v7248_v38 = vmul.f32 %v12762_v12, %v7240_v18  ;;  %v7241_v32 = vadd.f32 -1.4531521, %v7233_v17  ;;  %10333 = vpow2.f32 %v7332_v21 }
0x234c   :  { %v7258_v30 = vadd.f32 1.4214138, %v7250_v41  ;;  %v7251_v45 = vmul.f32 %v12771_v58, %v7243_v3  ;;  %v7319_v3 = vmul.f32 %v7311_v7, %v12760_v0 }
0x234d   :  { %v7256_v2 = vadd.f32 1.4214138, %v7248_v38  ;;  %v7249_v26 = vmul.f32 %v12775_v29, %v7241_v32  ;;  %v12801_v14 = vpop.eup %10317 }
0x234e   :  { %v7266_v43 = vmul.f32 %v12756_v23, %v7258_v30  ;;  %v7259_v24 = vadd.f32 1.4214138, %v7251_v45  ;;  %v12806_v54 = vpop.eup %10319  ;;  %v7238_v18 = vmul.f32 1.0614054, %v12801_v14  ;;  %v7334_v50 = vmul.f32 1.442695, %v7319_v3 }
0x234f   :  { %v7264_v28 = vmul.f32 %v12762_v12, %v7256_v2  ;;  %v7257_v25 = vadd.f32 1.4214138, %v7249_v26  ;;  %v10322_v41 = vpop.eup %10321  ;;  %v7236_v46 = vmul.f32 1.0614054, %v12806_v54 }
0x2350   :  { %v7274_v10 = vadd.f32 -0.28449672, %v7266_v43  ;;  %v7267_v63 = vmul.f32 %v12771_v58, %v7259_v24  ;;  %v7246_v30 = vadd.f32 -1.4531521, %v7238_v18  ;;  %v12813_v17 = vpop.eup %10323  ;;  %10335 = vpow2.f32 %v7334_v50 }
0x2351   :  { %v7272_v16 = vadd.f32 -0.28449672, %v7264_v28  ;;  %v7265_v38 = vmul.f32 %v12775_v29, %v7257_v25  ;;  %v7244_v45 = vadd.f32 -1.4531521, %v7236_v46  ;;  %v10326_v32 = vpop.eup %10325  ;;  %v7239_v49 = vmul.f32 1.0614054, %v12813_v17 }
0x2352   :  { %v7282_v44 = vmul.f32 %v12756_v23, %v7274_v10  ;;  %v7275_v60 = vadd.f32 -0.28449672, %v7267_v63  ;;  %v7254_v28 = vmul.f32 %v12801_v14, %v7246_v30  ;;  %10337 = vpow2.f32 %v7328_v39 }
0x2353   :  { %v7280_v48 = vmul.f32 %v12762_v12, %v7272_v16  ;;  %v7273_v43 = vadd.f32 -0.28449672, %v7265_v38  ;;  %v7252_v26 = vmul.f32 %v12806_v54, %v7244_v45  ;;  %v7247_v7 = vadd.f32 -1.4531521, %v7239_v49 }
0x2354   :  { %v7290_v1 = vadd.f32 0.2548296, %v7282_v44  ;;  %v7283_v37 = vmul.f32 %v12771_v58, %v7275_v60  ;;  %v10328_v44 = vpop.eup %10327 }
0x2355   :  { %v7288_v20 = vadd.f32 0.2548296, %v7280_v48  ;;  %v7281_v0 = vmul.f32 %v12775_v29, %v7273_v43  ;;  %v7260_v48 = vadd.f32 1.4214138, %v7252_v26  ;;  %v10330_v18 = vpop.eup %10329 }
0x2356   :  { %v7298_v2 = vmul.f32 %v12756_v23, %v7290_v1  ;;  %v7291_v24 = vadd.f32 0.2548296, %v7283_v37  ;;  %v7262_v23 = vadd.f32 1.4214138, %v7254_v28  ;;  %v7309_v1 = vsub.f32 0.0, %v12796_v57 }
0x2357   :  { %v7296_v22 = vmul.f32 %v12762_v12, %v7288_v20  ;;  %v7289_v12 = vadd.f32 0.2548296, %v7281_v0  ;;  %v7268_v20 = vmul.f32 %v12806_v54, %v7260_v48 }
0x2358   :  { %v7338_v10 = vmul.f32 %v10322_v41, %v7298_v2  ;;  %v7299_v25 = vmul.f32 %v12771_v58, %v7291_v24  ;;  %v7270_v51 = vmul.f32 %v12801_v14, %v7262_v23  ;;  %v7255_v41 = vmul.f32 %v12813_v17, %v7247_v7 }
0x2359   :  { %v7336_v16 = vmul.f32 %v10326_v32, %v7296_v22  ;;  %v7297_v46 = vmul.f32 %v12775_v29, %v7289_v12  ;;  %v7185_v58 = vsel %vm7177_vm1, 1.0, %v12939_v6  ;;  %v7276_v45 = vadd.f32 -0.28449672, %v7268_v20  ;;  %v10332_v32 = vpop.eup %10331 }
0x235a   :  { %v7346_v63 = vsub.f32 1.0, %v7338_v10  ;;  %v7339_v38 = vmul.f32 %v10328_v44, %v7299_v25  ;;  %v7278_v30 = vadd.f32 -0.28449672, %v7270_v51  ;;  %v7263_v3 = vadd.f32 1.4214138, %v7255_v41  ;;  %v10334_v24 = vpop.eup %10333 }
0x235b   :  { %v7344_v21 = vsub.f32 1.0, %v7336_v16  ;;  %v7337_v43 = vmul.f32 %v10330_v18, %v7297_v46  ;;  %v7317_v22 = vmul.f32 %v7309_v1, %v12796_v57  ;;  %v7284_v10 = vmul.f32 %v12806_v54, %v7276_v45 }
0x235c   :  { %v7354_v60 = vmul.f32 %v7346_v63, %v12752_v4  ;;  %v7347_v37 = vsub.f32 1.0, %v7339_v38  ;;  %v7286_v4 = vmul.f32 %v12801_v14, %v7278_v30  ;;  %v7271_v29 = vmul.f32 %v12813_v17, %v7263_v3 }
0x235d   :  { %v7352_v2 = vmul.f32 %v7344_v21, %v12785_v35  ;;  %v7345_v49 = vsub.f32 1.0, %v7337_v43  ;;  %v7237_v26 = vmul.f32 1.0614054, %v10332_v32  ;;  %v7161_v7 = vmul.f32 0.5, %v12719_v47 }
0x235e   :  { %v7362_v28 = vadd.f32 1.0, %v7354_v60  ;;  %v7355_v11 = vmul.f32 %v7347_v37, %v12793_v61  ;;  %v7294_v0 = vadd.f32 0.2548296, %v7286_v4  ;;  %v7279_v35 = vadd.f32 -0.28449672, %v7271_v29 }
0x235f   :  { %v7360_v16 = vadd.f32 1.0, %v7352_v2  ;;  %v7353_v50 = vmul.f32 %v7345_v49, %v7185_v58  ;;  %v7292_v44 = vadd.f32 0.2548296, %v7284_v10  ;;  %v7245_v63 = vadd.f32 -1.4531521, %v7237_v26 }
0x2360   :  { %v7363_v23 = vadd.f32 1.0, %v7355_v11  ;;  %v7302_v39 = vmul.f32 %v12801_v14, %v7294_v0  ;;  %v7287_v57 = vmul.f32 %v12813_v17, %v7279_v35  ;;  %v7370_v61 = vmul.f32 %v7362_v28, %v12746_v19  ;;  %v10336_v14 = vpop.eup %10335 }
0x2361   :  { %v7361_v12 = vadd.f32 1.0, %v7353_v50  ;;  %v7330_v48 = vmul.f32 1.442695, %v7317_v22  ;;  %v7253_v51 = vmul.f32 %v10332_v32, %v7245_v63  ;;  %v7368_v47 = vmul.f32 %v7360_v16, %v12748_v62  ;;  %v10338_v58 = vpop.eup %10337 }
0x2362   :  { %v7371_v25 = vmul.f32 %v7363_v23, %v12754_v27  ;;  %v7342_v18 = vmul.f32 %v10334_v24, %v7302_v39  ;;  %v7295_v21 = vadd.f32 0.2548296, %v7287_v57  ;;  %v7300_v38 = vmul.f32 %v12806_v54, %v7292_v44 }
0x2363   :  { %v7369_v1 = vmul.f32 %v7361_v12, %v7161_v7  ;;  %v7261_v19 = vadd.f32 1.4214138, %v7253_v51  ;;  %v7190_v27 = vsel %vm7182_vm2, 1.0, %v12939_v6  ;;  %10339 = vpow2.f32 %v7330_v48 }
0x2364   :  { %v7377_v41 = vpack.c.bf16 %v7371_v25, %v7370_v61  ;;  %v7350_v60 = vsub.f32 1.0, %v7342_v18  ;;  %v7303_v46 = vmul.f32 %v12813_v17, %v7295_v21  ;;  %v7340_v62 = vmul.f32 %v10338_v58, %v7300_v38 }
0x2365   :  { %v7376_v20 = vpack.c.bf16 %v7369_v1, %v7368_v47  ;;  %v7269_v3 = vmul.f32 %v10332_v32, %v7261_v19  ;;  %v7191_v54 = vsel %vm7183_vm3, 1.0, %v12939_v6  ;;  %v7166_v4 = vmul.f32 0.5, %v12728_v31 }
0x2366   :  { %v7358_v5 = vmul.f32 %v7350_v60, %v7190_v27  ;;  %v7343_v30 = vmul.f32 %v10336_v14, %v7303_v46  ;;  %v7167_v29 = vmul.f32 0.5, %v12734_v55  ;;  %v7348_v22 = vsub.f32 1.0, %v7340_v62 }
0x2367   :  { %9501 = vmatprep.mubr.bf16.mxu0 %v7376_v20  ;;  %v7277_v37 = vadd.f32 -0.28449672, %v7269_v3  ;;  %v7188_v0 = vsel %vm7180_vm4, 1.0, %v12939_v6  ;;  %v7189_v31 = vsel %vm7181_vm5, 1.0, %v12939_v6  ;;  %v7165_v50 = vmul.f32 0.5, %v12768_v9 }
0x2368   :  { %v7351_v2 = vsub.f32 1.0, %v7343_v30  ;;  %9502 = vmatmul.mubr.bf16.vlgmr.msra.gmra.mrb[176].mxu0 %v7377_v41  ;;  %v7366_v43 = vadd.f32 1.0, %v7358_v5  ;;  %v7356_v35 = vmul.f32 %v7348_v22, %v7188_v0  ;;  %v8144_v6 = vld [vmem:[%s12911_s19 + $0x1] ss:$0 sm:$0xff]  ;;  %s7555_s19 = sshll.u32 %s10398_s18, 4  ;;  %s7556_s19 = int_to_ptr.vmem [resolvable:$true] %s7555_s19 }
0x2369   :  { %v7285_v45 = vmul.f32 %v10332_v32, %v7277_v37  ;;  %s10373_s26 = scalar_lea.vmem %s7556_s19, 1024  ;;  %p10378_p1 = scmp.lt.s32.totalorder %s7556_s19, %s7556_s19 }
0x236a   :  { %v7359_v17 = vmul.f32 %v7351_v2, %v7191_v54  ;;  %v7374_v11 = vmul.f32 %v7366_v43, %v7166_v4  ;;  %v7364_v55 = vadd.f32 1.0, %v7356_v35  ;;  %p10374_p0 = scmp.ne.s32.totalorder %s7556_s19, %s10373_s26  ;;  %p10379_p2 = scmp.lt.s32.totalorder %s10373_s26, %s10373_s26 }
0x236b   :  { %v7293_v28 = vadd.f32 0.2548296, %v7285_v45 }
0x236c   :  { %v7367_v42 = vadd.f32 1.0, %v7359_v17  ;;  %v7372_v44 = vmul.f32 %v7364_v55, %v7164_v52  ;;  %p10380_p3 = por %p10379_p2, %p10378_p1 }
0x236d   :  { %v7301_v10 = vmul.f32 %v10332_v32, %v7293_v28  ;;  %v10340_v24 = vpop.eup %10339 }
0x236e   :  { %v7375_v49 = vmul.f32 %v7367_v42, %v7167_v29  ;;  %p10381_p4 = pnand %p10380_p3, %p10374_p0 }
0x236f   :  { %v7341_v26 = vmul.f32 %v10340_v24, %v7301_v10 }
0x2370   :  { %v7379_v16 = vpack.c.bf16 %v7375_v49, %v7374_v11 }
0x2371   :  { %v7349_v23 = vsub.f32 1.0, %v7341_v26 }
0x2373   :  { %v7357_v7 = vmul.f32 %v7349_v23, %v7189_v31 }
0x2375   :  { %v7365_v39 = vadd.f32 1.0, %v7357_v7 }
0x2377   :  { %v7373_v32 = vmul.f32 %v7365_v39, %v7165_v50 }
0x2379   :  { %v7378_v57 = vpack.c.bf16 %v7373_v32, %v7372_v44 }
0x237b   :  { %9505 = vmatprep.mubr.bf16.mxu0 %v7378_v57 }
0x237c   :  { %9506 = vmatmul.mubr.bf16.gmra.mrb[180].mxu0 %v7379_v16 }
0x243b   :  { %v9503_v63 = vpop.f32.mrb[176].mxu0 }
0x243c   :  { %v7496_v61 = vadd.f32 %v9503_v63, %v8134_v40  ;;  %v7487_v25 = vpop.f32.mrb[177].mxu0 }
0x243d   :  { %v7488_v34 = vadd.f32 %v8134_v40, %v7487_v25  ;;  %v9504_v12 = vpop.f32.mrb[178].mxu0 }
0x243e   :  { %v7528_v9 = vmul.f32 %v8144_v6, %v7496_v61  ;;  %v7499_v48 = vadd.f32 %v9504_v12, %v8134_v40  ;;  %v7490_v18 = vpop.f32.mrb[179].mxu0 }
0x243f   :  { %v7526_v21 = vmul.f32 %v8144_v6, %v7488_v34  ;;  %v7491_v51 = vadd.f32 %v8134_v40, %v7490_v18 }
0x2440   :  { %v7536_v47 = vadd.f32 %v7528_v9, %v12574_v8  ;;  %v7529_v41 = vmul.f32 %v8144_v6, %v7499_v48 }
0x2441   :  { %v7534_v1 = vadd.f32 %v7526_v21, %v12571_v59  ;;  %v7527_v14 = vmul.f32 %v8144_v6, %v7491_v51 }
0x2442   :  { %7544 = vst.msk [vmem:[#allocation2 + $0x10] sm:$0xff] %vm85_vm0, %v7536_v47  ;;  %v7537_v60 = vadd.f32 %v7529_v41, %v12582_v36 }
0x2443   :  { %7542 = vst.msk [vmem:[#allocation2] sm:$0xff] %vm85_vm0, %v7534_v1  ;;  %v7535_v38 = vadd.f32 %v7527_v14, %v12577_v13 }
0x2444   :  { %7545 = vst.msk [vmem:[#allocation2 + $0x18] sm:$0xff] %vm85_vm0, %v7537_v60 }
0x2445   :  { %7543 = vst.msk [vmem:[#allocation2 + $0x8] sm:$0xff] %vm85_vm0, %v7535_v38 }
0x244f   :  { %v9507_v46 = vpop.f32.mrb[180].mxu0 }
0x2450   :  { %v7512_v19 = vadd.f32 %v9507_v46, %v8134_v40  ;;  %v7503_v27 = vpop.f32.mrb[181].mxu0 }
0x2451   :  { %v7504_v8 = vadd.f32 %v8134_v40, %v7503_v27  ;;  %v9508_v20 = vpop.f32.mrb[182].mxu0 }
0x2452   :  { %v7532_v58 = vmul.f32 %v8144_v6, %v7512_v19  ;;  %v7515_v59 = vadd.f32 %v9508_v20, %v8134_v40  ;;  %v7506_v5 = vpop.f32.mrb[183].mxu0 }
0x2453   :  { %v7530_v30 = vmul.f32 %v8144_v6, %v7504_v8  ;;  %v7507_v3 = vadd.f32 %v8134_v40, %v7506_v5 }
0x2454   :  { %v7540_v36 = vadd.f32 %v7532_v58, %v12594_v15  ;;  %v7533_v62 = vmul.f32 %v8144_v6, %v7515_v59 }
0x2455   :  { %v7538_v13 = vadd.f32 %v7530_v30, %v12589_v56  ;;  %v7531_v2 = vmul.f32 %v8144_v6, %v7507_v3 }
0x2456   :  { %7548 = vst.msk [vmem:[#allocation2 + $0x30] sm:$0xff] %vm85_vm0, %v7540_v36  ;;  %v7541_v37 = vadd.f32 %v7533_v62, %v12602_v53 }
0x2457   :  { %7546 = vst.msk [vmem:[#allocation2 + $0x20] sm:$0xff] %vm85_vm0, %v7538_v13  ;;  %v7539_v54 = vadd.f32 %v7531_v2, %v12597_v33 }
0x2458   :  { %7549 = vst.msk [vmem:[#allocation2 + $0x38] sm:$0xff] %vm85_vm0, %v7541_v37 }
0x2459   :  { %7547 = vst.msk [vmem:[#allocation2 + $0x28] sm:$0xff] %vm85_vm0, %v7539_v54 }
0x245a   :  { %10384 = shalt.err (!%p10381_p4)
}
0x245b   :  { %s10385_s3 = scalar_lea.hbm %s12912_s20, 1024 }
0x245c   :  { %p10386_p5 = scmp.ne.s32.totalorder %s12912_s20, %s10385_s3  ;;  %p10389_p6 = scmp.lt.u32.totalorder %s10385_s3, %s12912_s20 }
0x245e   :  { %p10391_p7 = pnand %p10389_p6, %p10386_p5 }
0x2460   :  { %10394 = shalt.err (!%p10391_p7)
}
0x2461   :  { %s10399_s28 = smov 128   ;;  %s10400_s29 = smov 8  }
0x2462   :  { %7561 = dma.vmem_to_hbm [thread:$0]  %s7556_s19, 1024, %s12912_s20, [#allocation3], %s10399_s28, %s10399_s28, %s10400_s29  }
0x2463   :  { %10395 = dma.done.wait [#allocation3], 1024  }
0x2464   :  { %10396 = vsyncadd [#allocation3], 4294966272 }
0x2465   :  { %7565 = vsyncpa [#allocation3], 1 }

</bundles_post_ra>
